<compile_context>
chip_gen: v5e
topology: v5e:2x2
jax: 0.10.0
libtpu: 0.0.40
codegen_flags: <defaults>
</compile_context>

<pallas_src>
import jax
import jax.numpy as jnp
from jax.experimental import pallas as pl
from jax.experimental.pallas import tpu as pltpu

LANE = 128
SUBLANE = 8


def _round_up(x, m):
    return ((x + m - 1) // m) * m


def _double_conv_kernel(x_ref, w1_ref, b1_ref, w2_ref, b2_ref, o_ref, mid_ref):
    """Fused (conv3x3 + BN + ReLU) x 2 for one batch element.

    x_ref:   (1, H+2, Wp, Ci) bf16; zero halo rows {0,H+1}, col 0, cols >= W+1.
    w1_ref:  (9, Ci, Kp)      bf16 per-tap weights, BN scale folded in.
    b1_ref:  (1, Kp)          f32 folded conv-bias + BN shift.
    w2_ref:  (9, Kp, Kp)      bf16.
    b2_ref:  (1, Kp)          f32.
    o_ref:   (1, H, W, Kp)    bf16 (lane-dense Kp).
    mid_ref: (H+2, Wp, Kp)    bf16 VMEM scratch (stage-1 activation + zero halo).
    """
    H, W, Kp = o_ref.shape[1], o_ref.shape[2], o_ref.shape[3]
    Wp = x_ref.shape[2]
    Ci = x_ref.shape[3]

    def conv_bn_relu(tap, cin, w_ref, b_ref):
        # 9 per-tap matmuls (K = cin) accumulated in f32: no materialized
        # (H*W, 9*cin) im2col patch, no lane-concat copies.  On v7x the MXU
        # result buffer accumulates these in place.
        acc = jnp.zeros((H * W, Kp), jnp.float32)
        t = 0
        for dy in range(3):
            for dx in range(3):
                p = tap(dy, dx).reshape(H * W, cin)
                acc = acc + jnp.dot(p, w_ref[t],
                                    preferred_element_type=jnp.float32)
                t += 1
        return jnp.maximum(acc + b_ref[...], 0.0)        # folded BN + ReLU (f32)

    # ---- stage 1: conv3x3 + BN + ReLU (reads the HBM-supplied block) ----
    y1 = conv_bn_relu(lambda dy, dx: x_ref[0, dy:dy + H, dx:dx + W, :],
                      Ci, w1_ref, b1_ref)

    # Stage-1 activation -> VMEM scratch with a zero 1-pixel halo.  Only small
    # aligned halo slabs are re-zeroed each grid step (kept per-step so the
    # kernel stays correct when the batch axis is sharded across TensorCores),
    # then the interior is written once.
    zrow = jnp.zeros((1, Wp, Kp), mid_ref.dtype)
    mid_ref[0:1, :, :] = zrow                              # top halo row
    mid_ref[H + 1:H + 2, :, :] = zrow                      # bottom halo row
    # Aligned 8-wide column slabs covering halo columns 0 and W+1; any image
    # columns they also touch are overwritten by the interior store below.
    lslab = min(SUBLANE, Wp)
    mid_ref[:, 0:lslab, :] = jnp.zeros((H + 2, lslab, Kp), mid_ref.dtype)
    rstart = ((W + 1) // SUBLANE) * SUBLANE
    if lslab <= rstart < Wp:
        mid_ref[:, rstart:Wp, :] = jnp.zeros((H + 2, Wp - rstart, Kp),
                                             mid_ref.dtype)
    mid_ref[1:H + 1, 1:W + 1, :] = y1.reshape(H, W, Kp).astype(mid_ref.dtype)

    # ---- stage 2: conv3x3 + BN + ReLU (reads the in-VMEM intermediate) ----
    y2 = conv_bn_relu(lambda dy, dx: mid_ref[dy:dy + H, dx:dx + W, :],
                      Kp, w2_ref, b2_ref)
    o_ref[0, :, :, :] = y2.reshape(H, W, Kp).astype(o_ref.dtype)


def _fold_bn_into_conv(w_oihw, conv_bias, gamma, beta, mean, var, eps):
    """Fold eval-mode BatchNorm into the conv weights / one bias vector."""
    scale = gamma / jnp.sqrt(var + eps)                 # (Cout,)
    w = w_oihw * scale[:, None, None, None]
    b = (conv_bias - mean) * scale + beta
    return w, b


def _per_tap_weights(w_oihw, cin_p, cout_p):
    """(Cout, Cin, 3, 3) -> (9, cin_p, cout_p) bf16, tap index t = dy*3 + dx."""
    cout, cin = w_oihw.shape[0], w_oihw.shape[1]
    w = jnp.transpose(w_oihw, (2, 3, 1, 0)).reshape(9, cin, cout)
    w = jnp.pad(w, ((0, 0), (0, cin_p - cin), (0, cout_p - cout)))
    return w.astype(jnp.bfloat16)


def double_conv_nchw(x_nchw, w1, b1, bn1, w2, b2, bn2, eps=1e-5):
    """Full DoubleConv forward.  x_nchw: (N, Cin, H, W); PyTorch weight layout."""
    N, Cin, H, W = x_nchw.shape
    Cout = w1.shape[0]
    # Lane-pad only when the channel count already fills a lane group: the tiny
    # UNet-stem Cin stays dense (avoids ~32x input DMA inflation).
    Ci = Cin if Cin < LANE else _round_up(Cin, LANE)
    Kp = _round_up(Cout, LANE)            # lane-dense outputs / mid channels
    Wp = _round_up(W + 2, SUBLANE)        # sublane-aligned padded width

    w1f, b1f = _fold_bn_into_conv(w1, b1, *bn1, eps=eps)
    w2f, b2f = _fold_bn_into_conv(w2, b2, *bn2, eps=eps)
    w1t = _per_tap_weights(w1f, Ci, Kp)
    w2t = _per_tap_weights(w2f, Kp, Kp)
    b1v = jnp.pad(b1f, (0, Kp - Cout)).reshape(1, Kp).astype(jnp.float32)
    b2v = jnp.pad(b2f, (0, Kp - Cout)).reshape(1, Kp).astype(jnp.float32)

    # NCHW -> NHWC + spatial halo pad + (optional) channel pad + bf16 cast in one
    # fused expression: the halo rides along with the layout copy we need anyway.
    x = jnp.pad(jnp.transpose(x_nchw, (0, 2, 3, 1)),
                ((0, 0), (1, 1), (1, Wp - W - 1), (0, Ci - Cin))
                ).astype(jnp.bfloat16)

    flops = 2 * N * H * W * 9 * (Ci * Kp + Kp * Kp)
    bytes_accessed = (x.size * 2 + N * H * W * Kp * 2
                      + (w1t.size + w2t.size) * 2 + (b1v.size + b2v.size) * 4)

    out = pl.pallas_call(
        _double_conv_kernel,
        out_shape=jax.ShapeDtypeStruct((N, H, W, Kp), jnp.bfloat16),
        grid_spec=pltpu.PrefetchScalarGridSpec(
            num_scalar_prefetch=0,
            grid=(N,),
            in_specs=[
                pl.BlockSpec((1, H + 2, Wp, Ci), lambda n: (n, 0, 0, 0)),
                # Weights / biases: constant block index -> resident in VMEM
                # across grid steps (no per-step re-DMA).
                pl.BlockSpec((9, Ci, Kp), lambda n: (0, 0, 0)),
                pl.BlockSpec((1, Kp), lambda n: (0, 0)),
                pl.BlockSpec((9, Kp, Kp), lambda n: (0, 0, 0)),
                pl.BlockSpec((1, Kp), lambda n: (0, 0)),
            ],
            out_specs=pl.BlockSpec((1, H, W, Kp), lambda n: (n, 0, 0, 0)),
            scratch_shapes=[pltpu.VMEM((H + 2, Wp, Kp), jnp.bfloat16)],
        ),
        # Working set at these shapes is < 2 MiB -- far under the scoped-VMEM
        # default on every generation; spatial tiling + vmem_limit_bytes only
        # become necessary at full-resolution UNet sizes (see TODOs above).
        compiler_params=pltpu.CompilerParams(
            dimension_semantics=("parallel",)),
        cost_estimate=pl.CostEstimate(flops=flops, transcendentals=0,
                                      bytes_accessed=bytes_accessed),
    )(x, w1t, b1v, w2t, b2v)

    # Drop channel padding, cast back to f32, NHWC -> NCHW (PyTorch layout).
    return jnp.transpose(out[..., :Cout].astype(jnp.float32), (0, 3, 1, 2))


_double_conv_jit = jax.jit(double_conv_nchw)


class DoubleConvPallas:
    """Conv3x3(pad=1) -> BN -> ReLU -> Conv3x3(pad=1) -> BN -> ReLU (eval BN)."""

    def __init__(self, input_channels, output_channels, key):
        k1, k2, k3, k4 = jax.random.split(key, 4)
        cin, cout = input_channels, output_channels
        # Deterministic synthetic init (shapes match nn.Conv2d / nn.BatchNorm2d).
        self.w1 = jax.random.normal(k1, (cout, cin, 3, 3), jnp.float32) * 0.1
        self.b1 = jax.random.normal(k2, (cout,), jnp.float32) * 0.1
        self.w2 = jax.random.normal(k3, (cout, cout, 3, 3), jnp.float32) * 0.1
        self.b2 = jax.random.normal(k4, (cout,), jnp.float32) * 0.1
        # BatchNorm2d fresh-module parameters / running stats (eval mode).
        self.gamma1 = jnp.ones((cout,), jnp.float32)
        self.beta1 = jnp.zeros((cout,), jnp.float32)
        self.mean1 = jnp.zeros((cout,), jnp.float32)
        self.var1 = jnp.ones((cout,), jnp.float32)
        self.gamma2 = jnp.ones((cout,), jnp.float32)
        self.beta2 = jnp.zeros((cout,), jnp.float32)
        self.mean2 = jnp.zeros((cout,), jnp.float32)
        self.var2 = jnp.ones((cout,), jnp.float32)

    def __call__(self, x_nchw):
        return _double_conv_jit(
            x_nchw,
            self.w1, self.b1,
            (self.gamma1, self.beta1, self.mean1, self.var1),
            self.w2, self.b2,
            (self.gamma2, self.beta2, self.mean2, self.var2))


def _reference_double_conv(x, m, eps=1e-5):
    """Pure-JAX f32 reference (PyTorch semantics: cross-correlation, eval BN)."""
    def stage(x, w, b, gamma, beta, mean, var):
        y = jax.lax.conv_general_dilated(
            x, w, window_strides=(1, 1), padding=((1, 1), (1, 1)),
            dimension_numbers=("NCHW", "OIHW", "NCHW"))
        y = y + b[None, :, None, None]
        y = (y - mean[None, :, None, None]) * (
            gamma[None, :, None, None]
            / jnp.sqrt(var[None, :, None, None] + eps))
        y = y + beta[None, :, None, None]
        return jnp.maximum(y, 0.0)

    y = stage(x, m.w1, m.b1, m.gamma1, m.beta1, m.mean1, m.var1)
    return stage(y, m.w2, m.b2, m.gamma2, m.beta2, m.mean2, m.var2)


if __name__ == "__main__":
    key = jax.random.PRNGKey(0)
    kx, kp = jax.random.split(key)

    N, Cin, H, W = 2, 4, 16, 16
    Cout = 8

    x = jax.random.normal(kx, (N, Cin, H, W), jnp.float32)
    model = DoubleConvPallas(Cin, Cout, kp)

    y = jax.block_until_ready(model(x))

    assert y.shape == (N, Cout, H, W), y.shape
    assert bool(jnp.all(y >= 0.0))            # ReLU output is non-negative
    assert bool(jnp.all(jnp.isfinite(y)))

    y_ref = _reference_double_conv(x, model)
    max_err = float(jnp.max(jnp.abs(y - y_ref)))
    assert max_err < 0.1, max_err             # bf16 kernel vs f32 reference

    print("KERNEL_OK")
</pallas_src>

<mosaic_0001>
module attributes {stable_mosaic.version = 11 : i64} {
  func.func @_double_conv_kernel(%arg0: i32, %arg1: memref<1x18x24x4xbf16, #tpu.memory_space<vmem>>, %arg2: memref<9x4x128xbf16, #tpu.memory_space<vmem>>, %arg3: memref<1x128xf32, #tpu.memory_space<vmem>>, %arg4: memref<9x128x128xbf16, #tpu.memory_space<vmem>>, %arg5: memref<1x128xf32, #tpu.memory_space<vmem>>, %arg6: memref<1x16x16x128xbf16, #tpu.memory_space<vmem>>, %arg7: memref<18x24x128xbf16, #tpu.memory_space<vmem>>) attributes {dimension_semantics = [#tpu.dimension_semantics<parallel>], iteration_bounds = array<i64: 2>, scalar_prefetch = 0 : i64, scratch_operands = 1 : i64, tpu.core_type = #tpu.core_type<tc>, window_params = [{transform_indices = @transform_0, window_bounds = array<i64: 1, 18, 24, 4>}, {pipeline_mode = #tpu.pipeline_mode<synchronous>, transform_indices = @transform_1, window_bounds = array<i64: 9, 4, 128>}, {pipeline_mode = #tpu.pipeline_mode<synchronous>, transform_indices = @transform_2, window_bounds = array<i64: 1, 128>}, {pipeline_mode = #tpu.pipeline_mode<synchronous>, transform_indices = @transform_3, window_bounds = array<i64: 9, 128, 128>}, {pipeline_mode = #tpu.pipeline_mode<synchronous>, transform_indices = @transform_4, window_bounds = array<i64: 1, 128>}, {transform_indices = @transform_5, window_bounds = array<i64: 1, 16, 16, 128>}]} {
    %cst = arith.constant 0.000000e+00 : f32
    %0 = vector.broadcast %cst : f32 to vector<256x128xf32>
    %c0 = arith.constant 0 : index
    %c0_0 = arith.constant 0 : index
    %c0_1 = arith.constant 0 : index
    %c0_2 = arith.constant 0 : index
    %1 = vector.load %arg1[%c0, %c0_0, %c0_1, %c0_2] : memref<1x18x24x4xbf16, #tpu.memory_space<vmem>>, vector<1x16x16x4xbf16>
    %2 = vector.shape_cast %1 : vector<1x16x16x4xbf16> to vector<16x16x4xbf16>
    %3 = vector.shape_cast %2 : vector<16x16x4xbf16> to vector<256x4xbf16>
    %c0_3 = arith.constant 0 : index
    %c0_4 = arith.constant 0 : index
    %c0_5 = arith.constant 0 : index
    %4 = vector.load %arg2[%c0_3, %c0_4, %c0_5] : memref<9x4x128xbf16, #tpu.memory_space<vmem>>, vector<1x4x128xbf16>
    %5 = vector.shape_cast %4 : vector<1x4x128xbf16> to vector<4x128xbf16>
    %cst_6 = arith.constant dense<0.000000e+00> : vector<256x128xf32>
    %6 = tpu.matmul %3, %5, %cst_6 {dimension_numbers = #tpu.dot_dimension_numbers<[1], [0], [0], [1], [0, 0, 1, 1], [], []>} : vector<256x4xbf16>, vector<4x128xbf16>, vector<256x128xf32> -> vector<256x128xf32>
    %7 = arith.addf %0, %6 : vector<256x128xf32>
    %c0_7 = arith.constant 0 : index
    %c0_8 = arith.constant 0 : index
    %c1 = arith.constant 1 : index
    %c0_9 = arith.constant 0 : index
    %8 = vector.load %arg1[%c0_7, %c0_8, %c1, %c0_9] : memref<1x18x24x4xbf16, #tpu.memory_space<vmem>>, vector<1x16x16x4xbf16>
    %9 = vector.shape_cast %8 : vector<1x16x16x4xbf16> to vector<16x16x4xbf16>
    %10 = vector.shape_cast %9 : vector<16x16x4xbf16> to vector<256x4xbf16>
    %c1_10 = arith.constant 1 : index
    %c0_11 = arith.constant 0 : index
    %c0_12 = arith.constant 0 : index
    %11 = vector.load %arg2[%c1_10, %c0_11, %c0_12] : memref<9x4x128xbf16, #tpu.memory_space<vmem>>, vector<1x4x128xbf16>
    %12 = vector.shape_cast %11 : vector<1x4x128xbf16> to vector<4x128xbf16>
    %cst_13 = arith.constant dense<0.000000e+00> : vector<256x128xf32>
    %13 = tpu.matmul %10, %12, %cst_13 {dimension_numbers = #tpu.dot_dimension_numbers<[1], [0], [0], [1], [0, 0, 1, 1], [], []>} : vector<256x4xbf16>, vector<4x128xbf16>, vector<256x128xf32> -> vector<256x128xf32>
    %14 = arith.addf %7, %13 : vector<256x128xf32>
    %c0_14 = arith.constant 0 : index
    %c0_15 = arith.constant 0 : index
    %c2 = arith.constant 2 : index
    %c0_16 = arith.constant 0 : index
    %15 = vector.load %arg1[%c0_14, %c0_15, %c2, %c0_16] : memref<1x18x24x4xbf16, #tpu.memory_space<vmem>>, vector<1x16x16x4xbf16>
    %16 = vector.shape_cast %15 : vector<1x16x16x4xbf16> to vector<16x16x4xbf16>
    %17 = vector.shape_cast %16 : vector<16x16x4xbf16> to vector<256x4xbf16>
    %c2_17 = arith.constant 2 : index
    %c0_18 = arith.constant 0 : index
    %c0_19 = arith.constant 0 : index
    %18 = vector.load %arg2[%c2_17, %c0_18, %c0_19] : memref<9x4x128xbf16, #tpu.memory_space<vmem>>, vector<1x4x128xbf16>
    %19 = vector.shape_cast %18 : vector<1x4x128xbf16> to vector<4x128xbf16>
    %cst_20 = arith.constant dense<0.000000e+00> : vector<256x128xf32>
    %20 = tpu.matmul %17, %19, %cst_20 {dimension_numbers = #tpu.dot_dimension_numbers<[1], [0], [0], [1], [0, 0, 1, 1], [], []>} : vector<256x4xbf16>, vector<4x128xbf16>, vector<256x128xf32> -> vector<256x128xf32>
    %21 = arith.addf %14, %20 : vector<256x128xf32>
    %c0_21 = arith.constant 0 : index
    %c1_22 = arith.constant 1 : index
    %c0_23 = arith.constant 0 : index
    %c0_24 = arith.constant 0 : index
    %22 = vector.load %arg1[%c0_21, %c1_22, %c0_23, %c0_24] : memref<1x18x24x4xbf16, #tpu.memory_space<vmem>>, vector<1x16x16x4xbf16>
    %23 = vector.shape_cast %22 : vector<1x16x16x4xbf16> to vector<16x16x4xbf16>
    %24 = vector.shape_cast %23 : vector<16x16x4xbf16> to vector<256x4xbf16>
    %c3 = arith.constant 3 : index
    %c0_25 = arith.constant 0 : index
    %c0_26 = arith.constant 0 : index
    %25 = vector.load %arg2[%c3, %c0_25, %c0_26] : memref<9x4x128xbf16, #tpu.memory_space<vmem>>, vector<1x4x128xbf16>
    %26 = vector.shape_cast %25 : vector<1x4x128xbf16> to vector<4x128xbf16>
    %cst_27 = arith.constant dense<0.000000e+00> : vector<256x128xf32>
    %27 = tpu.matmul %24, %26, %cst_27 {dimension_numbers = #tpu.dot_dimension_numbers<[1], [0], [0], [1], [0, 0, 1, 1], [], []>} : vector<256x4xbf16>, vector<4x128xbf16>, vector<256x128xf32> -> vector<256x128xf32>
    %28 = arith.addf %21, %27 : vector<256x128xf32>
    %c0_28 = arith.constant 0 : index
    %c1_29 = arith.constant 1 : index
    %c1_30 = arith.constant 1 : index
    %c0_31 = arith.constant 0 : index
    %29 = vector.load %arg1[%c0_28, %c1_29, %c1_30, %c0_31] : memref<1x18x24x4xbf16, #tpu.memory_space<vmem>>, vector<1x16x16x4xbf16>
    %30 = vector.shape_cast %29 : vector<1x16x16x4xbf16> to vector<16x16x4xbf16>
    %31 = vector.shape_cast %30 : vector<16x16x4xbf16> to vector<256x4xbf16>
    %c4 = arith.constant 4 : index
    %c0_32 = arith.constant 0 : index
    %c0_33 = arith.constant 0 : index
    %32 = vector.load %arg2[%c4, %c0_32, %c0_33] : memref<9x4x128xbf16, #tpu.memory_space<vmem>>, vector<1x4x128xbf16>
    %33 = vector.shape_cast %32 : vector<1x4x128xbf16> to vector<4x128xbf16>
    %cst_34 = arith.constant dense<0.000000e+00> : vector<256x128xf32>
    %34 = tpu.matmul %31, %33, %cst_34 {dimension_numbers = #tpu.dot_dimension_numbers<[1], [0], [0], [1], [0, 0, 1, 1], [], []>} : vector<256x4xbf16>, vector<4x128xbf16>, vector<256x128xf32> -> vector<256x128xf32>
    %35 = arith.addf %28, %34 : vector<256x128xf32>
    %c0_35 = arith.constant 0 : index
    %c1_36 = arith.constant 1 : index
    %c2_37 = arith.constant 2 : index
    %c0_38 = arith.constant 0 : index
    %36 = vector.load %arg1[%c0_35, %c1_36, %c2_37, %c0_38] : memref<1x18x24x4xbf16, #tpu.memory_space<vmem>>, vector<1x16x16x4xbf16>
    %37 = vector.shape_cast %36 : vector<1x16x16x4xbf16> to vector<16x16x4xbf16>
    %38 = vector.shape_cast %37 : vector<16x16x4xbf16> to vector<256x4xbf16>
    %c5 = arith.constant 5 : index
    %c0_39 = arith.constant 0 : index
    %c0_40 = arith.constant 0 : index
    %39 = vector.load %arg2[%c5, %c0_39, %c0_40] : memref<9x4x128xbf16, #tpu.memory_space<vmem>>, vector<1x4x128xbf16>
    %40 = vector.shape_cast %39 : vector<1x4x128xbf16> to vector<4x128xbf16>
    %cst_41 = arith.constant dense<0.000000e+00> : vector<256x128xf32>
    %41 = tpu.matmul %38, %40, %cst_41 {dimension_numbers = #tpu.dot_dimension_numbers<[1], [0], [0], [1], [0, 0, 1, 1], [], []>} : vector<256x4xbf16>, vector<4x128xbf16>, vector<256x128xf32> -> vector<256x128xf32>
    %42 = arith.addf %35, %41 : vector<256x128xf32>
    %c0_42 = arith.constant 0 : index
    %c2_43 = arith.constant 2 : index
    %c0_44 = arith.constant 0 : index
    %c0_45 = arith.constant 0 : index
    %43 = vector.load %arg1[%c0_42, %c2_43, %c0_44, %c0_45] : memref<1x18x24x4xbf16, #tpu.memory_space<vmem>>, vector<1x16x16x4xbf16>
    %44 = vector.shape_cast %43 : vector<1x16x16x4xbf16> to vector<16x16x4xbf16>
    %45 = vector.shape_cast %44 : vector<16x16x4xbf16> to vector<256x4xbf16>
    %c6 = arith.constant 6 : index
    %c0_46 = arith.constant 0 : index
    %c0_47 = arith.constant 0 : index
    %46 = vector.load %arg2[%c6, %c0_46, %c0_47] : memref<9x4x128xbf16, #tpu.memory_space<vmem>>, vector<1x4x128xbf16>
    %47 = vector.shape_cast %46 : vector<1x4x128xbf16> to vector<4x128xbf16>
    %cst_48 = arith.constant dense<0.000000e+00> : vector<256x128xf32>
    %48 = tpu.matmul %45, %47, %cst_48 {dimension_numbers = #tpu.dot_dimension_numbers<[1], [0], [0], [1], [0, 0, 1, 1], [], []>} : vector<256x4xbf16>, vector<4x128xbf16>, vector<256x128xf32> -> vector<256x128xf32>
    %49 = arith.addf %42, %48 : vector<256x128xf32>
    %c0_49 = arith.constant 0 : index
    %c2_50 = arith.constant 2 : index
    %c1_51 = arith.constant 1 : index
    %c0_52 = arith.constant 0 : index
    %50 = vector.load %arg1[%c0_49, %c2_50, %c1_51, %c0_52] : memref<1x18x24x4xbf16, #tpu.memory_space<vmem>>, vector<1x16x16x4xbf16>
    %51 = vector.shape_cast %50 : vector<1x16x16x4xbf16> to vector<16x16x4xbf16>
    %52 = vector.shape_cast %51 : vector<16x16x4xbf16> to vector<256x4xbf16>
    %c7 = arith.constant 7 : index
    %c0_53 = arith.constant 0 : index
    %c0_54 = arith.constant 0 : index
    %53 = vector.load %arg2[%c7, %c0_53, %c0_54] : memref<9x4x128xbf16, #tpu.memory_space<vmem>>, vector<1x4x128xbf16>
    %54 = vector.shape_cast %53 : vector<1x4x128xbf16> to vector<4x128xbf16>
    %cst_55 = arith.constant dense<0.000000e+00> : vector<256x128xf32>
    %55 = tpu.matmul %52, %54, %cst_55 {dimension_numbers = #tpu.dot_dimension_numbers<[1], [0], [0], [1], [0, 0, 1, 1], [], []>} : vector<256x4xbf16>, vector<4x128xbf16>, vector<256x128xf32> -> vector<256x128xf32>
    %56 = arith.addf %49, %55 : vector<256x128xf32>
    %c0_56 = arith.constant 0 : index
    %c2_57 = arith.constant 2 : index
    %c2_58 = arith.constant 2 : index
    %c0_59 = arith.constant 0 : index
    %57 = vector.load %arg1[%c0_56, %c2_57, %c2_58, %c0_59] : memref<1x18x24x4xbf16, #tpu.memory_space<vmem>>, vector<1x16x16x4xbf16>
    %58 = vector.shape_cast %57 : vector<1x16x16x4xbf16> to vector<16x16x4xbf16>
    %59 = vector.shape_cast %58 : vector<16x16x4xbf16> to vector<256x4xbf16>
    %c8 = arith.constant 8 : index
    %c0_60 = arith.constant 0 : index
    %c0_61 = arith.constant 0 : index
    %60 = vector.load %arg2[%c8, %c0_60, %c0_61] : memref<9x4x128xbf16, #tpu.memory_space<vmem>>, vector<1x4x128xbf16>
    %61 = vector.shape_cast %60 : vector<1x4x128xbf16> to vector<4x128xbf16>
    %cst_62 = arith.constant dense<0.000000e+00> : vector<256x128xf32>
    %62 = tpu.matmul %59, %61, %cst_62 {dimension_numbers = #tpu.dot_dimension_numbers<[1], [0], [0], [1], [0, 0, 1, 1], [], []>} : vector<256x4xbf16>, vector<4x128xbf16>, vector<256x128xf32> -> vector<256x128xf32>
    %63 = arith.addf %56, %62 : vector<256x128xf32>
    %c0_63 = arith.constant 0 : index
    %c0_64 = arith.constant 0 : index
    %64 = vector.load %arg3[%c0_63, %c0_64] : memref<1x128xf32, #tpu.memory_space<vmem>>, vector<1x128xf32>
    %65 = vector.broadcast %64 : vector<1x128xf32> to vector<256x128xf32>
    %66 = arith.addf %63, %65 : vector<256x128xf32>
    %cst_65 = arith.constant 0.000000e+00 : f32
    %67 = vector.broadcast %cst_65 : f32 to vector<256x128xf32>
    %68 = arith.maximumf %66, %67 : vector<256x128xf32>
    %cst_66 = arith.constant 0.000000e+00 : bf16
    %69 = vector.broadcast %cst_66 : bf16 to vector<1x24x128xbf16>
    %c0_67 = arith.constant 0 : index
    %c0_68 = arith.constant 0 : index
    %c0_69 = arith.constant 0 : index
    %70 = vector.load %arg7[%c0_67, %c0_68, %c0_69] : memref<18x24x128xbf16, #tpu.memory_space<vmem>>, vector<1x24x128xbf16>
    tpu.vector_store %arg7[%c0_67, %c0_68, %c0_69], %69 {strides = array<i32>} : memref<18x24x128xbf16, #tpu.memory_space<vmem>>, vector<1x24x128xbf16>,
    %c17 = arith.constant 17 : index
    %c0_70 = arith.constant 0 : index
    %c0_71 = arith.constant 0 : index
    %71 = vector.load %arg7[%c17, %c0_70, %c0_71] : memref<18x24x128xbf16, #tpu.memory_space<vmem>>, vector<1x24x128xbf16>
    tpu.vector_store %arg7[%c17, %c0_70, %c0_71], %69 {strides = array<i32>} : memref<18x24x128xbf16, #tpu.memory_space<vmem>>, vector<1x24x128xbf16>,
    %cst_72 = arith.constant 0.000000e+00 : bf16
    %72 = vector.broadcast %cst_72 : bf16 to vector<18x8x128xbf16>
    %c0_73 = arith.constant 0 : index
    %c0_74 = arith.constant 0 : index
    %c0_75 = arith.constant 0 : index
    %73 = vector.load %arg7[%c0_73, %c0_74, %c0_75] : memref<18x24x128xbf16, #tpu.memory_space<vmem>>, vector<18x8x128xbf16>
    tpu.vector_store %arg7[%c0_73, %c0_74, %c0_75], %72 {strides = array<i32>} : memref<18x24x128xbf16, #tpu.memory_space<vmem>>, vector<18x8x128xbf16>,
    %cst_76 = arith.constant 0.000000e+00 : bf16
    %74 = vector.broadcast %cst_76 : bf16 to vector<18x8x128xbf16>
    %c0_77 = arith.constant 0 : index
    %c16 = arith.constant 16 : index
    %c0_78 = arith.constant 0 : index
    %75 = vector.load %arg7[%c0_77, %c16, %c0_78] : memref<18x24x128xbf16, #tpu.memory_space<vmem>>, vector<18x8x128xbf16>
    tpu.vector_store %arg7[%c0_77, %c16, %c0_78], %74 {strides = array<i32>} : memref<18x24x128xbf16, #tpu.memory_space<vmem>>, vector<18x8x128xbf16>,
    %76 = vector.shape_cast %68 : vector<256x128xf32> to vector<16x16x128xf32>
    %77 = arith.truncf %76 : vector<16x16x128xf32> to vector<16x16x128xbf16>
    %c1_79 = arith.constant 1 : index
    %c1_80 = arith.constant 1 : index
    %c0_81 = arith.constant 0 : index
    %78 = vector.load %arg7[%c1_79, %c1_80, %c0_81] : memref<18x24x128xbf16, #tpu.memory_space<vmem>>, vector<16x16x128xbf16>
    tpu.vector_store %arg7[%c1_79, %c1_80, %c0_81], %77 {strides = array<i32>} : memref<18x24x128xbf16, #tpu.memory_space<vmem>>, vector<16x16x128xbf16>,
    %cst_82 = arith.constant 0.000000e+00 : f32
    %79 = vector.broadcast %cst_82 : f32 to vector<256x128xf32>
    %c0_83 = arith.constant 0 : index
    %c0_84 = arith.constant 0 : index
    %c0_85 = arith.constant 0 : index
    %80 = vector.load %arg7[%c0_83, %c0_84, %c0_85] : memref<18x24x128xbf16, #tpu.memory_space<vmem>>, vector<16x16x128xbf16>
    %81 = vector.shape_cast %80 : vector<16x16x128xbf16> to vector<256x128xbf16>
    %c0_86 = arith.constant 0 : index
    %c0_87 = arith.constant 0 : index
    %c0_88 = arith.constant 0 : index
    %82 = vector.load %arg4[%c0_86, %c0_87, %c0_88] : memref<9x128x128xbf16, #tpu.memory_space<vmem>>, vector<1x128x128xbf16>
    %83 = vector.shape_cast %82 : vector<1x128x128xbf16> to vector<128x128xbf16>
    %cst_89 = arith.constant dense<0.000000e+00> : vector<256x128xf32>
    %84 = tpu.matmul %81, %83, %cst_89 {dimension_numbers = #tpu.dot_dimension_numbers<[1], [0], [0], [1], [0, 0, 1, 1], [], []>} : vector<256x128xbf16>, vector<128x128xbf16>, vector<256x128xf32> -> vector<256x128xf32>
    %85 = arith.addf %79, %84 : vector<256x128xf32>
    %c0_90 = arith.constant 0 : index
    %c1_91 = arith.constant 1 : index
    %c0_92 = arith.constant 0 : index
    %86 = vector.load %arg7[%c0_90, %c1_91, %c0_92] : memref<18x24x128xbf16, #tpu.memory_space<vmem>>, vector<16x16x128xbf16>
    %87 = vector.shape_cast %86 : vector<16x16x128xbf16> to vector<256x128xbf16>
    %c1_93 = arith.constant 1 : index
    %c0_94 = arith.constant 0 : index
    %c0_95 = arith.constant 0 : index
    %88 = vector.load %arg4[%c1_93, %c0_94, %c0_95] : memref<9x128x128xbf16, #tpu.memory_space<vmem>>, vector<1x128x128xbf16>
    %89 = vector.shape_cast %88 : vector<1x128x128xbf16> to vector<128x128xbf16>
    %cst_96 = arith.constant dense<0.000000e+00> : vector<256x128xf32>
    %90 = tpu.matmul %87, %89, %cst_96 {dimension_numbers = #tpu.dot_dimension_numbers<[1], [0], [0], [1], [0, 0, 1, 1], [], []>} : vector<256x128xbf16>, vector<128x128xbf16>, vector<256x128xf32> -> vector<256x128xf32>
    %91 = arith.addf %85, %90 : vector<256x128xf32>
    %c0_97 = arith.constant 0 : index
    %c2_98 = arith.constant 2 : index
    %c0_99 = arith.constant 0 : index
    %92 = vector.load %arg7[%c0_97, %c2_98, %c0_99] : memref<18x24x128xbf16, #tpu.memory_space<vmem>>, vector<16x16x128xbf16>
    %93 = vector.shape_cast %92 : vector<16x16x128xbf16> to vector<256x128xbf16>
    %c2_100 = arith.constant 2 : index
    %c0_101 = arith.constant 0 : index
    %c0_102 = arith.constant 0 : index
    %94 = vector.load %arg4[%c2_100, %c0_101, %c0_102] : memref<9x128x128xbf16, #tpu.memory_space<vmem>>, vector<1x128x128xbf16>
    %95 = vector.shape_cast %94 : vector<1x128x128xbf16> to vector<128x128xbf16>
    %cst_103 = arith.constant dense<0.000000e+00> : vector<256x128xf32>
    %96 = tpu.matmul %93, %95, %cst_103 {dimension_numbers = #tpu.dot_dimension_numbers<[1], [0], [0], [1], [0, 0, 1, 1], [], []>} : vector<256x128xbf16>, vector<128x128xbf16>, vector<256x128xf32> -> vector<256x128xf32>
    %97 = arith.addf %91, %96 : vector<256x128xf32>
    %c1_104 = arith.constant 1 : index
    %c0_105 = arith.constant 0 : index
    %c0_106 = arith.constant 0 : index
    %98 = vector.load %arg7[%c1_104, %c0_105, %c0_106] : memref<18x24x128xbf16, #tpu.memory_space<vmem>>, vector<16x16x128xbf16>
    %99 = vector.shape_cast %98 : vector<16x16x128xbf16> to vector<256x128xbf16>
    %c3_107 = arith.constant 3 : index
    %c0_108 = arith.constant 0 : index
    %c0_109 = arith.constant 0 : index
    %100 = vector.load %arg4[%c3_107, %c0_108, %c0_109] : memref<9x128x128xbf16, #tpu.memory_space<vmem>>, vector<1x128x128xbf16>
    %101 = vector.shape_cast %100 : vector<1x128x128xbf16> to vector<128x128xbf16>
    %cst_110 = arith.constant dense<0.000000e+00> : vector<256x128xf32>
    %102 = tpu.matmul %99, %101, %cst_110 {dimension_numbers = #tpu.dot_dimension_numbers<[1], [0], [0], [1], [0, 0, 1, 1], [], []>} : vector<256x128xbf16>, vector<128x128xbf16>, vector<256x128xf32> -> vector<256x128xf32>
    %103 = arith.addf %97, %102 : vector<256x128xf32>
    %c1_111 = arith.constant 1 : index
    %c1_112 = arith.constant 1 : index
    %c0_113 = arith.constant 0 : index
    %104 = vector.load %arg7[%c1_111, %c1_112, %c0_113] : memref<18x24x128xbf16, #tpu.memory_space<vmem>>, vector<16x16x128xbf16>
    %105 = vector.shape_cast %104 : vector<16x16x128xbf16> to vector<256x128xbf16>
    %c4_114 = arith.constant 4 : index
    %c0_115 = arith.constant 0 : index
    %c0_116 = arith.constant 0 : index
    %106 = vector.load %arg4[%c4_114, %c0_115, %c0_116] : memref<9x128x128xbf16, #tpu.memory_space<vmem>>, vector<1x128x128xbf16>
    %107 = vector.shape_cast %106 : vector<1x128x128xbf16> to vector<128x128xbf16>
    %cst_117 = arith.constant dense<0.000000e+00> : vector<256x128xf32>
    %108 = tpu.matmul %105, %107, %cst_117 {dimension_numbers = #tpu.dot_dimension_numbers<[1], [0], [0], [1], [0, 0, 1, 1], [], []>} : vector<256x128xbf16>, vector<128x128xbf16>, vector<256x128xf32> -> vector<256x128xf32>
    %109 = arith.addf %103, %108 : vector<256x128xf32>
    %c1_118 = arith.constant 1 : index
    %c2_119 = arith.constant 2 : index
    %c0_120 = arith.constant 0 : index
    %110 = vector.load %arg7[%c1_118, %c2_119, %c0_120] : memref<18x24x128xbf16, #tpu.memory_space<vmem>>, vector<16x16x128xbf16>
    %111 = vector.shape_cast %110 : vector<16x16x128xbf16> to vector<256x128xbf16>
    %c5_121 = arith.constant 5 : index
    %c0_122 = arith.constant 0 : index
    %c0_123 = arith.constant 0 : index
    %112 = vector.load %arg4[%c5_121, %c0_122, %c0_123] : memref<9x128x128xbf16, #tpu.memory_space<vmem>>, vector<1x128x128xbf16>
    %113 = vector.shape_cast %112 : vector<1x128x128xbf16> to vector<128x128xbf16>
    %cst_124 = arith.constant dense<0.000000e+00> : vector<256x128xf32>
    %114 = tpu.matmul %111, %113, %cst_124 {dimension_numbers = #tpu.dot_dimension_numbers<[1], [0], [0], [1], [0, 0, 1, 1], [], []>} : vector<256x128xbf16>, vector<128x128xbf16>, vector<256x128xf32> -> vector<256x128xf32>
    %115 = arith.addf %109, %114 : vector<256x128xf32>
    %c2_125 = arith.constant 2 : index
    %c0_126 = arith.constant 0 : index
    %c0_127 = arith.constant 0 : index
    %116 = vector.load %arg7[%c2_125, %c0_126, %c0_127] : memref<18x24x128xbf16, #tpu.memory_space<vmem>>, vector<16x16x128xbf16>
    %117 = vector.shape_cast %116 : vector<16x16x128xbf16> to vector<256x128xbf16>
    %c6_128 = arith.constant 6 : index
    %c0_129 = arith.constant 0 : index
    %c0_130 = arith.constant 0 : index
    %118 = vector.load %arg4[%c6_128, %c0_129, %c0_130] : memref<9x128x128xbf16, #tpu.memory_space<vmem>>, vector<1x128x128xbf16>
    %119 = vector.shape_cast %118 : vector<1x128x128xbf16> to vector<128x128xbf16>
    %cst_131 = arith.constant dense<0.000000e+00> : vector<256x128xf32>
    %120 = tpu.matmul %117, %119, %cst_131 {dimension_numbers = #tpu.dot_dimension_numbers<[1], [0], [0], [1], [0, 0, 1, 1], [], []>} : vector<256x128xbf16>, vector<128x128xbf16>, vector<256x128xf32> -> vector<256x128xf32>
    %121 = arith.addf %115, %120 : vector<256x128xf32>
    %c2_132 = arith.constant 2 : index
    %c1_133 = arith.constant 1 : index
    %c0_134 = arith.constant 0 : index
    %122 = vector.load %arg7[%c2_132, %c1_133, %c0_134] : memref<18x24x128xbf16, #tpu.memory_space<vmem>>, vector<16x16x128xbf16>
    %123 = vector.shape_cast %122 : vector<16x16x128xbf16> to vector<256x128xbf16>
    %c7_135 = arith.constant 7 : index
    %c0_136 = arith.constant 0 : index
    %c0_137 = arith.constant 0 : index
    %124 = vector.load %arg4[%c7_135, %c0_136, %c0_137] : memref<9x128x128xbf16, #tpu.memory_space<vmem>>, vector<1x128x128xbf16>
    %125 = vector.shape_cast %124 : vector<1x128x128xbf16> to vector<128x128xbf16>
    %cst_138 = arith.constant dense<0.000000e+00> : vector<256x128xf32>
    %126 = tpu.matmul %123, %125, %cst_138 {dimension_numbers = #tpu.dot_dimension_numbers<[1], [0], [0], [1], [0, 0, 1, 1], [], []>} : vector<256x128xbf16>, vector<128x128xbf16>, vector<256x128xf32> -> vector<256x128xf32>
    %127 = arith.addf %121, %126 : vector<256x128xf32>
    %c2_139 = arith.constant 2 : index
    %c2_140 = arith.constant 2 : index
    %c0_141 = arith.constant 0 : index
    %128 = vector.load %arg7[%c2_139, %c2_140, %c0_141] : memref<18x24x128xbf16, #tpu.memory_space<vmem>>, vector<16x16x128xbf16>
    %129 = vector.shape_cast %128 : vector<16x16x128xbf16> to vector<256x128xbf16>
    %c8_142 = arith.constant 8 : index
    %c0_143 = arith.constant 0 : index
    %c0_144 = arith.constant 0 : index
    %130 = vector.load %arg4[%c8_142, %c0_143, %c0_144] : memref<9x128x128xbf16, #tpu.memory_space<vmem>>, vector<1x128x128xbf16>
    %131 = vector.shape_cast %130 : vector<1x128x128xbf16> to vector<128x128xbf16>
    %cst_145 = arith.constant dense<0.000000e+00> : vector<256x128xf32>
    %132 = tpu.matmul %129, %131, %cst_145 {dimension_numbers = #tpu.dot_dimension_numbers<[1], [0], [0], [1], [0, 0, 1, 1], [], []>} : vector<256x128xbf16>, vector<128x128xbf16>, vector<256x128xf32> -> vector<256x128xf32>
    %133 = arith.addf %127, %132 : vector<256x128xf32>
    %c0_146 = arith.constant 0 : index
    %c0_147 = arith.constant 0 : index
    %134 = vector.load %arg5[%c0_146, %c0_147] : memref<1x128xf32, #tpu.memory_space<vmem>>, vector<1x128xf32>
    %135 = vector.broadcast %134 : vector<1x128xf32> to vector<256x128xf32>
    %136 = arith.addf %133, %135 : vector<256x128xf32>
    %cst_148 = arith.constant 0.000000e+00 : f32
    %137 = vector.broadcast %cst_148 : f32 to vector<256x128xf32>
    %138 = arith.maximumf %136, %137 : vector<256x128xf32>
    %139 = vector.shape_cast %138 : vector<256x128xf32> to vector<16x16x128xf32>
    %140 = arith.truncf %139 : vector<16x16x128xf32> to vector<16x16x128xbf16>
    %c0_149 = arith.constant 0 : index
    %c0_150 = arith.constant 0 : index
    %c0_151 = arith.constant 0 : index
    %c0_152 = arith.constant 0 : index
    %141 = vector.load %arg6[%c0_149, %c0_150, %c0_151, %c0_152] : memref<1x16x16x128xbf16, #tpu.memory_space<vmem>>, vector<1x16x16x128xbf16>
    %142 = vector.shape_cast %141 : vector<1x16x16x128xbf16> to vector<16x16x128xbf16>
    %143 = vector.shape_cast %140 : vector<16x16x128xbf16> to vector<1x16x16x128xbf16>
    tpu.vector_store %arg6[%c0_149, %c0_150, %c0_151, %c0_152], %143 {strides = array<i32>} : memref<1x16x16x128xbf16, #tpu.memory_space<vmem>>, vector<1x16x16x128xbf16>,
    return
  }
  func.func @transform_0(%arg0: i32) -> (i32, i32, i32, i32) {
    %c0_i32 = arith.constant 0 : i32
    %c0_i32_0 = arith.constant 0 : i32
    %c0_i32_1 = arith.constant 0 : i32
    %c0_i32_2 = arith.constant 0 : i32
    return %arg0, %c0_i32, %c0_i32_0, %c0_i32_1 : i32, i32, i32, i32
  }
  func.func @transform_1(%arg0: i32) -> (i32, i32, i32) {
    %c0_i32 = arith.constant 0 : i32
    %c0_i32_0 = arith.constant 0 : i32
    %c0_i32_1 = arith.constant 0 : i32
    %c0_i32_2 = arith.constant 0 : i32
    return %c0_i32, %c0_i32_0, %c0_i32_1 : i32, i32, i32
  }
  func.func @transform_2(%arg0: i32) -> (i32, i32) {
    %c0_i32 = arith.constant 0 : i32
    %c0_i32_0 = arith.constant 0 : i32
    %c0_i32_1 = arith.constant 0 : i32
    return %c0_i32, %c0_i32_0 : i32, i32
  }
  func.func @transform_3(%arg0: i32) -> (i32, i32, i32) {
    %c0_i32 = arith.constant 0 : i32
    %c0_i32_0 = arith.constant 0 : i32
    %c0_i32_1 = arith.constant 0 : i32
    %c0_i32_2 = arith.constant 0 : i32
    return %c0_i32, %c0_i32_0, %c0_i32_1 : i32, i32, i32
  }
  func.func @transform_4(%arg0: i32) -> (i32, i32) {
    %c0_i32 = arith.constant 0 : i32
    %c0_i32_0 = arith.constant 0 : i32
    %c0_i32_1 = arith.constant 0 : i32
    return %c0_i32, %c0_i32_0 : i32, i32
  }
  func.func @transform_5(%arg0: i32) -> (i32, i32, i32, i32) {
    %c0_i32 = arith.constant 0 : i32
    %c0_i32_0 = arith.constant 0 : i32
    %c0_i32_1 = arith.constant 0 : i32
    %c0_i32_2 = arith.constant 0 : i32
    return %arg0, %c0_i32, %c0_i32_0, %c0_i32_1 : i32, i32, i32, i32
  }
}

</mosaic_0001>

<bundles_post_ra>
// kernel: double_conv_nchw.1
= control target key start
LH: loop header
LB: loop body
LE: loop exit
PB: predicated region body
PF: predicated region fallthrough
CT: control target
= control target key end

     0   :  { %s10649_s18 = smov 0   ;;  %s14510_s0 = inlined_call_operand.vmem [shape: bf16[2,18,24,4], index: 0, kind: input, shape index: {}]   ;;  %s14511_s1 = inlined_call_operand.vmem [shape: bf16[9,4,128], index: 1, kind: input, shape index: {}]   ;;  %s14512_s2 = inlined_call_operand.vmem [shape: f32[1,128], index: 2, kind: input, shape index: {}]   ;;  %s14513_s3 = inlined_call_operand.vmem [shape: bf16[9,128,128], index: 3, kind: input, shape index: {}]   ;;  %s14514_s4 = inlined_call_operand.vmem [shape: f32[1,128], index: 4, kind: input, shape index: {}]   ;;  %s14515_s5 = inlined_call_operand.vmem [shape: bf16[2,16,16,128], index: 5, kind: output, shape index: {}]  }
   0x1 LB: > { %s9062_s19 = sadd.s32 4294967295, %s10616_s18   ;;  %p9066_p0 = scmp.ge.s32.totalorder %s10616_s18, 1  ;;  %s10616_s18 = sphi %s10649_s18, %s15_s18  }
   0x2   : > { %p187_p1 = scmp.lt.s32.totalorder %s10616_s18, 3 }
   0x4   : > { %p188_p2 = pnand %p9066_p0, %p187_p1 }
   0x6   : > { %191 = sbr.rel (%p188_p2) target bundleno = 1482 (0x5ca), region = 40 }
   0xb   : > { %v258_v0 = vld [vmem:[%s14511_s1] sm:$0x3]  ;;  %vm761_vm0 = vcmask 1041408   ;;  %p215_p3 = scmp.lt.s32.totalorder %s9062_s19, 1  ;;  %v9070_v2 = vld [vmem:[%s14511_s1 + $0x2] sm:$0x3] }
   0xc   : > { %v983_v1 = vsel %vm761_vm0, %v258_v0, 0  ;;  %v763_v3 = vsel %vm761_vm0, %v9070_v2, 0  ;;  %v9183_v4 = vld [vmem:[%s14511_s1 + $0x4] sm:$0x3]  ;;  %v9232_v6 = vld [vmem:[%s14511_s1 + $0x6] sm:$0x3] }
   0xd   : > { %10577 = vmatpush.bf16.msra.mxu3 %v983_v1  ;;  %s14755_s19 = smov (!%p215_p3, %s9062_s19), 1  ;;  %992 = vmatpush.bf16.msra.mxu1 %v983_v1  ;;  %v1336_v5 = vsel %vm761_vm0, %v9183_v4, 0  ;;  %v9361_v7 = vld [vmem:[%s14511_s1 + $0x8] sm:$0x3]  ;;  %v1623_v8 = vsel %vm761_vm0, %v9232_v6, 0  ;;  %vm712_vm1 = vcmask 31744  }
   0xe   : > { %772 = vmatpush.bf16.msra.mxu0 %v763_v3  ;;  %10576 = vmatpush.bf16.msra.mxu2 %v763_v3  ;;  %s10578_s30 = smul.u32 216, %s14755_s19  ;;  %v2277_v9 = vsel %vm761_vm0, %v9361_v7, 0  ;;  %vm275_vm2 = vsmask.f32 3328  ;;  %vm276_vm3 = vsmask.f32 7440 }
   0xf   : > { %vm10707_vm4 = vmor %vm275_vm2, %vm276_vm3  ;;  %vm1122_vm5 = vcmask 1042432   ;;  %vm1123_vm6 = vcmask 1046532   ;;  %vm4605_vm8 = vsmask.f32 7938  ;;  %vm4604_vm9 = vcmask 1043456   ;;  %s10312_s11 = sshll.u32 %s14755_s19, 7 }
  0x10   : > { %s10683_s8 = scalar_lea.vmem %s14510_s0, %s10578_s30  ;;  %vm10927_vm7 = vmor %vm1122_vm5, %vm1123_vm6  ;;  %vm4280_vm10 = vsmask.f32 256  ;;  %vm4281_vm11 = vsmask.f32 4368  ;;  %vm4611_vm12 = vcmask 1040384   ;;  %s14402_s14 = scalar_lea.vmem %s14515_s5, %s10312_s11 }
  0x11   : > { %1632 = vmatpush.bf16.msrb.mxu3 %v1623_v8  ;;  %v10321_v10 = vld [vmem:[%s10683_s8 + $0x60] sm:$0xff]  ;;  %v10691_v13 = vld [vmem:[%s10683_s8 + $0x8] sm:$0x1]  ;;  %v228_v35 = vld [vmem:[%s10683_s8 + $0xc] sm:$0xf] }
  0x12   : > { %1345 = vmatpush.bf16.msrb.mxu2 %v1336_v5  ;;  %2286 = vmatpush.bf16.msrb.mxu0 %v2277_v9  ;;  %v226_v11 = vld [vmem:[%s10683_s8] sm:$0xf]  ;;  %v10688_v12 = vld [vmem:[%s10683_s8 + $0x4] sm:$0xf]  ;;  %v298_v18 = vshll.u32 %v10691_v13, 16  ;;  %v303_v46 = vshrl.u32 %v228_v35, 16  ;;  %vm12098_vm13 = vmand %vm4604_vm9, %vm4605_vm8 }
  0x13   : > { %v279_v14 = vshrl.u32 %v226_v11, 16  ;;  %v282_v15 = vshll.u32 %v226_v11, 16  ;;  %v288_v16 = vshll.u32 %v10688_v12, 16  ;;  %v292_v17 = vshrl.u32 %v10688_v12, 16  ;;  %9159 = vmatmul.msk.bf16.vlgmr.msra.gmra.mxu3 %vm712_vm1, %v10321_v10  ;;  %v242_v19 = vld [vmem:[%s10683_s8 + $0x60] sm:$0xf]  ;;  %vm12135_vm14 = vmor %vm4280_vm10, %vm4281_vm11 }
  0x14   : > { %v243_v20 = vld [vmem:[%s10683_s8 + $0x64] sm:$0xf]  ;;  %v267_v25 = vld [vmem:[%s10683_s8 + $0x68] sm:$0x1]  ;;  %v300_v26 = vrot.slane %v298_v18, 5  ;;  %v471_v27 = vshrl.u32 %v242_v19, 16  ;;  %vm12143_vm15 = vmand %vm4611_vm12, %vm4280_vm10 }
  0x15   : > { %v281_v21 = vrot.slane %v279_v14, 4  ;;  %v284_v22 = vrot.slane %v282_v15, 5  ;;  %v290_v23 = vrot.slane %v288_v16, 5  ;;  %v294_v24 = vrot.slane %v292_v17, 4  ;;  %v10313_v30 = vld [vmem:[%s10683_s8] sm:$0xff]  ;;  %v10322_v10 = vld [vmem:[%s10683_s8 + $0x6c] sm:$0xff] }
  0x16   : > { %v474_v28 = vshll.u32 %v242_v19, 16  ;;  %v480_v29 = vshll.u32 %v243_v20, 16  ;;  %v484_v33 = vshrl.u32 %v243_v20, 16  ;;  %v490_v34 = vshll.u32 %v267_v25, 16  ;;  %v10703_v36 = vld [vmem:[%s10683_s8 + $0x10] sm:$0xf]  ;;  %9151 = vmatmul.msk.bf16.vlgmr.msra.gmra.mxu1 %vm712_vm1, %v10313_v30 }
  0x17   : > { %v285_v31 = vor.u32 %v284_v22, %v281_v21  ;;  %v295_v32 = vor.u32 %v294_v24, %v290_v23  ;;  %v473_v38 = vrot.slane %v471_v27, 4  ;;  %v306_v47 = vshll.u32 %v228_v35, 16  ;;  %v10718_v52 = vld [vmem:[%s10683_s8 + $0x14] sm:$0x1]  ;;  %v244_v54 = vld [vmem:[%s10683_s8 + $0x6c] sm:$0xf] }
  0x18   : > { %v476_v39 = vrot.slane %v474_v28, 5  ;;  %v482_v40 = vrot.slane %v480_v29, 5  ;;  %v486_v43 = vrot.slane %v484_v33, 4  ;;  %v492_v44 = vrot.slane %v490_v34, 5  ;;  %v245_v2 = vld [vmem:[%s10683_s8 + $0x70] sm:$0xf] }
  0x19   : > { %v286_v41 = vrot.slane %v285_v31, 4  ;;  %v296_v42 = vrot.slane %v295_v32, 4  ;;  %v312_v48 = vshll.u32 %v10703_v36, 16  ;;  %v316_v53 = vshrl.u32 %v10703_v36, 16  ;;  %v268_v8 = vld [vmem:[%s10683_s8 + $0x74] sm:$0x1] }
  0x1a   : > { %v477_v45 = vor.u32 %v476_v39, %v473_v38  ;;  %v487_v51 = vor.u32 %v486_v43, %v482_v40  ;;  %v305_v58 = vrot.slane %v303_v46, 4  ;;  %v308_v60 = vrot.slane %v306_v47, 5  ;;  %v10733_v24 = vld [vmem:[%s10683_s8 + $0x1c] sm:$0xf]  ;;  %v10314_v31 = vld [vmem:[%s10683_s8 + $0xc] sm:$0xff] }
  0x1b   : > { %v291_v49 = vsel %vm10707_vm4, %v286_v41, %v290_v23  ;;  %v301_v50 = vsel %vm10707_vm4, %v296_v42, %v300_v26  ;;  %v314_v61 = vrot.slane %v312_v48, 5  ;;  %v318_v62 = vrot.slane %v316_v53, 4  ;;  %v230_v23 = vld [vmem:[%s10683_s8 + $0x18] sm:$0xf]  ;;  %v247_v46 = vld [vmem:[%s10683_s8 + $0x7c] sm:$0xf] }
  0x1c   : > { %v664_v55 = vunpack.c.l.b16 %v291_v49  ;;  %v665_v56 = vunpack.c.l.b16 %v301_v50  ;;  %v478_v57 = vrot.slane %v477_v45, 4  ;;  %v488_v59 = vrot.slane %v487_v51, 4  ;;  %v246_v38 = vld [vmem:[%s10683_s8 + $0x78] sm:$0xf] }
  0x1d   : > { %v322_v1 = vshll.u32 %v10718_v52, 16  ;;  %v495_v3 = vshrl.u32 %v244_v54, 16  ;;  %v309_v6 = vor.u32 %v308_v60, %v305_v58  ;;  %v319_v7 = vor.u32 %v318_v62, %v314_v61 }
  0x1e   : > { %v696_v63 = vpack.c.b16 %v665_v56, %v664_v55  ;;  %v483_v0 = vsel %vm10707_vm4, %v478_v57, %v482_v40  ;;  %v493_v4 = vsel %vm10707_vm4, %v488_v59, %v492_v44  ;;  %v498_v15 = vshll.u32 %v244_v54, 16  ;;  %v10745_v40 = vld [vmem:[%s10683_s8 + $0x20] sm:$0x1] }
  0x1f   : > { %v680_v5 = vunpack.c.l.b16 %v483_v0  ;;  %v681_v9 = vunpack.c.l.b16 %v493_v4  ;;  %v324_v11 = vrot.slane %v322_v1, 5  ;;  %v497_v14 = vrot.slane %v495_v3, 4  ;;  %v269_v59 = vld [vmem:[%s10683_s8 + $0x80] sm:$0x1] }
  0x20   : > { %9071 = vmatmul.msk.bf16.vlgmr.msra.gmra.mxu0 %vm712_vm1, %v696_v63  ;;  %v310_v16 = vrot.slane %v309_v6, 4  ;;  %v320_v17 = vrot.slane %v319_v7, 4  ;;  %v504_v18 = vshll.u32 %v245_v2, 16  ;;  %v508_v19 = vshrl.u32 %v245_v2, 16 }
  0x21   : > { %v704_v20 = vpack.c.b16 %v681_v9, %v680_v5  ;;  %v500_v21 = vrot.slane %v498_v15, 5  ;;  %v514_v22 = vshll.u32 %v268_v8, 16  ;;  %v327_v33 = vshrl.u32 %v230_v23, 16  ;;  %v10760_v15 = vld [vmem:[%s10683_s8 + $0x28] sm:$0xf] }
  0x22   : > { %v506_v25 = vrot.slane %v504_v18, 5  ;;  %v510_v26 = vrot.slane %v508_v19, 4  ;;  %v315_v27 = vsel %vm10707_vm4, %v310_v16, %v314_v61  ;;  %v325_v28 = vsel %vm10707_vm4, %v320_v17, %v324_v11 }
  0x23   : > { %9079 = vmatmul.msk.bf16.vlgmr.msra.gmra.mxu2 %vm712_vm1, %v704_v20  ;;  %9160 = vmatmul.msk.bf16.gmra.mxu3 %vm712_vm1, %v10322_v10  ;;  %v501_v29 = vor.u32 %v500_v21, %v497_v14  ;;  %v516_v30 = vrot.slane %v514_v22, 5  ;;  %v330_v34 = vshll.u32 %v230_v23, 16  ;;  %v336_v35 = vshll.u32 %v10733_v24, 16  ;;  %v232_v10 = vld [vmem:[%s10683_s8 + $0x24] sm:$0xf]  ;;  %v10323_v14 = vld [vmem:[%s10683_s8 + $0x78] sm:$0xff] }
  0x24   : > { %v511_v32 = vor.u32 %v510_v26, %v506_v25  ;;  %v340_v41 = vshrl.u32 %v10733_v24, 16  ;;  %v329_v43 = vrot.slane %v327_v33, 4  ;;  %v666_v47 = vunpack.c.l.b16 %v315_v27  ;;  %v10315_v26 = vld [vmem:[%s10683_s8 + $0x18] sm:$0xff]  ;;  %v248_v27 = vld [vmem:[%s10683_s8 + $0x84] sm:$0xf] }
  0x25   : > { %v502_v39 = vrot.slane %v501_v29, 4  ;;  %v332_v44 = vrot.slane %v330_v34, 5  ;;  %v338_v45 = vrot.slane %v336_v35, 5  ;;  %v667_v48 = vunpack.c.l.b16 %v325_v28  ;;  %v249_v28 = vld [vmem:[%s10683_s8 + $0x88] sm:$0xf] }
  0x26   : > { %v512_v42 = vrot.slane %v511_v32, 4  ;;  %9152 = vmatmul.msk.bf16.gmra.mxu1 %vm712_vm1, %v10314_v31  ;;  %v342_v49 = vrot.slane %v340_v41, 4  ;;  %v519_v50 = vshrl.u32 %v246_v38, 16  ;;  %v522_v55 = vshll.u32 %v246_v38, 16  ;;  %v10778_v35 = vld [vmem:[%s10683_s8 + $0x2c] sm:$0x1] }
  0x27   : > { %v507_v51 = vsel %vm10707_vm4, %v502_v39, %v506_v25  ;;  %v333_v54 = vor.u32 %v332_v44, %v329_v43  ;;  %v346_v57 = vshll.u32 %v10745_v40, 16  ;;  %v528_v58 = vshll.u32 %v247_v46, 16 }
  0x28   : > { %v517_v53 = vsel %vm10707_vm4, %v512_v42, %v516_v30  ;;  %v343_v56 = vor.u32 %v342_v49, %v338_v45  ;;  %v521_v60 = vrot.slane %v519_v50, 4  ;;  %v524_v61 = vrot.slane %v522_v55, 5 }
  0x29   : > { %v532_v62 = vshrl.u32 %v247_v46, 16  ;;  %v697_v63 = vpack.c.b16 %v667_v48, %v666_v47  ;;  %v682_v0 = vunpack.c.l.b16 %v507_v51  ;;  %v683_v1 = vunpack.c.l.b16 %v517_v53  ;;  %v270_v51 = vld [vmem:[%s10683_s8 + $0x8c] sm:$0x1] }
  0x2a   : > { %v530_v2 = vrot.slane %v528_v58, 5  ;;  %v334_v3 = vrot.slane %v333_v54, 4  ;;  %v344_v5 = vrot.slane %v343_v56, 4  ;;  %v348_v6 = vrot.slane %v346_v57, 5 }
  0x2b   : > { %v534_v4 = vrot.slane %v532_v62, 4  ;;  %v538_v7 = vshll.u32 %v269_v59, 16  ;;  %v525_v8 = vor.u32 %v524_v61, %v521_v60  ;;  %v705_v11 = vpack.c.b16 %v683_v1, %v682_v0  ;;  %v10324_v62 = vld [vmem:[%s10683_s8 + $0x84] sm:$0xff]  ;;  %v234_v1 = vld [vmem:[%s10683_s8 + $0x30] sm:$0xf] }
  0x2c   : > { %v339_v16 = vsel %vm10707_vm4, %v334_v3, %v338_v45  ;;  %v349_v17 = vsel %vm10707_vm4, %v344_v5, %v348_v6  ;;  %v351_v19 = vshrl.u32 %v232_v10, 16  ;;  %v354_v20 = vshll.u32 %v232_v10, 16  ;;  %v10316_v10 = vld [vmem:[%s10683_s8 + $0x24] sm:$0xff] }
  0x2d   : > { %v535_v9 = vor.u32 %v534_v4, %v530_v2  ;;  %v540_v18 = vrot.slane %v538_v7, 5  ;;  %v526_v21 = vrot.slane %v525_v8, 4  ;;  %v360_v23 = vshll.u32 %v10760_v15, 16 }
  0x2e   : > { %v364_v25 = vshrl.u32 %v10760_v15, 16  ;;  %v668_v29 = vunpack.c.l.b16 %v339_v16  ;;  %v669_v30 = vunpack.c.l.b16 %v349_v17  ;;  %v353_v31 = vrot.slane %v351_v19, 4  ;;  %v250_v16 = vld [vmem:[%s10683_s8 + $0x90] sm:$0xf]  ;;  %v251_v17 = vld [vmem:[%s10683_s8 + $0x94] sm:$0xf] }
  0x2f   : > { %v536_v22 = vrot.slane %v535_v9, 4  ;;  %v356_v32 = vrot.slane %v354_v20, 5  ;;  %v531_v33 = vsel %vm10707_vm4, %v526_v21, %v530_v2  ;;  %v362_v38 = vrot.slane %v360_v23, 5  ;;  %v10787_v2 = vld [vmem:[%s10683_s8 + $0x34] sm:$0xf] }
  0x30   : > { %9072 = vmatmul.msk.bf16.gmra.mxu0 %vm712_vm1, %v697_v63  ;;  %v366_v39 = vrot.slane %v364_v25, 4  ;;  %v543_v41 = vshrl.u32 %v248_v27, 16  ;;  %v546_v42 = vshll.u32 %v248_v27, 16  ;;  %v552_v43 = vshll.u32 %v249_v28, 16  ;;  %v10806_v25 = vld [vmem:[%s10683_s8 + $0x38] sm:$0x1] }
  0x31   : > { %v541_v34 = vsel %vm10707_vm4, %v536_v22, %v540_v18  ;;  %v556_v44 = vshrl.u32 %v249_v28, 16  ;;  %v357_v45 = vor.u32 %v356_v32, %v353_v31  ;;  %v370_v46 = vshll.u32 %v10778_v35, 16 }
  0x32   : > { %v698_v47 = vpack.c.b16 %v669_v30, %v668_v29  ;;  %v684_v48 = vunpack.c.l.b16 %v531_v33  ;;  %v685_v49 = vunpack.c.l.b16 %v541_v34  ;;  %v367_v50 = vor.u32 %v366_v39, %v362_v38 }
  0x33   : > { %9080 = vmatmul.msk.bf16.gmra.mxu2 %vm712_vm1, %v705_v11  ;;  %9161 = vmatmul.msk.bf16.gmra.mxu3 %vm712_vm1, %v10323_v14  ;;  %v545_v53 = vrot.slane %v543_v41, 4  ;;  %v548_v54 = vrot.slane %v546_v42, 5  ;;  %v554_v55 = vrot.slane %v552_v43, 5  ;;  %v558_v56 = vrot.slane %v556_v44, 4 }
  0x34   : > { %v358_v57 = vrot.slane %v357_v45, 4  ;;  %v368_v58 = vrot.slane %v367_v50, 4  ;;  %v372_v59 = vrot.slane %v370_v46, 5  ;;  %v562_v60 = vshll.u32 %v270_v51, 16  ;;  %v271_v46 = vld [vmem:[%s10683_s8 + $0x98] sm:$0x1] }
  0x35   : > { %v706_v61 = vpack.c.b16 %v685_v49, %v684_v48  ;;  %v549_v63 = vor.u32 %v548_v54, %v545_v53  ;;  %v559_v0 = vor.u32 %v558_v56, %v554_v55  ;;  %v375_v6 = vshrl.u32 %v234_v1, 16  ;;  %v10325_v49 = vld [vmem:[%s10683_s8 + $0x90] sm:$0xff]  ;;  %v10814_v53 = vld [vmem:[%s10683_s8 + $0x40] sm:$0xf] }
  0x36   : > { %9153 = vmatmul.msk.bf16.gmra.mxu1 %vm712_vm1, %v10315_v26  ;;  %v363_v3 = vsel %vm10707_vm4, %v358_v57, %v362_v38  ;;  %v373_v4 = vsel %vm10707_vm4, %v368_v58, %v372_v59  ;;  %v564_v5 = vrot.slane %v562_v60, 5  ;;  %v378_v7 = vshll.u32 %v234_v1, 16  ;;  %v10317_v1 = vld [vmem:[%s10683_s8 + $0x30] sm:$0xff] }
  0x37   : > { %v550_v8 = vrot.slane %v549_v63, 4  ;;  %v560_v9 = vrot.slane %v559_v0, 4  ;;  %v384_v11 = vshll.u32 %v10787_v2, 16  ;;  %v388_v14 = vshrl.u32 %v10787_v2, 16  ;;  %v253_v63 = vld [vmem:[%s10683_s8 + $0xa0] sm:$0xf] }
  0x38   : > { %v670_v18 = vunpack.c.l.b16 %v363_v3  ;;  %v671_v19 = vunpack.c.l.b16 %v373_v4  ;;  %v377_v20 = vrot.slane %v375_v6, 4  ;;  %v380_v21 = vrot.slane %v378_v7, 5 }
  0x39   : > { %v555_v22 = vsel %vm10707_vm4, %v550_v8, %v554_v55  ;;  %v565_v23 = vsel %vm10707_vm4, %v560_v9, %v564_v5  ;;  %v386_v26 = vrot.slane %v384_v11, 5  ;;  %v390_v27 = vrot.slane %v388_v14, 4 }
  0x3a   : > { %v567_v28 = vshrl.u32 %v250_v16, 16  ;;  %v570_v29 = vshll.u32 %v250_v16, 16  ;;  %v576_v30 = vshll.u32 %v251_v17, 16  ;;  %v580_v31 = vshrl.u32 %v251_v17, 16 }
  0x3b   : > { %v699_v32 = vpack.c.b16 %v671_v19, %v670_v18  ;;  %v394_v33 = vshll.u32 %v10806_v25, 16  ;;  %v686_v34 = vunpack.c.l.b16 %v555_v22  ;;  %v687_v38 = vunpack.c.l.b16 %v565_v23 }
  0x3c   : > { %v381_v39 = vor.u32 %v380_v21, %v377_v20  ;;  %v391_v41 = vor.u32 %v390_v27, %v386_v26  ;;  %v569_v42 = vrot.slane %v567_v28, 4  ;;  %v572_v43 = vrot.slane %v570_v29, 5  ;;  %v10829_v20 = vld [vmem:[%s10683_s8 + $0x44] sm:$0x1] }
  0x3d   : > { %v578_v44 = vrot.slane %v576_v30, 5  ;;  %v582_v45 = vrot.slane %v580_v31, 4  ;;  %v707_v48 = vpack.c.b16 %v687_v38, %v686_v34  ;;  %v396_v51 = vrot.slane %v394_v33, 5 }
  0x3e   : > { %v382_v50 = vrot.slane %v381_v39, 4  ;;  %v392_v54 = vrot.slane %v391_v41, 4  ;;  %v573_v55 = vor.u32 %v572_v43, %v569_v42  ;;  %v586_v57 = vshll.u32 %v271_v46, 16 }
  0x3f   : > { %v583_v56 = vor.u32 %v582_v45, %v578_v44  ;;  %v408_v60 = vshll.u32 %v10814_v53, 16  ;;  %v600_v9 = vshll.u32 %v253_v63, 16  ;;  %v418_v31 = vshll.u32 %v10829_v20, 16 }
  0x40   : > { %9073 = vmatmul.msk.bf16.gmra.mxu0 %vm712_vm1, %v698_v47  ;;  %v236_v47 = vld [vmem:[%s10683_s8 + $0x3c] sm:$0xf]  ;;  %v387_v0 = vsel %vm10707_vm4, %v382_v50, %v386_v26  ;;  %v397_v3 = vsel %vm10707_vm4, %v392_v54, %v396_v51  ;;  %v574_v4 = vrot.slane %v573_v55, 4  ;;  %v588_v6 = vrot.slane %v586_v57, 5 }
  0x41   : > { %v399_v58 = vshrl.u32 %v236_v47, 16  ;;  %v402_v59 = vshll.u32 %v236_v47, 16  ;;  %v584_v5 = vrot.slane %v583_v56, 4  ;;  %v410_v16 = vrot.slane %v408_v60, 5  ;;  %v10326_v47 = vld [vmem:[%s10683_s8 + $0x9c] sm:$0xff] }
  0x42   : > { %v672_v18 = vunpack.c.l.b16 %v387_v0  ;;  %v673_v19 = vunpack.c.l.b16 %v397_v3  ;;  %v579_v21 = vsel %vm10707_vm4, %v574_v4, %v578_v44  ;;  %v602_v27 = vrot.slane %v600_v9, 5  ;;  %v10860_v9 = vld [vmem:[%s10683_s8 + $0x50] sm:$0x1] }
  0x43   : > { %9081 = vmatmul.msk.bf16.gmra.mxu2 %vm712_vm1, %v706_v61  ;;  %9162 = vmatmul.msk.bf16.gmra.mxu3 %vm712_vm1, %v10324_v62  ;;  %v412_v61 = vshrl.u32 %v10814_v53, 16  ;;  %v252_v62 = vld [vmem:[%s10683_s8 + $0x9c] sm:$0xf]  ;;  %v401_v11 = vrot.slane %v399_v58, 4  ;;  %v404_v14 = vrot.slane %v402_v59, 5  ;;  %v589_v22 = vsel %vm10707_vm4, %v584_v5, %v588_v6 }
  0x44   : > { %v591_v7 = vshrl.u32 %v252_v62, 16  ;;  %v594_v8 = vshll.u32 %v252_v62, 16  ;;  %v700_v33 = vpack.c.b16 %v673_v19, %v672_v18  ;;  %v688_v34 = vunpack.c.l.b16 %v579_v21  ;;  %v10318_v59 = vld [vmem:[%s10683_s8 + $0x3c] sm:$0xff]  ;;  %v254_v62 = vld [vmem:[%s10683_s8 + $0xa8] sm:$0xf] }
  0x45   : > { %v414_v17 = vrot.slane %v412_v61, 4  ;;  %v405_v29 = vor.u32 %v404_v14, %v401_v11  ;;  %v689_v38 = vunpack.c.l.b16 %v589_v22  ;;  %v420_v45 = vrot.slane %v418_v31, 5 }
  0x46   : > { %9154 = vmatmul.msk.bf16.gmra.mxu1 %vm712_vm1, %v10316_v10  ;;  %v604_v10 = vshrl.u32 %v253_v63, 16  ;;  %v593_v23 = vrot.slane %v591_v7, 4  ;;  %v596_v26 = vrot.slane %v594_v8, 5  ;;  %v255_v63 = vld [vmem:[%s10683_s8 + $0xac] sm:$0xf]  ;;  %v615_v7 = vshrl.u32 %v254_v62, 16 }
  0x47   : > { %v415_v30 = vor.u32 %v414_v17, %v410_v16  ;;  %v406_v43 = vrot.slane %v405_v29, 4  ;;  %v708_v46 = vpack.c.b16 %v689_v38, %v688_v34  ;;  %v618_v8 = vshll.u32 %v254_v62, 16  ;;  %v10327_v34 = vld [vmem:[%s10683_s8 + $0xa8] sm:$0xff] }
  0x48   : > { %v606_v28 = vrot.slane %v604_v10, 4  ;;  %v597_v39 = vor.u32 %v596_v26, %v593_v23  ;;  %v624_v14 = vshll.u32 %v255_v63, 16  ;;  %v442_v22 = vshll.u32 %v10860_v9, 16 }
  0x49   : > { %v416_v44 = vrot.slane %v415_v30, 4  ;;  %v411_v55 = vsel %vm10707_vm4, %v406_v43, %v410_v16  ;;  %v628_v16 = vshrl.u32 %v255_v63, 16  ;;  %v617_v23 = vrot.slane %v615_v7, 4  ;;  %v273_v30 = vld [vmem:[%s10683_s8 + $0xb0] sm:$0x1] }
  0x4a   : > { %v607_v41 = vor.u32 %v606_v28, %v602_v27  ;;  %v598_v50 = vrot.slane %v597_v39, 4  ;;  %v674_v0 = vunpack.c.l.b16 %v411_v55  ;;  %v626_v28 = vrot.slane %v624_v14, 5  ;;  %v240_v43 = vld [vmem:[%s10683_s8 + $0x54] sm:$0xf] }
  0x4b   : > { %v421_v56 = vsel %vm10707_vm4, %v416_v44, %v420_v45  ;;  %v630_v29 = vrot.slane %v628_v16, 4  ;;  %v10868_v44 = vld [vmem:[%s10683_s8 + $0x58] sm:$0xf]  ;;  %v447_v55 = vshrl.u32 %v240_v43, 16 }
  0x4c   : > { %v608_v51 = vrot.slane %v607_v41, 4  ;;  %v603_v3 = vsel %vm10707_vm4, %v598_v50, %v602_v27  ;;  %v620_v27 = vrot.slane %v618_v8, 5 }
  0x4d   : > { %v690_v18 = vunpack.c.l.b16 %v603_v3  ;;  %v631_v41 = vor.u32 %v630_v29, %v626_v28 }
  0x4e   : > { %v621_v39 = vor.u32 %v620_v27, %v617_v23 }
  0x50   : > { %9074 = vmatmul.msk.bf16.gmra.mxu0 %vm712_vm1, %v699_v32  ;;  %v272_v32 = vld [vmem:[%s10683_s8 + $0xa4] sm:$0x1] }
  0x51   : > { %v610_v42 = vshll.u32 %v272_v32, 16 }
  0x53   : > { %9082 = vmatmul.msk.bf16.gmra.mxu2 %vm712_vm1, %v707_v48  ;;  %9163 = vmatmul.msk.bf16.gmra.mxu3 %vm712_vm1, %v10325_v49  ;;  %v238_v48 = vld [vmem:[%s10683_s8 + $0x48] sm:$0xf]  ;;  %v10841_v49 = vld [vmem:[%s10683_s8 + $0x4c] sm:$0xf]  ;;  %v612_v54 = vrot.slane %v610_v42, 5  ;;  %v634_v42 = vshll.u32 %v273_v30, 16 }
  0x54   : > { %v423_v57 = vshrl.u32 %v238_v48, 16  ;;  %v426_v58 = vshll.u32 %v238_v48, 16  ;;  %v432_v60 = vshll.u32 %v10841_v49, 16  ;;  %v436_v61 = vshrl.u32 %v10841_v49, 16  ;;  %v9313_v30 = vld [vmem:[%s10683_s8 + $0xc] sm:$0xf] }
  0x55   : > { %v613_v4 = vsel %vm10707_vm4, %v608_v51, %v612_v54  ;;  %v632_v48 = vrot.slane %v631_v41, 4  ;;  %v636_v50 = vrot.slane %v634_v42, 5  ;;  %v10319_v51 = vld [vmem:[%s10683_s8 + $0x48] sm:$0xff]  ;;  %v256_v54 = vld [vmem:[%s10683_s8 + $0xb4] sm:$0xf]  ;;  %v1795_v42 = vshrl.u32 %v9313_v30, 16 }
  0x56   : > { %9155 = vmatmul.msk.bf16.gmra.mxu1 %vm712_vm1, %v10317_v1  ;;  %v675_v1 = vunpack.c.l.b16 %v421_v56  ;;  %v425_v5 = vrot.slane %v423_v57, 4  ;;  %v428_v6 = vrot.slane %v426_v58, 5  ;;  %v434_v10 = vrot.slane %v432_v60, 5 }
  0x57   : > { %v438_v11 = vrot.slane %v436_v61, 4  ;;  %v691_v19 = vunpack.c.l.b16 %v613_v4  ;;  %v450_v56 = vshll.u32 %v240_v43, 16  ;;  %v456_v57 = vshll.u32 %v10868_v44, 16 }
  0x58   : > { %v701_v17 = vpack.c.b16 %v675_v1, %v674_v0  ;;  %v429_v21 = vor.u32 %v428_v6, %v425_v5  ;;  %v460_v58 = vshrl.u32 %v10868_v44, 16  ;;  %v639_v62 = vshrl.u32 %v256_v54, 16 }
  0x59   : > { %v439_v26 = vor.u32 %v438_v11, %v434_v10  ;;  %v709_v31 = vpack.c.b16 %v691_v19, %v690_v18  ;;  %v642_v63 = vshll.u32 %v256_v54, 16  ;;  %v637_v1 = vsel %vm10707_vm4, %v632_v48, %v636_v50  ;;  %v274_v19 = vld [vmem:[%s10683_s8 + $0xbc] sm:$0x1]  ;;  %v9459_v54 = vld [vmem:[%s14511_s1 + $0xc] sm:$0x3] }
  0x5a   : > { %v430_v32 = vrot.slane %v429_v21, 4  ;;  %v449_v5 = vrot.slane %v447_v55, 4  ;;  %v452_v6 = vrot.slane %v450_v56, 5  ;;  %v458_v7 = vrot.slane %v456_v57, 5  ;;  %v9588_v55 = vld [vmem:[%s14511_s1 + $0xe] sm:$0x3] }
  0x5b   : > { %v440_v38 = vrot.slane %v439_v26, 4  ;;  %v462_v8 = vrot.slane %v460_v58, 4  ;;  %v641_v14 = vrot.slane %v639_v62, 4  ;;  %v644_v16 = vrot.slane %v642_v63, 5 }
  0x5c   : > { %v435_v45 = vsel %vm10707_vm4, %v430_v32, %v434_v10  ;;  %v10887_v10 = vld [vmem:[%s10683_s8 + $0x5c] sm:$0x1]  ;;  %v693_v18 = vunpack.c.l.b16 %v637_v1  ;;  %v453_v23 = vor.u32 %v452_v6, %v449_v5  ;;  %v658_v29 = vshll.u32 %v274_v19, 16  ;;  %v9410_v6 = vld [vmem:[%s14511_s1 + $0xa] sm:$0x3] }
  0x5d   : > { %v676_v60 = vunpack.c.l.b16 %v435_v45  ;;  %v463_v26 = vor.u32 %v462_v8, %v458_v7  ;;  %v466_v27 = vshll.u32 %v10887_v10, 16  ;;  %v1798_v43 = vshll.u32 %v9313_v30, 16  ;;  %v9378_v8 = vld [vmem:[%s10683_s8 + $0xc] sm:$0xe] }
  0x5e   : > { %v2962_v58 = vsel %vm761_vm0, %v9459_v54, 0 }
  0x5f   : > { %v468_v41 = vrot.slane %v466_v27, 5  ;;  %2971 = vmatpush.bf16.msra.mxu2 %v2962_v58 }
  0x60   : > { %9075 = vmatmul.msk.bf16.gmra.mxu0 %vm712_vm1, %v700_v33  ;;  %v444_v33 = vrot.slane %v442_v22, 5 }
  0x63   : > { %9083 = vmatmul.msk.bf16.gmra.mxu2 %vm712_vm1, %v708_v46  ;;  %9164 = vmatmul.msk.bf16.gmra.mxu3 %vm712_vm1, %v10326_v47  ;;  %v445_v46 = vsel %vm10707_vm4, %v440_v38, %v444_v33  ;;  %v622_v47 = vrot.slane %v621_v39, 4  ;;  %v10328_v33 = vld [vmem:[%s10683_s8 + $0xb4] sm:$0xff]  ;;  %v454_v38 = vrot.slane %v453_v23, 4  ;;  %v464_v39 = vrot.slane %v463_v26, 4 }
  0x64   : > { %v677_v61 = vunpack.c.l.b16 %v445_v46 }
  0x65   : > { %v627_v0 = vsel %vm10707_vm4, %v622_v47, %v626_v28  ;;  %v645_v28 = vor.u32 %v644_v16, %v641_v14  ;;  %v660_v47 = vrot.slane %v658_v29, 5  ;;  %v459_v56 = vsel %vm10707_vm4, %v454_v38, %v458_v7  ;;  %v9637_v7 = vld [vmem:[%s14511_s1 + $0x10] sm:$0x3] }
  0x66   : > { %9156 = vmatmul.msk.bf16.gmra.mxu1 %vm712_vm1, %v10318_v59  ;;  %v257_v59 = vld [vmem:[%s10683_s8 + $0xb8] sm:$0xf]  ;;  %v692_v11 = vunpack.c.l.b16 %v627_v0  ;;  %v469_v57 = vsel %vm10707_vm4, %v464_v39, %v468_v41  ;;  %v678_v1 = vunpack.c.l.b16 %v459_v56  ;;  %v2675_v14 = vsel %vm761_vm0, %v9410_v6, 0  ;;  %v10329_v38 = vld [vmem:[%s10683_s8 + $0xc] sm:$0xff]  ;;  %v1074_v39 = vld [vmem:[%s10683_s8] sm:$0xe] }
  0x67   : > { %v648_v3 = vshll.u32 %v257_v59, 16  ;;  %v652_v4 = vshrl.u32 %v257_v59, 16  ;;  %v646_v46 = vrot.slane %v645_v28, 4  ;;  %v3616_v59 = vsel %vm761_vm0, %v9588_v55, 0  ;;  %2684 = vmatpush.bf16.msrb.mxu1 %v2675_v14 }
  0x68   : > { %v710_v32 = vpack.c.b16 %v693_v18, %v692_v11  ;;  %3625 = vmatpush.bf16.msra.mxu3 %v3616_v59  ;;  %v9315_v11 = vld [vmem:[%s10683_s8 + $0x14] sm:$0x1]  ;;  %v4014_v16 = vsel %vm761_vm0, %v9637_v7, 0  ;;  %v9379_v7 = vld [vmem:[%s10683_s8 + $0x18] sm:$0xe] }
  0x69   : > { %v650_v21 = vrot.slane %v648_v3, 5  ;;  %v654_v22 = vrot.slane %v652_v4, 4  ;;  %v679_v3 = vunpack.c.l.b16 %v469_v57  ;;  %4023 = vmatpush.bf16.msra.mxu0 %v4014_v16  ;;  %v2469_v19 = vrot.slane %v9315_v11, 5 }
  0x6a   : > { %v1814_v29 = vshll.u32 %v9315_v11, 16  ;;  %v9395_v11 = vrot.slane %v9379_v7, 9 }
  0x6b   : > { %v651_v4 = vsel %vm10707_vm4, %v646_v46, %v650_v21  ;;  %v9316_v46 = vld [vmem:[%s10683_s8 + $0x18] sm:$0xf] }
  0x6c   : > { %v694_v23 = vunpack.c.l.b16 %v651_v4  ;;  %v1819_v55 = vshrl.u32 %v9316_v46, 16  ;;  %v1822_v56 = vshll.u32 %v9316_v46, 16 }
  0x6e   : > { %v1821_v4 = vrot.slane %v1819_v55, 4 }
  0x70   : > { %9076 = vmatmul.msk.bf16.gmra.mxu0 %vm712_vm1, %v701_v17  ;;  %v702_v17 = vpack.c.b16 %v677_v61, %v676_v60  ;;  %v1797_v60 = vrot.slane %v1795_v42, 4  ;;  %v1800_v61 = vrot.slane %v1798_v43, 5 }
  0x73   : > { %9084 = vmatmul.msk.bf16.gmra.mxu2 %vm712_vm1, %v709_v31  ;;  %9165 = vmatmul.msk.bf16.gmra.mxu3 %vm712_vm1, %v10327_v34  ;;  %v9314_v31 = vld [vmem:[%s10683_s8 + $0x10] sm:$0xf]  ;;  %v655_v34 = vor.u32 %v654_v22, %v650_v21  ;;  %v1801_v21 = vor.u32 %v1800_v61, %v1797_v60  ;;  %v703_v22 = vpack.c.b16 %v679_v3, %v678_v1 }
  0x74   : > { %v1804_v45 = vshll.u32 %v9314_v31, 16  ;;  %v1808_v48 = vshrl.u32 %v9314_v31, 16  ;;  %v2466_v0 = vrot.slane %v9314_v31, 5 }
  0x75   : > { %v656_v50 = vrot.slane %v655_v34, 4 }
  0x76   : > { %9157 = vmatmul.msk.bf16.gmra.mxu1 %vm712_vm1, %v10319_v51  ;;  %v10320_v51 = vld [vmem:[%s10683_s8 + $0x54] sm:$0xff]  ;;  %v1806_v62 = vrot.slane %v1804_v45, 5  ;;  %v1810_v63 = vrot.slane %v1808_v48, 4  ;;  %v2468_v18 = vrot.slane %v2466_v0, 4  ;;  %v1816_v45 = vrot.slane %v1814_v29, 5 }
  0x77   : > { %v661_v5 = vsel %vm10707_vm4, %v656_v50, %v660_v47  ;;  %v9317_v47 = vld [vmem:[%s10683_s8 + $0x1c] sm:$0xf]  ;;  %v1130_v48 = vrot.slane %v10691_v13, 5  ;;  %v9167_v50 = vrot.slane %v1074_v39, 9 }
  0x78   : > { %v695_v26 = vunpack.c.l.b16 %v661_v5  ;;  %v1811_v28 = vor.u32 %v1810_v63, %v1806_v62  ;;  %v2470_v31 = vsel %vm10927_vm7, %v2468_v18, %v2469_v19  ;;  %v1828_v57 = vshll.u32 %v9317_v47, 16  ;;  %v10330_v39 = vld [vmem:[%s10683_s8 + $0x18] sm:$0xff] }
  0x79   : > { %v2579_v42 = vunpack.c.l.b16 %v2470_v31  ;;  %v1832_v13 = vshrl.u32 %v9317_v47, 16  ;;  %v2473_v1 = vrot.slane %v9317_v47, 5  ;;  %v1824_v5 = vrot.slane %v1822_v56, 5 }
  0x7a   : > { %v711_v34 = vpack.c.b16 %v695_v26, %v694_v23  ;;  %v1812_v43 = vrot.slane %v1811_v28, 4  ;;  %v1830_v6 = vrot.slane %v1828_v57, 5 }
  0x7b   : > { %v2475_v14 = vrot.slane %v2473_v1, 4  ;;  %v2474_v29 = vsel %vm10927_vm7, %v9395_v11, %v2473_v1 }
  0x7c   : > { %v1817_v59 = vsel %vm10707_vm4, %v1812_v43, %v1816_v45  ;;  %v9319_v45 = vld [vmem:[%s10683_s8 + $0x24] sm:$0xf] }
  0x7d   : > { %v2181_v3 = vunpack.c.l.b16 %v1817_v59  ;;  %v1846_v56 = vshll.u32 %v9319_v45, 16 }
  0x7f   : > { %v1848_v11 = vrot.slane %v1846_v56, 5  ;;  %v9323_v56 = vld [vmem:[%s10683_s8 + $0x34] sm:$0xf] }
  0x80   : > { %9077 = vmatmul.msk.bf16.gmra.mxu0 %vm712_vm1, %v702_v17  ;;  %v9394_v17 = vrot.slane %v9378_v8, 9  ;;  %v1834_v8 = vrot.slane %v1832_v13, 4 }
  0x82   : > { %v2467_v30 = vsel %vm10927_vm7, %v9394_v17, %v2466_v0  ;;  %v9318_v0 = vld [vmem:[%s10683_s8 + $0x20] sm:$0x1]  ;;  %v1835_v26 = vor.u32 %v1834_v8, %v1830_v6  ;;  %v9321_v8 = vld [vmem:[%s10683_s8 + $0x2c] sm:$0x1] }
  0x83   : > { %9085 = vmatmul.msk.bf16.gmra.mxu2 %vm712_vm1, %v710_v32  ;;  %9166 = vmatmul.msk.bf16.gmra.mxu3 %vm712_vm1, %v10328_v33  ;;  %v1127_v32 = vrot.slane %v10688_v12, 5  ;;  %v1802_v33 = vrot.slane %v1801_v21, 4  ;;  %v2578_v41 = vunpack.c.l.b16 %v2467_v30  ;;  %v2476_v16 = vrot.slane %v9318_v0, 5 }
  0x84   : > { %v1825_v21 = vor.u32 %v1824_v5, %v1821_v4  ;;  %v1838_v28 = vshll.u32 %v9318_v0, 16  ;;  %v1836_v46 = vrot.slane %v1835_v26, 4 }
  0x85   : > { %v1807_v12 = vsel %vm10707_vm4, %v1802_v33, %v1806_v62  ;;  %v2610_v54 = vpack.c.b16 %v2579_v42, %v2578_v41  ;;  %v1128_v61 = vsel %vm10927_vm7, %v9167_v50, %v1127_v32  ;;  %v2477_v30 = vsel %vm10927_vm7, %v2475_v14, %v2476_v16  ;;  %v1075_v33 = vld [vmem:[%s10683_s8 + $0xc] sm:$0xe]  ;;  %v9380_v16 = vld [vmem:[%s10683_s8 + $0x24] sm:$0xe] }
  0x86   : > { %9158 = vmatmul.msk.bf16.gmra.mxu1 %vm712_vm1, %v10320_v51  ;;  %v1129_v51 = vrot.slane %v1127_v32, 4  ;;  %v2180_v63 = vunpack.c.l.b16 %v1807_v12  ;;  %v1239_v17 = vunpack.c.l.b16 %v1128_v61  ;;  %v1826_v41 = vrot.slane %v1825_v21, 4 }
  0x87   : > { %v2580_v42 = vunpack.c.l.b16 %v2474_v29  ;;  %v2581_v43 = vunpack.c.l.b16 %v2477_v30  ;;  %v1840_v47 = vrot.slane %v1838_v28, 5  ;;  %v9168_v50 = vrot.slane %v1075_v33, 9 }
  0x88   : > { %v1131_v62 = vsel %vm10927_vm7, %v1129_v51, %v1130_v48  ;;  %v2212_v19 = vpack.c.b16 %v2181_v3, %v2180_v63  ;;  %v9320_v48 = vld [vmem:[%s10683_s8 + $0x28] sm:$0xf]  ;;  %v1137_v12 = vrot.slane %v10718_v52, 5  ;;  %v2483_v21 = vrot.slane %v9321_v8, 5 }
  0x89   : > { %v1240_v18 = vunpack.c.l.b16 %v1131_v62  ;;  %v2611_v55 = vpack.c.b16 %v2581_v43, %v2580_v42  ;;  %v1852_v57 = vshll.u32 %v9320_v48, 16  ;;  %v1841_v13 = vsel %vm10707_vm4, %v1836_v46, %v1840_v47 }
  0x8a   : > { %v1856_v61 = vshrl.u32 %v9320_v48, 16  ;;  %v2480_v5 = vrot.slane %v9320_v48, 5  ;;  %v2183_v7 = vunpack.c.l.b16 %v1841_v13  ;;  %v1862_v33 = vshll.u32 %v9321_v8, 16  ;;  %v10331_v48 = vld [vmem:[%s10683_s8 + $0x24] sm:$0xff] }
  0x8b   : > { %v1854_v14 = vrot.slane %v1852_v57, 5  ;;  %v1141_v46 = vrot.slane %v10733_v24, 5 }
  0x90   : > { %9078 = vmatmul.msk.bf16.gmra.mxu0 %vm712_vm1, %v703_v22 }
  0x93   : > { %9086 = vmatmul.msk.bf16.gmra.mxu2 %vm712_vm1, %v711_v34  ;;  %9297 = vmatmul.msk.bf16.vlgmr.msrb.gmra.mxu3 %vm712_vm1, %v10329_v38  ;;  %v994_v58 = vpop.f32.mrf.mxu1  ;;  %v1134_v34 = vrot.slane %v10703_v36, 5  ;;  %v1271_v38 = vpack.c.b16 %v1240_v18, %v1239_v17  ;;  %v1831_v36 = vsel %vm10707_vm4, %v1826_v41, %v1830_v6  ;;  %v1858_v17 = vrot.slane %v1856_v61, 4 }
  0x94   : > { %v2182_v3 = vunpack.c.l.b16 %v1831_v36  ;;  %v9396_v18 = vrot.slane %v9380_v16, 9 }
  0x95   : > { %v1136_v51 = vrot.slane %v1134_v34, 4  ;;  %v1135_v62 = vsel %vm10927_vm7, %v9168_v50, %v1134_v34  ;;  %v1859_v30 = vor.u32 %v1858_v17, %v1854_v14  ;;  %v2487_v17 = vrot.slane %v9323_v56, 5 }
  0x96   : > { %v1034_v60 = vpop.f32.mrf.mxu3  ;;  %9411 = vmatmul.msk.bf16.vlgmr.msrb.gmra.mxu1 %vm712_vm1, %v2610_v54  ;;  %v1843_v54 = vshrl.u32 %v9319_v45, 16  ;;  %v2213_v26 = vpack.c.b16 %v2183_v7, %v2182_v3  ;;  %v2481_v34 = vsel %vm10927_vm7, %v9396_v18, %v2480_v5  ;;  %v1076_v45 = vld [vmem:[%s10683_s8 + $0x18] sm:$0xe] }
  0x97   : > { %v1138_v1 = vsel %vm10927_vm7, %v1136_v51, %v1137_v12  ;;  %v2582_v51 = vunpack.c.l.b16 %v2481_v34  ;;  %v1860_v36 = vrot.slane %v1859_v30, 4  ;;  %v9169_v57 = vrot.slane %v1076_v45, 9 }
  0x98   : > { %v1845_v4 = vrot.slane %v1843_v54, 4  ;;  %v9322_v54 = vld [vmem:[%s10683_s8 + $0x30] sm:$0xf] }
  0x99   : > { %v1867_v13 = vshrl.u32 %v9322_v54, 16  ;;  %v1870_v61 = vshll.u32 %v9322_v54, 16 }
  0x9a   : > { %v1849_v28 = vor.u32 %v1848_v11, %v1845_v4  ;;  %v1880_v4 = vshrl.u32 %v9323_v56, 16 }
  0x9b   : > { %v996_v23 = vpop.f32.mrf.mxu1  ;;  %v1869_v16 = vrot.slane %v1867_v13, 4 }
  0x9c   : > { %v1850_v50 = vrot.slane %v1849_v28, 4  ;;  %v1882_v28 = vrot.slane %v1880_v4, 4  ;;  %v1151_v4 = vrot.slane %v10778_v35, 5 }
  0x9d   : > { %v774_v22 = vpop.f32.mrf.mxu0 }
  0x9e   : > { %v10959_v31 = vadd.f32 %v994_v58, %v774_v22  ;;  %v1036_v32 = vpop.f32.mrf.mxu3  ;;  %v1241_v22 = vunpack.c.l.b16 %v1135_v62  ;;  %v1855_v24 = vsel %vm10707_vm4, %v1850_v50, %v1854_v14  ;;  %v1876_v62 = vshll.u32 %v9323_v56, 16 }
  0x9f   : > { %v2184_v14 = vunpack.c.l.b16 %v1855_v24  ;;  %v1148_v56 = vrot.slane %v10760_v15, 5 }
  0xa0   : > { %9362 = vmatmul.msk.bf16.vlgmr.msrb.gmra.mxu0 %vm712_vm1, %v2212_v19  ;;  %v2482_v19 = vrot.slane %v2480_v5, 4  ;;  %v1142_v5 = vsel %vm10927_vm7, %v9169_v57, %v1141_v46 }
  0xa3   : > { %9184 = vmatmul.msk.bf16.vlgmr.msrb.gmra.mxu2 %vm712_vm1, %v1271_v38  ;;  %9298 = vmatmul.msk.bf16.gmra.mxu3 %vm712_vm1, %v10330_v39  ;;  %v999_v59 = vpop.f32.mrf.mxu1  ;;  %v2484_v38 = vsel %vm10927_vm7, %v2482_v19, %v2483_v21  ;;  %v9324_v21 = vld [vmem:[%s10683_s8 + $0x38] sm:$0x1] }
  0xa4   : > { %v2583_v12 = vunpack.c.l.b16 %v2484_v38  ;;  %v2490_v30 = vrot.slane %v9324_v21, 5 }
  0xa5   : > { %v776_v58 = vpop.f32.mrf.mxu0 }
  0xa6   : > { %v10974_v52 = vadd.f32 %v996_v23, %v776_v58  ;;  %v814_v63 = vpop.f32.mrf.mxu2  ;;  %v10978_v0 = vpop.f32.mrf.mxu3  ;;  %9412 = vmatmul.msk.bf16.gmra.mxu1 %vm712_vm1, %v2611_v55  ;;  %v1242_v23 = vunpack.c.l.b16 %v1138_v1  ;;  %v1864_v55 = vrot.slane %v1862_v33, 5  ;;  %v1143_v58 = vrot.slane %v1141_v46, 4 }
  0xa7   : > { %v10982_v6 = vadd.f32 %v1034_v60, %v814_v63  ;;  %v1243_v33 = vunpack.c.l.b16 %v1142_v5  ;;  %v1886_v46 = vshll.u32 %v9324_v21, 16 }
  0xa8   : > { %v1272_v43 = vpack.c.b16 %v1242_v23, %v1241_v22  ;;  %v1865_v3 = vsel %vm10707_vm4, %v1860_v36, %v1864_v55  ;;  %v1872_v22 = vrot.slane %v1870_v61, 5  ;;  %v1878_v23 = vrot.slane %v1876_v62, 5  ;;  %v1077_v55 = vld [vmem:[%s10683_s8 + $0x24] sm:$0xe] }
  0xa9   : > { %v2185_v19 = vunpack.c.l.b16 %v1865_v3  ;;  %v1888_v62 = vrot.slane %v1886_v46, 5  ;;  %v1150_v3 = vrot.slane %v1148_v56, 4 }
  0xaa   : > { %v1883_v45 = vor.u32 %v1882_v28, %v1878_v23 }
  0xab   : > { %v1001_v60 = vpop.f32.mrf.mxu1  ;;  %v2214_v38 = vpack.c.b16 %v2185_v19, %v2184_v14 }
  0xac   : > { %v1884_v61 = vrot.slane %v1883_v45, 4 }
  0xad   : > { %v779_v29 = vpop.f32.mrf.mxu0 }
  0xae   : > { %v10991_v39 = vadd.f32 %v999_v59, %v779_v29  ;;  %v816_v41 = vpop.f32.mrf.mxu2  ;;  %v10993_v42 = vpop.f32.mrf.mxu3  ;;  %v1144_v59 = vrot.slane %v10745_v40, 5 }
  0xaf   : > { %v10997_v47 = vadd.f32 %v1036_v32, %v816_v41  ;;  %v2612_v32 = vpack.c.b16 %v2583_v12, %v2582_v51  ;;  %v1873_v41 = vor.u32 %v1872_v22, %v1869_v16 }
  0xb0   : > { %9363 = vmatmul.msk.bf16.gmra.mxu0 %vm712_vm1, %v2213_v26  ;;  %v1145_v11 = vsel %vm10927_vm7, %v1143_v58, %v1144_v59  ;;  %v9381_v26 = vld [vmem:[%s10683_s8 + $0x30] sm:$0xe] }
  0xb1   : > { %v9397_v29 = vrot.slane %v9381_v26, 9  ;;  %v1244_v34 = vunpack.c.l.b16 %v1145_v11  ;;  %v10332_v58 = vld [vmem:[%s10683_s8 + $0x30] sm:$0xff]  ;;  %v1874_v59 = vrot.slane %v1873_v41, 4 }
  0xb3   : > { %9185 = vmatmul.msk.bf16.gmra.mxu2 %vm712_vm1, %v1272_v43  ;;  %9299 = vmatmul.msk.bf16.gmra.mxu3 %vm712_vm1, %v10331_v48  ;;  %v1004_v1 = vpop.f32.mrf.mxu1  ;;  %v2488_v48 = vsel %vm10927_vm7, %v9397_v29, %v2487_v17  ;;  %v1273_v36 = vpack.c.b16 %v1244_v34, %v1243_v33  ;;  %v1879_v15 = vsel %vm10707_vm4, %v1874_v59, %v1878_v23  ;;  %v9327_v34 = vld [vmem:[%s10683_s8 + $0x44] sm:$0x1] }
  0xb4   : > { %v2584_v13 = vunpack.c.l.b16 %v2488_v48  ;;  %v1152_v23 = vsel %vm10927_vm7, %v1150_v3, %v1151_v4  ;;  %v2186_v28 = vunpack.c.l.b16 %v1879_v15  ;;  %v2497_v48 = vrot.slane %v9327_v34, 5 }
  0xb5   : > { %v781_v63 = vpop.f32.mrf.mxu0  ;;  %v1910_v59 = vshll.u32 %v9327_v34, 16  ;;  %v1155_v3 = vrot.slane %v10787_v2, 5 }
  0xb6   : > { %v11010_v40 = vadd.f32 %v1001_v60, %v781_v63  ;;  %v819_v7 = vpop.f32.mrf.mxu2  ;;  %v11014_v8 = vpop.f32.mrf.mxu3  ;;  %9413 = vmatmul.msk.bf16.gmra.mxu1 %vm712_vm1, %v2612_v32  ;;  %v2489_v60 = vrot.slane %v2487_v17, 4  ;;  %v9325_v32 = vld [vmem:[%s10683_s8 + $0x3c] sm:$0xf]  ;;  %v9326_v63 = vld [vmem:[%s10683_s8 + $0x40] sm:$0xf]  ;;  %v1889_v17 = vsel %vm10707_vm4, %v1884_v61, %v1888_v62 }
  0xb7   : > { %v11019_v18 = vadd.f32 %v10978_v0, %v819_v7  ;;  %v1891_v5 = vshrl.u32 %v9325_v32, 16  ;;  %v1894_v7 = vshll.u32 %v9325_v32, 16  ;;  %v1900_v11 = vshll.u32 %v9326_v63, 16 }
  0xb8   : > { %v2491_v50 = vsel %vm10927_vm7, %v2489_v60, %v2490_v30  ;;  %v1904_v19 = vshrl.u32 %v9326_v63, 16  ;;  %v2494_v60 = vrot.slane %v9326_v63, 5  ;;  %v2187_v33 = vunpack.c.l.b16 %v1889_v17  ;;  %v9329_v17 = vld [vmem:[%s10683_s8 + $0x4c] sm:$0xf] }
  0xb9   : > { %v2585_v24 = vunpack.c.l.b16 %v2491_v50  ;;  %v1893_v29 = vrot.slane %v1891_v5, 4  ;;  %v1902_v41 = vrot.slane %v1900_v11, 5  ;;  %v10333_v5 = vld [vmem:[%s10683_s8 + $0x3c] sm:$0xff]  ;;  %v9328_v11 = vld [vmem:[%s10683_s8 + $0x48] sm:$0xf] }
  0xba   : > { %v2496_v46 = vrot.slane %v2494_v60, 4 }
  0xbb   : > { %v1006_v0 = vpop.f32.mrf.mxu1 }
  0xbd   : > { %v784_v43 = vpop.f32.mrf.mxu0 }
  0xbe   : > { %v11028_v51 = vadd.f32 %v1004_v1, %v784_v43  ;;  %v821_v12 = vpop.f32.mrf.mxu2  ;;  %v11030_v54 = vpop.f32.mrf.mxu3  ;;  %v9170_v1 = vrot.slane %v1077_v55, 9  ;;  %v9382_v43 = vld [vmem:[%s10683_s8 + $0x3c] sm:$0xe] }
  0xbf   : > { %v11035_v57 = vadd.f32 %v10993_v42, %v821_v12  ;;  %v2613_v42 = vpack.c.b16 %v2585_v24, %v2584_v13  ;;  %v9398_v45 = vrot.slane %v9382_v43, 9  ;;  %v1246_v12 = vunpack.c.l.b16 %v1152_v23 }
  0xc0   : > { %9364 = vmatmul.msk.bf16.gmra.mxu0 %vm712_vm1, %v2214_v38  ;;  %v1149_v21 = vsel %vm10927_vm7, %v9170_v1, %v1148_v56  ;;  %v1896_v38 = vrot.slane %v1894_v7, 5  ;;  %v2498_v24 = vsel %vm10927_vm7, %v2496_v46, %v2497_v48  ;;  %v1078_v1 = vld [vmem:[%s10683_s8 + $0x30] sm:$0xe]  ;;  %v1915_v23 = vshrl.u32 %v9328_v11, 16 }
  0xc1   : > { %v1245_v50 = vunpack.c.l.b16 %v1149_v21  ;;  %v2495_v13 = vsel %vm10927_vm7, %v9398_v45, %v2494_v60  ;;  %v2587_v7 = vunpack.c.l.b16 %v2498_v24  ;;  %v1158_v21 = vrot.slane %v10806_v25, 5 }
  0xc2   : > { %v1897_v55 = vor.u32 %v1896_v38, %v1893_v29  ;;  %v1924_v29 = vshll.u32 %v9329_v17, 16  ;;  %v1928_v25 = vshrl.u32 %v9329_v17, 16  ;;  %v1917_v48 = vrot.slane %v1915_v23, 4 }
  0xc3   : > { %9186 = vmatmul.msk.bf16.gmra.mxu2 %vm712_vm1, %v1273_v36  ;;  %9300 = vmatmul.msk.bf16.gmra.mxu3 %vm712_vm1, %v10332_v58  ;;  %v1009_v16 = vpop.f32.mrf.mxu1  ;;  %v2215_v36 = vpack.c.b16 %v2187_v33, %v2186_v28  ;;  %v1274_v63 = vpack.c.b16 %v1246_v12, %v1245_v50  ;;  %v1918_v28 = vshll.u32 %v9328_v11, 16  ;;  %v2501_v50 = vrot.slane %v9329_v17, 5 }
  0xc4   : > { %v1898_v15 = vrot.slane %v1897_v55, 4  ;;  %v9330_v55 = vld [vmem:[%s10683_s8 + $0x50] sm:$0x1]  ;;  %v1162_v23 = vrot.slane %v10814_v53, 5 }
  0xc5   : > { %v786_v14 = vpop.f32.mrf.mxu0  ;;  %v2503_v24 = vrot.slane %v2501_v50, 4 }
  0xc6   : > { %v11048_v35 = vadd.f32 %v1006_v0, %v786_v14  ;;  %v824_v22 = vpop.f32.mrf.mxu2  ;;  %v11052_v26 = vpop.f32.mrf.mxu3  ;;  %9414 = vmatmul.msk.bf16.gmra.mxu1 %vm712_vm1, %v2613_v42  ;;  %v1906_v0 = vrot.slane %v1904_v19, 4  ;;  %v2586_v42 = vunpack.c.l.b16 %v2495_v13  ;;  %v9171_v19 = vrot.slane %v1078_v1, 9 }
  0xc7   : > { %v11057_v30 = vadd.f32 %v11014_v8, %v824_v22  ;;  %v1157_v22 = vrot.slane %v1155_v3, 4  ;;  %v1903_v2 = vsel %vm10707_vm4, %v1898_v15, %v1902_v41 }
  0xc8   : > { %v1907_v58 = vor.u32 %v1906_v0, %v1902_v41  ;;  %v1156_v43 = vsel %vm10927_vm7, %v9171_v19, %v1155_v3  ;;  %v2188_v46 = vunpack.c.l.b16 %v1903_v2 }
  0xc9   : > { %v1159_v41 = vsel %vm10927_vm7, %v1157_v22, %v1158_v21  ;;  %v1079_v22 = vld [vmem:[%s10683_s8 + $0x3c] sm:$0xe] }
  0xca   : > { %v1908_v14 = vrot.slane %v1907_v58, 4  ;;  %v9383_v58 = vld [vmem:[%s10683_s8 + $0x48] sm:$0xe]  ;;  %v1248_v1 = vunpack.c.l.b16 %v1159_v41  ;;  %v1165_v41 = vrot.slane %v10829_v20, 5 }
  0xcb   : > { %v1011_v8 = vpop.f32.mrf.mxu1  ;;  %v9399_v13 = vrot.slane %v9383_v58, 9 }
  0xcd   : > { %v789_v56 = vpop.f32.mrf.mxu0  ;;  %v2502_v11 = vsel %vm10927_vm7, %v9399_v13, %v2501_v50 }
  0xce   : > { %v11066_v32 = vadd.f32 %v1009_v16, %v789_v56  ;;  %v826_v61 = vpop.f32.mrf.mxu2  ;;  %v11068_v62 = vpop.f32.mrf.mxu3  ;;  %v1912_v16 = vrot.slane %v1910_v59, 5  ;;  %v1920_v56 = vrot.slane %v1918_v28, 5  ;;  %v1930_v59 = vrot.slane %v1928_v25, 4 }
  0xcf   : > { %v11073_v4 = vadd.f32 %v11030_v54, %v826_v61  ;;  %v2614_v54 = vpack.c.b16 %v2587_v7, %v2586_v42  ;;  %v2504_v61 = vrot.slane %v9330_v55, 5  ;;  %v1934_v7 = vshll.u32 %v9330_v55, 16 }
  0xd0   : > { %9365 = vmatmul.msk.bf16.gmra.mxu0 %vm712_vm1, %v2215_v36  ;;  %v1913_v34 = vsel %vm10707_vm4, %v1908_v14, %v1912_v16 }
  0xd1   : > { %v2189_v36 = vunpack.c.l.b16 %v1913_v34  ;;  %v2505_v14 = vsel %vm10927_vm7, %v2503_v24, %v2504_v61  ;;  %v9331_v34 = vld [vmem:[%s10683_s8 + $0x54] sm:$0xf] }
  0xd2   : > { %v1942_v50 = vshll.u32 %v9331_v34, 16 }
  0xd3   : > { %9187 = vmatmul.msk.bf16.gmra.mxu2 %vm712_vm1, %v1274_v63  ;;  %9301 = vmatmul.msk.bf16.gmra.mxu3 %vm712_vm1, %v10333_v5  ;;  %v1014_v33 = vpop.f32.mrf.mxu1  ;;  %v1247_v63 = vunpack.c.l.b16 %v1156_v43  ;;  %v2216_v3 = vpack.c.b16 %v2189_v36, %v2188_v46  ;;  %v1921_v5 = vor.u32 %v1920_v56, %v1917_v48  ;;  %v9332_v43 = vld [vmem:[%s10683_s8 + $0x58] sm:$0xf]  ;;  %v1164_v46 = vrot.slane %v1162_v23, 4 }
  0xd4   : > { %v1939_v48 = vshrl.u32 %v9331_v34, 16  ;;  %v1948_v36 = vshll.u32 %v9332_v43, 16  ;;  %v1952_v20 = vshrl.u32 %v9332_v43, 16 }
  0xd5   : > { %v791_v60 = vpop.f32.mrf.mxu0  ;;  %v1275_v21 = vpack.c.b16 %v1248_v1, %v1247_v63  ;;  %v1922_v28 = vrot.slane %v1921_v5, 4 }
  0xd6   : > { %v11086_v38 = vadd.f32 %v1011_v8, %v791_v60  ;;  %v829_v0 = vpop.f32.mrf.mxu2  ;;  %v11090_v45 = vpop.f32.mrf.mxu3  ;;  %9415 = vmatmul.msk.bf16.gmra.mxu1 %vm712_vm1, %v2614_v54  ;;  %v1926_v8 = vrot.slane %v1924_v29, 5  ;;  %v10334_v54 = vld [vmem:[%s10683_s8 + $0x48] sm:$0xff]  ;;  %v2588_v29 = vunpack.c.l.b16 %v2502_v11  ;;  %v2589_v60 = vunpack.c.l.b16 %v2505_v14  ;;  %v9384_v11 = vld [vmem:[%s10683_s8 + $0x54] sm:$0xe] }
  0xd7   : > { %v11095_v12 = vadd.f32 %v11052_v26, %v829_v0  ;;  %v9172_v0 = vrot.slane %v1079_v22, 9  ;;  %v1941_v1 = vrot.slane %v1939_v48, 4  ;;  %v1954_v14 = vrot.slane %v1952_v20, 4 }
  0xd8   : > { %v1931_v42 = vor.u32 %v1930_v59, %v1926_v8  ;;  %v1927_v53 = vsel %vm10707_vm4, %v1922_v28, %v1926_v8  ;;  %v1166_v8 = vsel %vm10927_vm7, %v1164_v46, %v1165_v41 }
  0xd9   : > { %v1163_v13 = vsel %vm10927_vm7, %v9172_v0, %v1162_v23  ;;  %v2190_v63 = vunpack.c.l.b16 %v1927_v53  ;;  %v1080_v53 = vld [vmem:[%s10683_s8 + $0x48] sm:$0xe] }
  0xda   : > { %v1932_v25 = vrot.slane %v1931_v42, 4  ;;  %v1944_v42 = vrot.slane %v1942_v50, 5  ;;  %v1249_v23 = vunpack.c.l.b16 %v1163_v13  ;;  %v9334_v13 = vld [vmem:[%s10683_s8 + $0x60] sm:$0xf] }
  0xdb   : > { %v1016_v26 = vpop.f32.mrf.mxu1 }
  0xdd   : > { %v794_v15 = vpop.f32.mrf.mxu0 }
  0xde   : > { %v11104_v16 = vadd.f32 %v1014_v33, %v794_v15  ;;  %v831_v17 = vpop.f32.mrf.mxu2  ;;  %v11106_v19 = vpop.f32.mrf.mxu3  ;;  %v1936_v33 = vrot.slane %v1934_v7, 5  ;;  %v1950_v7 = vrot.slane %v1948_v36, 5  ;;  %v10335_v36 = vld [vmem:[%s10683_s8 + $0x54] sm:$0xff] }
  0xdf   : > { %v11111_v2 = vadd.f32 %v11068_v62, %v831_v17  ;;  %v2615_v62 = vpack.c.b16 %v2589_v60, %v2588_v29  ;;  %v9400_v17 = vrot.slane %v9384_v11, 9  ;;  %v1945_v29 = vor.u32 %v1944_v42, %v1941_v1 }
  0xe0   : > { %9366 = vmatmul.msk.bf16.gmra.mxu0 %vm712_vm1, %v2216_v3  ;;  %v1937_v58 = vsel %vm10707_vm4, %v1932_v25, %v1936_v33  ;;  %v2508_v3 = vrot.slane %v9332_v43, 5  ;;  %v1955_v34 = vor.u32 %v1954_v14, %v1950_v7  ;;  %v1172_v1 = vrot.slane %v10860_v9, 5 }
  0xe1   : > { %v2191_v15 = vunpack.c.l.b16 %v1937_v58 }
  0xe2   : > { %v2509_v33 = vsel %vm10927_vm7, %v9400_v17, %v2508_v3 }
  0xe3   : > { %9188 = vmatmul.msk.bf16.gmra.mxu2 %vm712_vm1, %v1275_v21  ;;  %9302 = vmatmul.msk.bf16.gmra.mxu3 %vm712_vm1, %v10334_v54  ;;  %v1019_v56 = vpop.f32.mrf.mxu1  ;;  %v2510_v21 = vrot.slane %v2508_v3, 4  ;;  %v1250_v54 = vunpack.c.l.b16 %v1166_v8  ;;  %v2217_v28 = vpack.c.b16 %v2191_v15, %v2190_v63  ;;  %v2590_v58 = vunpack.c.l.b16 %v2509_v33  ;;  %v9335_v8 = vld [vmem:[%s10683_s8 + $0x64] sm:$0xf] }
  0xe4   : > { %v9173_v63 = vrot.slane %v1080_v53, 9  ;;  %v1963_v15 = vshrl.u32 %v9334_v13, 16  ;;  %v1972_v42 = vshll.u32 %v9335_v8, 16  ;;  %v1976_v9 = vshrl.u32 %v9335_v8, 16 }
  0xe5   : > { %v796_v55 = vpop.f32.mrf.mxu0  ;;  %v1276_v48 = vpack.c.b16 %v1250_v54, %v1249_v23 }
  0xe6   : > { %v11124_v59 = vadd.f32 %v1016_v26, %v796_v55  ;;  %v834_v24 = vpop.f32.mrf.mxu2  ;;  %v11128_v61 = vpop.f32.mrf.mxu3  ;;  %9416 = vmatmul.msk.bf16.gmra.mxu1 %vm712_vm1, %v2615_v62  ;;  %v9333_v26 = vld [vmem:[%s10683_s8 + $0x5c] sm:$0x1]  ;;  %v1169_v62 = vrot.slane %v10841_v49, 5  ;;  %v1946_v55 = vrot.slane %v1945_v29, 4  ;;  %v1965_v29 = vrot.slane %v1963_v15, 4 }
  0xe7   : > { %v11133_v5 = vadd.f32 %v11090_v45, %v834_v24  ;;  %v2511_v22 = vrot.slane %v9333_v26, 5  ;;  %v1958_v25 = vshll.u32 %v9333_v26, 16  ;;  %v1956_v24 = vrot.slane %v1955_v34, 4 }
  0xe8   : > { %v1171_v3 = vrot.slane %v1169_v62, 4  ;;  %v1951_v49 = vsel %vm10707_vm4, %v1946_v55, %v1950_v7  ;;  %v1966_v26 = vshll.u32 %v9334_v13, 16 }
  0xe9   : > { %v2512_v43 = vsel %vm10927_vm7, %v2510_v21, %v2511_v22  ;;  %v1170_v22 = vsel %vm10927_vm7, %v9173_v63, %v1169_v62 }
  0xea   : > { %v2591_v20 = vunpack.c.l.b16 %v2512_v43  ;;  %v1173_v7 = vsel %vm10927_vm7, %v1171_v3, %v1172_v1  ;;  %v1968_v33 = vrot.slane %v1966_v26, 5  ;;  %v1974_v43 = vrot.slane %v1972_v42, 5  ;;  %v1081_v26 = vld [vmem:[%s10683_s8 + $0x54] sm:$0xe] }
  0xeb   : > { %v1021_v45 = vpop.f32.mrf.mxu1  ;;  %v1251_v55 = vunpack.c.l.b16 %v1170_v22  ;;  %v1176_v42 = vrot.slane %v10868_v44, 5 }
  0xec   : > { %v1969_v13 = vor.u32 %v1968_v33, %v1965_v29  ;;  %v9338_v29 = vld [vmem:[%s10683_s8 + $0x70] sm:$0xf] }
  0xed   : > { %v799_v60 = vpop.f32.mrf.mxu0 }
  0xee   : > { %v11142_v0 = vadd.f32 %v1019_v56, %v799_v60  ;;  %v836_v41 = vpop.f32.mrf.mxu2  ;;  %v11144_v46 = vpop.f32.mrf.mxu3  ;;  %v1960_v56 = vrot.slane %v1958_v25, 5  ;;  %v2515_v60 = vrot.slane %v9335_v8, 5 }
  0xef   : > { %v11149_v50 = vadd.f32 %v11106_v19, %v836_v41  ;;  %v2616_v19 = vpack.c.b16 %v2591_v20, %v2590_v58  ;;  %v9385_v41 = vld [vmem:[%s10683_s8 + $0x60] sm:$0xe]  ;;  %v1252_v58 = vunpack.c.l.b16 %v1173_v7  ;;  %v9337_v7 = vld [vmem:[%s10683_s8 + $0x6c] sm:$0xf] }
  0xf0   : > { %9367 = vmatmul.msk.bf16.gmra.mxu0 %vm712_vm1, %v2217_v28  ;;  %v1961_v17 = vsel %vm10707_vm4, %v1956_v24, %v1960_v56  ;;  %v2192_v28 = vunpack.c.l.b16 %v1951_v49  ;;  %v9401_v53 = vrot.slane %v9385_v41, 9  ;;  %v2517_v62 = vrot.slane %v2515_v60, 4 }
  0xf1   : > { %v2193_v25 = vunpack.c.l.b16 %v1961_v17  ;;  %v10336_v17 = vld [vmem:[%s10683_s8 + $0x60] sm:$0xff]  ;;  %v1987_v33 = vshrl.u32 %v9337_v7, 16  ;;  %v1990_v41 = vshll.u32 %v9337_v7, 16 }
  0xf2   : > { %v2516_v63 = vsel %vm10927_vm7, %v9401_v53, %v2515_v60  ;;  %v9174_v60 = vrot.slane %v1081_v26, 9  ;;  %v9386_v26 = vld [vmem:[%s10683_s8 + $0x6c] sm:$0xe] }
  0xf3   : > { %9189 = vmatmul.msk.bf16.gmra.mxu2 %vm712_vm1, %v1276_v48  ;;  %9303 = vmatmul.msk.bf16.gmra.mxu3 %vm712_vm1, %v10335_v36  ;;  %v1024_v14 = vpop.f32.mrf.mxu1  ;;  %v1978_v48 = vrot.slane %v1976_v9, 4  ;;  %v2218_v20 = vpack.c.b16 %v2193_v25, %v2192_v28  ;;  %v1970_v9 = vrot.slane %v1969_v13, 4  ;;  %v2592_v22 = vunpack.c.l.b16 %v2516_v63 }
  0xf4   : > { %v1179_v25 = vrot.slane %v10887_v10, 5  ;;  %v2000_v10 = vshrl.u32 %v9338_v29, 16 }
  0xf5   : > { %v801_v11 = vpop.f32.mrf.mxu0  ;;  %v1979_v56 = vor.u32 %v1978_v48, %v1974_v43  ;;  %v1975_v44 = vsel %vm10707_vm4, %v1970_v9, %v1974_v43  ;;  %v1996_v48 = vshll.u32 %v9338_v29, 16 }
  0xf6   : > { %v11162_v21 = vadd.f32 %v1021_v45, %v801_v11  ;;  %v839_v23 = vpop.f32.mrf.mxu2  ;;  %v11166_v54 = vpop.f32.mrf.mxu3  ;;  %9417 = vmatmul.msk.bf16.gmra.mxu1 %vm712_vm1, %v2616_v19  ;;  %v9336_v45 = vld [vmem:[%s10683_s8 + $0x68] sm:$0x1]  ;;  %v1277_v19 = vpack.c.b16 %v1252_v58, %v1251_v55  ;;  %v1177_v58 = vsel %vm10927_vm7, %v9174_v60, %v1176_v42 }
  0xf7   : > { %v11171_v34 = vadd.f32 %v11128_v61, %v839_v23  ;;  %v2518_v36 = vrot.slane %v9336_v45, 5  ;;  %v1982_v8 = vshll.u32 %v9336_v45, 16  ;;  %v1980_v28 = vrot.slane %v1979_v56, 4 }
  0xf8   : > { %v1178_v45 = vrot.slane %v1176_v42, 4  ;;  %v1989_v56 = vrot.slane %v1987_v33, 4  ;;  %v2002_v42 = vrot.slane %v2000_v10, 4 }
  0xf9   : > { %v2519_v1 = vsel %vm10927_vm7, %v2517_v62, %v2518_v36 }
  0xfa   : > { %v2593_v23 = vunpack.c.l.b16 %v2519_v1  ;;  %v1180_v43 = vsel %vm10927_vm7, %v1178_v45, %v1179_v25 }
  0xfb   : > { %v1026_v61 = vpop.f32.mrf.mxu1  ;;  %v1254_v7 = vunpack.c.l.b16 %v1180_v43 }
  0xfd   : > { %v804_v24 = vpop.f32.mrf.mxu0 }
  0xfe   : > { %v11180_v3 = vadd.f32 %v1024_v14, %v804_v24  ;;  %v841_v15 = vpop.f32.mrf.mxu2  ;;  %v11182_v49 = vpop.f32.mrf.mxu3  ;;  %v1984_v14 = vrot.slane %v1982_v8, 5  ;;  %v2194_v24 = vunpack.c.l.b16 %v1975_v44  ;;  %v2522_v8 = vrot.slane %v9338_v29, 5 }
  0xff   : > { %v11187_v11 = vadd.f32 %v11144_v46, %v841_v15  ;;  %v2617_v46 = vpack.c.b16 %v2593_v23, %v2592_v22  ;;  %v1992_v15 = vrot.slane %v1990_v41, 5  ;;  %v1253_v23 = vunpack.c.l.b16 %v1177_v58 }
 0x100   : > { %9368 = vmatmul.msk.bf16.gmra.mxu0 %vm712_vm1, %v2218_v20  ;;  %v1985_v36 = vsel %vm10707_vm4, %v1980_v28, %v1984_v14  ;;  %v2524_v9 = vrot.slane %v2522_v8, 4 }
 0x101   : > { %14522 = vst [vmem:[#allocation3_spill] sm:$0xff] %v11187_v11  ;;  %v2195_v1 = vunpack.c.l.b16 %v1985_v36  ;;  %v1993_v14 = vor.u32 %v1992_v15, %v1989_v56  ;;  %v10590_v36 = vld [vmem:[%s10683_s8 + $0x64] sm:$0xf] }
 0x102   : > { %v1183_v10 = vrot.slane %v10590_v36, 5 }
 0x103   : > { %9190 = vmatmul.msk.bf16.gmra.mxu2 %vm712_vm1, %v1277_v19  ;;  %9304 = vmatmul.msk.bf16.gmra.mxu3 %vm712_vm1, %v10336_v17  ;;  %v1029_v62 = vpop.f32.mrf.mxu1  ;;  %v1998_v19 = vrot.slane %v1996_v48, 5  ;;  %v9402_v17 = vrot.slane %v9386_v26, 9  ;;  %v2219_v28 = vpack.c.b16 %v2195_v1, %v2194_v24  ;;  %v1278_v48 = vpack.c.b16 %v1254_v7, %v1253_v23  ;;  %v10591_v26 = vld [vmem:[%s10683_s8 + $0x68] sm:$0x1] }
 0x104   : > { %v1994_v43 = vrot.slane %v1993_v14, 4 }
 0x105   : > { %v806_v53 = vpop.f32.mrf.mxu0  ;;  %v2003_v60 = vor.u32 %v2002_v42, %v1998_v19  ;;  %v2523_v45 = vsel %vm10927_vm7, %v9402_v17, %v2522_v8  ;;  %v1186_v42 = vrot.slane %v10591_v26, 5  ;;  %v1185_v17 = vrot.slane %v1183_v10, 4 }
 0x106   : > { %v11200_v55 = vadd.f32 %v1026_v61, %v806_v53  ;;  %v844_v20 = vpop.f32.mrf.mxu2  ;;  %v11204_v13 = vpop.f32.mrf.mxu3  ;;  %9418 = vmatmul.msk.bf16.gmra.mxu1 %vm712_vm1, %v2617_v46  ;;  %v9339_v61 = vld [vmem:[%s10683_s8 + $0x74] sm:$0x1]  ;;  %v1082_v53 = vld [vmem:[%s10683_s8 + $0x60] sm:$0xe]  ;;  %v2594_v24 = vunpack.c.l.b16 %v2523_v45 }
 0x107   : > { %v11209_v63 = vadd.f32 %v11166_v54, %v844_v20  ;;  %v2525_v22 = vrot.slane %v9339_v61, 5  ;;  %v2006_v25 = vshll.u32 %v9339_v61, 16  ;;  %v10337_v20 = vld [vmem:[%s10683_s8 + $0x6c] sm:$0xff]  ;;  %v2004_v8 = vrot.slane %v2003_v60, 4  ;;  %v9341_v61 = vld [vmem:[%s10683_s8 + $0x7c] sm:$0xf] }
 0x108   : > { %v9175_v15 = vrot.slane %v1082_v53, 9  ;;  %v2020_v7 = vshll.u32 %v9341_v61, 16  ;;  %v2024_v60 = vshrl.u32 %v9341_v61, 16  ;;  %v2529_v36 = vrot.slane %v9341_v61, 5 }
 0x109   : > { %14523 = vst [vmem:[#allocation4_spill] sm:$0xff] %v11209_v63  ;;  %v2526_v33 = vsel %vm10927_vm7, %v2524_v9, %v2525_v22  ;;  %v2008_v1 = vrot.slane %v2006_v25, 5 }
 0x10a   : > { %v2595_v56 = vunpack.c.l.b16 %v2526_v33  ;;  %v1184_v45 = vsel %vm10927_vm7, %v9175_v15, %v1183_v10  ;;  %v2026_v10 = vrot.slane %v2024_v60, 4  ;;  %v1083_v60 = vld [vmem:[%s10683_s8 + $0x6c] sm:$0xe] }
 0x10b   : > { %v1031_v29 = vpop.f32.mrf.mxu1  ;;  %v2009_v14 = vsel %vm10707_vm4, %v2004_v8, %v2008_v1  ;;  %v2531_v1 = vrot.slane %v2529_v36, 4  ;;  %v1255_v26 = vunpack.c.l.b16 %v1184_v45  ;;  %v10592_v45 = vld [vmem:[%s10683_s8 + $0x70] sm:$0xf] }
 0x10c   : > { %v2618_v22 = vpack.c.b16 %v2595_v56, %v2594_v24  ;;  %v2022_v56 = vrot.slane %v2020_v7, 5 }
 0x10d   : > { %v809_v54 = vpop.f32.mrf.mxu0 }
 0x10e   : > { %v11218_v44 = vadd.f32 %v1029_v62, %v809_v54  ;;  %v846_v46 = vpop.f32.mrf.mxu2  ;;  %v11220_v41 = vpop.f32.mrf.mxu3  ;;  %v9340_v62 = vld [vmem:[%s10683_s8 + $0x78] sm:$0xf] }
 0x10f   : > { %v11225_v58 = vadd.f32 %v11182_v49, %v846_v46  ;;  %v2011_v9 = vshrl.u32 %v9340_v62, 16  ;;  %v1999_v49 = vsel %vm10707_vm4, %v1994_v43, %v1998_v19  ;;  %v2014_v23 = vshll.u32 %v9340_v62, 16  ;;  %v9387_v62 = vld [vmem:[%s10683_s8 + $0x78] sm:$0xe] }
 0x110   : > { %9369 = vmatmul.msk.bf16.gmra.mxu0 %vm712_vm1, %v2219_v28  ;;  %v1187_v19 = vsel %vm10927_vm7, %v1185_v17, %v1186_v42  ;;  %v2197_v43 = vunpack.c.l.b16 %v2009_v14  ;;  %v9403_v8 = vrot.slane %v9387_v62, 9 }
 0x111   : > { %14524 = vst [vmem:[#allocation5_spill] sm:$0xff] %v11225_v58  ;;  %v2013_v53 = vrot.slane %v2011_v9, 4  ;;  %v2016_v24 = vrot.slane %v2014_v23, 5  ;;  %v1256_v42 = vunpack.c.l.b16 %v1187_v19 }
 0x112   : > { %v2530_v23 = vsel %vm10927_vm7, %v9403_v8, %v2529_v36  ;;  %v9344_v8 = vld [vmem:[%s10683_s8 + $0x88] sm:$0xf] }
 0x113   : > { %9191 = vmatmul.msk.bf16.gmra.mxu2 %vm712_vm1, %v1278_v48  ;;  %9305 = vmatmul.msk.bf16.gmra.mxu3 %vm712_vm1, %v10337_v20  ;;  %v11238_v54 = vpop.f32.mrf.mxu1  ;;  %v2196_v48 = vunpack.c.l.b16 %v1999_v49  ;;  %v2017_v9 = vor.u32 %v2016_v24, %v2013_v53  ;;  %v2027_v49 = vor.u32 %v2026_v10, %v2022_v56  ;;  %v10338_v53 = vld [vmem:[%s10683_s8 + $0x78] sm:$0xff] }
 0x115   : > { %v811_v28 = vpop.f32.mrf.mxu0  ;;  %v2220_v17 = vpack.c.b16 %v2197_v43, %v2196_v48  ;;  %v1279_v48 = vpack.c.b16 %v1256_v42, %v1255_v26  ;;  %v2596_v43 = vunpack.c.l.b16 %v2530_v23  ;;  %v2018_v24 = vrot.slane %v2017_v9, 4 }
 0x116   : > { %v11240_v25 = vadd.f32 %v1031_v29, %v811_v28  ;;  %v849_v33 = vpop.f32.mrf.mxu2  ;;  %v11244_v46 = vpop.f32.mrf.mxu3  ;;  %9419 = vmatmul.msk.bf16.gmra.mxu1 %vm712_vm1, %v2618_v22  ;;  %v9342_v29 = vld [vmem:[%s10683_s8 + $0x80] sm:$0x1]  ;;  %v2028_v62 = vrot.slane %v2027_v49, 4  ;;  %v2044_v26 = vshll.u32 %v9344_v8, 16  ;;  %v2048_v49 = vshrl.u32 %v9344_v8, 16 }
 0x117   : > { %v11249_v20 = vadd.f32 %v11204_v13, %v849_v33  ;;  %v2532_v15 = vrot.slane %v9342_v29, 5  ;;  %v2030_v61 = vshll.u32 %v9342_v29, 16  ;;  %v1190_v33 = vrot.slane %v10592_v45, 5  ;;  %v9343_v29 = vld [vmem:[%s10683_s8 + $0x84] sm:$0xf] }
 0x118   : > { %v2035_v63 = vshrl.u32 %v9343_v29, 16  ;;  %v2038_v45 = vshll.u32 %v9343_v29, 16 }
 0x119   : > { %14525 = vst [vmem:[#allocation6_spill] sm:$0xff] %v11249_v20  ;;  %v2533_v7 = vsel %vm10927_vm7, %v2531_v1, %v2532_v15  ;;  %v2032_v10 = vrot.slane %v2030_v61, 5  ;;  %v9176_v1 = vrot.slane %v1083_v60, 9  ;;  %v10593_v15 = vld [vmem:[%s10683_s8 + $0x74] sm:$0x1]  ;;  %v1192_v58 = vrot.slane %v1190_v33, 4 }
 0x11a   : > { %v2597_v36 = vunpack.c.l.b16 %v2533_v7  ;;  %v1193_v20 = vrot.slane %v10593_v15, 5  ;;  %v2050_v15 = vrot.slane %v2048_v49, 4 }
 0x11b   : > { %v11254_v22 = vpop.f32.mrf.mxu1  ;;  %v2033_v61 = vsel %vm10707_vm4, %v2028_v62, %v2032_v10  ;;  %v1191_v23 = vsel %vm10927_vm7, %v9176_v1, %v1190_v33  ;;  %v2046_v62 = vrot.slane %v2044_v26, 5  ;;  %v9388_v10 = vld [vmem:[%s10683_s8 + $0x84] sm:$0xe] }
 0x11c   : > { %v1194_v60 = vsel %vm10927_vm7, %v1192_v58, %v1193_v20  ;;  %v2199_v29 = vunpack.c.l.b16 %v2033_v61  ;;  %v9404_v33 = vrot.slane %v9388_v10, 9  ;;  %v1257_v20 = vunpack.c.l.b16 %v1191_v23  ;;  %v1084_v23 = vld [vmem:[%s10683_s8 + $0x78] sm:$0xe] }
 0x11d   : > { %v2288_v13 = vpop.f32.mrf.mxu0  ;;  %v2051_v26 = vor.u32 %v2050_v15, %v2046_v62  ;;  %v9347_v15 = vld [vmem:[%s10683_s8 + $0x94] sm:$0xf] }
 0x11e   : > { %v851_v28 = vpop.f32.mrf.mxu2  ;;  %v11260_v14 = vpop.f32.mrf.mxu3 }
 0x11f   : > { %v11265_v19 = vadd.f32 %v11220_v41, %v851_v28  ;;  %v2619_v41 = vpack.c.b16 %v2597_v36, %v2596_v43  ;;  %v2536_v43 = vrot.slane %v9344_v8, 5  ;;  %v1258_v8 = vunpack.c.l.b16 %v1194_v60  ;;  %v10594_v60 = vld [vmem:[%s10683_s8 + $0x7c] sm:$0xf] }
 0x120   : > { %9370 = vmatmul.msk.bf16.gmra.mxu0 %vm712_vm1, %v2220_v17  ;;  %v2023_v17 = vsel %vm10707_vm4, %v2018_v24, %v2022_v56  ;;  %v9345_v24 = vld [vmem:[%s10683_s8 + $0x8c] sm:$0x1] }
 0x121   : > { %14526 = vst [vmem:[#allocation7_spill] sm:$0xff] %v11265_v19  ;;  %v2198_v36 = vunpack.c.l.b16 %v2023_v17  ;;  %v2538_v1 = vrot.slane %v2536_v43, 4  ;;  %v2539_v19 = vrot.slane %v9345_v24, 5  ;;  %v2054_v17 = vshll.u32 %v9345_v24, 16  ;;  %v9346_v24 = vld [vmem:[%s10683_s8 + $0x90] sm:$0xf] }
 0x123   : > { %9192 = vmatmul.msk.bf16.gmra.mxu2 %vm712_vm1, %v1279_v48  ;;  %9306 = vmatmul.msk.bf16.gmra.mxu3 %vm712_vm1, %v10338_v53  ;;  %v11278_v9 = vpop.f32.mrf.mxu1  ;;  %v2037_v48 = vrot.slane %v2035_v63, 4  ;;  %v2040_v53 = vrot.slane %v2038_v45, 5  ;;  %v10392_v63 = vld [vmem:[%s14513_s3 + $0x78] sm:$0xff]  ;;  %v2221_v45 = vpack.c.b16 %v2199_v29, %v2198_v36  ;;  %v2540_v49 = vsel %vm10927_vm7, %v2538_v1, %v2539_v19 }
 0x124   : > { %5298 = vmatpush.bf16.msra.mxu1 %v10392_v63  ;;  %v1280_v36 = vpack.c.b16 %v1258_v8, %v1257_v20  ;;  %v2599_v19 = vunpack.c.l.b16 %v2540_v49  ;;  %v2056_v10 = vrot.slane %v2054_v17, 5  ;;  %v9177_v1 = vrot.slane %v1084_v23, 9  ;;  %v10595_v63 = vld [vmem:[%s10683_s8 + $0x80] sm:$0x1] }
 0x125   : > { %v2290_v42 = vpop.f32.mrf.mxu0  ;;  %v2041_v58 = vor.u32 %v2040_v53, %v2037_v48  ;;  %v1197_v48 = vrot.slane %v10594_v60, 5  ;;  %v2072_v49 = vshrl.u32 %v9347_v15, 16 }
 0x126   : > { %v1347_v7 = vpop.f32.mrf.mxu2  ;;  %v11282_v28 = vpop.f32.mrf.mxu3  ;;  %9420 = vmatmul.msk.bf16.gmra.mxu1 %vm712_vm1, %v2619_v41 }
 0x127   : > { %v1427_v56 = vadd.f32 %v1347_v7, %v10959_v31  ;;  %v2042_v53 = vrot.slane %v2041_v58, 4 }
 0x129   : > { %v1714_v11 = vadd.f32 %v11244_v46, %v1427_v56  ;;  %v2537_v46 = vsel %vm10927_vm7, %v9404_v33, %v2536_v43  ;;  %v10339_v43 = vld [vmem:[%s10683_s8 + $0x84] sm:$0xff]  ;;  %v2047_v58 = vsel %vm10707_vm4, %v2042_v53, %v2046_v62 }
 0x12a   : > { %v2598_v29 = vunpack.c.l.b16 %v2537_v46  ;;  %v2200_v53 = vunpack.c.l.b16 %v2047_v58 }
 0x12b   : > { %v2368_v31 = vadd.f32 %v2288_v13, %v1714_v11  ;;  %v11294_v61 = vpop.f32.mrf.mxu1 }
 0x12c   : > { %v2620_v8 = vpack.c.b16 %v2599_v19, %v2598_v29  ;;  %v9348_v19 = vld [vmem:[%s10683_s8 + $0x98] sm:$0x1] }
 0x12d   : > { %v2293_v41 = vpop.f32.mrf.mxu0  ;;  %v11301_v7 = vadd.f32 %v11238_v54, %v2368_v31  ;;  %v2052_v54 = vrot.slane %v2051_v26, 4  ;;  %v1200_v31 = vrot.slane %v10595_v63, 5  ;;  %v2068_v26 = vshll.u32 %v9347_v15, 16 }
 0x12e   : > { %v1349_v11 = vpop.f32.mrf.mxu2  ;;  %v11303_v13 = vpop.f32.mrf.mxu3 }
 0x12f   : > { %14527 = vst [vmem:[#allocation8_spill] sm:$0xff] %v11301_v7  ;;  %v1428_v56 = vadd.f32 %v1349_v11, %v10974_v52  ;;  %v1199_v7 = vrot.slane %v1197_v48, 4  ;;  %v2059_v52 = vshrl.u32 %v9346_v24, 16 }
 0x130   : > { %9371 = vmatmul.msk.bf16.gmra.mxu0 %vm712_vm1, %v2221_v45  ;;  %v2062_v45 = vshll.u32 %v9346_v24, 16  ;;  %v2070_v24 = vrot.slane %v2068_v26, 5 }
 0x131   : > { %v1715_v33 = vadd.f32 %v11260_v14, %v1428_v56  ;;  %v2057_v14 = vsel %vm10707_vm4, %v2052_v54, %v2056_v10  ;;  %v1201_v60 = vsel %vm10927_vm7, %v1199_v7, %v1200_v31  ;;  %v2061_v56 = vrot.slane %v2059_v52, 4  ;;  %v9389_v54 = vld [vmem:[%s10683_s8 + $0x90] sm:$0xe] }
 0x132   : > { %v2201_v29 = vunpack.c.l.b16 %v2057_v14  ;;  %v2074_v10 = vrot.slane %v2072_v49, 4 }
 0x133   : > { %9193 = vmatmul.msk.bf16.gmra.mxu2 %vm712_vm1, %v1280_v36  ;;  %v2369_v20 = vadd.f32 %v2290_v42, %v1715_v33  ;;  %9307 = vmatmul.msk.bf16.gmra.mxu3 %vm712_vm1, %v10339_v43  ;;  %v11320_v46 = vpop.f32.mrf.mxu1  ;;  %v1198_v42 = vsel %vm10927_vm7, %v9177_v1, %v1197_v48  ;;  %v2543_v36 = vrot.slane %v9347_v15, 5  ;;  %v9405_v48 = vrot.slane %v9389_v54, 9 }
 0x134   : > { %v2546_v1 = vrot.slane %v9348_v19, 5  ;;  %v1259_v7 = vunpack.c.l.b16 %v1198_v42  ;;  %v1260_v15 = vunpack.c.l.b16 %v1201_v60  ;;  %v2222_v58 = vpack.c.b16 %v2201_v29, %v2200_v53  ;;  %v1085_v42 = vld [vmem:[%s10683_s8 + $0x84] sm:$0xe] }
 0x135   : > { %v2295_v17 = vpop.f32.mrf.mxu0  ;;  %v11323_v62 = vadd.f32 %v11254_v22, %v2369_v20  ;;  %v2064_v22 = vrot.slane %v2062_v45, 5  ;;  %v2545_v33 = vrot.slane %v2543_v36, 4  ;;  %v2544_v26 = vsel %vm10927_vm7, %v9405_v48, %v2543_v36  ;;  %v10340_v36 = vld [vmem:[%s10683_s8 + $0x90] sm:$0xff] }
 0x136   : > { %v1352_v11 = vpop.f32.mrf.mxu2  ;;  %v11327_v23 = vpop.f32.mrf.mxu3  ;;  %9421 = vmatmul.msk.bf16.gmra.mxu1 %vm712_vm1, %v2620_v8  ;;  %v2075_v8 = vor.u32 %v2074_v10, %v2070_v24  ;;  %v9350_v10 = vld [vmem:[%s10683_s8 + $0xa0] sm:$0xf] }
 0x137   : > { %v1429_v43 = vadd.f32 %v1352_v11, %v10991_v39  ;;  %v2078_v39 = vshll.u32 %v9348_v19, 16  ;;  %v2065_v20 = vor.u32 %v2064_v22, %v2061_v56  ;;  %v2547_v14 = vsel %vm10927_vm7, %v2545_v33, %v2546_v1  ;;  %v10596_v11 = vld [vmem:[%s10683_s8 + $0x88] sm:$0xf]  ;;  %v9349_v19 = vld [vmem:[%s10683_s8 + $0x9c] sm:$0xf] }
 0x138   : > { %v1204_v60 = vrot.slane %v10596_v11, 5  ;;  %v1281_v56 = vpack.c.b16 %v1260_v15, %v1259_v7  ;;  %v2601_v29 = vunpack.c.l.b16 %v2547_v14  ;;  %v9178_v33 = vrot.slane %v1085_v42, 9  ;;  %v10597_v1 = vld [vmem:[%s10683_s8 + $0x8c] sm:$0x1] }
 0x139   : > { %v1716_v63 = vadd.f32 %v11282_v28, %v1429_v43  ;;  %v2600_v43 = vunpack.c.l.b16 %v2544_v26  ;;  %v2066_v22 = vrot.slane %v2065_v20, 4  ;;  %v2080_v54 = vrot.slane %v2078_v39, 5 }
 0x13a   : > { %v2083_v11 = vshrl.u32 %v9349_v19, 16  ;;  %v2092_v15 = vshll.u32 %v9350_v10, 16 }
 0x13b   : > { %v2370_v31 = vadd.f32 %v2293_v41, %v1716_v63  ;;  %v11336_v45 = vpop.f32.mrf.mxu1  ;;  %v1207_v63 = vrot.slane %v10597_v1, 5  ;;  %v2621_v7 = vpack.c.b16 %v2601_v29, %v2600_v43  ;;  %v2071_v39 = vsel %vm10707_vm4, %v2066_v22, %v2070_v24  ;;  %v9390_v22 = vld [vmem:[%s10683_s8 + $0x9c] sm:$0xe] }
 0x13c   : > { %v2085_v42 = vrot.slane %v2083_v11, 4  ;;  %v2202_v43 = vunpack.c.l.b16 %v2071_v39 }
 0x13d   : > { %v2298_v52 = vpop.f32.mrf.mxu0  ;;  %v11343_v28 = vadd.f32 %v11278_v9, %v2370_v31  ;;  %v2076_v9 = vrot.slane %v2075_v8, 4  ;;  %v1206_v31 = vrot.slane %v1204_v60, 4  ;;  %v2096_v8 = vshrl.u32 %v9350_v10, 16 }
 0x13e   : > { %v1354_v41 = vpop.f32.mrf.mxu2  ;;  %v11345_v49 = vpop.f32.mrf.mxu3 }
 0x13f   : > { %14528 = vst [vmem:[#allocation9_spill] sm:$0xff] %v11343_v28  ;;  %v1430_v53 = vadd.f32 %v1354_v41, %v11010_v40  ;;  %v2086_v28 = vshll.u32 %v9349_v19, 16  ;;  %v1208_v24 = vsel %vm10927_vm7, %v1206_v31, %v1207_v63  ;;  %v2094_v19 = vrot.slane %v2092_v15, 5 }
 0x140   : > { %9372 = vmatmul.msk.bf16.gmra.mxu0 %vm712_vm1, %v2222_v58  ;;  %v1262_v63 = vunpack.c.l.b16 %v1208_v24 }
 0x141   : > { %v1717_v48 = vadd.f32 %v11303_v13, %v1430_v53  ;;  %v2081_v13 = vsel %vm10707_vm4, %v2076_v9, %v2080_v54  ;;  %v2088_v53 = vrot.slane %v2086_v28, 5  ;;  %v2098_v9 = vrot.slane %v2096_v8, 4  ;;  %v10391_v28 = vld [vmem:[%s14513_s3 + $0x70] sm:$0xff] }
 0x142   : > { %v2203_v29 = vunpack.c.l.b16 %v2081_v13  ;;  %5299 = vmatpush.bf16.msra.mxu1 %v10391_v28 }
 0x143   : > { %9194 = vmatmul.msk.bf16.gmra.mxu2 %vm712_vm1, %v1281_v56  ;;  %v2371_v40 = vadd.f32 %v2295_v17, %v1717_v48  ;;  %9308 = vmatmul.msk.bf16.gmra.mxu3 %vm712_vm1, %v10340_v36  ;;  %v11364_v20 = vpop.f32.mrf.mxu1  ;;  %v1205_v17 = vsel %vm10927_vm7, %v9178_v33, %v1204_v60  ;;  %v2550_v56 = vrot.slane %v9350_v10, 5  ;;  %v9406_v60 = vrot.slane %v9390_v22, 9 }
 0x144   : > { %v2089_v10 = vor.u32 %v2088_v53, %v2085_v42  ;;  %v1261_v1 = vunpack.c.l.b16 %v1205_v17  ;;  %v2223_v31 = vpack.c.b16 %v2203_v29, %v2202_v43  ;;  %v1086_v17 = vld [vmem:[%s10683_s8 + $0x90] sm:$0xe] }
 0x145   : > { %v11358_v58 = vpop.f32.mrf.mxu0  ;;  %v11367_v26 = vadd.f32 %v11294_v61, %v2371_v40  ;;  %v9351_v61 = vld [vmem:[%s10683_s8 + $0xa4] sm:$0x1]  ;;  %v2552_v54 = vrot.slane %v2550_v56, 4  ;;  %v2099_v40 = vor.u32 %v2098_v9, %v2094_v19  ;;  %v9353_v9 = vld [vmem:[%s10683_s8 + $0xac] sm:$0xf] }
 0x146   : > { %v1357_v14 = vpop.f32.mrf.mxu2  ;;  %v11371_v41 = vpop.f32.mrf.mxu3  ;;  %9422 = vmatmul.msk.bf16.gmra.mxu1 %vm712_vm1, %v2621_v7  ;;  %v2553_v48 = vrot.slane %v9351_v61, 5  ;;  %v2102_v7 = vshll.u32 %v9351_v61, 16  ;;  %v2090_v42 = vrot.slane %v2089_v10, 4  ;;  %v9352_v61 = vld [vmem:[%s10683_s8 + $0xa8] sm:$0xf] }
 0x147   : > { %v1431_v36 = vadd.f32 %v1357_v14, %v11028_v51  ;;  %v10598_v14 = vld [vmem:[%s10683_s8 + $0x94] sm:$0xf] }
 0x148   : > { %v2554_v39 = vsel %vm10927_vm7, %v2552_v54, %v2553_v48  ;;  %v1211_v24 = vrot.slane %v10598_v14, 5  ;;  %v2104_v22 = vrot.slane %v2102_v7, 5  ;;  %v9179_v54 = vrot.slane %v1086_v17, 9  ;;  %v10599_v48 = vld [vmem:[%s10683_s8 + $0x98] sm:$0x1] }
 0x149   : > { %v1718_v33 = vadd.f32 %v11327_v23, %v1431_v36  ;;  %v2551_v23 = vsel %vm10927_vm7, %v9406_v60, %v2550_v56  ;;  %v1282_v36 = vpack.c.b16 %v1262_v63, %v1261_v1  ;;  %v10341_v56 = vld [vmem:[%s10683_s8 + $0x9c] sm:$0xff]  ;;  %v2603_v29 = vunpack.c.l.b16 %v2554_v39 }
 0x14a   : > { %v2602_v43 = vunpack.c.l.b16 %v2551_v23  ;;  %v1213_v28 = vrot.slane %v1211_v24, 4  ;;  %v2095_v10 = vsel %vm10707_vm4, %v2090_v42, %v2094_v19  ;;  %v2110_v63 = vshll.u32 %v9352_v61, 16 }
 0x14b   : > { %v2372_v51 = vadd.f32 %v2298_v52, %v1718_v33  ;;  %v11383_v15 = vpop.f32.mrf.mxu1  ;;  %v1214_v33 = vrot.slane %v10599_v48, 5  ;;  %v2120_v23 = vshrl.u32 %v9353_v9, 16  ;;  %v2204_v14 = vunpack.c.l.b16 %v2095_v10 }
 0x14c   : > { %v2622_v1 = vpack.c.b16 %v2603_v29, %v2602_v43  ;;  %v9354_v43 = vld [vmem:[%s10683_s8 + $0xb0] sm:$0x1] }
 0x14d   : > { %v2303_v11 = vpop.f32.mrf.mxu0  ;;  %v11390_v13 = vadd.f32 %v11320_v46, %v2372_v51  ;;  %v2100_v46 = vrot.slane %v2099_v40, 4  ;;  %v1215_v17 = vsel %vm10927_vm7, %v1213_v28, %v1214_v33  ;;  %v2126_v28 = vshll.u32 %v9354_v43, 16 }
 0x14e   : > { %v1359_v52 = vpop.f32.mrf.mxu2  ;;  %v11392_v8 = vpop.f32.mrf.mxu3 }
 0x14f   : > { %v1432_v53 = vadd.f32 %v1359_v52, %v11048_v35  ;;  %v2107_v35 = vshrl.u32 %v9352_v61, 16  ;;  %v9391_v61 = vld [vmem:[%s10683_s8 + $0xa8] sm:$0xe] }
 0x150   : > { %9373 = vmatmul.msk.bf16.gmra.mxu0 %vm712_vm1, %v2223_v31  ;;  %v2116_v31 = vshll.u32 %v9353_v9, 16 }
 0x151   : > { %v1719_v60 = vadd.f32 %v11345_v49, %v1432_v53  ;;  %v2105_v49 = vsel %vm10707_vm4, %v2100_v46, %v2104_v22  ;;  %v2109_v42 = vrot.slane %v2107_v35, 4  ;;  %v2557_v53 = vrot.slane %v9353_v9, 5 }
 0x152   : > { %v11424_v29 = vrot.slane %v2116_v31, 5  ;;  %v9407_v46 = vrot.slane %v9391_v61, 9  ;;  %v1264_v9 = vunpack.c.l.b16 %v1215_v17  ;;  %v10342_v17 = vld [vmem:[%s10683_s8 + $0xa8] sm:$0xff]  ;;  %v2128_v61 = vrot.slane %v2126_v28, 5 }
 0x153   : > { %9195 = vmatmul.msk.bf16.gmra.mxu2 %vm712_vm1, %v1282_v36  ;;  %v2373_v51 = vadd.f32 %v11358_v58, %v1719_v60  ;;  %9309 = vmatmul.msk.bf16.gmra.mxu3 %vm712_vm1, %v10341_v56  ;;  %v11410_v7 = vpop.f32.mrf.mxu1  ;;  %v1212_v58 = vsel %vm10927_vm7, %v9179_v54, %v1211_v24  ;;  %v2205_v56 = vunpack.c.l.b16 %v2105_v49  ;;  %v2122_v24 = vrot.slane %v2120_v23, 4  ;;  %v9355_v23 = vld [vmem:[%s10683_s8 + $0xb4] sm:$0xf] }
 0x154   : > { %v2559_v22 = vrot.slane %v2557_v53, 4  ;;  %v2560_v60 = vrot.slane %v9354_v43, 5  ;;  %v1263_v48 = vunpack.c.l.b16 %v1212_v58 }
 0x155   : > { %v2305_v40 = vpop.f32.mrf.mxu0  ;;  %v11413_v19 = vadd.f32 %v11336_v45, %v2373_v51  ;;  %v2112_v45 = vrot.slane %v2110_v63, 5  ;;  %v2123_v51 = vor.u32 %v2122_v24, %v11424_v29  ;;  %v2558_v63 = vsel %vm10927_vm7, %v9407_v46, %v2557_v53  ;;  %v1087_v53 = vld [vmem:[%s10683_s8 + $0x9c] sm:$0xe] }
 0x156   : > { %v1362_v39 = vpop.f32.mrf.mxu2  ;;  %v11417_v52 = vpop.f32.mrf.mxu3  ;;  %9423 = vmatmul.msk.bf16.gmra.mxu1 %vm712_vm1, %v2622_v1  ;;  %v2131_v46 = vshrl.u32 %v9355_v23, 16 }
 0x157   : > { %v1433_v36 = vadd.f32 %v1362_v39, %v11066_v32  ;;  %v2224_v32 = vpack.c.b16 %v2205_v56, %v2204_v14  ;;  %v2113_v35 = vor.u32 %v2112_v45, %v2109_v42  ;;  %v1283_v39 = vpack.c.b16 %v1264_v9, %v1263_v48  ;;  %v10600_v56 = vld [vmem:[%s10683_s8 + $0xa0] sm:$0xf]  ;;  %v10601_v9 = vld [vmem:[%s10683_s8 + $0xa4] sm:$0x1] }
 0x158   : > { %v2604_v14 = vunpack.c.l.b16 %v2558_v63  ;;  %v1218_v43 = vrot.slane %v10600_v56, 5  ;;  %v9180_v48 = vrot.slane %v1087_v53, 9 }
 0x159   : > { %v1720_v54 = vadd.f32 %v11371_v41, %v1433_v36  ;;  %v2561_v41 = vsel %vm10927_vm7, %v2559_v22, %v2560_v60  ;;  %v9356_v36 = vld [vmem:[%s10683_s8 + $0xb8] sm:$0xf]  ;;  %v2114_v45 = vrot.slane %v2113_v35, 4  ;;  %v2134_v22 = vshll.u32 %v9355_v23, 16 }
 0x15a   : > { %v2605_v42 = vunpack.c.l.b16 %v2561_v41  ;;  %v2140_v60 = vshll.u32 %v9356_v36, 16  ;;  %v1220_v35 = vrot.slane %v1218_v43, 4  ;;  %v2133_v41 = vrot.slane %v2131_v46, 4 }
 0x15b   : > { %v2374_v33 = vadd.f32 %v2303_v11, %v1720_v54  ;;  %v11431_v1 = vpop.f32.mrf.mxu1 }
 0x15d   : > { %v11428_v10 = vpop.f32.mrf.mxu0  ;;  %v11438_v11 = vadd.f32 %v11364_v20, %v2374_v33  ;;  %v2124_v20 = vrot.slane %v2123_v51, 4  ;;  %v2623_v33 = vpack.c.b16 %v2605_v42, %v2604_v14  ;;  %v2564_v14 = vrot.slane %v9356_v36, 5 }
 0x15e   : > { %v1364_v31 = vpop.f32.mrf.mxu2  ;;  %v11440_v49 = vpop.f32.mrf.mxu3  ;;  %v1219_v42 = vsel %vm10927_vm7, %v9180_v48, %v1218_v43  ;;  %v10390_v43 = vld [vmem:[%s14513_s3 + $0x68] sm:$0xff] }
 0x15f   : > { %v1434_v58 = vadd.f32 %v1364_v31, %v11086_v38  ;;  %v2144_v38 = vshrl.u32 %v9356_v36, 16  ;;  %v2129_v28 = vsel %vm10707_vm4, %v2124_v20, %v2128_v61  ;;  %v2136_v31 = vrot.slane %v2134_v22, 5  ;;  %5300 = vmatpush.bf16.msra.mxu1 %v10390_v43 }
 0x160   : > { %9374 = vmatmul.msk.bf16.gmra.mxu0 %vm712_vm1, %v2224_v32  ;;  %v1221_v32 = vrot.slane %v10601_v9, 5  ;;  %v2207_v56 = vunpack.c.l.b16 %v2129_v28  ;;  %v10602_v28 = vld [vmem:[%s10683_s8 + $0xac] sm:$0xf] }
 0x161   : > { %v1721_v24 = vadd.f32 %v11392_v8, %v1434_v58  ;;  %v2119_v8 = vsel %vm10707_vm4, %v2114_v45, %v11424_v29  ;;  %v9392_v45 = vld [vmem:[%s10683_s8 + $0xb4] sm:$0xe] }
 0x162   : > { %v2206_v53 = vunpack.c.l.b16 %v2119_v8  ;;  %v1222_v20 = vsel %vm10927_vm7, %v1220_v35, %v1221_v32  ;;  %v9408_v61 = vrot.slane %v9392_v45, 9 }
 0x163   : > { %9196 = vmatmul.msk.bf16.gmra.mxu2 %vm712_vm1, %v1283_v39  ;;  %v2375_v54 = vadd.f32 %v2305_v40, %v1721_v24  ;;  %9310 = vmatmul.msk.bf16.gmra.mxu3 %vm712_vm1, %v10342_v17  ;;  %v11460_v51 = vpop.f32.mrf.mxu1  ;;  %v11467_v39 = vrot.slane %v2140_v60, 5  ;;  %v2146_v17 = vrot.slane %v2144_v38, 4  ;;  %v2566_v24 = vrot.slane %v2564_v14, 4 }
 0x164   : > { %v1266_v48 = vunpack.c.l.b16 %v1222_v20  ;;  %v9359_v20 = vld [vmem:[%s10683_s8 + $0xc4] sm:$0xf] }
 0x165   : > { %v11453_v63 = vpop.f32.mrf.mxu0  ;;  %v11463_v40 = vadd.f32 %v11383_v15, %v2375_v54  ;;  %v9357_v15 = vld [vmem:[%s10683_s8 + $0xbc] sm:$0x1]  ;;  %v2147_v22 = vor.u32 %v2146_v17, %v11467_v39  ;;  %v1265_v54 = vunpack.c.l.b16 %v1219_v42 }
 0x166   : > { %v1367_v23 = vpop.f32.mrf.mxu2  ;;  %v11465_v58 = vpop.f32.mrf.mxu3  ;;  %9424 = vmatmul.msk.bf16.gmra.mxu1 %vm712_vm1, %v2623_v33  ;;  %v2567_v46 = vrot.slane %v9357_v15, 5  ;;  %v2150_v60 = vshll.u32 %v9357_v15, 16  ;;  %v2225_v33 = vpack.c.b16 %v2207_v56, %v2206_v53  ;;  %v9358_v53 = vld [vmem:[%s10683_s8 + $0xc0] sm:$0xf]  ;;  %v10343_v15 = vld [vmem:[%s10683_s8 + $0xb4] sm:$0xff] }
 0x167   : > { %14529 = vst [vmem:[#allocation10_spill] sm:$0xff] %v11463_v40  ;;  %v1435_v29 = vadd.f32 %v1367_v23, %v11104_v16  ;;  %v2137_v16 = vor.u32 %v2136_v31, %v2133_v41  ;;  %v1225_v41 = vrot.slane %v10602_v28, 5  ;;  %v1284_v56 = vpack.c.b16 %v1266_v48, %v1265_v54 }
 0x168   : > { %v2568_v35 = vsel %vm10927_vm7, %v2566_v24, %v2567_v46  ;;  %v2152_v42 = vrot.slane %v2150_v60, 5  ;;  %v2158_v60 = vshll.u32 %v9358_v53, 16  ;;  %v2168_v54 = vshrl.u32 %v9359_v20, 16 }
 0x169   : > { %v1722_v36 = vadd.f32 %v11417_v52, %v1435_v29  ;;  %v2565_v52 = vsel %vm10927_vm7, %v9408_v61, %v2564_v14  ;;  %v2138_v31 = vrot.slane %v2137_v16, 4  ;;  %v2148_v29 = vrot.slane %v2147_v22, 4  ;;  %v10603_v61 = vld [vmem:[%s10683_s8 + $0xb0] sm:$0x1] }
 0x16a   : > { %v2607_v45 = vunpack.c.l.b16 %v2568_v35  ;;  %v1228_v24 = vrot.slane %v10603_v61, 5  ;;  %v1227_v16 = vrot.slane %v1225_v41, 4  ;;  %v9540_v35 = vld [vmem:[%s10683_s8 + $0x18] sm:$0xf] }
 0x16b   : > { %v2376_v38 = vadd.f32 %v11428_v10, %v1722_v36  ;;  %v11485_v32 = vpop.f32.mrf.mxu1  ;;  %v1088_v10 = vld [vmem:[%s10683_s8 + $0xa8] sm:$0xe]  ;;  %v2143_v43 = vsel %vm10707_vm4, %v2138_v31, %v11467_v39  ;;  %v2153_v22 = vsel %vm10707_vm4, %v2148_v29, %v2152_v42  ;;  %v3137_v61 = vshll.u32 %v9540_v35, 16 }
 0x16c   : > { %14530 = vst [vmem:[#allocation11_spill] sm:$0xff] %v11485_v32  ;;  %v9181_v46 = vrot.slane %v1088_v10, 9  ;;  %v11523_v10 = vld [vmem:[%s10683_s8 + $0x1c] sm:$0xf]  ;;  %v1229_v28 = vsel %vm10927_vm7, %v1227_v16, %v1228_v24  ;;  %v2208_v31 = vunpack.c.l.b16 %v2143_v43 }
 0x16d   : > { %v11483_v9 = vpop.f32.mrf.mxu0  ;;  %v11492_v8 = vadd.f32 %v11410_v7, %v2376_v38  ;;  %v2606_v7 = vunpack.c.l.b16 %v2565_v52  ;;  %v2164_v38 = vshll.u32 %v9359_v20, 16  ;;  %v3143_v24 = vshll.u32 %v11523_v10, 16 }
 0x16e   : > { %v1369_v23 = vpop.f32.mrf.mxu2  ;;  %v11496_v17 = vpop.f32.mrf.mxu3  ;;  %v1226_v39 = vsel %vm10927_vm7, %v9181_v46, %v1225_v41  ;;  %v2170_v41 = vrot.slane %v2168_v54, 4  ;;  %v9393_v46 = vld [vmem:[%s10683_s8 + $0xc0] sm:$0xe] }
 0x16f   : > { %14531 = vst [vmem:[#allocation12_spill] sm:$0xff] %v11492_v8  ;;  %v1436_v14 = vadd.f32 %v1369_v23, %v11124_v59  ;;  %v2155_v59 = vshrl.u32 %v9358_v53, 16  ;;  %v9360_v53 = vld [vmem:[%s10683_s8 + $0xc8] sm:$0x1]  ;;  %v9409_v16 = vrot.slane %v9393_v46, 9  ;;  %v3139_v8 = vrot.slane %v3137_v61, 5 }
 0x170   : > { %9375 = vmatmul.msk.bf16.gmra.mxu0 %vm712_vm1, %v2225_v33  ;;  %v2174_v54 = vshll.u32 %v9360_v53, 16  ;;  %v3145_v40 = vrot.slane %v3143_v24, 5  ;;  %v10344_v24 = vld [vmem:[%s10683_s8 + $0xc0] sm:$0xff] }
 0x171   : > { %v1723_v36 = vadd.f32 %v11440_v49, %v1436_v14  ;;  %v2624_v49 = vpack.c.b16 %v2607_v45, %v2606_v7  ;;  %v2157_v23 = vrot.slane %v2155_v59, 4  ;;  %v2160_v14 = vrot.slane %v2158_v60, 5 }
 0x172   : > { %v3134_v45 = vshrl.u32 %v9540_v35, 16  ;;  %v2574_v59 = vrot.slane %v9360_v53, 5  ;;  %v1267_v60 = vunpack.c.l.b16 %v1226_v39  ;;  %v2176_v61 = vrot.slane %v2174_v54, 5 }
 0x173   : > { %9197 = vmatmul.msk.bf16.gmra.mxu2 %vm712_vm1, %v1284_v56  ;;  %v11512_v48 = vadd.f32 %v11453_v63, %v1723_v36  ;;  %9311 = vmatmul.msk.bf16.gmra.mxu3 %vm712_vm1, %v10343_v15  ;;  %v11519_v52 = vpop.f32.mrf.mxu1  ;;  %v2209_v63 = vunpack.c.l.b16 %v2153_v22  ;;  %v11530_v56 = vrot.slane %v2164_v38, 5  ;;  %v2571_v15 = vrot.slane %v9359_v20, 5 }
 0x174   : > { %v3147_v36 = vshrl.u32 %v11523_v10, 16  ;;  %v1268_v38 = vunpack.c.l.b16 %v1229_v28  ;;  %v2161_v20 = vor.u32 %v2160_v14, %v2157_v23  ;;  %v10604_v14 = vld [vmem:[%s10683_s8 + $0xb8] sm:$0xf] }
 0x175   : > { %v11515_v33 = vpop.f32.mrf.mxu0  ;;  %v2573_v43 = vrot.slane %v2571_v15, 4  ;;  %v2226_v35 = vpack.c.b16 %v2209_v63, %v2208_v31  ;;  %v2572_v39 = vsel %vm10927_vm7, %v9409_v16, %v2571_v15  ;;  %v11552_v31 = vld [vmem:[%s10683_s8 + $0x20] sm:$0x1] }
 0x176   : > { %v1372_v29 = vpop.f32.mrf.mxu2  ;;  %v11527_v42 = vpop.f32.mrf.mxu3  ;;  %9425 = vmatmul.msk.bf16.gmra.mxu1 %vm712_vm1, %v2624_v49  ;;  %v2608_v16 = vunpack.c.l.b16 %v2572_v39 }
 0x177   : > { %v1437_v7 = vadd.f32 %v1372_v29, %v11142_v0  ;;  %v2171_v0 = vor.u32 %v2170_v41, %v11530_v56  ;;  %v3136_v29 = vrot.slane %v3134_v45, 4  ;;  %v2575_v28 = vsel %vm10927_vm7, %v2573_v43, %v2574_v59 }
 0x178   : > { %v1232_v41 = vrot.slane %v10604_v14, 5  ;;  %v2609_v43 = vunpack.c.l.b16 %v2575_v28  ;;  %v11578_v14 = vld [vmem:[%s10683_s8 + $0x28] sm:$0xf] }
 0x179   : > { %v1724_v22 = vadd.f32 %v11465_v58, %v1437_v7  ;;  %v3149_v58 = vrot.slane %v3147_v36, 4  ;;  %v2162_v7 = vrot.slane %v2161_v20, 4  ;;  %v2172_v45 = vrot.slane %v2171_v0, 4  ;;  %v1089_v36 = vld [vmem:[%s10683_s8 + $0xb4] sm:$0xe] }
 0x17a   : > { %v9182_v0 = vrot.slane %v1089_v36, 9  ;;  %v1234_v54 = vrot.slane %v1232_v41, 4 }
 0x17b   : > { %v2378_v49 = vadd.f32 %v11483_v9, %v1724_v22  ;;  %v11542_v46 = vpop.f32.mrf.mxu1  ;;  %v1285_v9 = vpack.c.b16 %v1268_v38, %v1267_v60  ;;  %v3150_v59 = vor.u32 %v3149_v58, %v3145_v40  ;;  %v3153_v22 = vshll.u32 %v11552_v31, 16  ;;  %v10605_v60 = vld [vmem:[%s10683_s8 + $0xbc] sm:$0x1]  ;;  %v9543_v58 = vld [vmem:[%s10683_s8 + $0x24] sm:$0xf] }
 0x17c   : > { %v1235_v38 = vrot.slane %v10605_v60, 5 }
 0x17d   : > { %v11540_v32 = vpop.f32.mrf.mxu0  ;;  %v11549_v23 = vadd.f32 %v11460_v51, %v2378_v49  ;;  %v3140_v51 = vor.u32 %v3139_v8, %v3136_v29  ;;  %v2177_v8 = vsel %vm10707_vm4, %v2172_v45, %v2176_v61  ;;  %v2625_v29 = vpack.c.b16 %v2609_v43, %v2608_v16 }
 0x17e   : > { %v1374_v63 = vpop.f32.mrf.mxu2  ;;  %v11554_v53 = vpop.f32.mrf.mxu3  ;;  %v3151_v39 = vrot.slane %v3150_v59, 4  ;;  %v3155_v28 = vrot.slane %v3153_v22, 5  ;;  %v3167_v16 = vshll.u32 %v11578_v14, 16  ;;  %v3171_v43 = vshrl.u32 %v11578_v14, 16 }
 0x17f   : > { %v1438_v15 = vadd.f32 %v1374_v63, %v11162_v21  ;;  %v2167_v21 = vsel %vm10707_vm4, %v2162_v7, %v11530_v56  ;;  %v2211_v7 = vunpack.c.l.b16 %v2177_v8 }
 0x180   : > { %9376 = vmatmul.msk.bf16.gmra.mxu0 %vm712_vm1, %v2226_v35  ;;  %v3141_v35 = vrot.slane %v3140_v51, 4  ;;  %v2210_v56 = vunpack.c.l.b16 %v2167_v21 }
 0x181   : > { %v1725_v20 = vadd.f32 %v11496_v17, %v1438_v15  ;;  %v3158_v15 = vshrl.u32 %v9543_v58, 16 }
 0x182   : > { %v3146_v51 = vsel %vm10707_vm4, %v3141_v35, %v3145_v40  ;;  %v9605_v35 = vld [vmem:[%s10683_s8 + $0x18] sm:$0xe] }
 0x183   : > { %9198 = vmatmul.msk.bf16.gmra.mxu2 %vm712_vm1, %v1285_v9  ;;  %v11571_v49 = vadd.f32 %v11515_v33, %v1725_v20  ;;  %9312 = vmatmul.msk.bf16.gmra.mxu3 %vm712_vm1, %v10344_v24  ;;  %v11575_v63 = vpop.f32.mrf.mxu1  ;;  %v1233_v33 = vsel %vm10927_vm7, %v9182_v0, %v1232_v41  ;;  %v1236_v9 = vsel %vm10927_vm7, %v1234_v54, %v1235_v38  ;;  %v3161_v24 = vshll.u32 %v9543_v58, 16 }
 0x184   : > { %v3156_v41 = vsel %vm10707_vm4, %v3151_v39, %v3155_v28  ;;  %v1269_v22 = vunpack.c.l.b16 %v1233_v33  ;;  %v1270_v60 = vunpack.c.l.b16 %v1236_v9  ;;  %v2227_v38 = vpack.c.b16 %v2211_v7, %v2210_v56  ;;  %v11604_v28 = vld [vmem:[%s10683_s8 + $0x2c] sm:$0x1] }
 0x185   : > { %v2320_v17 = vpop.f32.mrf.mxu0  ;;  %v3519_v40 = vunpack.c.l.b16 %v3146_v51  ;;  %v3805_v20 = vrot.slane %v11523_v10, 5  ;;  %v3160_v0 = vrot.slane %v3158_v15, 4  ;;  %v3163_v54 = vrot.slane %v3161_v24, 5 }
 0x186   : > { %v1377_v45 = vpop.f32.mrf.mxu2  ;;  %v11580_v61 = vpop.f32.mrf.mxu3  ;;  %9426 = vmatmul.msk.bf16.gmra.mxu1 %vm712_vm1, %v2625_v29  ;;  %v3520_v8 = vunpack.c.l.b16 %v3156_v41  ;;  %v3169_v29 = vrot.slane %v3167_v16, 5  ;;  %v1286_v7 = vpack.c.b16 %v1270_v60, %v1269_v22  ;;  %v9621_v33 = vrot.slane %v9605_v35, 9  ;;  %v9546_v60 = vld [vmem:[%s10683_s8 + $0x30] sm:$0xf] }
 0x187   : > { %v1439_v36 = vadd.f32 %v1377_v45, %v11180_v3  ;;  %v10389_v3 = vld [vmem:[%s14513_s3 + $0x60] sm:$0xff]  ;;  %v3807_v9 = vrot.slane %v3805_v20, 4  ;;  %v3164_v15 = vor.u32 %v3163_v54, %v3160_v0  ;;  %v3177_v16 = vshll.u32 %v11604_v28, 16 }
 0x188   : > { %5301 = vmatpush.bf16.msra.mxu1 %v10389_v3 }
 0x189   : > { %v1726_v59 = vadd.f32 %v11527_v42, %v1439_v36  ;;  %v3173_v42 = vrot.slane %v3171_v43, 4  ;;  %v3551_v36 = vpack.c.b16 %v3520_v8, %v3519_v40  ;;  %v3806_v43 = vsel %vm10927_vm7, %v9621_v33, %v3805_v20 }
 0x18a   : > { %v3165_v41 = vrot.slane %v3164_v15, 4  ;;  %v3179_v22 = vrot.slane %v3177_v16, 5  ;;  %v3917_v40 = vunpack.c.l.b16 %v3806_v43  ;;  %v3185_v8 = vshll.u32 %v9546_v60, 16 }
 0x18b   : > { %v2380_v21 = vadd.f32 %v11540_v32, %v1726_v59  ;;  %v11601_v39 = vpop.f32.mrf.mxu1  ;;  %v3808_v32 = vrot.slane %v11552_v31, 5  ;;  %v3174_v51 = vor.u32 %v3173_v42, %v3169_v29  ;;  %v3812_v15 = vrot.slane %v11578_v14, 5 }
 0x18d   : > { %v2323_v58 = vpop.f32.mrf.mxu0  ;;  %v11607_v56 = vadd.f32 %v11519_v52, %v2380_v21  ;;  %v3175_v59 = vrot.slane %v3174_v51, 4  ;;  %v3182_v21 = vshrl.u32 %v9546_v60, 16 }
 0x18e   : > { %v1379_v45 = vpop.f32.mrf.mxu2  ;;  %v1671_v10 = vpop.f32.mrf.mxu3 }
 0x18f   : > { %v1440_v24 = vadd.f32 %v1379_v45, %v11200_v55  ;;  %v3809_v55 = vsel %vm10927_vm7, %v3807_v9, %v3808_v32  ;;  %v3180_v42 = vsel %vm10707_vm4, %v3175_v59, %v3179_v22 }
 0x190   : > { %9377 = vmatmul.msk.bf16.gmra.mxu0 %vm712_vm1, %v2227_v38  ;;  %v3918_v54 = vunpack.c.l.b16 %v3809_v55  ;;  %v3522_v32 = vunpack.c.l.b16 %v3180_v42  ;;  %v11641_v55 = vld [vmem:[%s10683_s8 + $0x38] sm:$0x1] }
 0x191   : > { %v1727_v52 = vadd.f32 %v11554_v53, %v1440_v24  ;;  %v11626_v53 = vld [vmem:[%s10683_s8 + $0x34] sm:$0xf]  ;;  %v3184_v24 = vrot.slane %v3182_v21, 4 }
 0x192   : > { %v3195_v45 = vshrl.u32 %v11626_v53, 16  ;;  %v3949_v51 = vpack.c.b16 %v3918_v54, %v3917_v40  ;;  %v10345_v54 = vld [vmem:[%s10683_s8 + $0x18] sm:$0xff] }
 0x193   : > { %9199 = vmatmul.msk.bf16.gmra.mxu2 %vm712_vm1, %v1286_v7  ;;  %v11617_v31 = vadd.f32 %v2320_v17, %v1727_v52  ;;  %9589 = vmatmul.msk.bf16.vlgmr.msra.gmra.mxu3 %vm712_vm1, %v3551_v36  ;;  %v11623_v3 = vpop.f32.mrf.mxu1  ;;  %v3170_v17 = vsel %vm10707_vm4, %v3165_v41, %v3169_v29  ;;  %v3191_v7 = vshll.u32 %v11626_v53, 16  ;;  %v3187_v29 = vrot.slane %v3185_v8, 5 }
 0x194   : > { %v3521_v9 = vunpack.c.l.b16 %v3170_v17  ;;  %v3197_v52 = vrot.slane %v3195_v45, 4  ;;  %v3815_v17 = vrot.slane %v11604_v28, 5  ;;  %v9549_v28 = vld [vmem:[%s10683_s8 + $0x3c] sm:$0xf] }
 0x195   : > { %v2325_v38 = vpop.f32.mrf.mxu0  ;;  %v3193_v16 = vrot.slane %v3191_v7, 5 }
 0x196   : > { %v1382_v20 = vpop.f32.mrf.mxu2  ;;  %v1674_v0 = vpop.f32.mrf.mxu3  ;;  %v3552_v14 = vpack.c.b16 %v3522_v32, %v3521_v9 }
 0x197   : > { %v1441_v35 = vadd.f32 %v1382_v20, %v11218_v44  ;;  %v9606_v44 = vld [vmem:[%s10683_s8 + $0x24] sm:$0xe]  ;;  %v3814_v20 = vrot.slane %v3812_v15, 4  ;;  %v3198_v21 = vor.u32 %v3197_v52, %v3193_v16 }
 0x198   : > { %v9622_v60 = vrot.slane %v9606_v44, 9  ;;  %v3209_v44 = vshll.u32 %v9549_v28, 16 }
 0x199   : > { %v1728_v33 = vadd.f32 %v11580_v61, %v1441_v35  ;;  %v3199_v45 = vrot.slane %v3198_v21, 4 }
 0x19a   : > { %v3813_v35 = vsel %vm10927_vm7, %v9622_v60, %v3812_v15  ;;  %v3211_v21 = vrot.slane %v3209_v44, 5  ;;  %v3822_v44 = vrot.slane %v11641_v55, 5 }
 0x19b   : > { %v2382_v36 = vadd.f32 %v2323_v58, %v1728_v33  ;;  %v11638_v41 = vpop.f32.mrf.mxu1  ;;  %v3188_v58 = vor.u32 %v3187_v29, %v3184_v24  ;;  %v3919_v24 = vunpack.c.l.b16 %v3813_v35 }
 0x19d   : > { %v2328_v43 = vpop.f32.mrf.mxu0  ;;  %v11644_v59 = vadd.f32 %v11575_v63, %v2382_v36  ;;  %v3201_v63 = vshll.u32 %v11641_v55, 16  ;;  %v3189_v42 = vrot.slane %v3188_v58, 4 }
 0x19e   : > { %v1384_v61 = vpop.f32.mrf.mxu2  ;;  %v11646_v22 = vpop.f32.mrf.mxu3 }
 0x19f   : > { %v1442_v40 = vadd.f32 %v1384_v61, %v11240_v25  ;;  %v3816_v25 = vsel %vm10927_vm7, %v3814_v20, %v3815_v17  ;;  %v3203_v33 = vrot.slane %v3201_v63, 5 }
 0x1a0   : > { %9638 = vmatmul.msk.bf16.vlgmr.msra.gmra.mxu0 %vm712_vm1, %v3949_v51  ;;  %v3920_v36 = vunpack.c.l.b16 %v3816_v25  ;;  %v3206_v51 = vshrl.u32 %v9549_v28, 16 }
 0x1a1   : > { %v1729_v8 = vadd.f32 %v1671_v10, %v1442_v40  ;;  %v11665_v10 = vld [vmem:[%s10683_s8 + $0x40] sm:$0xf]  ;;  %v3204_v61 = vsel %vm10707_vm4, %v3199_v45, %v3203_v33  ;;  %v10388_v40 = vld [vmem:[%s14513_s3 + $0x58] sm:$0xff] }
 0x1a2   : > { %v3219_v60 = vshrl.u32 %v11665_v10, 16  ;;  %v3208_v17 = vrot.slane %v3206_v51, 4  ;;  %v3950_v63 = vpack.c.b16 %v3920_v36, %v3919_v24  ;;  %5302 = vmatpush.bf16.msra.mxu1 %v10388_v40  ;;  %v10346_v36 = vld [vmem:[%s10683_s8 + $0x24] sm:$0xff] }
 0x1a3   : > { %9524 = vmatmul.msk.bf16.vlgmr.msra.gmra.mxu2 %vm712_vm1, %v10345_v54  ;;  %v11656_v7 = vadd.f32 %v2325_v38, %v1729_v8  ;;  %9590 = vmatmul.msk.bf16.gmra.mxu3 %vm712_vm1, %v3552_v14  ;;  %v11662_v32 = vpop.f32.mrf.mxu1  ;;  %v3194_v38 = vsel %vm10707_vm4, %v3189_v42, %v3193_v16  ;;  %v3215_v14 = vshll.u32 %v11665_v10, 16  ;;  %v3524_v16 = vunpack.c.l.b16 %v3204_v61  ;;  %v9607_v8 = vld [vmem:[%s10683_s8 + $0x30] sm:$0xe]  ;;  %v9552_v40 = vld [vmem:[%s10683_s8 + $0x48] sm:$0xf] }
 0x1a4   : > { %v3523_v58 = vunpack.c.l.b16 %v3194_v38  ;;  %v3819_v54 = vrot.slane %v11626_v53, 5  ;;  %v3221_v42 = vrot.slane %v3219_v60, 4  ;;  %v9623_v38 = vrot.slane %v9607_v8, 9 }
 0x1a5   : > { %v2330_v9 = vpop.f32.mrf.mxu0  ;;  %v3217_v35 = vrot.slane %v3215_v14, 5  ;;  %v3230_v8 = vshrl.u32 %v9552_v40, 16 }
 0x1a6   : > { %v1387_v15 = vpop.f32.mrf.mxu2  ;;  %v1679_v29 = vpop.f32.mrf.mxu3  ;;  %v3553_v53 = vpack.c.b16 %v3524_v16, %v3523_v58  ;;  %v3821_v51 = vrot.slane %v3819_v54, 4  ;;  %v3820_v14 = vsel %vm10927_vm7, %v9623_v38, %v3819_v54 }
 0x1a7   : > { %v1443_v52 = vadd.f32 %v1387_v15, %v10982_v6 }
 0x1a9   : > { %v1730_v20 = vadd.f32 %v1674_v0, %v1443_v52  ;;  %v11682_v0 = vld [vmem:[%s10683_s8 + $0x44] sm:$0x1]  ;;  %v3222_v52 = vor.u32 %v3221_v42, %v3217_v35  ;;  %v3233_v42 = vshll.u32 %v9552_v40, 16  ;;  %v11717_v40 = vld [vmem:[%s10683_s8 + $0x50] sm:$0x1] }
 0x1aa   : > { %v3225_v61 = vshll.u32 %v11682_v0, 16 }
 0x1ab   : > { %v2384_v6 = vadd.f32 %v2328_v43, %v1730_v20  ;;  %v11679_v45 = vpop.f32.mrf.mxu1  ;;  %v3212_v43 = vor.u32 %v3211_v21, %v3208_v17  ;;  %v3223_v58 = vrot.slane %v3222_v52, 4  ;;  %v11703_v17 = vld [vmem:[%s10683_s8 + $0x4c] sm:$0xf]  ;;  %v3232_v52 = vrot.slane %v3230_v8, 4 }
 0x1ac   : > { %v3227_v55 = vrot.slane %v3225_v61, 5  ;;  %v3239_v38 = vshll.u32 %v11703_v17, 16  ;;  %v3235_v61 = vrot.slane %v3233_v42, 5 }
 0x1ad   : > { %v2333_v25 = vpop.f32.mrf.mxu0  ;;  %v11685_v33 = vadd.f32 %v11623_v3, %v2384_v6  ;;  %v3213_v60 = vrot.slane %v3212_v43, 4 }
 0x1ae   : > { %v1389_v28 = vpop.f32.mrf.mxu2  ;;  %v1681_v15 = vpop.f32.mrf.mxu3  ;;  %v3236_v8 = vor.u32 %v3235_v61, %v3232_v52  ;;  %v11741_v61 = vld [vmem:[%s10683_s8 + $0x58] sm:$0xf] }
 0x1af   : > { %v1444_v24 = vadd.f32 %v1389_v28, %v10997_v47  ;;  %v3823_v47 = vsel %vm10927_vm7, %v3821_v51, %v3822_v44  ;;  %v3243_v51 = vshrl.u32 %v11703_v17, 16  ;;  %v3826_v44 = vrot.slane %v11665_v10, 5 }
 0x1b0   : > { %9639 = vmatmul.msk.bf16.gmra.mxu0 %vm712_vm1, %v3950_v63  ;;  %v3922_v63 = vunpack.c.l.b16 %v3823_v47 }
 0x1b1   : > { %v1731_v3 = vadd.f32 %v11646_v22, %v1444_v24  ;;  %v3921_v22 = vunpack.c.l.b16 %v3820_v14  ;;  %v9608_v14 = vld [vmem:[%s10683_s8 + $0x3c] sm:$0xe]  ;;  %v3828_v10 = vrot.slane %v3826_v44, 4 }
 0x1b3   : > { %9525 = vmatmul.msk.bf16.gmra.mxu2 %vm712_vm1, %v10346_v36  ;;  %v11696_v20 = vadd.f32 %v2330_v9, %v1731_v3  ;;  %9591 = vmatmul.msk.bf16.gmra.mxu3 %vm712_vm1, %v3553_v53  ;;  %v11705_v21 = vpop.f32.mrf.mxu1  ;;  %v3218_v9 = vsel %vm10707_vm4, %v3213_v60, %v3217_v35  ;;  %v3228_v53 = vsel %vm10707_vm4, %v3223_v58, %v3227_v55  ;;  %v3245_v60 = vrot.slane %v3243_v51, 4 }
 0x1b4   : > { %v3525_v24 = vunpack.c.l.b16 %v3218_v9  ;;  %v3526_v36 = vunpack.c.l.b16 %v3228_v53  ;;  %v3951_v3 = vpack.c.b16 %v3922_v63, %v3921_v22  ;;  %v9624_v9 = vrot.slane %v9608_v14, 9 }
 0x1b5   : > { %v2335_v16 = vpop.f32.mrf.mxu0  ;;  %v3829_v22 = vrot.slane %v11682_v0, 5  ;;  %v3237_v51 = vrot.slane %v3236_v8, 4 }
 0x1b6   : > { %v1392_v54 = vpop.f32.mrf.mxu2  ;;  %v1684_v6 = vpop.f32.mrf.mxu3 }
 0x1b7   : > { %v1445_v28 = vadd.f32 %v1392_v54, %v11019_v18  ;;  %v3241_v18 = vrot.slane %v3239_v38, 5  ;;  %v3554_v54 = vpack.c.b16 %v3526_v36, %v3525_v24  ;;  %v3827_v38 = vsel %vm10927_vm7, %v9624_v9, %v3826_v44  ;;  %v9555_v36 = vld [vmem:[%s10683_s8 + $0x54] sm:$0xf] }
 0x1b8   : > { %v3263_v9 = vshll.u32 %v11741_v61, 16 }
 0x1b9   : > { %v1732_v43 = vadd.f32 %v1679_v29, %v1445_v28  ;;  %v3249_v28 = vshll.u32 %v11717_v40, 16  ;;  %v3242_v14 = vsel %vm10707_vm4, %v3237_v51, %v3241_v18  ;;  %v9609_v51 = vld [vmem:[%s10683_s8 + $0x48] sm:$0xe] }
 0x1bb   : > { %v2386_v35 = vadd.f32 %v2333_v25, %v1732_v43  ;;  %v10347_v25 = vld [vmem:[%s10683_s8 + $0x30] sm:$0xff]  ;;  %v11728_v63 = vpop.f32.mrf.mxu1  ;;  %v3830_v43 = vsel %vm10927_vm7, %v3828_v10, %v3829_v22  ;;  %v3251_v24 = vrot.slane %v3249_v28, 5  ;;  %v3267_v10 = vshrl.u32 %v11741_v61, 16 }
 0x1bc   : > { %14532 = vst [vmem:[#allocation13_spill] sm:$0xff] %v11728_v63  ;;  %v3924_v44 = vunpack.c.l.b16 %v3830_v43  ;;  %v3265_v43 = vrot.slane %v3263_v9, 5 }
 0x1bd   : > { %v2338_v47 = vpop.f32.mrf.mxu0  ;;  %v11720_v58 = vadd.f32 %v11662_v32, %v2386_v35  ;;  %v3246_v32 = vor.u32 %v3245_v60, %v3241_v18  ;;  %v3257_v60 = vshll.u32 %v9555_v36, 16  ;;  %v10387_v18 = vld [vmem:[%s14513_s3 + $0x50] sm:$0xff] }
 0x1be   : > { %v1394_v55 = vpop.f32.mrf.mxu2  ;;  %v11722_v29 = vpop.f32.mrf.mxu3  ;;  %5303 = vmatpush.bf16.msra.mxu1 %v10387_v18 }
 0x1bf   : > { %v1446_v42 = vadd.f32 %v1394_v55, %v11035_v57  ;;  %v3247_v0 = vrot.slane %v3246_v32, 4  ;;  %v3833_v32 = vrot.slane %v11703_v17, 5  ;;  %v3259_v28 = vrot.slane %v3257_v60, 5 }
 0x1c0   : > { %9640 = vmatmul.msk.bf16.gmra.mxu0 %vm712_vm1, %v3951_v3 }
 0x1c1   : > { %v1733_v53 = vadd.f32 %v1681_v15, %v1446_v42  ;;  %v3923_v15 = vunpack.c.l.b16 %v3827_v38  ;;  %v3527_v42 = vunpack.c.l.b16 %v3242_v14  ;;  %v3835_v17 = vrot.slane %v3833_v32, 4 }
 0x1c3   : > { %9526 = vmatmul.msk.bf16.gmra.mxu2 %vm712_vm1, %v10347_v25  ;;  %v11734_v57 = vadd.f32 %v2335_v16, %v1733_v53  ;;  %9592 = vmatmul.msk.bf16.gmra.mxu3 %vm712_vm1, %v3554_v54  ;;  %v3254_v16 = vshrl.u32 %v9555_v36, 16  ;;  %v3252_v54 = vsel %vm10707_vm4, %v3247_v0, %v3251_v24  ;;  %v11750_v25 = vpop.f32.mrf.mxu1  ;;  %v3952_v38 = vpack.c.b16 %v3924_v44, %v3923_v15  ;;  %v11758_v24 = vld [vmem:[%s10683_s8 + $0x5c] sm:$0x1] }
 0x1c4   : > { %v3528_v22 = vunpack.c.l.b16 %v3252_v54  ;;  %v3269_v0 = vrot.slane %v3267_v10, 4  ;;  %v9625_v54 = vrot.slane %v9609_v51, 9  ;;  %v10348_v15 = vld [vmem:[%s10683_s8 + $0x3c] sm:$0xff]  ;;  %v3836_v44 = vrot.slane %v11717_v40, 5 }
 0x1c5   : > { %v2340_v52 = vpop.f32.mrf.mxu0  ;;  %v3273_v9 = vshll.u32 %v11758_v24, 16 }
 0x1c6   : > { %v1397_v35 = vpop.f32.mrf.mxu2  ;;  %v1689_v3 = vpop.f32.mrf.mxu3  ;;  %v3270_v60 = vor.u32 %v3269_v0, %v3265_v43  ;;  %v3834_v10 = vsel %vm10927_vm7, %v9625_v54, %v3833_v32 }
 0x1c7   : > { %v1447_v55 = vadd.f32 %v1397_v35, %v11057_v30  ;;  %v3256_v30 = vrot.slane %v3254_v16, 4 }
 0x1c8   : > { %v3271_v40 = vrot.slane %v3270_v60, 4  ;;  %v3840_v60 = vrot.slane %v11741_v61, 5 }
 0x1c9   : > { %v1734_v8 = vadd.f32 %v1684_v6, %v1447_v55  ;;  %v3555_v55 = vpack.c.b16 %v3528_v22, %v3527_v42  ;;  %v3260_v16 = vor.u32 %v3259_v28, %v3256_v30  ;;  %v3275_v22 = vrot.slane %v3273_v9, 5  ;;  %v9558_v30 = vld [vmem:[%s10683_s8 + $0x60] sm:$0xf] }
 0x1ca   : > { %v3278_v0 = vshrl.u32 %v9558_v30, 16 }
 0x1cb   : > { %v2388_v53 = vadd.f32 %v2338_v47, %v1734_v8  ;;  %v3261_v8 = vrot.slane %v3260_v16, 4  ;;  %v11777_v18 = vpop.f32.mrf.mxu1  ;;  %v3276_v54 = vsel %vm10707_vm4, %v3271_v40, %v3275_v22 }
 0x1cc   : > { %14534 = vst [vmem:[#allocation15_spill] sm:$0xff] %v11777_v18  ;;  %v3280_v9 = vrot.slane %v3278_v0, 4  ;;  %v3842_v0 = vrot.slane %v3840_v60, 4 }
 0x1cd   : > { %v2343_v6 = vpop.f32.mrf.mxu0  ;;  %v11761_v36 = vadd.f32 %v11705_v21, %v2388_v53  ;;  %v3925_v53 = vunpack.c.l.b16 %v3834_v10 }
 0x1ce   : > { %v1399_v35 = vpop.f32.mrf.mxu2  ;;  %v1691_v14 = vpop.f32.mrf.mxu3 }
 0x1cf   : > { %v1448_v47 = vadd.f32 %v1399_v35, %v11073_v4  ;;  %v3837_v4 = vsel %vm10927_vm7, %v3835_v17, %v3836_v44  ;;  %v3281_v35 = vshll.u32 %v9558_v30, 16  ;;  %v3530_v44 = vunpack.c.l.b16 %v3276_v54 }
 0x1d0   : > { %9641 = vmatmul.msk.bf16.gmra.mxu0 %vm712_vm1, %v3952_v38  ;;  %v3926_v51 = vunpack.c.l.b16 %v3837_v4 }
 0x1d1   : > { %v1735_v21 = vadd.f32 %v11722_v29, %v1448_v47  ;;  %v11781_v29 = vld [vmem:[%s10683_s8 + $0x64] sm:$0xf] }
 0x1d2   : > { %v3287_v17 = vshll.u32 %v11781_v29, 16  ;;  %v3291_v16 = vshrl.u32 %v11781_v29, 16  ;;  %v3953_v10 = vpack.c.b16 %v3926_v51, %v3925_v53  ;;  %v10349_v53 = vld [vmem:[%s10683_s8 + $0x48] sm:$0xff]  ;;  %v3843_v51 = vrot.slane %v11758_v24, 5 }
 0x1d3   : > { %9527 = vmatmul.msk.bf16.gmra.mxu2 %vm712_vm1, %v10348_v15  ;;  %v11772_v42 = vadd.f32 %v2340_v52, %v1735_v21  ;;  %9593 = vmatmul.msk.bf16.gmra.mxu3 %vm712_vm1, %v3555_v55  ;;  %v3266_v52 = vsel %vm10707_vm4, %v3261_v8, %v3265_v43  ;;  %v3283_v21 = vrot.slane %v3281_v35, 5  ;;  %v9610_v8 = vld [vmem:[%s10683_s8 + $0x54] sm:$0xe]  ;;  %v2746_v22 = vpop.f32.mrf.mxu1  ;;  %v9561_v24 = vld [vmem:[%s10683_s8 + $0x6c] sm:$0xf] }
 0x1d4   : > { %v3529_v15 = vunpack.c.l.b16 %v3266_v52  ;;  %v3293_v4 = vrot.slane %v3291_v16, 4  ;;  %v9626_v61 = vrot.slane %v9610_v8, 9 }
 0x1d5   : > { %14533 = vst [vmem:[#allocation14_spill] sm:$0xff] %v11772_v42  ;;  %v2345_v28 = vpop.f32.mrf.mxu0  ;;  %v3284_v35 = vor.u32 %v3283_v21, %v3280_v9 }
 0x1d6   : > { %v1402_v32 = vpop.f32.mrf.mxu2  ;;  %v1694_v38 = vpop.f32.mrf.mxu3  ;;  %v3841_v16 = vsel %vm10927_vm7, %v9626_v61, %v3840_v60 }
 0x1d7   : > { %v1449_v55 = vadd.f32 %v1402_v32, %v11095_v12  ;;  %v3289_v12 = vrot.slane %v3287_v17, 5  ;;  %v11793_v32 = vld [vmem:[%s10683_s8 + $0x68] sm:$0x1] }
 0x1d9   : > { %v1736_v47 = vadd.f32 %v1689_v3, %v1449_v55  ;;  %v3556_v55 = vpack.c.b16 %v3530_v44, %v3529_v15  ;;  %v3294_v54 = vor.u32 %v3293_v4, %v3289_v12 }
 0x1db   : > { %v2390_v43 = vadd.f32 %v2343_v6, %v1736_v47  ;;  %v3285_v47 = vrot.slane %v3284_v35, 4  ;;  %v3295_v44 = vrot.slane %v3294_v54, 4  ;;  %v11820_v61 = vpop.f32.mrf.mxu1 }
 0x1dc   : > { %14537 = vst [vmem:[#allocation18_spill] sm:$0xff] %v11820_v61 }
 0x1dd   : > { %v2348_v30 = vpop.f32.mrf.mxu0  ;;  %v11796_v40 = vadd.f32 %v11750_v25, %v2390_v43  ;;  %v3297_v25 = vshll.u32 %v11793_v32, 16  ;;  %v11815_v43 = vld [vmem:[%s10683_s8 + $0x70] sm:$0xf]  ;;  %v3290_v4 = vsel %vm10707_vm4, %v3285_v47, %v3289_v12  ;;  %v10386_v12 = vld [vmem:[%s14513_s3 + $0x48] sm:$0xff] }
 0x1de   : > { %v1404_v3 = vpop.f32.mrf.mxu2  ;;  %v11798_v52 = vpop.f32.mrf.mxu3  ;;  %v3311_v35 = vshll.u32 %v11815_v43, 16  ;;  %5304 = vmatpush.bf16.msra.mxu1 %v10386_v12 }
 0x1df   : > { %14535 = vst [vmem:[#allocation16_spill] sm:$0xff] %v11796_v40  ;;  %v1450_v6 = vadd.f32 %v1404_v3, %v11111_v2  ;;  %v3844_v2 = vsel %vm10927_vm7, %v3842_v0, %v3843_v51  ;;  %v3299_v9 = vrot.slane %v3297_v25, 5  ;;  %v3305_v3 = vshll.u32 %v9561_v24, 16  ;;  %v10355_v40 = vld [vmem:[%s10683_s8 + $0x90] sm:$0xff] }
 0x1e0   : > { %9642 = vmatmul.msk.bf16.gmra.mxu0 %vm712_vm1, %v3953_v10  ;;  %v3928_v60 = vunpack.c.l.b16 %v3844_v2  ;;  %v3531_v51 = vunpack.c.l.b16 %v3290_v4  ;;  %v3847_v25 = vrot.slane %v11781_v29, 5  ;;  %v9611_v2 = vld [vmem:[%s10683_s8 + $0x60] sm:$0xe] }
 0x1e1   : > { %v1737_v17 = vadd.f32 %v1691_v14, %v1450_v6  ;;  %v3927_v14 = vunpack.c.l.b16 %v3841_v16  ;;  %v3300_v0 = vsel %vm10707_vm4, %v3295_v44, %v3299_v9  ;;  %v3315_v6 = vshrl.u32 %v11815_v43, 16 }
 0x1e2   : > { %v3532_v54 = vunpack.c.l.b16 %v3300_v0  ;;  %v3313_v44 = vrot.slane %v3311_v35, 5  ;;  %v9627_v0 = vrot.slane %v9611_v2, 9  ;;  %v3849_v18 = vrot.slane %v3847_v25, 4 }
 0x1e3   : > { %9528 = vmatmul.msk.bf16.gmra.mxu2 %vm712_vm1, %v10349_v53  ;;  %v11808_v15 = vadd.f32 %v2345_v28, %v1737_v17  ;;  %9594 = vmatmul.msk.bf16.gmra.mxu3 %vm712_vm1, %v3556_v55  ;;  %v3302_v28 = vshrl.u32 %v9561_v24, 16  ;;  %v3307_v17 = vrot.slane %v3305_v3, 5  ;;  %v3954_v47 = vpack.c.b16 %v3928_v60, %v3927_v14  ;;  %v2751_v35 = vpop.f32.mrf.mxu1 }
 0x1e4   : > { %v3317_v9 = vrot.slane %v3315_v6, 4  ;;  %v3557_v61 = vpack.c.b16 %v3532_v54, %v3531_v51  ;;  %v3850_v14 = vrot.slane %v11793_v32, 5  ;;  %v3848_v6 = vsel %vm10927_vm7, %v9627_v0, %v3847_v25  ;;  %v9564_v54 = vld [vmem:[%s10683_s8 + $0x78] sm:$0xf] }
 0x1e5   : > { %14536 = vst [vmem:[#allocation17_spill] sm:$0xff] %v11808_v15  ;;  %v2350_v21 = vpop.f32.mrf.mxu0 }
 0x1e6   : > { %v1407_v10 = vpop.f32.mrf.mxu2  ;;  %v1699_v8 = vpop.f32.mrf.mxu3  ;;  %v3318_v60 = vor.u32 %v3317_v9, %v3313_v44  ;;  %v3851_v51 = vsel %vm10927_vm7, %v3849_v18, %v3850_v14  ;;  %v3329_v9 = vshll.u32 %v9564_v54, 16  ;;  %v3854_v14 = vrot.slane %v11815_v43, 5 }
 0x1e7   : > { %v1451_v55 = vadd.f32 %v1407_v10, %v11133_v5  ;;  %v3304_v5 = vrot.slane %v3302_v28, 4  ;;  %v11832_v10 = vld [vmem:[%s10683_s8 + $0x74] sm:$0x1]  ;;  %v3930_v25 = vunpack.c.l.b16 %v3851_v51 }
 0x1e8   : > { %v3321_v3 = vshll.u32 %v11832_v10, 16  ;;  %v3319_v32 = vrot.slane %v3318_v60, 4 }
 0x1e9   : > { %v1738_v53 = vadd.f32 %v1694_v38, %v1451_v55  ;;  %v3308_v29 = vor.u32 %v3307_v17, %v3304_v5  ;;  %v11852_v17 = vld [vmem:[%s10683_s8 + $0x7c] sm:$0xf] }
 0x1ea   : > { %v3323_v12 = vrot.slane %v3321_v3, 5  ;;  %v3339_v0 = vshrl.u32 %v11852_v17, 16 }
 0x1eb   : > { %v2392_v16 = vadd.f32 %v2348_v30, %v1738_v53  ;;  %v10350_v30 = vld [vmem:[%s10683_s8 + $0x54] sm:$0xff]  ;;  %v3309_v53 = vrot.slane %v3308_v29, 4 }
 0x1ec   : > { %v3324_v18 = vsel %vm10707_vm4, %v3319_v32, %v3323_v12  ;;  %v3341_v51 = vrot.slane %v3339_v0, 4  ;;  %v11866_v12 = vld [vmem:[%s10683_s8 + $0x80] sm:$0x1] }
 0x1ed   : > { %v2353_v24 = vpop.f32.mrf.mxu0  ;;  %v11834_v38 = vadd.f32 %v2746_v22, %v2392_v16  ;;  %v3314_v2 = vsel %vm10707_vm4, %v3309_v53, %v3313_v44  ;;  %v3331_v44 = vrot.slane %v3329_v9, 5 }
 0x1ee   : > { %v1409_v4 = vpop.f32.mrf.mxu2  ;;  %v1701_v55 = vpop.f32.mrf.mxu3 }
 0x1ef   : > { %14538 = vst [vmem:[#allocation19_spill] sm:$0xff] %v11834_v38  ;;  %v1452_v28 = vadd.f32 %v1409_v4, %v11149_v50  ;;  %v3335_v4 = vshll.u32 %v11852_v17, 16 }
 0x1f0   : > { %9643 = vmatmul.msk.bf16.gmra.mxu0 %vm712_vm1, %v3954_v47 }
 0x1f1   : > { %v1739_v22 = vadd.f32 %v11798_v52, %v1452_v28  ;;  %v3929_v52 = vunpack.c.l.b16 %v3848_v6  ;;  %v3533_v28 = vunpack.c.l.b16 %v3314_v2  ;;  %v11862_v6 = vpop.f32.mrf.mxu1  ;;  %v3337_v53 = vrot.slane %v3335_v4, 5 }
 0x1f2   : > { %14540 = vst [vmem:[#allocation21_spill] sm:$0xff] %v11862_v6 }
 0x1f3   : > { %9529 = vmatmul.msk.bf16.gmra.mxu2 %vm712_vm1, %v10350_v30  ;;  %v11845_v50 = vadd.f32 %v2350_v21, %v1739_v22  ;;  %9595 = vmatmul.msk.bf16.gmra.mxu3 %vm712_vm1, %v3557_v61  ;;  %v3326_v21 = vshrl.u32 %v9564_v54, 16  ;;  %v3534_v30 = vunpack.c.l.b16 %v3324_v18  ;;  %v3955_v22 = vpack.c.b16 %v3930_v25, %v3929_v52  ;;  %v10351_v25 = vld [vmem:[%s10683_s8 + $0x60] sm:$0xff] }
 0x1f4   : > { %v3342_v18 = vor.u32 %v3341_v51, %v3337_v53 }
 0x1f5   : > { %14539 = vst [vmem:[#allocation20_spill] sm:$0xff] %v11845_v50  ;;  %v2355_v5 = vpop.f32.mrf.mxu0  ;;  %v3328_v60 = vrot.slane %v3326_v21, 4  ;;  %v3558_v2 = vpack.c.b16 %v3534_v30, %v3533_v28  ;;  %v3856_v21 = vrot.slane %v3854_v14, 4 }
 0x1f6   : > { %v1412_v16 = vpop.f32.mrf.mxu2  ;;  %v1704_v47 = vpop.f32.mrf.mxu3 }
 0x1f7   : > { %v1453_v61 = vadd.f32 %v1412_v16, %v11171_v34  ;;  %v9612_v34 = vld [vmem:[%s10683_s8 + $0x6c] sm:$0xe]  ;;  %v3332_v9 = vor.u32 %v3331_v44, %v3328_v60  ;;  %v3343_v60 = vrot.slane %v3342_v18, 4 }
 0x1f8   : > { %v9628_v43 = vrot.slane %v9612_v34, 9 }
 0x1f9   : > { %v1740_v29 = vadd.f32 %v1699_v8, %v1453_v61  ;;  %v3857_v61 = vrot.slane %v11832_v10, 5  ;;  %v9567_v10 = vld [vmem:[%s10683_s8 + $0x84] sm:$0xf] }
 0x1fa   : > { %v3855_v0 = vsel %vm10927_vm7, %v9628_v43, %v3854_v14  ;;  %v3350_v43 = vshrl.u32 %v9567_v10, 16 }
 0x1fb   : > { %v2394_v3 = vadd.f32 %v2353_v24, %v1740_v29  ;;  %v14542_v24 = vld [vmem:[#allocation3_spill] sm:$0xff]  ;;  %v3333_v29 = vrot.slane %v3332_v9, 4  ;;  %v3858_v30 = vsel %vm10927_vm7, %v3856_v21, %v3857_v61  ;;  %v3931_v34 = vunpack.c.l.b16 %v3855_v0  ;;  %v14544_v9 = vld [vmem:[#allocation4_spill] sm:$0xff] }
 0x1fc   : > { %v3352_v0 = vrot.slane %v3350_v43, 4 }
 0x1fd   : > { %v2358_v32 = vpop.f32.mrf.mxu0  ;;  %v11868_v54 = vadd.f32 %v2751_v35, %v2394_v3  ;;  %v3345_v35 = vshll.u32 %v11866_v12, 16 }
 0x1fe   : > { %v1414_v8 = vpop.f32.mrf.mxu2  ;;  %v11870_v16 = vpop.f32.mrf.mxu3 }
 0x1ff   : > { %14541 = vst [vmem:[#allocation22_spill] sm:$0xff] %v11868_v54  ;;  %v1454_v52 = vadd.f32 %v1414_v8, %v14542_v24  ;;  %v3347_v44 = vrot.slane %v3345_v35, 5  ;;  %v3932_v8 = vunpack.c.l.b16 %v3858_v30  ;;  %v10618_v35 = vmov 0  }
 0x200   : > { %9644 = vmatmul.msk.bf16.gmra.mxu0 %vm712_vm1, %v3955_v22  ;;  %v11887_v22 = vld [vmem:[%s10683_s8 + $0x88] sm:$0xf]  ;;  %4213 = vst [vmem:[#allocation2 + $0xc] sm:$0xf] %v10618_v35 }
 0x201   : > { %v1741_v4 = vadd.f32 %v1701_v55, %v1454_v52  ;;  %v2756_v55 = vpop.f32.mrf.mxu1  ;;  %v3348_v24 = vsel %vm10707_vm4, %v3343_v60, %v3347_v44  ;;  %v3359_v52 = vshll.u32 %v11887_v22, 16  ;;  %4205 = vst [vmem:[#allocation2] sm:$0xf] %v10618_v35  ;;  %v9613_v60 = vld [vmem:[%s10683_s8 + $0x78] sm:$0xe] }
 0x202   : > { %4206 = vst [vmem:[#allocation2 + $0x4] sm:$0xf] %v10618_v35 }
 0x203   : > { %9530 = vmatmul.msk.bf16.gmra.mxu2 %vm712_vm1, %v10351_v25  ;;  %v11880_v28 = vadd.f32 %v2355_v5, %v1741_v4  ;;  %9596 = vmatmul.msk.bf16.gmra.mxu3 %vm712_vm1, %v3558_v2  ;;  %v3338_v5 = vsel %vm10707_vm4, %v3333_v29, %v3337_v53  ;;  %v3353_v2 = vshll.u32 %v9567_v10, 16  ;;  %v3363_v25 = vshrl.u32 %v11887_v22, 16  ;;  %4207 = vst [vmem:[#allocation2 + $0x8] sm:$0xf] %v10618_v35 }
 0x204   : > { %v3535_v18 = vunpack.c.l.b16 %v3338_v5  ;;  %v3536_v4 = vunpack.c.l.b16 %v3348_v24  ;;  %v3861_v53 = vrot.slane %v11852_v17, 5  ;;  %v3956_v10 = vpack.c.b16 %v3932_v8, %v3931_v34  ;;  %v11905_v5 = vld [vmem:[%s10683_s8 + $0x8c] sm:$0x1]  ;;  %4209 = vst [vmem:[#allocation2 + $0xcc] sm:$0xf] %v10618_v35 }
 0x205   : > { %14543 = vst [vmem:[#allocation3_spill] sm:$0xff] %v11880_v28  ;;  %v2360_v3 = vpop.f32.mrf.mxu0  ;;  %v3355_v29 = vrot.slane %v3353_v2, 5  ;;  %v3361_v44 = vrot.slane %v3359_v52, 5  ;;  %v9629_v34 = vrot.slane %v9613_v60, 9  ;;  %v10352_v52 = vld [vmem:[%s10683_s8 + $0x6c] sm:$0xff] }
 0x206   : > { %v1417_v51 = vpop.f32.mrf.mxu2  ;;  %v11889_v14 = vpop.f32.mrf.mxu3  ;;  %v3863_v8 = vrot.slane %v3861_v53, 4  ;;  %4210 = vst [vmem:[#allocation2 + $0xd0] sm:$0xf] %v10618_v35 }
 0x207   : > { %v1455_v21 = vadd.f32 %v1417_v51, %v14544_v9  ;;  %v3356_v2 = vor.u32 %v3355_v29, %v3352_v0  ;;  %4211 = vst [vmem:[#allocation2 + $0xd4] sm:$0xf] %v10618_v35  ;;  %v9570_v0 = vld [vmem:[%s10683_s8 + $0x90] sm:$0xf] }
 0x208   : > { %4214 = vst [vmem:[#allocation2 + $0x18] sm:$0xf] %v10618_v35 }
 0x209   : > { %v1742_v61 = vadd.f32 %v1704_v47, %v1455_v21  ;;  %v3365_v47 = vrot.slane %v3363_v25, 4  ;;  %v14546_v21 = vld [vmem:[#allocation5_spill] sm:$0xff]  ;;  %4215 = vst [vmem:[#allocation2 + $0x24] sm:$0xf] %v10618_v35 }
 0x20a   : > { %4216 = vst [vmem:[#allocation2 + $0x30] sm:$0xf] %v10618_v35 }
 0x20b   : > { %v2396_v30 = vadd.f32 %v2358_v32, %v1742_v61  ;;  %v3559_v32 = vpack.c.b16 %v3536_v4, %v3535_v18  ;;  %v3366_v25 = vor.u32 %v3365_v47, %v3361_v44  ;;  %v3369_v61 = vshll.u32 %v11905_v5, 16  ;;  %4217 = vst [vmem:[#allocation2 + $0x3c] sm:$0xf] %v10618_v35 }
 0x20c   : > { %v3862_v4 = vsel %vm10927_vm7, %v9629_v34, %v3861_v53  ;;  %4218 = vst [vmem:[#allocation2 + $0x48] sm:$0xf] %v10618_v35  ;;  %v11939_v53 = vld [vmem:[%s10683_s8 + $0x94] sm:$0xf] }
 0x20d   : > { %v2363_v51 = vpop.f32.mrf.mxu0  ;;  %v11907_v9 = vadd.f32 %v2756_v55, %v2396_v30  ;;  %v3864_v55 = vrot.slane %v11866_v12, 5  ;;  %v11919_v30 = vpop.f32.mrf.mxu1  ;;  %v3357_v12 = vrot.slane %v3356_v2, 4  ;;  %v3371_v60 = vrot.slane %v3369_v61, 5  ;;  %4219 = vst [vmem:[#allocation2 + $0x54] sm:$0xf] %v10618_v35 }
 0x20e   : > { %v1419_v17 = vpop.f32.mrf.mxu2  ;;  %v11910_v43 = vpop.f32.mrf.mxu3  ;;  %14547 = vst [vmem:[#allocation5_spill] sm:$0xff] %v11919_v30  ;;  %v3387_v61 = vshrl.u32 %v11939_v53, 16 }
 0x20f   : > { %14545 = vst [vmem:[#allocation4_spill] sm:$0xff] %v11907_v9  ;;  %v1456_v24 = vadd.f32 %v1419_v17, %v14546_v21  ;;  %v3374_v17 = vshrl.u32 %v9570_v0, 16 }
 0x210   : > { %9645 = vmatmul.msk.bf16.gmra.mxu0 %vm712_vm1, %v3956_v10  ;;  %v3865_v10 = vsel %vm10927_vm7, %v3863_v8, %v3864_v55  ;;  %4220 = vst [vmem:[#allocation2 + $0x60] sm:$0xf] %v10618_v35  ;;  %v3362_v8 = vsel %vm10707_vm4, %v3357_v12, %v3361_v44 }
 0x211   : > { %v1743_v18 = vadd.f32 %v11870_v16, %v1456_v24  ;;  %v3367_v16 = vrot.slane %v3366_v25, 4  ;;  %v3934_v21 = vunpack.c.l.b16 %v3865_v10  ;;  %v14549_v24 = vld [vmem:[#allocation6_spill] sm:$0xff]  ;;  %v3383_v25 = vshll.u32 %v11939_v53, 16  ;;  %4221 = vst [vmem:[#allocation2 + $0x6c] sm:$0xf] %v10618_v35  ;;  %v10385_v10 = vld [vmem:[%s14513_s3 + $0x40] sm:$0xff] }
 0x212   : > { %4222 = vst [vmem:[#allocation2 + $0x78] sm:$0xf] %v10618_v35  ;;  %5305 = vmatpush.bf16.msra.mxu1 %v10385_v10 }
 0x213   : > { %9531 = vmatmul.msk.bf16.gmra.mxu2 %vm712_vm1, %v10352_v52  ;;  %v11929_v29 = vadd.f32 %v2360_v3, %v1743_v18  ;;  %9597 = vmatmul.msk.bf16.gmra.mxu3 %vm712_vm1, %v3559_v32  ;;  %v3377_v3 = vshll.u32 %v9570_v0, 16  ;;  %v3933_v32 = vunpack.c.l.b16 %v3862_v4  ;;  %v3372_v55 = vsel %vm10707_vm4, %v3367_v16, %v3371_v60  ;;  %4223 = vst [vmem:[#allocation2 + $0x84] sm:$0xf] %v10618_v35 }
 0x214   : > { %v3376_v4 = vrot.slane %v3374_v17, 4  ;;  %v3537_v16 = vunpack.c.l.b16 %v3362_v8  ;;  %v3538_v60 = vunpack.c.l.b16 %v3372_v55  ;;  %4224 = vst [vmem:[#allocation2 + $0x90] sm:$0xf] %v10618_v35  ;;  %v11961_v17 = vrot.slane %v3383_v25, 5  ;;  %v14551_v25 = vld [vmem:[#allocation7_spill] sm:$0xff] }
 0x215   : > { %14548 = vst [vmem:[#allocation23_spill] sm:$0xff] %v11929_v29  ;;  %v11935_v47 = vpop.f32.mrf.mxu0  ;;  %v3379_v0 = vrot.slane %v3377_v3, 5  ;;  %v2761_v44 = vpop.f32.mrf.mxu1  ;;  %v3957_v12 = vpack.c.b16 %v3934_v21, %v3933_v32  ;;  %v3389_v3 = vrot.slane %v3387_v61, 4  ;;  %v9614_v32 = vld [vmem:[%s10683_s8 + $0x84] sm:$0xe] }
 0x216   : > { %v1422_v34 = vpop.f32.mrf.mxu2  ;;  %v11942_v2 = vpop.f32.mrf.mxu3  ;;  %4225 = vst [vmem:[#allocation2 + $0x9c] sm:$0xf] %v10618_v35  ;;  %v11968_v21 = vld [vmem:[%s10683_s8 + $0x98] sm:$0x1]  ;;  %v3560_v55 = vpack.c.b16 %v3538_v60, %v3537_v16 }
 0x217   : > { %v1457_v52 = vadd.f32 %v1422_v34, %v14549_v24  ;;  %4226 = vst [vmem:[#allocation2 + $0xa8] sm:$0xf] %v10618_v35  ;;  %v3390_v10 = vor.u32 %v3389_v3, %v11961_v17 }
 0x218   : > { %4227 = vst [vmem:[#allocation2 + $0xb4] sm:$0xf] %v10618_v35 }
 0x219   : > { %v1744_v18 = vadd.f32 %v11889_v14, %v1457_v52  ;;  %v3868_v14 = vrot.slane %v11887_v22, 5  ;;  %4228 = vst [vmem:[#allocation2 + $0xc0] sm:$0xf] %v10618_v35 }
 0x21a   : > { %4231 = vst [vmem:[#allocation2 + $0x14] sm:$0xf] %v10618_v35 }
 0x21b   : > { %v2398_v34 = vadd.f32 %v2363_v51, %v1744_v18  ;;  %v3380_v51 = vor.u32 %v3379_v0, %v3376_v4  ;;  %v10353_v18 = vld [vmem:[%s10683_s8 + $0x78] sm:$0xff]  ;;  %v3870_v4 = vrot.slane %v3868_v14, 4  ;;  %v3871_v0 = vrot.slane %v11905_v5, 5  ;;  %4232 = vst [vmem:[#allocation2 + $0x20] sm:$0xf] %v10618_v35 }
 0x21c   : > { %4233 = vst [vmem:[#allocation2 + $0x2c] sm:$0xf] %v10618_v35 }
 0x21d   : > { %v11963_v24 = vpop.f32.mrf.mxu0  ;;  %v11970_v52 = vadd.f32 %v2761_v44, %v2398_v34  ;;  %v9630_v44 = vrot.slane %v9614_v32, 9  ;;  %v3393_v34 = vshll.u32 %v11968_v21, 16  ;;  %v3381_v60 = vrot.slane %v3380_v51, 4  ;;  %v11989_v32 = vld [vmem:[%s10683_s8 + $0xa0] sm:$0xf] }
 0x21e   : > { %v1424_v8 = vpop.f32.mrf.mxu2  ;;  %v11973_v22 = vpop.f32.mrf.mxu3  ;;  %4234 = vst [vmem:[#allocation2 + $0x38] sm:$0xf] %v10618_v35 }
 0x21f   : > { %14550 = vst [vmem:[#allocation6_spill] sm:$0xff] %v11970_v52  ;;  %v1458_v61 = vadd.f32 %v1424_v8, %v14551_v25  ;;  %v9573_v52 = vld [vmem:[%s10683_s8 + $0x9c] sm:$0xf]  ;;  %v4722_v8 = vld [vmem:[#allocation2 + $0x4] sm:$0xf]  ;;  %v3869_v5 = vsel %vm10927_vm7, %v9630_v44, %v3868_v14  ;;  %v3395_v51 = vrot.slane %v3393_v34, 5 }
 0x220   : > { %9646 = vmatmul.msk.bf16.gmra.mxu0 %vm712_vm1, %v3957_v12  ;;  %v3398_v12 = vshrl.u32 %v9573_v52, 16  ;;  %v3401_v3 = vshll.u32 %v9573_v52, 16  ;;  %4235 = vst [vmem:[#allocation2 + $0x44] sm:$0xf] %v10618_v35  ;;  %v3872_v52 = vsel %vm10927_vm7, %v3870_v4, %v3871_v0  ;;  %v4799_v14 = vshrl.u32 %v4722_v8, 16 }
 0x221   : > { %v1745_v16 = vadd.f32 %v11910_v43, %v1458_v61  ;;  %v3391_v43 = vrot.slane %v3390_v10, 4  ;;  %4236 = vst [vmem:[#allocation2 + $0x50] sm:$0xf] %v10618_v35  ;;  %v9615_v44 = vld [vmem:[%s10683_s8 + $0x90] sm:$0xe]  ;;  %v3407_v10 = vshll.u32 %v11989_v32, 16  ;;  %v3935_v30 = vunpack.c.l.b16 %v3869_v5 }
 0x222   : > { %4237 = vst [vmem:[#allocation2 + $0x5c] sm:$0xf] %v10618_v35  ;;  %v3875_v4 = vrot.slane %v11939_v53, 5  ;;  %v12015_v0 = vld [vmem:[%s10683_s8 + $0xa4] sm:$0x1]  ;;  %v4801_v28 = vrot.slane %v4799_v14, 4 }
 0x223   : > { %9532 = vmatmul.msk.bf16.gmra.mxu2 %vm712_vm1, %v10353_v18  ;;  %v11993_v25 = vadd.f32 %v11935_v47, %v1745_v16  ;;  %9598 = vmatmul.msk.bf16.gmra.mxu3 %vm712_vm1, %v3560_v55  ;;  %v4795_v18 = vshll.u32 %v4722_v8, 16  ;;  %v3400_v47 = vrot.slane %v3398_v12, 4  ;;  %v3403_v16 = vrot.slane %v3401_v3, 5  ;;  %v14553_v3 = vld [vmem:[#allocation8_spill] sm:$0xff]  ;;  %4238 = vst [vmem:[#allocation2 + $0x68] sm:$0xf] %v10618_v35 }
 0x224   : > { %v3386_v55 = vsel %vm10707_vm4, %v3381_v60, %v11961_v17  ;;  %v3411_v12 = vshrl.u32 %v11989_v32, 16  ;;  %v12022_v17 = vld [vmem:[%s14512_s2] ss:$0 sm:$0xff]  ;;  %v3936_v60 = vunpack.c.l.b16 %v3872_v52  ;;  %v3396_v8 = vsel %vm10707_vm4, %v3391_v43, %v3395_v51  ;;  %4239 = vst [vmem:[#allocation2 + $0x74] sm:$0xf] %v10618_v35  ;;  %v10384_v51 = vld [vmem:[%s14513_s3 + $0x38] sm:$0xff] }
 0x225   : > { %14552 = vst [vmem:[#allocation7_spill] sm:$0xff] %v11993_v25  ;;  %v12000_v61 = vpop.f32.mrf.mxu0  ;;  %v3404_v5 = vor.u32 %v3403_v16, %v3400_v47  ;;  %v12028_v53 = vunpack.c.l.b16 %v3386_v55  ;;  %v12030_v9 = vrot.slane %v4795_v18, 5  ;;  %v3409_v6 = vrot.slane %v3407_v10, 5  ;;  %v10400_v18 = vld [vmem:[%s14513_s3 + $0xb8] sm:$0xff]  ;;  %5531 = vmatpush.bf16.msrb.mxu2 %v10384_v51  ;;  %v10354_v51 = vld [vmem:[%s10683_s8 + $0x84] sm:$0xff] }
 0x226   : > { %v2973_v34 = vpop.f32.mrf.mxu2  ;;  %v12011_v25 = vpop.f32.mrf.mxu3  ;;  %4240 = vst [vmem:[#allocation2 + $0x80] sm:$0xf] %v10618_v35  ;;  %v9631_v54 = vrot.slane %v9615_v44, 9  ;;  %v3417_v52 = vshll.u32 %v12015_v0, 16  ;;  %v3540_v43 = vunpack.c.l.b16 %v3396_v8  ;;  %v3877_v47 = vrot.slane %v3875_v4, 4  ;;  %5909 = vmatpush.bf16.msrb.mxu3 %v10400_v18 }
 0x227   : > { %v3053_v29 = vadd.f32 %v2973_v34, %v14553_v3  ;;  %v3413_v34 = vrot.slane %v3411_v12, 4  ;;  %4241 = vst [vmem:[#allocation2 + $0x8c] sm:$0xf] %v10618_v35  ;;  %v3958_v55 = vpack.c.b16 %v3936_v60, %v3935_v30  ;;  %v3405_v14 = vrot.slane %v3404_v5, 4 }
 0x228   : > { %4242 = vst [vmem:[#allocation2 + $0x98] sm:$0xf] %v10618_v35  ;;  %v3419_v44 = vrot.slane %v3417_v52, 5  ;;  %v3561_v60 = vpack.c.b16 %v3540_v43, %v12028_v53  ;;  %v4802_v5 = vor.u32 %v4801_v28, %v12030_v9  ;;  %v3882_v18 = vrot.slane %v11989_v32, 5  ;;  %v10424_v32 = vld [vmem:[%s14513_s3 + $0xf8] sm:$0xff] }
 0x229   : > { %v3707_v3 = vadd.f32 %v11942_v2, %v3053_v29  ;;  %v3878_v29 = vrot.slane %v11968_v21, 5  ;;  %v3414_v2 = vor.u32 %v3413_v34, %v3409_v6  ;;  %4243 = vst [vmem:[#allocation2 + $0xa4] sm:$0xf] %v10618_v35  ;;  %6223 = vmatpush.bf16.msrb.mxu0 %v10424_v32 }
 0x22a   : > { %4244 = vst [vmem:[#allocation2 + $0xb0] sm:$0xf] %v10618_v35 }
 0x22b   : > { %v4105_v16 = vadd.f32 %v11963_v24, %v3707_v3  ;;  %v3415_v12 = vrot.slane %v3414_v2, 4  ;;  %v3876_v24 = vsel %vm10927_vm7, %v9631_v54, %v3875_v4  ;;  %4245 = vst [vmem:[#allocation2 + $0xbc] sm:$0xf] %v10618_v35  ;;  %v3879_v34 = vsel %vm10927_vm7, %v3877_v47, %v3878_v29  ;;  %v9576_v47 = vld [vmem:[%s10683_s8 + $0xa8] sm:$0xf] }
 0x22c   : > { %4246 = vst [vmem:[#allocation2 + $0xc8] sm:$0xf] %v10618_v35  ;;  %v3410_v54 = vsel %vm10707_vm4, %v3405_v14, %v3409_v6  ;;  %v3937_v28 = vunpack.c.l.b16 %v3876_v24  ;;  %v12073_v6 = vrot.slane %v4802_v5, 4  ;;  %v12091_v24 = vld [vmem:[%s10683_s8 + $0xac] sm:$0xf] }
 0x22d   : > { %v12046_v10 = vpop.f32.mrf.mxu0  ;;  %v4141_v8 = vadd.f32 %v12022_v17, %v4105_v16  ;;  %v3420_v4 = vsel %vm10707_vm4, %v3415_v12, %v3419_v44  ;;  %4212 = vst [vmem:[#allocation2] sm:$0xf] %v10618_v35  ;;  %v12075_v29 = vunpack.c.l.b16 %v3410_v54  ;;  %v9616_v16 = vld [vmem:[%s10683_s8 + $0x9c] sm:$0xe]  ;;  %v3884_v12 = vrot.slane %v3882_v18, 4 }
 0x22e   : > { %v2975_v30 = vpop.f32.mrf.mxu2  ;;  %v12053_v21 = vpop.f32.mrf.mxu3  ;;  %4229 = vst [vmem:[#allocation2 + $0xcc] sm:$0xf] %v10618_v35  ;;  %v12077_v2 = vunpack.c.l.b16 %v3420_v4  ;;  %v9632_v14 = vrot.slane %v9616_v16, 9 }
 0x22f   : > { %v4173_v3 = vmax.f32 %v4141_v8, 0.0  ;;  %v3054_v52 = vadd.f32 %v2975_v30, %v11323_v62  ;;  %v3938_v62 = vunpack.c.l.b16 %v3879_v34  ;;  %4230 = vst [vmem:[#allocation2 + $0x8] sm:$0xf] %v10618_v35  ;;  %v3885_v8 = vrot.slane %v12015_v0, 5 }
 0x230   : > { %9647 = vmatmul.msk.bf16.gmra.mxu0 %vm712_vm1, %v3958_v55  ;;  %4247 = vst [vmem:[#allocation2 + $0xd4] sm:$0xf] %v10618_v35  ;;  %v3422_v35 = vshrl.u32 %v9576_v47, 16  ;;  %v3425_v30 = vshll.u32 %v9576_v47, 16  ;;  %v12108_v4 = vsel %vm10927_vm7, %v9632_v14, %v3882_v18  ;;  %v14556_v47 = vld [vmem:[#allocation9_spill] sm:$0xff] }
 0x231   : > { %v4248_v53 = vpack.c.bf16 %v4173_v3, %v4173_v3  ;;  %v3708_v43 = vadd.f32 %v11973_v22, %v3054_v52  ;;  %v4607_v52 = vld [vmem:[#allocation2 + $0xc] sm:$0xf]  ;;  %v12115_v54 = vsel %vm10927_vm7, %v3884_v12, %v3885_v8  ;;  %v10432_v12 = vld [vmem:[%s14513_s3 + $0x138] sm:$0xff] }
 0x232   : > { %6905 = vmatpush.bf16.msrb.mxu1 %v10432_v12  ;;  %v10472_v3 = vld [vmem:[%s14513_s3 + $0x1f8] sm:$0xff] }
 0x233   : > { %v4284_v55 = vshrl.u32 %v4248_v53, 16  ;;  %v4106_v22 = vadd.f32 %v12000_v61, %v3708_v43  ;;  %9533 = vmatmul.msk.bf16.gmra.mxu2 %vm712_vm1, %v10354_v51  ;;  %9599 = vmatmul.msk.bf16.gmra.mxu3 %vm712_vm1, %v3561_v60  ;;  %v4287_v5 = vshll.u32 %v4248_v53, 16  ;;  %v3959_v60 = vpack.c.b16 %v3938_v62, %v3937_v28 }
 0x234   : > { %v3424_v53 = vrot.slane %v3422_v35, 4  ;;  %v3427_v28 = vrot.slane %v3425_v30, 5 }
 0x235   : > { %v12087_v44 = vpop.f32.mrf.mxu0  ;;  %v12093_v61 = vrot.slane %v4284_v55, 7  ;;  %v4142_v34 = vadd.f32 %v12022_v17, %v4106_v22  ;;  %v4721_v55 = vld [vmem:[#allocation2] sm:$0xf]  ;;  %v3431_v22 = vshll.u32 %v12091_v24, 16 }
 0x236   : > { %v2978_v51 = vpop.f32.mrf.mxu2  ;;  %v12102_v0 = vpop.f32.mrf.mxu3  ;;  %v4786_v32 = vshrl.u32 %v4721_v55, 16  ;;  %v4789_v50 = vshll.u32 %v4721_v55, 16  ;;  %v3428_v38 = vor.u32 %v3427_v28, %v3424_v53 }
 0x237   : > { %v4289_v43 = vor.u32 %v4287_v5, %v12093_v61  ;;  %v4174_v62 = vmax.f32 %v4142_v34, 0.0  ;;  %v3055_v16 = vadd.f32 %v2978_v51, %v14556_v47  ;;  %v4290_v18 = vrot.slane %v12093_v61, 4  ;;  %v4769_v5 = vld [vmem:[#allocation2 + $0x8] sm:$0x1]  ;;  %v12122_v34 = vld [vmem:[%s10683_s8 + $0xb0] sm:$0x1] }
 0x238   : > { %v4788_v51 = vrot.slane %v4786_v32, 4  ;;  %v4791_v47 = vrot.slane %v4789_v50, 5  ;;  %v4805_v55 = vshll.u32 %v4769_v5, 16  ;;  %v3433_v28 = vrot.slane %v3431_v22, 5  ;;  %v4613_v5 = vld [vmem:[#allocation2 + $0x14] sm:$0x1] }
 0x239   : > { %v4608_v14 = vsel %vm12098_vm13, %v4289_v43, %v4607_v52  ;;  %v4249_v35 = vpack.c.bf16 %v4174_v62, %v4174_v62  ;;  %v3709_v30 = vadd.f32 %v12011_v25, %v3055_v16  ;;  %v3429_v52 = vrot.slane %v3428_v38, 4 }
 0x23a   : > { %4609 = vst [vmem:[#allocation2 + $0xc] sm:$0xf] %v4608_v14  ;;  %v4792_v43 = vor.u32 %v4791_v47, %v4788_v51  ;;  %v4807_v25 = vrot.slane %v4805_v55, 5  ;;  %v3435_v16 = vshrl.u32 %v12091_v24, 16  ;;  %v3441_v50 = vshll.u32 %v12122_v34, 16 }
 0x23b   : > { %v4292_v61 = vshrl.u32 %v4249_v35, 16  ;;  %v4107_v53 = vadd.f32 %v12046_v10, %v3709_v30  ;;  %v4295_v10 = vshll.u32 %v4249_v35, 16  ;;  %v3940_v22 = vunpack.c.l.b16 %v12115_v54 }
 0x23c   : > { %v4793_v47 = vrot.slane %v4792_v43, 4  ;;  %v4808_v55 = vsel %vm10707_vm4, %v12073_v6, %v4807_v25  ;;  %v3434_v35 = vsel %vm10707_vm4, %v3429_v52, %v3433_v28  ;;  %v3443_v25 = vrot.slane %v3441_v50, 5 }
 0x23d   : > { %v12129_v62 = vpop.f32.mrf.mxu0  ;;  %v4294_v14 = vrot.slane %v4292_v61, 7  ;;  %v4143_v38 = vadd.f32 %v12022_v17, %v4107_v53  ;;  %v3437_v61 = vrot.slane %v3435_v16, 4  ;;  %v5187_v63 = vunpack.c.l.b16 %v4808_v55 }
 0x23e   : > { %v2980_v51 = vpop.f32.mrf.mxu2  ;;  %v12150_v12 = vpop.f32.mrf.mxu3  ;;  %v4798_v43 = vsel %vm10707_vm4, %v4793_v47, %v12030_v9  ;;  %v9617_v47 = vld [vmem:[%s10683_s8 + $0xa8] sm:$0xe]  ;;  %v3889_v55 = vrot.slane %v12091_v24, 5  ;;  %v3892_v24 = vrot.slane %v12122_v34, 5 }
 0x23f   : > { %v4297_v54 = vor.u32 %v4295_v10, %v4294_v14  ;;  %v4299_v53 = vrot.slane %v4294_v14, 4  ;;  %v4175_v8 = vmax.f32 %v4143_v38, 0.0  ;;  %v3056_v15 = vadd.f32 %v2980_v51, %v11367_v26 }
 0x240   : > { %9648 = vmatmul.msk.bf16.gmra.mxu0 %vm712_vm1, %v3959_v60  ;;  %v3438_v6 = vor.u32 %v3437_v61, %v3433_v28  ;;  %v5186_v60 = vunpack.c.l.b16 %v4798_v43  ;;  %v12165_v51 = vunpack.c.l.b16 %v3434_v35  ;;  %v9633_v61 = vrot.slane %v9617_v47, 9  ;;  %v10399_v47 = vld [vmem:[%s14513_s3 + $0xb0] sm:$0xff] }
 0x241   : > { %v4298_v42 = vsel %vm12135_vm14, %v4290_v18, %v4297_v54  ;;  %v4614_v52 = vsel %vm12143_vm15, %v4299_v53, %v4613_v5  ;;  %v4250_v16 = vpack.c.bf16 %v4175_v8, %v4175_v8  ;;  %v3710_v14 = vadd.f32 %v12053_v21, %v3056_v15  ;;  %v4723_v26 = vld [vmem:[#allocation2 + $0xc] sm:$0xf]  ;;  %5910 = vmatpush.bf16.msrb.mxu3 %v10399_v47 }
 0x242   : > { %4610 = vst [vmem:[#allocation2 + $0x10] sm:$0xf] %v4298_v42  ;;  %v4810_v10 = vshrl.u32 %v4723_v26, 16  ;;  %v4813_v38 = vshll.u32 %v4723_v26, 16  ;;  %v14561_v18 = vpack.c.b16 %v12077_v2, %v12075_v29  ;;  %v3439_v15 = vrot.slane %v3438_v6, 4 }
 0x243   : > { %4615 = vst [vmem:[#allocation2 + $0x14] sm:$0x1] %v4614_v52  ;;  %v4301_v9 = vshrl.u32 %v4250_v16, 16  ;;  %v4304_v28 = vshll.u32 %v4250_v16, 16  ;;  %v4108_v50 = vadd.f32 %v12087_v44, %v3710_v14  ;;  %9534 = vmatmul.msk.bf16.gmra.mxu2 %vm712_vm1, %v10355_v40  ;;  %v5218_v42 = vpack.c.b16 %v5187_v63, %v5186_v60  ;;  %v4616_v29 = vld [vmem:[#allocation2 + $0x18] sm:$0xf] }
 0x244   : > { %9600 = vmatmul.msk.bf16.gmra.mxu3 %vm712_vm1, %v14561_v18  ;;  %v4812_v8 = vrot.slane %v4810_v10, 4  ;;  %v4815_v5 = vrot.slane %v4813_v38, 5  ;;  %v3444_v40 = vsel %vm10707_vm4, %v3439_v15, %v3443_v25  ;;  %v3891_v43 = vrot.slane %v3889_v55, 4 }
 0x245   : > { %v12173_v21 = vpop.f32.mrf.mxu0  ;;  %v12177_v35 = vrot.slane %v4301_v9, 7  ;;  %v4144_v44 = vadd.f32 %v12022_v17, %v4108_v50  ;;  %5306 = vmatmul.bf16.vlgmr.msra.gmra.mxu1 %v5218_v42  ;;  %v12184_v53 = vunpack.c.l.b16 %v3444_v40  ;;  %v14562_v14 = vunpack.c.l.b16 %v12108_v4 }
 0x246   : > { %v2983_v2 = vpop.f32.mrf.mxu2  ;;  %v12182_v54 = vpop.f32.mrf.mxu3  ;;  %v4816_v63 = vor.u32 %v4815_v5, %v4812_v8  ;;  %v12194_v60 = vsel %vm10927_vm7, %v9633_v61, %v3889_v55  ;;  %v12210_v15 = vsel %vm10927_vm7, %v3891_v43, %v3892_v24  ;;  %v10383_v5 = vld [vmem:[%s14513_s3 + $0x30] sm:$0xff]  ;;  %v4620_v43 = vld [vmem:[#allocation2 + $0x20] sm:$0x1] }
 0x247   : > { %v4306_v6 = vor.u32 %v4304_v28, %v12177_v35  ;;  %v4176_v52 = vmax.f32 %v4144_v44, 0.0  ;;  %v3057_v16 = vadd.f32 %v2983_v2, %v11390_v13  ;;  %v4307_v25 = vrot.slane %v12177_v35, 4  ;;  %v9579_v13 = vld [vmem:[%s10683_s8 + $0xb4] sm:$0xf]  ;;  %5532 = vmatpush.bf16.msrb.mxu2 %v10383_v5 }
 0x248   : > { %v3960_v26 = vpack.c.b16 %v3940_v22, %v14562_v14  ;;  %v4817_v28 = vrot.slane %v4816_v63, 4  ;;  %v3563_v18 = vpack.c.b16 %v12184_v53, %v12165_v51  ;;  %v3941_v55 = vunpack.c.l.b16 %v12194_v60  ;;  %v12222_v51 = vld [vmem:[%s10683_s8 + $0xb8] sm:$0xf] }
 0x249   : > { %v4617_v10 = vsel %vm12098_vm13, %v4306_v6, %v4616_v29  ;;  %v4251_v38 = vpack.c.bf16 %v4176_v52, %v4176_v52  ;;  %v3711_v34 = vadd.f32 %v12102_v0, %v3057_v16  ;;  %v12199_v9 = vld [vmem:[#allocation2 + $0x10] sm:$0xf]  ;;  %v3449_v53 = vshll.u32 %v9579_v13, 16 }
 0x24a   : > { %4618 = vst [vmem:[#allocation2 + $0x18] sm:$0xf] %v4617_v10  ;;  %v12202_v50 = vld [vmem:[#allocation2 + $0x14] sm:$0x1]  ;;  %v4819_v4 = vshll.u32 %v12199_v9, 16  ;;  %v4823_v22 = vshrl.u32 %v12199_v9, 16 }
 0x24b   : > { %v4309_v0 = vshrl.u32 %v4251_v38, 16  ;;  %v4109_v42 = vadd.f32 %v12129_v62, %v3711_v34  ;;  %v4829_v8 = vshll.u32 %v12202_v50, 16  ;;  %v4312_v35 = vshll.u32 %v4251_v38, 16 }
 0x24c   : > { %v4821_v40 = vrot.slane %v4819_v4, 5  ;;  %v4825_v61 = vrot.slane %v4823_v22, 4  ;;  %v3446_v62 = vshrl.u32 %v9579_v13, 16  ;;  %v3455_v10 = vshll.u32 %v12222_v51, 16 }
 0x24d   : > { %v12224_v44 = vpop.f32.mrf.mxu0  ;;  %v4311_v29 = vrot.slane %v4309_v0, 7  ;;  %v4145_v2 = vadd.f32 %v12022_v17, %v4109_v42  ;;  %v4831_v63 = vrot.slane %v4829_v8, 5  ;;  %v10356_v0 = vld [vmem:[%s10683_s8 + $0x9c] sm:$0xff]  ;;  %v3451_v8 = vrot.slane %v3449_v53, 5 }
 0x24e   : > { %v2985_v24 = vpop.f32.mrf.mxu2  ;;  %v12227_v6 = vpop.f32.mrf.mxu3  ;;  %v4822_v52 = vsel %vm10707_vm4, %v4817_v28, %v4821_v40  ;;  %v4826_v16 = vor.u32 %v4825_v61, %v4821_v40  ;;  %v3448_v14 = vrot.slane %v3446_v62, 4  ;;  %v12235_v5 = vrot.slane %v3455_v10, 5 }
 0x24f   : > { %v4314_v38 = vor.u32 %v4312_v35, %v4311_v29  ;;  %v4316_v34 = vrot.slane %v4311_v29, 4  ;;  %v4177_v4 = vmax.f32 %v4145_v2, 0.0  ;;  %v3058_v22 = vadd.f32 %v2985_v24, %v11413_v19  ;;  %v12245_v29 = vld [vmem:[%s10683_s8 + $0xbc] sm:$0x1] }
 0x250   : > { %9649 = vmatmul.msk.bf16.gmra.mxu0 %vm712_vm1, %v3960_v26  ;;  %v4827_v13 = vrot.slane %v4826_v16, 4  ;;  %v5188_v42 = vunpack.c.l.b16 %v4822_v52  ;;  %v3452_v2 = vor.u32 %v3451_v8, %v3448_v14  ;;  %v3459_v14 = vshrl.u32 %v12222_v51, 16 }
 0x251   : > { %v4315_v28 = vsel %vm12135_vm14, %v4307_v25, %v4314_v38  ;;  %v4621_v47 = vsel %vm12143_vm15, %v4316_v34, %v4620_v43  ;;  %v4252_v35 = vpack.c.bf16 %v4177_v4, %v4177_v4  ;;  %v3712_v40 = vadd.f32 %v12150_v12, %v3058_v22  ;;  %v4725_v61 = vld [vmem:[#allocation2 + $0x18] sm:$0xf]  ;;  %v10423_v12 = vld [vmem:[%s14513_s3 + $0xf0] sm:$0xff]  ;;  %v4623_v22 = vld [vmem:[#allocation2 + $0x24] sm:$0xf] }
 0x252   : > { %4619 = vst [vmem:[#allocation2 + $0x1c] sm:$0xf] %v4315_v28  ;;  %v4832_v19 = vsel %vm10707_vm4, %v4827_v13, %v4831_v63  ;;  %v4834_v26 = vshrl.u32 %v4725_v61, 16  ;;  %v4837_v62 = vshll.u32 %v4725_v61, 16  ;;  %v3453_v10 = vrot.slane %v3452_v2, 4  ;;  %6224 = vmatpush.bf16.msrb.mxu0 %v10423_v12 }
 0x253   : > { %4622 = vst [vmem:[#allocation2 + $0x20] sm:$0x1] %v4621_v47  ;;  %v4318_v53 = vshrl.u32 %v4252_v35, 16  ;;  %v4321_v25 = vshll.u32 %v4252_v35, 16  ;;  %v4110_v24 = vadd.f32 %v12173_v21, %v3712_v40  ;;  %9535 = vmatmul.msk.bf16.gmra.mxu2 %vm712_vm1, %v10356_v0  ;;  %v5189_v43 = vunpack.c.l.b16 %v4832_v19  ;;  %v9618_v38 = vld [vmem:[%s10683_s8 + $0xb4] sm:$0xe] }
 0x254   : > { %9601 = vmatmul.msk.bf16.gmra.mxu3 %vm712_vm1, %v3563_v18  ;;  %v4836_v52 = vrot.slane %v4834_v26, 4  ;;  %v4839_v16 = vrot.slane %v4837_v62, 5  ;;  %v3465_v18 = vshll.u32 %v12245_v29, 16  ;;  %v3942_v8 = vunpack.c.l.b16 %v12210_v15 }
 0x255   : > { %v12253_v63 = vpop.f32.mrf.mxu0  ;;  %v12257_v34 = vrot.slane %v4318_v53, 7  ;;  %v4146_v21 = vadd.f32 %v12022_v17, %v4110_v24  ;;  %v5219_v4 = vpack.c.b16 %v5189_v43, %v5188_v42  ;;  %v3458_v47 = vsel %vm10707_vm4, %v3453_v10, %v12235_v5 }
 0x256   : > { %v2988_v0 = vpop.f32.mrf.mxu2  ;;  %v12261_v13 = vpop.f32.mrf.mxu3  ;;  %v4840_v28 = vor.u32 %v4839_v16, %v4836_v52  ;;  %v3461_v35 = vrot.slane %v3459_v14, 4  ;;  %v9634_v19 = vrot.slane %v9618_v38, 9  ;;  %v3467_v53 = vrot.slane %v3465_v18, 5 }
 0x257   : > { %v4323_v40 = vor.u32 %v4321_v25, %v12257_v34  ;;  %v4178_v61 = vmax.f32 %v4146_v21, 0.0  ;;  %v3059_v42 = vadd.f32 %v2988_v0, %v11438_v11  ;;  %5311 = vmatmul.bf16.gmra.mxu1 %v5219_v4  ;;  %v4324_v26 = vrot.slane %v12257_v34, 4  ;;  %v4627_v0 = vld [vmem:[#allocation2 + $0x2c] sm:$0x1] }
 0x258   : > { %v4841_v62 = vrot.slane %v4840_v28, 4  ;;  %v3462_v2 = vor.u32 %v3461_v35, %v12235_v5  ;;  %v3896_v25 = vrot.slane %v12222_v51, 5  ;;  %v12279_v11 = vadd.f32 %v11431_v1, %v11512_v48  ;;  %v10431_v51 = vld [vmem:[%s14513_s3 + $0x130] sm:$0xff] }
 0x259   : > { %v4624_v15 = vsel %vm12098_vm13, %v4323_v40, %v4623_v22  ;;  %v4253_v24 = vpack.c.bf16 %v4178_v61, %v4178_v61  ;;  %v3713_v43 = vadd.f32 %v12182_v54, %v3059_v42  ;;  %v12274_v12 = vld [vmem:[#allocation2 + $0x1c] sm:$0xf]  ;;  %v3961_v52 = vpack.c.b16 %v3942_v8, %v3941_v55  ;;  %6906 = vmatpush.bf16.msrb.mxu1 %v10431_v51  ;;  %v9582_v51 = vld [vmem:[%s10683_s8 + $0xc0] sm:$0xf] }
 0x25a   : > { %4625 = vst [vmem:[#allocation2 + $0x24] sm:$0xf] %v4624_v15  ;;  %v12283_v5 = vld [vmem:[#allocation2 + $0x20] sm:$0x1]  ;;  %v4843_v16 = vshll.u32 %v12274_v12, 16  ;;  %v4847_v10 = vshrl.u32 %v12274_v12, 16  ;;  %v3545_v1 = vunpack.c.l.b16 %v3458_v47 }
 0x25b   : > { %v4326_v14 = vshrl.u32 %v4253_v24, 16  ;;  %v4329_v54 = vshll.u32 %v4253_v24, 16  ;;  %v4111_v38 = vadd.f32 %v12224_v44, %v3713_v43  ;;  %v4853_v55 = vshll.u32 %v12283_v5, 16  ;;  %v10357_v43 = vld [vmem:[%s10683_s8 + $0xa8] sm:$0xff] }
 0x25c   : > { %v4845_v34 = vrot.slane %v4843_v16, 5  ;;  %v4849_v60 = vrot.slane %v4847_v10, 4  ;;  %v3463_v21 = vrot.slane %v3462_v2, 4  ;;  %v12297_v44 = vsel %vm10927_vm7, %v9634_v19, %v3896_v25  ;;  %v14563_v19 = vld [vmem:[#allocation10_spill] sm:$0xff] }
 0x25d   : > { %v12291_v48 = vpop.f32.mrf.mxu0  ;;  %v4328_v4 = vrot.slane %v4326_v14, 7  ;;  %v4147_v18 = vadd.f32 %v12022_v17, %v4111_v38  ;;  %v3898_v22 = vrot.slane %v3896_v25, 4  ;;  %v3899_v61 = vrot.slane %v12245_v29, 5 }
 0x25e   : > { %v2990_v8 = vpop.f32.mrf.mxu2  ;;  %v12299_v28 = vpop.f32.mrf.mxu3  ;;  %v4846_v47 = vsel %vm10707_vm4, %v4841_v62, %v4845_v34  ;;  %v4850_v35 = vor.u32 %v4849_v60, %v4845_v34  ;;  %v3468_v40 = vsel %vm10707_vm4, %v3463_v21, %v3467_v53  ;;  %v4855_v16 = vrot.slane %v4853_v55, 5 }
 0x25f   : > { %v4331_v42 = vor.u32 %v4329_v54, %v4328_v4  ;;  %v4333_v2 = vrot.slane %v4328_v4, 4  ;;  %v4179_v15 = vmax.f32 %v4147_v18, 0.0  ;;  %v3060_v24 = vadd.f32 %v2990_v8, %v14563_v19 }
 0x260   : > { %9650 = vmatmul.msk.bf16.gmra.mxu0 %vm712_vm1, %v3961_v52  ;;  %v4851_v25 = vrot.slane %v4850_v35, 4  ;;  %v3546_v10 = vunpack.c.l.b16 %v3468_v40  ;;  %v3900_v62 = vsel %vm10927_vm7, %v3898_v22, %v3899_v61  ;;  %v5190_v34 = vunpack.c.l.b16 %v4846_v47  ;;  %v12323_v22 = vld [vmem:[%s10683_s8 + $0xc4] sm:$0xf]  ;;  %v10398_v61 = vld [vmem:[%s14513_s3 + $0xa8] sm:$0xff] }
 0x261   : > { %v4332_v53 = vsel %vm12135_vm14, %v4324_v26, %v4331_v42  ;;  %v4628_v29 = vsel %vm12143_vm15, %v4333_v2, %v4627_v0  ;;  %v4254_v14 = vpack.c.bf16 %v4179_v15, %v4179_v15  ;;  %v3714_v54 = vadd.f32 %v12227_v6, %v3060_v24  ;;  %v4727_v38 = vld [vmem:[#allocation2 + $0x24] sm:$0xf]  ;;  %v4630_v42 = vld [vmem:[#allocation2 + $0x30] sm:$0xf]  ;;  %5911 = vmatpush.bf16.msrb.mxu3 %v10398_v61 }
 0x262   : > { %4626 = vst [vmem:[#allocation2 + $0x28] sm:$0xf] %v4332_v53  ;;  %v4856_v52 = vsel %vm10707_vm4, %v4851_v25, %v4855_v16  ;;  %v3564_v60 = vpack.c.b16 %v3546_v10, %v3545_v1  ;;  %v3943_v55 = vunpack.c.l.b16 %v12297_v44  ;;  %v3944_v18 = vunpack.c.l.b16 %v3900_v62  ;;  %v14564_v16 = vld [vmem:[#allocation11_spill] sm:$0xff] }
 0x263   : > { %4629 = vst [vmem:[#allocation2 + $0x2c] sm:$0x1] %v4628_v29  ;;  %v4335_v21 = vshrl.u32 %v4254_v14, 16  ;;  %v4112_v26 = vadd.f32 %v12253_v63, %v3714_v54  ;;  %9536 = vmatmul.msk.bf16.gmra.mxu2 %vm712_vm1, %v10357_v43  ;;  %v5191_v4 = vunpack.c.l.b16 %v4856_v52  ;;  %v4338_v6 = vshll.u32 %v4254_v14, 16  ;;  %v14565_v29 = vld [vmem:[#allocation12_spill] sm:$0xff] }
 0x264   : > { %9602 = vmatmul.msk.bf16.gmra.mxu3 %vm712_vm1, %v3564_v60  ;;  %v4858_v8 = vshrl.u32 %v4727_v38, 16  ;;  %v4861_v47 = vshll.u32 %v4727_v38, 16  ;;  %v3470_v1 = vshrl.u32 %v9582_v51, 16  ;;  %v3473_v40 = vshll.u32 %v9582_v51, 16  ;;  %v12344_v54 = vld [vmem:[%s10683_s8 + $0xc8] sm:$0x1] }
 0x265   : > { %v12326_v0 = vpop.f32.mrf.mxu0  ;;  %v12328_v35 = vrot.slane %v4335_v21, 7  ;;  %v4148_v44 = vadd.f32 %v12022_v17, %v4112_v26  ;;  %v5220_v63 = vpack.c.b16 %v5191_v4, %v5190_v34  ;;  %v3479_v25 = vshll.u32 %v12323_v22, 16 }
 0x266   : > { %v2993_v2 = vpop.f32.mrf.mxu2  ;;  %v12334_v15 = vpop.f32.mrf.mxu3  ;;  %v4860_v19 = vrot.slane %v4858_v8, 4  ;;  %v4863_v24 = vrot.slane %v4861_v47, 5  ;;  %v3472_v43 = vrot.slane %v3470_v1, 4  ;;  %v12339_v10 = vadd.f32 %v14564_v16, %v11571_v49 }
 0x267   : > { %v4340_v62 = vor.u32 %v4338_v6, %v12328_v35  ;;  %v4180_v53 = vmax.f32 %v4148_v44, 0.0  ;;  %v3061_v14 = vadd.f32 %v2993_v2, %v14565_v29  ;;  %5316 = vmatmul.bf16.gmra.mxu1 %v5220_v63  ;;  %v4341_v38 = vrot.slane %v12328_v35, 4  ;;  %v10397_v6 = vld [vmem:[%s14513_s3 + $0xa0] sm:$0xff] }
 0x268   : > { %v4864_v51 = vor.u32 %v4863_v24, %v4860_v19  ;;  %v3475_v52 = vrot.slane %v3473_v40, 5  ;;  %v3483_v34 = vshrl.u32 %v12323_v22, 16  ;;  %v3481_v4 = vrot.slane %v3479_v25, 5  ;;  %5912 = vmatpush.bf16.msrb.mxu3 %v10397_v6 }
 0x269   : > { %v4631_v60 = vsel %vm12098_vm13, %v4340_v62, %v4630_v42  ;;  %v4255_v49 = vpack.c.bf16 %v4180_v53, %v4180_v53  ;;  %v3715_v21 = vadd.f32 %v12261_v13, %v3061_v14  ;;  %v12351_v26 = vld [vmem:[#allocation2 + $0x28] sm:$0xf]  ;;  %v3962_v8 = vpack.c.b16 %v3944_v18, %v3943_v55  ;;  %v4634_v62 = vld [vmem:[#allocation2 + $0x38] sm:$0x1] }
 0x26a   : > { %4632 = vst [vmem:[#allocation2 + $0x30] sm:$0xf] %v4631_v60  ;;  %v12356_v47 = vld [vmem:[#allocation2 + $0x2c] sm:$0x1]  ;;  %v4867_v1 = vshll.u32 %v12351_v26, 16  ;;  %v3476_v35 = vor.u32 %v3475_v52, %v3472_v43  ;;  %v3489_v44 = vshll.u32 %v12344_v54, 16 }
 0x26b   : > { %v4343_v63 = vshrl.u32 %v4255_v49, 16  ;;  %v4113_v40 = vadd.f32 %v12291_v48, %v3715_v21  ;;  %v4865_v13 = vrot.slane %v4864_v51, 4  ;;  %v4871_v61 = vshrl.u32 %v12351_v26, 16  ;;  %v10382_v42 = vld [vmem:[%s14513_s3 + $0x28] sm:$0xff]  ;;  %v10396_v60 = vld [vmem:[%s14513_s3 + $0x98] sm:$0xff] }
 0x26c   : > { %v4869_v55 = vrot.slane %v4867_v1, 5  ;;  %v4877_v18 = vshll.u32 %v12356_v47, 16  ;;  %v3477_v19 = vrot.slane %v3476_v35, 4  ;;  %v3485_v24 = vrot.slane %v3483_v34, 4  ;;  %5533 = vmatpush.bf16.msrb.mxu2 %v10382_v42  ;;  %v10358_v35 = vld [vmem:[%s10683_s8 + $0xb4] sm:$0xff]  ;;  %5913 = vmatpush.bf16.msrb.mxu3 %v10396_v60 }
 0x26d   : > { %v12365_v2 = vpop.f32.mrf.mxu0  ;;  %v4345_v43 = vrot.slane %v4343_v63, 7  ;;  %v4346_v25 = vshll.u32 %v4255_v49, 16  ;;  %v4149_v48 = vadd.f32 %v12022_v17, %v4113_v40  ;;  %v4873_v16 = vrot.slane %v4871_v61, 4  ;;  %v9619_v63 = vld [vmem:[%s10683_s8 + $0xc0] sm:$0xe] }
 0x26e   : > { %v2995_v53 = vpop.f32.mrf.mxu2  ;;  %v12369_v29 = vpop.f32.mrf.mxu3  ;;  %v4870_v14 = vsel %vm10707_vm4, %v4865_v13, %v4869_v55  ;;  %v3482_v51 = vsel %vm10707_vm4, %v3477_v19, %v3481_v4  ;;  %v3486_v52 = vor.u32 %v3485_v24, %v3481_v4  ;;  %v3491_v34 = vrot.slane %v3489_v44, 5 }
 0x26f   : > { %v4348_v49 = vor.u32 %v4346_v25, %v4345_v43  ;;  %v4350_v21 = vrot.slane %v4345_v43, 4  ;;  %v4181_v6 = vmax.f32 %v4149_v48, 0.0  ;;  %v3062_v1 = vadd.f32 %v2995_v53, %v12279_v11  ;;  %v10422_v11 = vld [vmem:[%s14513_s3 + $0xe8] sm:$0xff] }
 0x270   : > { %9651 = vmatmul.msk.bf16.gmra.mxu0 %vm712_vm1, %v3962_v8  ;;  %v4874_v40 = vor.u32 %v4873_v16, %v4869_v55  ;;  %v4879_v13 = vrot.slane %v4877_v18, 5  ;;  %v3487_v61 = vrot.slane %v3486_v52, 4  ;;  %v3547_v42 = vunpack.c.l.b16 %v3482_v51 }
 0x271   : > { %v4349_v4 = vsel %vm12135_vm14, %v4341_v38, %v4348_v49  ;;  %v4635_v44 = vsel %vm12143_vm15, %v4350_v21, %v4634_v62  ;;  %v4256_v19 = vpack.c.bf16 %v4181_v6, %v4181_v6  ;;  %v3716_v24 = vadd.f32 %v12299_v28, %v3062_v1  ;;  %v4729_v8 = vld [vmem:[#allocation2 + $0x30] sm:$0xf]  ;;  %6225 = vmatpush.bf16.msrb.mxu0 %v10422_v11 }
 0x272   : > { %4633 = vst [vmem:[#allocation2 + $0x34] sm:$0xf] %v4349_v4  ;;  %v4875_v55 = vrot.slane %v4874_v40, 4  ;;  %v5192_v18 = vunpack.c.l.b16 %v4870_v14  ;;  %v3492_v43 = vsel %vm10707_vm4, %v3487_v61, %v3491_v34  ;;  %v9635_v25 = vrot.slane %v9619_v63, 9  ;;  %v10395_v62 = vld [vmem:[%s14513_s3 + $0x90] sm:$0xff]  ;;  %v10421_v61 = vld [vmem:[%s14513_s3 + $0xe0] sm:$0xff] }
 0x273   : > { %4636 = vst [vmem:[#allocation2 + $0x38] sm:$0x1] %v4635_v44  ;;  %v4352_v38 = vshrl.u32 %v4256_v19, 16  ;;  %v4355_v48 = vshll.u32 %v4256_v19, 16  ;;  %v4114_v16 = vadd.f32 %v12326_v0, %v3716_v24  ;;  %9537 = vmatmul.msk.bf16.gmra.mxu2 %vm712_vm1, %v10358_v35  ;;  %v3548_v28 = vunpack.c.l.b16 %v3492_v43  ;;  %v4637_v0 = vld [vmem:[#allocation2 + $0x3c] sm:$0xf]  ;;  %5914 = vmatpush.bf16.msrb.mxu3 %v10395_v62 }
 0x274   : > { %v4880_v53 = vsel %vm10707_vm4, %v4875_v55, %v4879_v13  ;;  %v3903_v51 = vrot.slane %v12323_v22, 5  ;;  %v3906_v52 = vrot.slane %v12344_v54, 5  ;;  %v4882_v34 = vshrl.u32 %v4729_v8, 16  ;;  %v10381_v54 = vld [vmem:[%s14513_s3 + $0x20] sm:$0xff]  ;;  %v12432_v62 = vld [vmem:[%s10683_s8 + $0xd0] sm:$0xf] }
 0x275   : > { %v12399_v14 = vpop.f32.mrf.mxu0  ;;  %v12403_v60 = vrot.slane %v4352_v38, 7  ;;  %v4150_v49 = vadd.f32 %v12022_v17, %v4114_v16  ;;  %v5193_v21 = vunpack.c.l.b16 %v4880_v53  ;;  %v3565_v6 = vpack.c.b16 %v3548_v28, %v3547_v42  ;;  %v10394_v42 = vld [vmem:[%s14513_s3 + $0x88] sm:$0xff]  ;;  %5534 = vmatpush.bf16.msrb.mxu2 %v10381_v54  ;;  %6226 = vmatpush.bf16.msrb.mxu0 %v10421_v61 }
 0x276   : > { %v2998_v1 = vpop.f32.mrf.mxu2  ;;  %v12406_v35 = vpop.f32.mrf.mxu3  ;;  %v3904_v63 = vsel %vm10927_vm7, %v9635_v25, %v3903_v51  ;;  %v3905_v40 = vrot.slane %v3903_v51, 4  ;;  %v4884_v13 = vrot.slane %v4882_v34, 4  ;;  %v4885_v22 = vshll.u32 %v4729_v8, 16 }
 0x277   : > { %v4357_v4 = vor.u32 %v4355_v48, %v12403_v60  ;;  %v4358_v44 = vrot.slane %v12403_v60, 4  ;;  %v4182_v19 = vmax.f32 %v4150_v49, 0.0  ;;  %v3063_v24 = vadd.f32 %v2998_v1, %v11549_v23  ;;  %9603 = vmatmul.msk.bf16.gmra.mxu3 %vm712_vm1, %v3565_v6  ;;  %v9585_v23 = vld [vmem:[%s10683_s8 + $0xcc] sm:$0xf] }
 0x278   : > { %v5221_v11 = vpack.c.b16 %v5193_v21, %v5192_v18  ;;  %v3907_v8 = vsel %vm10927_vm7, %v3905_v40, %v3906_v52  ;;  %v3945_v55 = vunpack.c.l.b16 %v3904_v63  ;;  %v4887_v43 = vrot.slane %v4885_v22, 5  ;;  %5915 = vmatpush.bf16.msrb.mxu3 %v10394_v42  ;;  %v10430_v6 = vld [vmem:[%s14513_s3 + $0x128] sm:$0xff]  ;;  %v10393_v22 = vld [vmem:[%s14513_s3 + $0x80] sm:$0xff] }
 0x279   : > { %v4638_v25 = vsel %vm12098_vm13, %v4357_v4, %v4637_v0  ;;  %v4257_v38 = vpack.c.bf16 %v4182_v19, %v4182_v19  ;;  %v3717_v48 = vadd.f32 %v12334_v15, %v3063_v24  ;;  %v3946_v16 = vunpack.c.l.b16 %v3907_v8  ;;  %v12428_v28 = vld [vmem:[#allocation2 + $0x34] sm:$0xf]  ;;  %6907 = vmatpush.bf16.msrb.mxu1 %v10430_v6  ;;  %v4641_v19 = vld [vmem:[#allocation2 + $0x44] sm:$0x1] }
 0x27a   : > { %v12436_v18 = vadd.f32 %v11542_v46, %v11617_v31  ;;  %4639 = vst [vmem:[#allocation2 + $0x3c] sm:$0xf] %v4638_v25  ;;  %5321 = vmatmul.bf16.gmra.mxu1 %v5221_v11  ;;  %v12438_v53 = vld [vmem:[#allocation2 + $0x38] sm:$0x1]  ;;  %v4888_v51 = vor.u32 %v4887_v43, %v4884_v13  ;;  %v4891_v52 = vshll.u32 %v12428_v28, 16  ;;  %v4895_v15 = vshrl.u32 %v12428_v28, 16 }
 0x27b   : > { %v4360_v34 = vshrl.u32 %v4257_v38, 16  ;;  %v4363_v0 = vshll.u32 %v4257_v38, 16  ;;  %v4115_v49 = vadd.f32 %v12365_v2, %v3717_v48  ;;  %v3963_v21 = vpack.c.b16 %v3946_v16, %v3945_v55  ;;  %v10380_v46 = vld [vmem:[%s14513_s3 + $0x18] sm:$0xff]  ;;  %v10419_v38 = vld [vmem:[%s14513_s3 + $0xd0] sm:$0xff] }
 0x27c   : > { %v10420_v31 = vld [vmem:[%s14513_s3 + $0xd8] sm:$0xff]  ;;  %v4889_v63 = vrot.slane %v4888_v51, 4  ;;  %v4893_v40 = vrot.slane %v4891_v52, 5  ;;  %v4897_v13 = vrot.slane %v4895_v15, 4  ;;  %v4901_v2 = vshll.u32 %v12438_v53, 16  ;;  %5535 = vmatpush.bf16.msrb.mxu2 %v10380_v46  ;;  %5916 = vmatpush.bf16.msrb.mxu3 %v10393_v22  ;;  %v10359_v52 = vld [vmem:[%s10683_s8 + $0xc0] sm:$0xff] }
 0x27d   : > { %v12452_v1 = vpop.f32.mrf.mxu0  ;;  %v4362_v54 = vrot.slane %v4360_v34, 7  ;;  %v4151_v61 = vadd.f32 %v12022_v17, %v4115_v49  ;;  %v3494_v42 = vshrl.u32 %v9585_v23, 16  ;;  %v3497_v4 = vshll.u32 %v9585_v23, 16  ;;  %6227 = vmatpush.bf16.msrb.mxu0 %v10420_v31  ;;  %v10379_v17 = vld [vmem:[%s14513_s3 + $0x10] sm:$0xff] }
 0x27e   : > { %v3000_v24 = vpop.f32.mrf.mxu2  ;;  %v12459_v11 = vpop.f32.mrf.mxu3  ;;  %v4894_v8 = vsel %vm10707_vm4, %v4889_v63, %v4893_v40  ;;  %v4898_v55 = vor.u32 %v4897_v13, %v4893_v40  ;;  %v4903_v43 = vrot.slane %v4901_v2, 5  ;;  %v3503_v25 = vshll.u32 %v12432_v62, 16  ;;  %v9587_v40 = vld [vmem:[%s10683_s8 + $0xd4] sm:$0x1] }
 0x27f   : > { %v4365_v48 = vor.u32 %v4363_v0, %v4362_v54  ;;  %v4367_v16 = vrot.slane %v4362_v54, 4  ;;  %v4183_v23 = vmax.f32 %v4151_v61, 0.0  ;;  %v3064_v51 = vadd.f32 %v3000_v24, %v12339_v10  ;;  %v9620_v10 = vld [vmem:[%s10683_s8 + $0xcc] sm:$0xe] }
 0x280   : > { %9652 = vmatmul.msk.bf16.gmra.mxu0 %vm712_vm1, %v3963_v21  ;;  %v4899_v15 = vrot.slane %v4898_v55, 4  ;;  %v5194_v34 = vunpack.c.l.b16 %v4894_v8  ;;  %v3496_v49 = vrot.slane %v3494_v42, 4  ;;  %v3499_v6 = vrot.slane %v3497_v4, 5  ;;  %5536 = vmatpush.bf16.msrb.mxu2 %v10379_v17  ;;  %v10378_v61 = vld [vmem:[%s14513_s3 + $0x8] sm:$0xff] }
 0x281   : > { %v4366_v46 = vsel %vm12135_vm14, %v4358_v44, %v4365_v48  ;;  %v4642_v31 = vsel %vm12143_vm15, %v4367_v16, %v4641_v19  ;;  %v4258_v0 = vpack.c.bf16 %v4183_v23, %v4183_v23  ;;  %v3718_v63 = vadd.f32 %v12369_v29, %v3064_v51  ;;  %6228 = vmatpush.bf16.msrb.mxu0 %v10419_v38  ;;  %v10418_v42 = vld [vmem:[%s14513_s3 + $0xc8] sm:$0xff] }
 0x282   : > { %4640 = vst [vmem:[#allocation2 + $0x40] sm:$0xf] %v4366_v46  ;;  %v4904_v21 = vsel %vm10707_vm4, %v4899_v15, %v4903_v43  ;;  %v3500_v13 = vor.u32 %v3499_v6, %v3496_v49  ;;  %v3505_v2 = vrot.slane %v3503_v25, 5  ;;  %v3507_v60 = vshrl.u32 %v12432_v62, 16  ;;  %v4644_v48 = vld [vmem:[#allocation2 + $0x48] sm:$0xf] }
 0x283   : > { %4643 = vst [vmem:[#allocation2 + $0x44] sm:$0x1] %v4642_v31  ;;  %v4369_v44 = vshrl.u32 %v4258_v0, 16  ;;  %v4372_v22 = vshll.u32 %v4258_v0, 16  ;;  %v4116_v54 = vadd.f32 %v12399_v14, %v3718_v63  ;;  %9538 = vmatmul.msk.bf16.gmra.mxu2 %vm712_vm1, %v10359_v52  ;;  %v5195_v29 = vunpack.c.l.b16 %v4904_v21  ;;  %v12500_v14 = vld [vmem:[%s14512_s2] ss:$0 sm:$0xff] }
 0x284   : > { %v3501_v4 = vrot.slane %v3500_v13, 4  ;;  %v3509_v19 = vrot.slane %v3507_v60, 4  ;;  %v3513_v24 = vshll.u32 %v9587_v40, 16  ;;  %v9636_v55 = vrot.slane %v9620_v10, 9  ;;  %5537 = vmatpush.bf16.msrb.mxu2 %v10378_v61  ;;  %v10377_v6 = vld [vmem:[%s14513_s3] sm:$0xff] }
 0x285   : > { %v12493_v8 = vpop.f32.mrf.mxu0  ;;  %v12495_v43 = vrot.slane %v4369_v44, 7  ;;  %v4152_v25 = vadd.f32 %v12500_v14, %v4116_v54  ;;  %v5222_v17 = vpack.c.b16 %v5195_v29, %v5194_v34  ;;  %v3910_v38 = vrot.slane %v12432_v62, 5  ;;  %6229 = vmatpush.bf16.msrb.mxu0 %v10418_v42  ;;  %v10417_v62 = vld [vmem:[%s14513_s3 + $0xc0] sm:$0xff]  ;;  %v4731_v63 = vld [vmem:[#allocation2 + $0x3c] sm:$0xf] }
 0x286   : > { %v3003_v16 = vpop.f32.mrf.mxu2  ;;  %v3506_v23 = vsel %vm10707_vm4, %v3501_v4, %v3505_v2  ;;  %v3510_v51 = vor.u32 %v3509_v19, %v3505_v2  ;;  %v3515_v52 = vrot.slane %v3513_v24, 5  ;;  %v12506_v15 = vpop.f32.mrf.mxu3  ;;  %v3913_v49 = vrot.slane %v9587_v40, 5 }
 0x287   : > { %v4374_v34 = vor.u32 %v4372_v22, %v12495_v43  ;;  %v4375_v46 = vrot.slane %v12495_v43, 4  ;;  %v4184_v31 = vmax.f32 %v4152_v25, 0.0  ;;  %v3065_v0 = vadd.f32 %v3003_v16, %v11607_v56 }
 0x288   : > { %v3511_v10 = vrot.slane %v3510_v51, 4  ;;  %v3549_v21 = vunpack.c.l.b16 %v3506_v23  ;;  %v3911_v40 = vsel %vm10927_vm7, %v9636_v55, %v3910_v38  ;;  %v3912_v13 = vrot.slane %v3910_v38, 4  ;;  %5538 = vmatpush.bf16.msrb.mxu2 %v10377_v6  ;;  %v4648_v6 = vld [vmem:[#allocation2 + $0x50] sm:$0x1] }
 0x289   : > { %v4645_v2 = vsel %vm12098_vm13, %v4374_v34, %v4644_v48  ;;  %v4259_v60 = vpack.c.bf16 %v4184_v31, %v4184_v31  ;;  %v3719_v44 = vadd.f32 %v12406_v35, %v3065_v0  ;;  %v3947_v54 = vunpack.c.l.b16 %v3911_v40  ;;  %v12522_v22 = vld [vmem:[#allocation2 + $0x40] sm:$0xf]  ;;  %6230 = vmatpush.bf16.msrb.mxu0 %v10417_v62 }
 0x28a   : > { %4646 = vst [vmem:[#allocation2 + $0x48] sm:$0xf] %v4645_v2  ;;  %5326 = vmatmul.bf16.gmra.mxu1 %v5222_v17  ;;  %v3516_v56 = vsel %vm10707_vm4, %v3511_v10, %v3515_v52  ;;  %v3914_v29 = vsel %vm10927_vm7, %v3912_v13, %v3913_v49  ;;  %v4906_v61 = vshrl.u32 %v4731_v63, 16  ;;  %v4909_v42 = vshll.u32 %v4731_v63, 16  ;;  %v12529_v55 = vld [vmem:[#allocation2 + $0x44] sm:$0x1] }
 0x28b   : > { %v4377_v4 = vshrl.u32 %v4259_v60, 16  ;;  %v4380_v19 = vshll.u32 %v4259_v60, 16  ;;  %v4117_v24 = vadd.f32 %v12452_v1, %v3719_v44  ;;  %v3550_v35 = vunpack.c.l.b16 %v3516_v56  ;;  %v5620_v49 = vld [vmem:[#allocation2] sm:$0xe] }
 0x28c   : > { %v3948_v25 = vunpack.c.l.b16 %v3914_v29  ;;  %v4908_v17 = vrot.slane %v4906_v61, 4  ;;  %v4911_v38 = vrot.slane %v4909_v42, 5  ;;  %v4915_v48 = vshll.u32 %v12522_v22, 16 }
 0x28d   : > { %v12531_v43 = vpop.f32.mrf.mxu0  ;;  %v4379_v16 = vrot.slane %v4377_v4, 7  ;;  %v4153_v23 = vadd.f32 %v12500_v14, %v4117_v24  ;;  %v3566_v51 = vpack.c.b16 %v3550_v35, %v3549_v21  ;;  %v4919_v52 = vshrl.u32 %v12522_v22, 16  ;;  %v10360_v21 = vld [vmem:[%s10683_s8 + $0xcc] sm:$0xff]  ;;  %v10607_v24 = vld [vmem:[#allocation2 + $0x4] sm:$0xf]  ;;  %8328 = vmatpush.bf16.msra.mxu0 %v10472_v3 }
 0x28e   : > { %v3005_v1 = vpop.f32.mrf.mxu2  ;;  %v12536_v62 = vpop.f32.mrf.mxu3  ;;  %v3964_v34 = vpack.c.b16 %v3948_v25, %v3947_v54  ;;  %v4912_v31 = vor.u32 %v4911_v38, %v4908_v17  ;;  %v4917_v0 = vrot.slane %v4915_v48, 5  ;;  %v4925_v63 = vshll.u32 %v12529_v55, 16  ;;  %v10608_v35 = vld [vmem:[#allocation2 + $0x8] sm:$0x1] }
 0x28f   : > { %v4382_v10 = vor.u32 %v4380_v19, %v4379_v16  ;;  %v4384_v40 = vrot.slane %v4379_v16, 4  ;;  %v4185_v13 = vmax.f32 %v4153_v23, 0.0  ;;  %9604 = vmatmul.msk.bf16.gmra.mxu3 %vm712_vm1, %v3566_v51  ;;  %v3066_v2 = vadd.f32 %v3005_v1, %v12436_v18 }
 0x290   : > { %9653 = vmatmul.msk.bf16.gmra.mxu0 %vm712_vm1, %v3964_v34  ;;  %v4913_v60 = vrot.slane %v4912_v31, 4  ;;  %v4921_v44 = vrot.slane %v4919_v52, 4  ;;  %v9798_v56 = vrot.slane %v5620_v49, 9  ;;  %v5670_v18 = vrot.slane %v10607_v24, 5  ;;  %v4651_v34 = vld [vmem:[#allocation2 + $0x54] sm:$0xf] }
 0x291   : > { %v4383_v54 = vsel %vm12135_vm14, %v4375_v46, %v4382_v10  ;;  %v4649_v29 = vsel %vm12143_vm15, %v4384_v40, %v4648_v6  ;;  %v4260_v61 = vpack.c.bf16 %v4185_v13, %v4185_v13  ;;  %v3720_v42 = vadd.f32 %v12459_v11, %v3066_v2  ;;  %v4733_v4 = vld [vmem:[#allocation2 + $0x48] sm:$0xf]  ;;  %v5621_v24 = vld [vmem:[#allocation2 + $0xc] sm:$0xe] }
 0x292   : > { %4647 = vst [vmem:[#allocation2 + $0x4c] sm:$0xf] %v4383_v54  ;;  %v4922_v19 = vor.u32 %v4921_v44, %v4917_v0  ;;  %v5673_v25 = vrot.slane %v10608_v35, 5  ;;  %v4918_v46 = vsel %vm10707_vm4, %v4913_v60, %v4917_v0  ;;  %v4927_v48 = vrot.slane %v4925_v63, 5 }
 0x293   : > { %4650 = vst [vmem:[#allocation2 + $0x50] sm:$0x1] %v4649_v29  ;;  %v4386_v17 = vshrl.u32 %v4260_v61, 16  ;;  %v4118_v38 = vadd.f32 %v12493_v8, %v3720_v42  ;;  %9539 = vmatmul.msk.bf16.gmra.mxu2 %vm712_vm1, %v10360_v21  ;;  %v5671_v11 = vsel %vm10927_vm7, %v9798_v56, %v5670_v18  ;;  %v5672_v51 = vrot.slane %v5670_v18, 4 }
 0x294   : > { %v4923_v16 = vrot.slane %v4922_v19, 4  ;;  %v4930_v52 = vshrl.u32 %v4733_v4, 16  ;;  %v4389_v6 = vshll.u32 %v4260_v61, 16  ;;  %v4933_v8 = vshll.u32 %v4733_v4, 16 }
 0x295   : > { %v12552_v23 = vpop.f32.mrf.mxu0  ;;  %v12556_v49 = vrot.slane %v4386_v17, 7  ;;  %v4154_v1 = vadd.f32 %v12500_v14, %v4118_v38  ;;  %v5674_v63 = vsel %vm10927_vm7, %v5672_v51, %v5673_v25  ;;  %v5797_v60 = vunpack.c.l.b16 %v5671_v11 }
 0x296   : > { %v3008_v31 = vpop.f32.mrf.mxu2  ;;  %v4928_v0 = vsel %vm10707_vm4, %v4923_v16, %v4927_v48  ;;  %v12563_v10 = vpop.f32.mrf.mxu3  ;;  %v4932_v40 = vrot.slane %v4930_v52, 4  ;;  %v5196_v44 = vunpack.c.l.b16 %v4918_v46  ;;  %v5798_v54 = vunpack.c.l.b16 %v5674_v63 }
 0x297   : > { %v4391_v13 = vor.u32 %v4389_v6, %v12556_v49  ;;  %v4186_v2 = vmax.f32 %v4154_v1, 0.0  ;;  %v3067_v21 = vadd.f32 %v3008_v31, %v11644_v59  ;;  %v5197_v56 = vunpack.c.l.b16 %v4928_v0  ;;  %v10429_v59 = vld [vmem:[%s14513_s3 + $0x120] sm:$0xff]  ;;  %v4655_v0 = vld [vmem:[#allocation2 + $0x5c] sm:$0x1] }
 0x298   : > { %v4935_v29 = vrot.slane %v4933_v8, 5  ;;  %v5677_v17 = vrot.slane %v12199_v9, 5  ;;  %v5829_v48 = vpack.c.b16 %v5798_v54, %v5797_v60  ;;  %v2781_v11 = vadd.f32 %v11601_v39, %v11656_v7  ;;  %6908 = vmatpush.bf16.msrb.mxu1 %v10429_v59 }
 0x299   : > { %v4652_v61 = vsel %vm12098_vm13, %v4391_v13, %v4651_v34  ;;  %v4261_v42 = vpack.c.bf16 %v4186_v2, %v4186_v2  ;;  %v3721_v4 = vadd.f32 %v12506_v15, %v3067_v21  ;;  %v12570_v19 = vld [vmem:[#allocation2 + $0x4c] sm:$0xf]  ;;  %v5223_v18 = vpack.c.b16 %v5197_v56, %v5196_v44  ;;  %v10361_v56 = vld [vmem:[#allocation2] sm:$0xff] }
 0x29a   : > { %4653 = vst [vmem:[#allocation2 + $0x54] sm:$0xf] %v4652_v61  ;;  %v4936_v35 = vor.u32 %v4935_v29, %v4932_v40  ;;  %v4939_v25 = vshll.u32 %v12570_v19, 16  ;;  %v12578_v16 = vld [vmem:[#allocation2 + $0x50] sm:$0x1]  ;;  %v4943_v15 = vshrl.u32 %v12570_v19, 16 }
 0x29b   : > { %v4394_v38 = vshrl.u32 %v4261_v42, 16  ;;  %v4119_v46 = vadd.f32 %v12531_v43, %v3721_v4  ;;  %5331 = vmatmul.bf16.gmra.mxu1 %v5223_v18  ;;  %v9799_v6 = vrot.slane %v5621_v24, 9  ;;  %v4397_v8 = vshll.u32 %v4261_v42, 16  ;;  %v10401_v34 = vld [vmem:[#allocation2 + $0xc] sm:$0xff] }
 0x29c   : > { %v4941_v52 = vrot.slane %v4939_v25, 5  ;;  %v4945_v31 = vrot.slane %v4943_v15, 4  ;;  %v4392_v43 = vrot.slane %v12556_v49, 4  ;;  %v4937_v13 = vrot.slane %v4936_v35, 4  ;;  %v12600_v35 = vld [vmem:[#allocation2 + $0x18] sm:$0xe] }
 0x29d   : > { %v12583_v51 = vpop.f32.mrf.mxu0  ;;  %v4396_v1 = vrot.slane %v4394_v38, 7  ;;  %v4155_v9 = vadd.f32 %v12500_v14, %v4119_v46  ;;  %v4949_v39 = vshll.u32 %v12578_v16, 16  ;;  %v5679_v7 = vrot.slane %v5677_v17, 4 }
 0x29e   : > { %v3010_v63 = vpop.f32.mrf.mxu2  ;;  %v12587_v40 = vpop.f32.mrf.mxu3  ;;  %v4942_v54 = vsel %vm10707_vm4, %v4937_v13, %v4941_v52  ;;  %v4946_v29 = vor.u32 %v4945_v31, %v4941_v52  ;;  %v5678_v49 = vsel %vm10927_vm7, %v9799_v6, %v5677_v17  ;;  %v5680_v61 = vrot.slane %v12202_v50, 5 }
 0x29f   : > { %v4399_v2 = vor.u32 %v4397_v8, %v4396_v1  ;;  %v4401_v21 = vrot.slane %v4396_v1, 4  ;;  %v4187_v60 = vmax.f32 %v4155_v9, 0.0  ;;  %5917 = vmatmul.bf16.vlgmr.msrb.gmra.mxu3 %v5829_v48  ;;  %v3068_v44 = vadd.f32 %v3010_v63, %v2781_v11  ;;  %v5623_v48 = vld [vmem:[#allocation2 + $0x24] sm:$0xe] }
 0x2a0   : > { %6231 = vmatmul.bf16.vlgmr.msrb.gmra.mxu0 %v10401_v34  ;;  %v4947_v25 = vrot.slane %v4946_v29, 4  ;;  %v4951_v59 = vrot.slane %v4949_v39, 5  ;;  %v5684_v38 = vrot.slane %v12274_v12, 5  ;;  %v5681_v46 = vsel %vm10927_vm7, %v5679_v7, %v5680_v61  ;;  %v4658_v34 = vld [vmem:[#allocation2 + $0x60] sm:$0xf] }
 0x2a1   : > { %v4400_v42 = vsel %vm12135_vm14, %v4392_v43, %v4399_v2  ;;  %v4656_v4 = vsel %vm12143_vm15, %v4401_v21, %v4655_v0  ;;  %v4262_v24 = vpack.c.bf16 %v4187_v60, %v4187_v60  ;;  %v3722_v18 = vadd.f32 %v12536_v62, %v3068_v44 }
 0x2a2   : > { %4654 = vst [vmem:[#allocation2 + $0x58] sm:$0xf] %v4400_v42  ;;  %v4952_v15 = vsel %vm10707_vm4, %v4947_v25, %v4951_v59  ;;  %v5198_v62 = vunpack.c.l.b16 %v4942_v54  ;;  %v5799_v52 = vunpack.c.l.b16 %v5678_v49  ;;  %v9800_v6 = vrot.slane %v12600_v35, 9 }
 0x2a3   : > { %4657 = vst [vmem:[#allocation2 + $0x5c] sm:$0x1] %v4656_v4  ;;  %v4403_v17 = vshrl.u32 %v4262_v24, 16  ;;  %v4120_v50 = vadd.f32 %v12552_v23, %v3722_v18  ;;  %5539 = vmatmul.bf16.vlgmr.msrb.gmra.mxu2 %v10361_v56  ;;  %v4406_v8 = vshll.u32 %v4262_v24, 16  ;;  %v5199_v23 = vunpack.c.l.b16 %v4952_v15  ;;  %v4735_v24 = vld [vmem:[#allocation2 + $0x54] sm:$0xf] }
 0x2a4   : > { %v5800_v43 = vunpack.c.l.b16 %v5681_v46  ;;  %v12618_v63 = vrot.slane %v5684_v38, 4  ;;  %v9801_v13 = vrot.slane %v5623_v48, 9  ;;  %v5691_v39 = vrot.slane %v12351_v26, 5 }
 0x2a5   : > { %v12608_v11 = vpop.f32.mrf.mxu0  ;;  %v12611_v1 = vrot.slane %v4403_v17, 7  ;;  %v4156_v9 = vadd.f32 %v12500_v14, %v4120_v50  ;;  %v5687_v60 = vrot.slane %v12283_v5, 5  ;;  %v5224_v44 = vpack.c.b16 %v5199_v23, %v5198_v62 }
 0x2a6   : > { %v3013_v31 = vpop.f32.mrf.mxu2  ;;  %v12614_v0 = vpop.f32.mrf.mxu3  ;;  %v5692_v56 = vsel %vm10927_vm7, %v9801_v13, %v5691_v39  ;;  %v5693_v54 = vrot.slane %v5691_v39, 4  ;;  %v5694_v29 = vrot.slane %v12356_v47, 5  ;;  %v5830_v4 = vpack.c.b16 %v5800_v43, %v5799_v52 }
 0x2a7   : > { %v4408_v7 = vor.u32 %v4406_v8, %v12611_v1  ;;  %v4188_v2 = vmax.f32 %v4156_v9, 0.0  ;;  %v3069_v21 = vadd.f32 %v3013_v31, %v11685_v33  ;;  %v4409_v49 = vrot.slane %v12611_v1, 4  ;;  %v10402_v1 = vld [vmem:[#allocation2 + $0x18] sm:$0xff] }
 0x2a8   : > { %v2783_v33 = vadd.f32 %v11638_v41, %v11696_v20  ;;  %v5695_v25 = vsel %vm10927_vm7, %v5693_v54, %v5694_v29  ;;  %v4954_v50 = vshrl.u32 %v4735_v24, 16  ;;  %v5803_v46 = vunpack.c.l.b16 %v5692_v56  ;;  %v5624_v56 = vld [vmem:[#allocation2 + $0x30] sm:$0xe] }
 0x2a9   : > { %v4659_v61 = vsel %vm12098_vm13, %v4408_v7, %v4658_v34  ;;  %v4263_v26 = vpack.c.bf16 %v4188_v2, %v4188_v2  ;;  %v3723_v42 = vadd.f32 %v12563_v10, %v3069_v21  ;;  %v12633_v18 = vld [vmem:[#allocation2 + $0x58] sm:$0xf]  ;;  %v4957_v41 = vshll.u32 %v4735_v24, 16 }
 0x2aa   : > { %4660 = vst [vmem:[#allocation2 + $0x60] sm:$0xf] %v4659_v61  ;;  %v12638_v17 = vld [vmem:[#allocation2 + $0x5c] sm:$0x1]  ;;  %v4963_v20 = vshll.u32 %v12633_v18, 16  ;;  %v4967_v15 = vshrl.u32 %v12633_v18, 16  ;;  %v5804_v9 = vunpack.c.l.b16 %v5695_v25 }
 0x2ab   : > { %v4411_v47 = vshrl.u32 %v4263_v26, 16  ;;  %v4121_v59 = vadd.f32 %v12583_v51, %v3723_v42  ;;  %v4414_v48 = vshll.u32 %v4263_v26, 16  ;;  %5336 = vmatmul.bf16.gmra.mxu1 %v5224_v44  ;;  %v4956_v8 = vrot.slane %v4954_v50, 4  ;;  %v4662_v51 = vld [vmem:[#allocation2 + $0x68] sm:$0x1] }
 0x2ac   : > { %v4959_v31 = vrot.slane %v4957_v41, 5  ;;  %v4965_v43 = vrot.slane %v4963_v20, 5  ;;  %v4969_v13 = vrot.slane %v4967_v15, 4  ;;  %v4973_v39 = vshll.u32 %v12638_v17, 16 }
 0x2ad   : > { %v12640_v10 = vpop.f32.mrf.mxu0  ;;  %v4413_v62 = vrot.slane %v4411_v47, 7  ;;  %v4157_v52 = vadd.f32 %v12500_v14, %v4121_v59  ;;  %v12648_v61 = vpack.c.b16 %v5804_v9, %v5803_v46  ;;  %v5698_v26 = vrot.slane %v12428_v28, 5  ;;  %v10362_v59 = vld [vmem:[#allocation2 + $0xc] sm:$0xff] }
 0x2ae   : > { %v3015_v23 = vpop.f32.mrf.mxu2  ;;  %v12645_v34 = vpop.f32.mrf.mxu3  ;;  %v4960_v54 = vor.u32 %v4959_v31, %v4956_v8  ;;  %v4970_v29 = vor.u32 %v4969_v13, %v4965_v43  ;;  %v4975_v50 = vrot.slane %v4973_v39, 5  ;;  %v5688_v28 = vsel %vm10927_vm7, %v12618_v63, %v5687_v60  ;;  %v4665_v60 = vld [vmem:[#allocation2 + $0x6c] sm:$0xf] }
 0x2af   : > { %v4416_v7 = vor.u32 %v4414_v48, %v4413_v62  ;;  %v4418_v2 = vrot.slane %v4413_v62, 4  ;;  %v4189_v21 = vmax.f32 %v4157_v52, 0.0  ;;  %5922 = vmatmul.bf16.gmra.mxu3 %v5830_v4  ;;  %v3070_v44 = vadd.f32 %v3015_v23, %v2783_v33 }
 0x2b0   : > { %6236 = vmatmul.bf16.gmra.mxu0 %v10402_v1  ;;  %v4961_v33 = vrot.slane %v4960_v54, 4  ;;  %v4971_v4 = vrot.slane %v4970_v29, 4  ;;  %v9802_v48 = vrot.slane %v5624_v56, 9  ;;  %v5802_v39 = vunpack.c.l.b16 %v5688_v28  ;;  %v4669_v28 = vld [vmem:[#allocation2 + $0x74] sm:$0x1] }
 0x2b1   : > { %v4417_v42 = vsel %vm12135_vm14, %v4409_v49, %v4416_v7  ;;  %v4663_v24 = vsel %vm12143_vm15, %v4418_v2, %v4662_v51  ;;  %v4264_v25 = vpack.c.bf16 %v4189_v21, %v4189_v21  ;;  %v3724_v47 = vadd.f32 %v12587_v40, %v3070_v44  ;;  %v4737_v56 = vld [vmem:[#allocation2 + $0x60] sm:$0xf] }
 0x2b2   : > { %4661 = vst [vmem:[#allocation2 + $0x64] sm:$0xf] %v4417_v42  ;;  %v5700_v49 = vrot.slane %v5698_v26, 4  ;;  %v4966_v40 = vsel %vm10707_vm4, %v4961_v33, %v4965_v43  ;;  %v4976_v20 = vsel %vm10707_vm4, %v4971_v4, %v4975_v50  ;;  %v5699_v62 = vsel %vm10927_vm7, %v9802_v48, %v5698_v26 }
 0x2b3   : > { %4664 = vst [vmem:[#allocation2 + $0x68] sm:$0x1] %v4663_v24  ;;  %v4420_v46 = vshrl.u32 %v4264_v25, 16  ;;  %v4122_v41 = vadd.f32 %v12608_v11, %v3724_v47  ;;  %5544 = vmatmul.bf16.gmra.mxu2 %v10362_v59  ;;  %v5701_v11 = vrot.slane %v12438_v53, 5  ;;  %v4423_v5 = vshll.u32 %v4264_v25, 16 }
 0x2b4   : > { %v5201_v63 = vunpack.c.l.b16 %v4976_v20  ;;  %v5200_v9 = vunpack.c.l.b16 %v4966_v40  ;;  %v5685_v51 = vsel %vm10927_vm7, %v9800_v6, %v5684_v38  ;;  %v5805_v2 = vunpack.c.l.b16 %v5699_v62 }
 0x2b5   : > { %v12666_v15 = vpop.f32.mrf.mxu0  ;;  %v12671_v52 = vrot.slane %v4420_v46, 7  ;;  %v4158_v1 = vadd.f32 %v12500_v14, %v4122_v41  ;;  %v5702_v53 = vsel %vm10927_vm7, %v5700_v49, %v5701_v11  ;;  %v5801_v6 = vunpack.c.l.b16 %v5685_v51  ;;  %v10403_v46 = vld [vmem:[#allocation2 + $0x24] sm:$0xff] }
 0x2b6   : > { %v3018_v8 = vpop.f32.mrf.mxu2  ;;  %v12680_v23 = vpop.f32.mrf.mxu3  ;;  %v5225_v7 = vpack.c.b16 %v5201_v63, %v5200_v9  ;;  %v5806_v21 = vunpack.c.l.b16 %v5702_v53  ;;  %v2785_v44 = vadd.f32 %v11679_v45, %v11734_v57  ;;  %v4978_v47 = vshrl.u32 %v4737_v56, 16 }
 0x2b7   : > { %v4425_v31 = vor.u32 %v4423_v5, %v12671_v52  ;;  %v4190_v43 = vmax.f32 %v4158_v1, 0.0  ;;  %v3071_v13 = vadd.f32 %v3018_v8, %v11720_v58  ;;  %v12695_v58 = vpop.f32.mrf.mxu1  ;;  %v5831_v24 = vpack.c.b16 %v5802_v39, %v5801_v6  ;;  %v5625_v8 = vld [vmem:[#allocation2 + $0x3c] sm:$0xe] }
 0x2b8   : > { %v12693_v29 = vpack.c.b16 %v5806_v21, %v5805_v2  ;;  %v4426_v45 = vrot.slane %v12671_v52, 4  ;;  %v4981_v59 = vshll.u32 %v4737_v56, 16  ;;  %v4980_v41 = vrot.slane %v4978_v47, 4 }
 0x2b9   : > { %v4666_v12 = vsel %vm12098_vm13, %v4425_v31, %v4665_v60  ;;  %v4265_v35 = vpack.c.bf16 %v4190_v43, %v4190_v43  ;;  %v3725_v38 = vadd.f32 %v12614_v0, %v3071_v13  ;;  %v12691_v54 = vld [vmem:[#allocation2 + $0x64] sm:$0xf]  ;;  %v10428_v0 = vld [vmem:[%s14513_s3 + $0x118] sm:$0xff]  ;;  %v5705_v53 = vrot.slane %v12522_v22, 5 }
 0x2ba   : > { %4667 = vst [vmem:[#allocation2 + $0x6c] sm:$0xf] %v4666_v12  ;;  %v12698_v25 = vld [vmem:[#allocation2 + $0x68] sm:$0x1]  ;;  %v4987_v33 = vshll.u32 %v12691_v54, 16  ;;  %v4991_v4 = vshrl.u32 %v12691_v54, 16  ;;  %6909 = vmatpush.bf16.msrb.mxu1 %v10428_v0 }
 0x2bb   : > { %v4428_v26 = vshrl.u32 %v4265_v35, 16  ;;  %v4123_v42 = vadd.f32 %v12640_v10, %v3725_v38  ;;  %5341 = vmatmul.bf16.gmra.mxu1 %v5225_v7  ;;  %v4431_v10 = vshll.u32 %v4265_v35, 16  ;;  %v4983_v20 = vrot.slane %v4981_v59, 5  ;;  %v10363_v7 = vld [vmem:[#allocation2 + $0x18] sm:$0xff] }
 0x2bc   : > { %v4989_v62 = vrot.slane %v4987_v33, 5  ;;  %v4993_v11 = vrot.slane %v4991_v4, 4  ;;  %v4997_v52 = vshll.u32 %v12698_v25, 16  ;;  %v9803_v35 = vrot.slane %v5625_v8, 9  ;;  %v4672_v59 = vld [vmem:[#allocation2 + $0x78] sm:$0xf] }
 0x2bd   : > { %v12704_v57 = vpop.f32.mrf.mxu0  ;;  %v4430_v50 = vrot.slane %v4428_v26, 7  ;;  %v4159_v48 = vadd.f32 %v12500_v14, %v4123_v42  ;;  %v4984_v9 = vor.u32 %v4983_v20, %v4980_v41 }
 0x2be   : > { %v3020_v49 = vpop.f32.mrf.mxu2  ;;  %v12709_v40 = vpop.f32.mrf.mxu3  ;;  %v4994_v51 = vor.u32 %v4993_v11, %v4989_v62  ;;  %v4999_v12 = vrot.slane %v4997_v52, 5  ;;  %v5706_v42 = vsel %vm10927_vm7, %v9803_v35, %v5705_v53  ;;  %v10404_v35 = vld [vmem:[#allocation2 + $0x30] sm:$0xff] }
 0x2bf   : > { %v4433_v5 = vor.u32 %v4431_v10, %v4430_v50  ;;  %v4435_v1 = vrot.slane %v4430_v50, 4  ;;  %v4191_v63 = vmax.f32 %v4159_v48, 0.0  ;;  %5927 = vmatmul.bf16.gmra.mxu3 %v5831_v24  ;;  %v3072_v60 = vadd.f32 %v3020_v49, %v2785_v44 }
 0x2c0   : > { %6241 = vmatmul.bf16.gmra.mxu0 %v10403_v46  ;;  %v4985_v2 = vrot.slane %v4984_v9, 4  ;;  %v4995_v21 = vrot.slane %v4994_v51, 4  ;;  %v5707_v44 = vrot.slane %v5705_v53, 4  ;;  %v5708_v24 = vrot.slane %v12529_v55, 5 }
 0x2c1   : > { %v4434_v31 = vsel %vm12135_vm14, %v4426_v45, %v4433_v5  ;;  %v4670_v43 = vsel %vm12143_vm15, %v4435_v1, %v4669_v28  ;;  %v4266_v13 = vpack.c.bf16 %v4191_v63, %v4191_v63  ;;  %v3726_v39 = vadd.f32 %v12645_v34, %v3072_v60  ;;  %v4739_v52 = vld [vmem:[#allocation2 + $0x6c] sm:$0xf]  ;;  %v14566_v63 = vld [vmem:[#allocation14_spill] sm:$0xff] }
 0x2c2   : > { %4668 = vst [vmem:[#allocation2 + $0x70] sm:$0xf] %v4434_v31  ;;  %v12718_v6 = vpop.f32.mrf.mxu1  ;;  %v4990_v56 = vsel %vm10707_vm4, %v4985_v2, %v4989_v62  ;;  %v5000_v34 = vsel %vm10707_vm4, %v4995_v21, %v4999_v12  ;;  %v5709_v10 = vsel %vm10927_vm7, %v5707_v44, %v5708_v24  ;;  %v5807_v49 = vunpack.c.l.b16 %v5706_v42  ;;  %v14567_v60 = vld [vmem:[#allocation13_spill] sm:$0xff] }
 0x2c3   : > { %4671 = vst [vmem:[#allocation2 + $0x74] sm:$0x1] %v4670_v43  ;;  %v4437_v38 = vshrl.u32 %v4266_v13, 16  ;;  %v4124_v22 = vadd.f32 %v12666_v15, %v3726_v39  ;;  %5549 = vmatmul.bf16.gmra.mxu2 %v10363_v7  ;;  %v4440_v0 = vshll.u32 %v4266_v13, 16  ;;  %v5203_v15 = vunpack.c.l.b16 %v5000_v34 }
 0x2c4   : > { %v5202_v4 = vunpack.c.l.b16 %v4990_v56  ;;  %v5808_v55 = vunpack.c.l.b16 %v5709_v10  ;;  %v2787_v8 = vadd.f32 %v14567_v60, %v14566_v63  ;;  %v5002_v53 = vshrl.u32 %v4739_v52, 16 }
 0x2c5   : > { %v12725_v26 = vpop.f32.mrf.mxu0  ;;  %v4439_v47 = vrot.slane %v4437_v38, 7  ;;  %v4160_v45 = vadd.f32 %v12500_v14, %v4124_v22  ;;  %v5005_v13 = vshll.u32 %v4739_v52, 16  ;;  %v4676_v38 = vld [vmem:[#allocation2 + $0x80] sm:$0x1]  ;;  %v5712_v10 = vrot.slane %v12570_v19, 5 }
 0x2c6   : > { %v3023_v33 = vpop.f32.mrf.mxu2  ;;  %v5226_v28 = vpack.c.b16 %v5203_v15, %v5202_v4  ;;  %v12741_v1 = vpack.c.b16 %v5808_v55, %v5807_v49  ;;  %v10364_v49 = vld [vmem:[#allocation2 + $0x24] sm:$0xff] }
 0x2c7   : > { %v12731_v50 = vpop.f32.mrf.mxu3  ;;  %v4442_v48 = vor.u32 %v4440_v0, %v4439_v47  ;;  %v4192_v46 = vmax.f32 %v4160_v45, 0.0  ;;  %v3073_v41 = vadd.f32 %v3023_v33, %v11761_v36  ;;  %v4443_v31 = vrot.slane %v4439_v47, 4 }
 0x2c8   : > { %v5007_v56 = vrot.slane %v5005_v13, 5  ;;  %v5714_v19 = vrot.slane %v5712_v10, 4 }
 0x2c9   : > { %v4673_v20 = vsel %vm12098_vm13, %v4442_v48, %v4672_v59  ;;  %v4267_v62 = vpack.c.bf16 %v4192_v46, %v4192_v46  ;;  %v3727_v11 = vadd.f32 %v12680_v23, %v3073_v41  ;;  %v12739_v5 = vld [vmem:[#allocation2 + $0x70] sm:$0xf]  ;;  %v5626_v59 = vld [vmem:[#allocation2 + $0x48] sm:$0xe] }
 0x2ca   : > { %4674 = vst [vmem:[#allocation2 + $0x78] sm:$0xf] %v4673_v20  ;;  %v12746_v51 = vld [vmem:[#allocation2 + $0x74] sm:$0x1]  ;;  %v12748_v43 = vpop.f32.mrf.mxu1  ;;  %v5011_v39 = vshll.u32 %v12739_v5, 16  ;;  %v5015_v7 = vshrl.u32 %v12739_v5, 16 }
 0x2cb   : > { %v4445_v9 = vshrl.u32 %v4267_v62, 16  ;;  %v4125_v36 = vadd.f32 %v12704_v57, %v3727_v11  ;;  %5346 = vmatmul.bf16.gmra.mxu1 %v5226_v28  ;;  %v4448_v21 = vshll.u32 %v4267_v62, 16  ;;  %v5004_v57 = vrot.slane %v5002_v53, 4 }
 0x2cc   : > { %v5013_v34 = vrot.slane %v5011_v39, 5  ;;  %v5017_v42 = vrot.slane %v5015_v7, 4  ;;  %v5021_v24 = vshll.u32 %v12746_v51, 16  ;;  %v9804_v62 = vrot.slane %v5626_v59, 9  ;;  %v4679_v39 = vld [vmem:[#allocation2 + $0x84] sm:$0xf] }
 0x2cd   : > { %v12750_v23 = vpop.f32.mrf.mxu0  ;;  %v4447_v2 = vrot.slane %v4445_v9, 7  ;;  %v4161_v12 = vadd.f32 %v12500_v14, %v4125_v36  ;;  %v5008_v33 = vor.u32 %v5007_v56, %v5004_v57  ;;  %v5715_v36 = vrot.slane %v12578_v16, 5  ;;  %v14569_v59 = vld [vmem:[#allocation17_spill] sm:$0xff] }
 0x2ce   : > { %v3025_v22 = vpop.f32.mrf.mxu2  ;;  %v5018_v4 = vor.u32 %v5017_v42, %v5013_v34  ;;  %v5023_v20 = vrot.slane %v5021_v24, 5  ;;  %v5713_v9 = vsel %vm10927_vm7, %v9804_v62, %v5712_v10 }
 0x2cf   : > { %v12755_v44 = vpop.f32.mrf.mxu3  ;;  %v4450_v47 = vor.u32 %v4448_v21, %v4447_v2  ;;  %v4452_v0 = vrot.slane %v4447_v2, 4  ;;  %v4193_v45 = vmax.f32 %v4161_v12, 0.0  ;;  %5932 = vmatmul.bf16.gmra.mxu3 %v12648_v61  ;;  %v3074_v15 = vadd.f32 %v3025_v22, %v2787_v8 }
 0x2d0   : > { %6246 = vmatmul.bf16.gmra.mxu0 %v10404_v35  ;;  %v5009_v55 = vrot.slane %v5008_v33, 4  ;;  %v5019_v61 = vrot.slane %v5018_v4, 4  ;;  %v5716_v12 = vsel %vm10927_vm7, %v5714_v19, %v5715_v36  ;;  %v14570_v33 = vld [vmem:[#allocation15_spill] sm:$0xff] }
 0x2d1   : > { %v4451_v48 = vsel %vm12135_vm14, %v4443_v31, %v4450_v47  ;;  %v4677_v46 = vsel %vm12143_vm15, %v4452_v0, %v4676_v38  ;;  %v4268_v41 = vpack.c.bf16 %v4193_v45, %v4193_v45  ;;  %v3728_v28 = vadd.f32 %v12709_v40, %v3074_v15  ;;  %v14568_v38 = vld [vmem:[#allocation16_spill] sm:$0xff]  ;;  %v4741_v0 = vld [vmem:[#allocation2 + $0x78] sm:$0xf] }
 0x2d2   : > { %4675 = vst [vmem:[#allocation2 + $0x7c] sm:$0xf] %v4451_v48  ;;  %v5014_v60 = vsel %vm10707_vm4, %v5009_v55, %v5013_v34  ;;  %v5024_v40 = vsel %vm10707_vm4, %v5019_v61, %v5023_v20  ;;  %v5809_v34 = vunpack.c.l.b16 %v5713_v9  ;;  %v5810_v16 = vunpack.c.l.b16 %v5716_v12  ;;  %v10405_v19 = vld [vmem:[#allocation2 + $0x3c] sm:$0xff]  ;;  %v5627_v12 = vld [vmem:[#allocation2 + $0x54] sm:$0xe] }
 0x2d3   : > { %4678 = vst [vmem:[#allocation2 + $0x80] sm:$0x1] %v4677_v46  ;;  %v4454_v11 = vshrl.u32 %v4268_v41, 16  ;;  %v4126_v52 = vadd.f32 %v12725_v26, %v3728_v28  ;;  %5554 = vmatmul.bf16.gmra.mxu2 %v10364_v49  ;;  %v4457_v31 = vshll.u32 %v4268_v41, 16  ;;  %v5205_v13 = vunpack.c.l.b16 %v5024_v40  ;;  %v10427_v28 = vld [vmem:[%s14513_s3 + $0x110] sm:$0xff] }
 0x2d4   : > { %v12766_v63 = vpop.f32.mrf.mxu1  ;;  %v5204_v2 = vunpack.c.l.b16 %v5014_v60  ;;  %v12788_v15 = vpack.c.b16 %v5810_v16, %v5809_v34  ;;  %v2789_v4 = vadd.f32 %v14570_v33, %v14569_v59  ;;  %v5026_v41 = vshrl.u32 %v4741_v0, 16  ;;  %6910 = vmatpush.bf16.msrb.mxu1 %v10427_v28  ;;  %v4683_v40 = vld [vmem:[#allocation2 + $0x8c] sm:$0x1] }
 0x2d5   : > { %v12772_v8 = vpop.f32.mrf.mxu0  ;;  %v4456_v53 = vrot.slane %v4454_v11, 7  ;;  %v4162_v26 = vadd.f32 %v12500_v14, %v4126_v52  ;;  %v5029_v61 = vshll.u32 %v4741_v0, 16  ;;  %v9805_v59 = vrot.slane %v5627_v12, 9 }
 0x2d6   : > { %v3028_v7 = vpop.f32.mrf.mxu2  ;;  %v5227_v56 = vpack.c.b16 %v5205_v13, %v5204_v2  ;;  %v5028_v60 = vrot.slane %v5026_v41, 4 }
 0x2d7   : > { %v12778_v21 = vpop.f32.mrf.mxu3  ;;  %v4459_v35 = vor.u32 %v4457_v31, %v4456_v53  ;;  %v4194_v57 = vmax.f32 %v4162_v26, 0.0  ;;  %v3075_v22 = vadd.f32 %v3028_v7, %v14568_v38  ;;  %v5031_v36 = vrot.slane %v5029_v61, 5 }
 0x2d9   : > { %v4680_v42 = vsel %vm12098_vm13, %v4459_v35, %v4679_v39  ;;  %v4269_v24 = vpack.c.bf16 %v4194_v57, %v4194_v57  ;;  %v3729_v47 = vadd.f32 %v12731_v50, %v3075_v22  ;;  %v12786_v45 = vld [vmem:[#allocation2 + $0x7c] sm:$0xf]  ;;  %v4460_v50 = vrot.slane %v4456_v53, 4 }
 0x2da   : > { %4681 = vst [vmem:[#allocation2 + $0x84] sm:$0xf] %v4680_v42  ;;  %v12793_v46 = vld [vmem:[#allocation2 + $0x80] sm:$0x1]  ;;  %v5035_v20 = vshll.u32 %v12786_v45, 16  ;;  %v5039_v62 = vshrl.u32 %v12786_v45, 16  ;;  %v5032_v57 = vor.u32 %v5031_v36, %v5028_v60 }
 0x2db   : > { %v4462_v10 = vshrl.u32 %v4269_v24, 16  ;;  %v4127_v48 = vadd.f32 %v12750_v23, %v3729_v47  ;;  %5351 = vmatmul.bf16.gmra.mxu1 %v5227_v56  ;;  %v4465_v23 = vshll.u32 %v4269_v24, 16  ;;  %v5045_v26 = vshll.u32 %v12793_v46, 16  ;;  %v10365_v24 = vld [vmem:[#allocation2 + $0x30] sm:$0xff] }
 0x2dc   : > { %v12798_v49 = vpop.f32.mrf.mxu1  ;;  %v5037_v53 = vrot.slane %v5035_v20, 5  ;;  %v5041_v31 = vrot.slane %v5039_v62, 4  ;;  %v5719_v22 = vrot.slane %v12633_v18, 5 }
 0x2dd   : > { %v12800_v55 = vpop.f32.mrf.mxu0  ;;  %v4464_v11 = vrot.slane %v4462_v10, 7  ;;  %v4163_v52 = vadd.f32 %v12500_v14, %v4127_v48  ;;  %v5047_v0 = vrot.slane %v5045_v26, 5 }
 0x2de   : > { %v3030_v9 = vpop.f32.mrf.mxu2  ;;  %v5042_v38 = vor.u32 %v5041_v31, %v5037_v53  ;;  %v5721_v18 = vrot.slane %v5719_v22, 4  ;;  %v5720_v28 = vsel %vm10927_vm7, %v9805_v59, %v5719_v22 }
 0x2df   : > { %v4467_v13 = vor.u32 %v4465_v23, %v4464_v11  ;;  %v4469_v39 = vrot.slane %v4464_v11, 4  ;;  %v4195_v7 = vmax.f32 %v4163_v52, 0.0  ;;  %5937 = vmatmul.bf16.gmra.mxu3 %v12693_v29  ;;  %v3076_v2 = vadd.f32 %v3030_v9, %v2789_v4  ;;  %v12807_v35 = vpop.f32.mrf.mxu3  ;;  %v4686_v11 = vld [vmem:[#allocation2 + $0x90] sm:$0xf]  ;;  %v14571_v9 = vld [vmem:[#allocation19_spill] sm:$0xff] }
 0x2e0   : > { %6251 = vmatmul.bf16.gmra.mxu0 %v10405_v19  ;;  %v5033_v29 = vrot.slane %v5032_v57, 4  ;;  %v5043_v47 = vrot.slane %v5042_v38, 4  ;;  %v5811_v31 = vunpack.c.l.b16 %v5720_v28  ;;  %v14572_v57 = vld [vmem:[#allocation20_spill] sm:$0xff]  ;;  %v14573_v38 = vld [vmem:[#allocation18_spill] sm:$0xff]  ;;  %v4690_v28 = vld [vmem:[#allocation2 + $0x98] sm:$0x1] }
 0x2e1   : > { %v4468_v56 = vsel %vm12135_vm14, %v4460_v50, %v4467_v13  ;;  %v4684_v34 = vsel %vm12143_vm15, %v4469_v39, %v4683_v40  ;;  %v4270_v16 = vpack.c.bf16 %v4195_v7, %v4195_v7  ;;  %v3730_v42 = vadd.f32 %v12755_v44, %v3076_v2  ;;  %v4743_v7 = vld [vmem:[#allocation2 + $0x84] sm:$0xf] }
 0x2e2   : > { %4682 = vst [vmem:[#allocation2 + $0x88] sm:$0xf] %v4468_v56  ;;  %v5038_v48 = vsel %vm10707_vm4, %v5033_v29, %v5037_v53  ;;  %v5048_v44 = vsel %vm10707_vm4, %v5043_v47, %v5047_v0  ;;  %v5722_v50 = vrot.slane %v12638_v17, 5  ;;  %v2791_v22 = vadd.f32 %v14573_v38, %v14572_v57 }
 0x2e3   : > { %4685 = vst [vmem:[#allocation2 + $0x8c] sm:$0x1] %v4684_v34  ;;  %v4471_v33 = vshrl.u32 %v4270_v16, 16  ;;  %v4128_v4 = vadd.f32 %v12772_v8, %v3730_v42  ;;  %5559 = vmatmul.bf16.gmra.mxu2 %v10365_v24  ;;  %v4474_v20 = vshll.u32 %v4270_v16, 16  ;;  %v5207_v62 = vunpack.c.l.b16 %v5048_v44 }
 0x2e4   : > { %v12816_v10 = vpop.f32.mrf.mxu1  ;;  %v5206_v52 = vunpack.c.l.b16 %v5038_v48  ;;  %v5723_v19 = vsel %vm10927_vm7, %v5721_v18, %v5722_v50  ;;  %v5050_v42 = vshrl.u32 %v4743_v7, 16  ;;  %v5053_v29 = vshll.u32 %v4743_v7, 16  ;;  %v10406_v48 = vld [vmem:[#allocation2 + $0x48] sm:$0xff] }
 0x2e5   : > { %v12822_v41 = vpop.f32.mrf.mxu0  ;;  %v4473_v61 = vrot.slane %v4471_v33, 7  ;;  %v4164_v8 = vadd.f32 %v12500_v14, %v4128_v4  ;;  %v5812_v26 = vunpack.c.l.b16 %v5723_v19  ;;  %v12852_v4 = vld [vmem:[%s14512_s2] ss:$0 sm:$0xff] }
 0x2e6   : > { %v3033_v23 = vpop.f32.mrf.mxu2  ;;  %v5228_v53 = vpack.c.b16 %v5207_v62, %v5206_v52  ;;  %v5052_v44 = vrot.slane %v5050_v42, 4 }
 0x2e7   : > { %v4476_v60 = vor.u32 %v4474_v20, %v4473_v61  ;;  %v4196_v40 = vmax.f32 %v4164_v8, 0.0  ;;  %v3077_v36 = vadd.f32 %v3033_v23, %v14571_v9  ;;  %v12834_v39 = vpop.f32.mrf.mxu3  ;;  %v12838_v12 = vpack.c.b16 %v5812_v26, %v5811_v31 }
 0x2e8   : > { %v4477_v24 = vrot.slane %v4473_v61, 4  ;;  %v5055_v61 = vrot.slane %v5053_v29, 5  ;;  %v5729_v29 = vrot.slane %v12698_v25, 5 }
 0x2e9   : > { %v4687_v17 = vsel %vm12098_vm13, %v4476_v60, %v4686_v11  ;;  %v4271_v13 = vpack.c.bf16 %v4196_v40, %v4196_v40  ;;  %v3731_v14 = vadd.f32 %v12778_v21, %v3077_v36  ;;  %v12836_v2 = vld [vmem:[#allocation2 + $0x88] sm:$0xf]  ;;  %v5628_v60 = vld [vmem:[#allocation2 + $0x60] sm:$0xe]  ;;  %v5726_v36 = vrot.slane %v12691_v54, 5 }
 0x2ea   : > { %4688 = vst [vmem:[#allocation2 + $0x90] sm:$0xf] %v4687_v17  ;;  %v12843_v16 = vld [vmem:[#allocation2 + $0x8c] sm:$0x1]  ;;  %v5059_v47 = vshll.u32 %v12836_v2, 16  ;;  %v5063_v0 = vshrl.u32 %v12836_v2, 16  ;;  %v5056_v40 = vor.u32 %v5055_v61, %v5052_v44 }
 0x2eb   : > { %v4479_v56 = vshrl.u32 %v4271_v13, 16  ;;  %v4129_v34 = vadd.f32 %v12800_v55, %v3731_v14  ;;  %5356 = vmatmul.bf16.gmra.mxu1 %v5228_v53  ;;  %v4482_v33 = vshll.u32 %v4271_v13, 16  ;;  %v5069_v62 = vshll.u32 %v12843_v16, 16  ;;  %v10366_v13 = vld [vmem:[#allocation2 + $0x3c] sm:$0xff] }
 0x2ec   : > { %v12855_v18 = vpop.f32.mrf.mxu1  ;;  %v5061_v20 = vrot.slane %v5059_v47, 5  ;;  %v5065_v8 = vrot.slane %v5063_v0, 4  ;;  %v5057_v14 = vrot.slane %v5056_v40, 4  ;;  %v9806_v57 = vrot.slane %v5628_v60, 9 }
 0x2ed   : > { %v12845_v21 = vpop.f32.mrf.mxu0  ;;  %v4481_v59 = vrot.slane %v4479_v56, 7  ;;  %v4165_v55 = vadd.f32 %v12852_v4, %v4129_v34  ;;  %v5071_v7 = vrot.slane %v5069_v62, 5  ;;  %v5728_v54 = vrot.slane %v5726_v36, 4 }
 0x2ee   : > { %v3035_v50 = vpop.f32.mrf.mxu2  ;;  %v5066_v9 = vor.u32 %v5065_v8, %v5061_v20  ;;  %v5062_v34 = vsel %vm10707_vm4, %v5057_v14, %v5061_v20  ;;  %v14574_v20 = vld [vmem:[#allocation22_spill] sm:$0xff] }
 0x2ef   : > { %v4484_v11 = vor.u32 %v4482_v33, %v4481_v59  ;;  %v4486_v23 = vrot.slane %v4481_v59, 4  ;;  %v4197_v52 = vmax.f32 %v4165_v55, 0.0  ;;  %5942 = vmatmul.bf16.gmra.mxu3 %v12741_v1  ;;  %v3078_v19 = vadd.f32 %v3035_v50, %v2791_v22  ;;  %v12866_v56 = vpop.f32.mrf.mxu3  ;;  %v4693_v33 = vld [vmem:[#allocation2 + $0x9c] sm:$0xf] }
 0x2f0   : > { %6256 = vmatmul.bf16.gmra.mxu0 %v10406_v48  ;;  %v5067_v1 = vrot.slane %v5066_v9, 4  ;;  %v5208_v48 = vunpack.c.l.b16 %v5062_v34  ;;  %v5730_v44 = vsel %vm10927_vm7, %v5728_v54, %v5729_v29  ;;  %v4697_v29 = vld [vmem:[#allocation2 + $0xa4] sm:$0x1] }
 0x2f1   : > { %v4485_v53 = vsel %vm12135_vm14, %v4477_v24, %v4484_v11  ;;  %v4691_v31 = vsel %vm12143_vm15, %v4486_v23, %v4690_v28  ;;  %v4272_v26 = vpack.c.bf16 %v4197_v52, %v4197_v52  ;;  %v3732_v17 = vadd.f32 %v12807_v35, %v3078_v19  ;;  %v4745_v60 = vld [vmem:[#allocation2 + $0x90] sm:$0xf] }
 0x2f2   : > { %4689 = vst [vmem:[#allocation2 + $0x94] sm:$0xf] %v4485_v53  ;;  %v5072_v35 = vsel %vm10707_vm4, %v5067_v1, %v5071_v7  ;;  %v5727_v24 = vsel %vm10927_vm7, %v9806_v57, %v5726_v36  ;;  %v5814_v25 = vunpack.c.l.b16 %v5730_v44  ;;  %v14575_v36 = vld [vmem:[#allocation3_spill] sm:$0xff]  ;;  %v14576_v53 = vld [vmem:[#allocation21_spill] sm:$0xff]  ;;  %v5074_v14 = vshrl.u32 %v4745_v60, 16 }
 0x2f3   : > { %4692 = vst [vmem:[#allocation2 + $0x98] sm:$0x1] %v4691_v31  ;;  %v4488_v38 = vshrl.u32 %v4272_v26, 16  ;;  %v4130_v22 = vadd.f32 %v12822_v41, %v3732_v17  ;;  %5564 = vmatmul.bf16.gmra.mxu2 %v10366_v13  ;;  %v4491_v0 = vshll.u32 %v4272_v26, 16  ;;  %v5209_v59 = vunpack.c.l.b16 %v5072_v35  ;;  %v10426_v1 = vld [vmem:[%s14513_s3 + $0x108] sm:$0xff]  ;;  %v10407_v35 = vld [vmem:[#allocation2 + $0x54] sm:$0xff] }
 0x2f4   : > { %v5813_v11 = vunpack.c.l.b16 %v5727_v24  ;;  %v2793_v31 = vadd.f32 %v14576_v53, %v14575_v36  ;;  %v5077_v57 = vshll.u32 %v4745_v60, 16  ;;  %v5076_v24 = vrot.slane %v5074_v14, 4  ;;  %6911 = vmatpush.bf16.msrb.mxu1 %v10426_v1  ;;  %v10367_v36 = vld [vmem:[#allocation2 + $0x48] sm:$0xff] }
 0x2f5   : > { %v12872_v42 = vpop.f32.mrf.mxu0  ;;  %v4490_v47 = vrot.slane %v4488_v38, 7  ;;  %v4166_v41 = vadd.f32 %v12852_v4, %v4130_v22  ;;  %v5229_v62 = vpack.c.b16 %v5209_v59, %v5208_v48 }
 0x2f6   : > { %v3038_v55 = vpop.f32.mrf.mxu2  ;;  %v12888_v9 = vpack.c.b16 %v5814_v25, %v5813_v11  ;;  %v5079_v59 = vrot.slane %v5077_v57, 5  ;;  %v5733_v25 = vrot.slane %v12739_v5, 5 }
 0x2f7   : > { %v4493_v28 = vor.u32 %v4491_v0, %v4490_v47  ;;  %v4198_v50 = vmax.f32 %v4166_v41, 0.0  ;;  %v12880_v61 = vpop.f32.mrf.mxu1  ;;  %v3079_v8 = vadd.f32 %v3038_v55, %v14574_v20 }
 0x2f8   : > { %v5735_v5 = vrot.slane %v5733_v25, 4 }
 0x2f9   : > { %v4694_v23 = vsel %vm12098_vm13, %v4493_v28, %v4693_v33  ;;  %v4273_v52 = vpack.c.bf16 %v4198_v50, %v4198_v50  ;;  %v3733_v19 = vadd.f32 %v12834_v39, %v3079_v8  ;;  %v12886_v40 = vld [vmem:[#allocation2 + $0x94] sm:$0xf]  ;;  %v4494_v39 = vrot.slane %v4490_v47, 4  ;;  %v5629_v8 = vld [vmem:[#allocation2 + $0x6c] sm:$0xe] }
 0x2fa   : > { %4695 = vst [vmem:[#allocation2 + $0x9c] sm:$0xf] %v4694_v23  ;;  %v12893_v13 = vld [vmem:[#allocation2 + $0x98] sm:$0x1]  ;;  %v5083_v38 = vshll.u32 %v12886_v40, 16  ;;  %v5087_v22 = vshrl.u32 %v12886_v40, 16  ;;  %v3697_v0 = vpop.f32.mrf.mxu3 }
 0x2fb   : > { %v4496_v26 = vshrl.u32 %v4273_v52, 16  ;;  %v4131_v17 = vadd.f32 %v12845_v21, %v3733_v19  ;;  %5361 = vmatmul.bf16.gmra.mxu1 %v5229_v62  ;;  %v4499_v34 = vshll.u32 %v4273_v52, 16  ;;  %v5093_v55 = vshll.u32 %v12893_v13, 16 }
 0x2fc   : > { %v5085_v47 = vrot.slane %v5083_v38, 5  ;;  %v5089_v33 = vrot.slane %v5087_v22, 4  ;;  %v5080_v62 = vor.u32 %v5079_v59, %v5076_v24  ;;  %v5736_v38 = vrot.slane %v12746_v51, 5 }
 0x2fd   : > { %v12898_v7 = vpop.f32.mrf.mxu0  ;;  %v4498_v54 = vrot.slane %v4496_v26, 7  ;;  %v4167_v21 = vadd.f32 %v12852_v4, %v4131_v17  ;;  %v9807_v26 = vrot.slane %v5629_v8, 9 }
 0x2fe   : > { %v3040_v41 = vpop.f32.mrf.mxu2  ;;  %v5090_v11 = vor.u32 %v5089_v33, %v5085_v47  ;;  %v14577_v33 = vld [vmem:[#allocation4_spill] sm:$0xff] }
 0x2ff   : > { %v4501_v48 = vor.u32 %v4499_v34, %v4498_v54  ;;  %v4503_v44 = vrot.slane %v4498_v54, 4  ;;  %v4199_v28 = vmax.f32 %v4167_v21, 0.0  ;;  %5947 = vmatmul.bf16.gmra.mxu3 %v12788_v15  ;;  %v12905_v50 = vpop.f32.mrf.mxu1  ;;  %v3080_v20 = vadd.f32 %v3040_v41, %v2793_v31  ;;  %v4700_v21 = vld [vmem:[#allocation2 + $0xa8] sm:$0xf] }
 0x300   : > { %6261 = vmatmul.bf16.gmra.mxu0 %v10407_v35  ;;  %v5081_v15 = vrot.slane %v5080_v62, 4  ;;  %v5091_v53 = vrot.slane %v5090_v11, 4  ;;  %v5095_v31 = vrot.slane %v5093_v55, 5 }
 0x301   : > { %v4502_v23 = vsel %vm12135_vm14, %v4494_v39, %v4501_v48  ;;  %v4698_v52 = vsel %vm12143_vm15, %v4503_v44, %v4697_v29  ;;  %v4274_v19 = vpack.c.bf16 %v4199_v28, %v4199_v28  ;;  %v3734_v60 = vadd.f32 %v12866_v56, %v3080_v20  ;;  %v4747_v11 = vld [vmem:[#allocation2 + $0x9c] sm:$0xf] }
 0x302   : > { %4696 = vst [vmem:[#allocation2 + $0xa0] sm:$0xf] %v4502_v23  ;;  %v5086_v1 = vsel %vm10707_vm4, %v5081_v15, %v5085_v47  ;;  %v5096_v39 = vsel %vm10707_vm4, %v5091_v53, %v5095_v31  ;;  %v5734_v56 = vsel %vm10927_vm7, %v9807_v26, %v5733_v25  ;;  %v5737_v29 = vsel %vm10927_vm7, %v5735_v5, %v5736_v38  ;;  %v3699_v48 = vpop.f32.mrf.mxu3  ;;  %v10408_v38 = vld [vmem:[#allocation2 + $0x60] sm:$0xff] }
 0x303   : > { %4699 = vst [vmem:[#allocation2 + $0xa4] sm:$0x1] %v4698_v52  ;;  %v4505_v17 = vshrl.u32 %v4274_v19, 16  ;;  %v4132_v14 = vadd.f32 %v12872_v42, %v3734_v60  ;;  %5569 = vmatmul.bf16.gmra.mxu2 %v10367_v36  ;;  %v4508_v54 = vshll.u32 %v4274_v19, 16  ;;  %v5211_v42 = vunpack.c.l.b16 %v5096_v39  ;;  %v14578_v52 = vld [vmem:[#allocation23_spill] sm:$0xff]  ;;  %v14579_v19 = vld [vmem:[#allocation5_spill] sm:$0xff] }
 0x304   : > { %v5210_v24 = vunpack.c.l.b16 %v5086_v1  ;;  %v5815_v51 = vunpack.c.l.b16 %v5734_v56  ;;  %v5816_v28 = vunpack.c.l.b16 %v5737_v29  ;;  %v2795_v60 = vadd.f32 %v14579_v19, %v14578_v52 }
 0x305   : > { %v12918_v57 = vpop.f32.mrf.mxu0  ;;  %v4507_v22 = vrot.slane %v4505_v17, 7  ;;  %v4168_v34 = vadd.f32 %v12852_v4, %v4132_v14  ;;  %v5098_v31 = vshrl.u32 %v4747_v11, 16  ;;  %v5101_v17 = vshll.u32 %v4747_v11, 16  ;;  %v10368_v11 = vld [vmem:[#allocation2 + $0x54] sm:$0xff] }
 0x306   : > { %v3043_v35 = vpop.f32.mrf.mxu2  ;;  %v5230_v44 = vpack.c.b16 %v5211_v42, %v5210_v24  ;;  %v12933_v23 = vpack.c.b16 %v5816_v28, %v5815_v51  ;;  %v5630_v51 = vld [vmem:[#allocation2 + $0x78] sm:$0xe] }
 0x307   : > { %v4510_v41 = vor.u32 %v4508_v54, %v4507_v22  ;;  %v4200_v59 = vmax.f32 %v4168_v34, 0.0  ;;  %v12926_v47 = vpop.f32.mrf.mxu1  ;;  %v3081_v55 = vadd.f32 %v3043_v35, %v14577_v33  ;;  %v4511_v26 = vrot.slane %v4507_v22, 4  ;;  %v4704_v34 = vld [vmem:[#allocation2 + $0xb0] sm:$0x1] }
 0x308   : > { %v5100_v54 = vrot.slane %v5098_v31, 4  ;;  %v5103_v42 = vrot.slane %v5101_v17, 5 }
 0x309   : > { %v4701_v20 = vsel %vm12098_vm13, %v4510_v41, %v4700_v21  ;;  %v4275_v8 = vpack.c.bf16 %v4200_v59, %v4200_v59  ;;  %v3735_v62 = vadd.f32 %v3697_v0, %v3081_v55  ;;  %v12931_v25 = vld [vmem:[#allocation2 + $0xa0] sm:$0xf] }
 0x30a   : > { %4702 = vst [vmem:[#allocation2 + $0xa8] sm:$0xf] %v4701_v20  ;;  %v12938_v53 = vld [vmem:[#allocation2 + $0xa4] sm:$0x1]  ;;  %v5107_v0 = vshll.u32 %v12931_v25, 16  ;;  %v5111_v14 = vshrl.u32 %v12931_v25, 16  ;;  %v5104_v55 = vor.u32 %v5103_v42, %v5100_v54 }
 0x30b   : > { %v4513_v36 = vshrl.u32 %v4275_v8, 16  ;;  %v4133_v15 = vadd.f32 %v12898_v7, %v3735_v62  ;;  %5366 = vmatmul.bf16.gmra.mxu1 %v5230_v44  ;;  %v4516_v1 = vshll.u32 %v4275_v8, 16  ;;  %v5117_v22 = vshll.u32 %v12938_v53, 16 }
 0x30c   : > { %v5109_v21 = vrot.slane %v5107_v0, 5  ;;  %v5113_v35 = vrot.slane %v5111_v14, 4  ;;  %v5105_v19 = vrot.slane %v5104_v55, 4 }
 0x30d   : > { %v4515_v5 = vrot.slane %v4513_v36, 7  ;;  %v4169_v39 = vadd.f32 %v12852_v4, %v4133_v15  ;;  %v12943_v56 = vpop.f32.mrf.mxu0  ;;  %v5119_v36 = vrot.slane %v5117_v22, 5 }
 0x30e   : > { %v3045_v7 = vpop.f32.mrf.mxu2  ;;  %v5114_v44 = vor.u32 %v5113_v35, %v5109_v21  ;;  %v5110_v0 = vsel %vm10707_vm4, %v5105_v19, %v5109_v21  ;;  %v5743_v35 = vrot.slane %v12793_v46, 5 }
 0x30f   : > { %v4518_v24 = vor.u32 %v4516_v1, %v4515_v5  ;;  %v4520_v29 = vrot.slane %v4515_v5, 4  ;;  %v4201_v41 = vmax.f32 %v4169_v39, 0.0  ;;  %5952 = vmatmul.bf16.gmra.mxu3 %v12838_v12  ;;  %v12947_v59 = vpop.f32.mrf.mxu1  ;;  %v3082_v33 = vadd.f32 %v3045_v7, %v2795_v60  ;;  %v10425_v1 = vld [vmem:[%s14513_s3 + $0x100] sm:$0xff] }
 0x310   : > { %6266 = vmatmul.bf16.gmra.mxu0 %v10408_v38  ;;  %v5115_v12 = vrot.slane %v5114_v44, 4  ;;  %v5740_v60 = vrot.slane %v12786_v45, 5  ;;  %v5212_v42 = vunpack.c.l.b16 %v5110_v0  ;;  %6912 = vmatpush.bf16.msrb.mxu1 %v10425_v1  ;;  %v14581_v0 = vld [vmem:[#allocation7_spill] sm:$0xff] }
 0x311   : > { %v4519_v28 = vsel %vm12135_vm14, %v4511_v26, %v4518_v24  ;;  %v4705_v20 = vsel %vm12143_vm15, %v4520_v29, %v4704_v34  ;;  %v4276_v8 = vpack.c.bf16 %v4201_v41, %v4201_v41  ;;  %v3736_v62 = vadd.f32 %v3699_v48, %v3082_v33  ;;  %v4749_v17 = vld [vmem:[#allocation2 + $0xa8] sm:$0xf]  ;;  %v4707_v34 = vld [vmem:[#allocation2 + $0xb4] sm:$0xf] }
 0x312   : > { %4703 = vst [vmem:[#allocation2 + $0xac] sm:$0xf] %v4519_v28  ;;  %v3702_v52 = vpop.f32.mrf.mxu3  ;;  %v9808_v26 = vrot.slane %v5630_v51, 9  ;;  %v5120_v48 = vsel %vm10707_vm4, %v5115_v12, %v5119_v36  ;;  %v5122_v14 = vshrl.u32 %v4749_v17, 16  ;;  %v5125_v5 = vshll.u32 %v4749_v17, 16  ;;  %v14580_v29 = vld [vmem:[#allocation6_spill] sm:$0xff] }
 0x313   : > { %4706 = vst [vmem:[#allocation2 + $0xb0] sm:$0x1] %v4705_v20  ;;  %v4522_v15 = vshrl.u32 %v4276_v8, 16  ;;  %v4134_v31 = vadd.f32 %v12918_v57, %v3736_v62  ;;  %5574 = vmatmul.bf16.gmra.mxu2 %v10368_v11  ;;  %v4525_v39 = vshll.u32 %v4276_v8, 16  ;;  %v5213_v57 = vunpack.c.l.b16 %v5120_v48 }
 0x314   : > { %v5742_v21 = vrot.slane %v5740_v60, 4  ;;  %v5741_v33 = vsel %vm10927_vm7, %v9808_v26, %v5740_v60  ;;  %v5124_v44 = vrot.slane %v5122_v14, 4  ;;  %v5127_v51 = vrot.slane %v5125_v5, 5 }
 0x315   : > { %v4524_v45 = vrot.slane %v4522_v15, 7  ;;  %v4170_v38 = vadd.f32 %v12852_v4, %v4134_v31  ;;  %v12963_v54 = vpop.f32.mrf.mxu0  ;;  %v5231_v55 = vpack.c.b16 %v5213_v57, %v5212_v42  ;;  %v5817_v60 = vunpack.c.l.b16 %v5741_v33 }
 0x316   : > { %v3048_v7 = vpop.f32.mrf.mxu2  ;;  %v5744_v28 = vsel %vm10927_vm7, %v5742_v21, %v5743_v35  ;;  %v2797_v48 = vadd.f32 %v12695_v58, %v14581_v0  ;;  %v10409_v21 = vld [vmem:[#allocation2 + $0x6c] sm:$0xff] }
 0x317   : > { %v4527_v22 = vor.u32 %v4525_v39, %v4524_v45  ;;  %v4202_v24 = vmax.f32 %v4170_v38, 0.0  ;;  %v3083_v41 = vadd.f32 %v3048_v7, %v14580_v29  ;;  %v5818_v19 = vunpack.c.l.b16 %v5744_v28  ;;  %v4711_v7 = vld [vmem:[#allocation2 + $0xbc] sm:$0x1] }
 0x318   : > { %v12973_v62 = vpop.f32.mrf.mxu1 }
 0x319   : > { %v4708_v20 = vsel %vm12098_vm13, %v4527_v22, %v4707_v34  ;;  %v4277_v8 = vpack.c.bf16 %v4202_v24, %v4202_v24  ;;  %v3737_v46 = vadd.f32 %v3702_v52, %v3083_v41  ;;  %v12975_v11 = vld [vmem:[#allocation2 + $0xac] sm:$0xf]  ;;  %v5128_v52 = vor.u32 %v5127_v51, %v5124_v44 }
 0x31a   : > { %4709 = vst [vmem:[#allocation2 + $0xb4] sm:$0xf] %v4708_v20  ;;  %v3704_v12 = vpop.f32.mrf.mxu3  ;;  %v5131_v36 = vshll.u32 %v12975_v11, 16  ;;  %v12979_v17 = vld [vmem:[#allocation2 + $0xb0] sm:$0x1]  ;;  %v5135_v26 = vshrl.u32 %v12975_v11, 16  ;;  %v12984_v5 = vpack.c.b16 %v5818_v19, %v5817_v60 }
 0x31b   : > { %v4530_v15 = vshrl.u32 %v4277_v8, 16  ;;  %v4135_v31 = vadd.f32 %v12943_v56, %v3737_v46  ;;  %5371 = vmatmul.bf16.gmra.mxu1 %v5231_v55  ;;  %v4533_v39 = vshll.u32 %v4277_v8, 16  ;;  %v4528_v56 = vrot.slane %v4524_v45, 4  ;;  %v10369_v20 = vld [vmem:[#allocation2 + $0x60] sm:$0xff] }
 0x31c   : > { %v5133_v14 = vrot.slane %v5131_v36, 5  ;;  %v5137_v34 = vrot.slane %v5135_v26, 4  ;;  %v5141_v35 = vshll.u32 %v12979_v17, 16  ;;  %v5129_v41 = vrot.slane %v5128_v52, 4  ;;  %v10440_v36 = vld [vmem:[%s14513_s3 + $0x178] sm:$0xff] }
 0x31d   : > { %v4532_v1 = vrot.slane %v4530_v15, 7  ;;  %v4171_v38 = vadd.f32 %v12852_v4, %v4135_v31  ;;  %v12987_v57 = vpop.f32.mrf.mxu0  ;;  %7331 = vmatpush.bf16.msra.mxu2 %v10440_v36 }
 0x31e   : > { %v3050_v42 = vpop.f32.mrf.mxu2  ;;  %v5138_v33 = vor.u32 %v5137_v34, %v5133_v14  ;;  %v5134_v31 = vsel %vm10707_vm4, %v5129_v41, %v5133_v14  ;;  %v4714_v34 = vld [vmem:[#allocation2 + $0xc0] sm:$0xf] }
 0x31f   : > { %v4535_v22 = vor.u32 %v4533_v39, %v4532_v1  ;;  %v4537_v58 = vrot.slane %v4532_v1, 4  ;;  %v4203_v24 = vmax.f32 %v4171_v38, 0.0  ;;  %5957 = vmatmul.bf16.gmra.mxu3 %v12888_v9  ;;  %v3084_v29 = vadd.f32 %v3050_v42, %v2797_v48 }
 0x320   : > { %6271 = vmatmul.bf16.gmra.mxu0 %v10409_v21  ;;  %v12995_v51 = vpop.f32.mrf.mxu1  ;;  %v5139_v19 = vrot.slane %v5138_v33, 4  ;;  %v5143_v9 = vrot.slane %v5141_v35, 5 }
 0x321   : > { %v4536_v55 = vsel %vm12135_vm14, %v4528_v56, %v4535_v22  ;;  %v4712_v45 = vsel %vm12143_vm15, %v4537_v58, %v4711_v7  ;;  %v4278_v44 = vpack.c.bf16 %v4203_v24, %v4203_v24  ;;  %v3738_v28 = vadd.f32 %v3704_v12, %v3084_v29  ;;  %v4751_v8 = vld [vmem:[#allocation2 + $0xb4] sm:$0xf]  ;;  %v10464_v12 = vld [vmem:[%s14513_s3 + $0x1b8] sm:$0xff] }
 0x322   : > { %4710 = vst [vmem:[#allocation2 + $0xb8] sm:$0xf] %v4536_v55  ;;  %v5918_v46 = vpop.f32.mrf.mxu3  ;;  %v5144_v26 = vsel %vm10707_vm4, %v5139_v19, %v5143_v9  ;;  %v5146_v0 = vshrl.u32 %v4751_v8, 16  ;;  %v5149_v48 = vshll.u32 %v4751_v8, 16  ;;  %7646 = vmatpush.bf16.msra.mxu3 %v10464_v12  ;;  %v5214_v56 = vunpack.c.l.b16 %v5134_v31  ;;  %v10480_v19 = vld [vmem:[%s14513_s3 + $0x238] sm:$0xff] }
 0x323   : > { %4713 = vst [vmem:[#allocation2 + $0xbc] sm:$0x1] %v4712_v45  ;;  %v4539_v60 = vshrl.u32 %v4278_v44, 16  ;;  %v4136_v15 = vadd.f32 %v12963_v54, %v3738_v28  ;;  %5579 = vmatmul.bf16.gmra.mxu2 %v10369_v20  ;;  %v4542_v1 = vshll.u32 %v4278_v44, 16  ;;  %v5215_v38 = vunpack.c.l.b16 %v5144_v26  ;;  %v4718_v31 = vld [vmem:[#allocation2 + $0xc8] sm:$0x1]  ;;  %8754 = vmatpush.bf16.msra.mxu1 %v10480_v19 }
 0x324   : > { %v5148_v22 = vrot.slane %v5146_v0, 4  ;;  %v5151_v33 = vrot.slane %v5149_v48, 5  ;;  %v10410_v26 = vld [vmem:[#allocation2 + $0x78] sm:$0xff] }
 0x325   : > { %v4541_v52 = vrot.slane %v4539_v60, 7  ;;  %v4172_v39 = vadd.f32 %v12852_v4, %v4136_v15  ;;  %v13009_v54 = vpop.f32.mrf.mxu0  ;;  %v5232_v35 = vpack.c.b16 %v5215_v38, %v5214_v56 }
 0x326   : > { %14582 = vst [vmem:[#allocation8_spill] sm:$0xff] %v13009_v54  ;;  %v5540_v14 = vpop.f32.mrf.mxu2  ;;  %v5152_v15 = vor.u32 %v5151_v33, %v5148_v22  ;;  %v6344_v33 = vld [vmem:[#allocation2 + $0xc] sm:$0xf] }
 0x327   : > { %v4544_v7 = vor.u32 %v4542_v1, %v4541_v52  ;;  %v4204_v42 = vmax.f32 %v4172_v39, 0.0  ;;  %v5541_v21 = vadd.f32 %v5540_v14, %v12718_v6  ;;  %v4545_v48 = vrot.slane %v4541_v52, 4 }
 0x328   : > { %v13014_v29 = vpop.f32.mrf.mxu1  ;;  %v5153_v22 = vrot.slane %v5152_v15, 4  ;;  %v6396_v19 = vshll.u32 %v6344_v33, 16 }
 0x329   : > { %v4715_v58 = vsel %vm12098_vm13, %v4544_v7, %v4714_v34  ;;  %v4279_v24 = vpack.c.bf16 %v4204_v42, %v4204_v42  ;;  %v13016_v4 = vadd.f32 %v5918_v46, %v5541_v21  ;;  %v13018_v41 = vld [vmem:[#allocation2 + $0xb8] sm:$0xf]  ;;  %v13035_v34 = vld [vmem:[#allocation2 + $0x10] sm:$0xf] }
 0x32a   : > { %4716 = vst [vmem:[#allocation2 + $0xc0] sm:$0xf] %v4715_v58  ;;  %v5920_v55 = vpop.f32.mrf.mxu3  ;;  %v13020_v45 = vld [vmem:[#allocation2 + $0xbc] sm:$0x1]  ;;  %v5155_v44 = vshll.u32 %v13018_v41, 16  ;;  %v5159_v6 = vshrl.u32 %v13018_v41, 16 }
 0x32b   : > { %v4547_v28 = vshrl.u32 %v4279_v24, 16  ;;  %5376 = vmatmul.bf16.gmra.mxu1 %v5232_v35  ;;  %v5165_v46 = vshll.u32 %v13020_v45, 16  ;;  %v4550_v36 = vshll.u32 %v4279_v24, 16  ;;  %v10370_v35 = vld [vmem:[#allocation2 + $0x6c] sm:$0xff]  ;;  %v6402_v58 = vshll.u32 %v13035_v34, 16 }
 0x32c   : > { %v5157_v20 = vrot.slane %v5155_v44, 5  ;;  %v5161_v8 = vrot.slane %v5159_v6, 4  ;;  %v6406_v24 = vshrl.u32 %v13035_v34, 16 }
 0x32d   : > { %v4549_v9 = vrot.slane %v4547_v28, 7  ;;  %v13031_v60 = vpop.f32.mrf.mxu0  ;;  %v5167_v56 = vrot.slane %v5165_v46, 5  ;;  %v13053_v28 = vrot.slane %v6402_v58, 5  ;;  %v6393_v46 = vshrl.u32 %v6344_v33, 16  ;;  %v13071_v58 = vld [vmem:[#allocation2 + $0x1c] sm:$0xf] }
 0x32e   : > { %14583 = vst [vmem:[#allocation9_spill] sm:$0xff] %v13031_v60  ;;  %v5542_v12 = vpop.f32.mrf.mxu2  ;;  %v5162_v0 = vor.u32 %v5161_v8, %v5157_v20  ;;  %v5158_v32 = vsel %vm10707_vm4, %v5153_v22, %v5157_v20  ;;  %v6408_v3 = vrot.slane %v6406_v24, 4  ;;  %v5757_v22 = vrot.slane %v12893_v13, 5  ;;  %v10371_v13 = vld [vmem:[#allocation2 + $0x78] sm:$0xff] }
 0x32f   : > { %v4552_v1 = vor.u32 %v4550_v36, %v4549_v9  ;;  %v4554_v39 = vrot.slane %v4549_v9, 4  ;;  %5962 = vmatmul.bf16.gmra.mxu3 %v12933_v23  ;;  %v5543_v38 = vadd.f32 %v5542_v12, %v12748_v43  ;;  %v5216_v6 = vunpack.c.l.b16 %v5158_v32  ;;  %v6347_v33 = vld [vmem:[#allocation2 + $0x18] sm:$0xf] }
 0x330   : > { %6276 = vmatmul.bf16.gmra.mxu0 %v10410_v26  ;;  %v5163_v14 = vrot.slane %v5162_v0, 4  ;;  %v13041_v21 = vpop.f32.mrf.mxu1  ;;  %v6409_v12 = vor.u32 %v6408_v3, %v13053_v28  ;;  %v6395_v26 = vrot.slane %v6393_v46, 4  ;;  %v6398_v0 = vrot.slane %v6396_v19, 5  ;;  %v10439_v19 = vld [vmem:[%s14513_s3 + $0x170] sm:$0xff] }
 0x331   : > { %v4553_v7 = vsel %vm12135_vm14, %v4545_v48, %v4552_v1  ;;  %v4719_v42 = vsel %vm12143_vm15, %v4554_v39, %v4718_v31  ;;  %v13043_v52 = vadd.f32 %v5920_v55, %v5543_v38  ;;  %v13060_v31 = vld [vmem:[#allocation2 + $0x14] sm:$0x1]  ;;  %v5632_v1 = vld [vmem:[#allocation2 + $0x90] sm:$0xe]  ;;  %v6430_v46 = vshrl.u32 %v13071_v58, 16  ;;  %7332 = vmatpush.bf16.msra.mxu2 %v10439_v19 }
 0x332   : > { %4717 = vst [vmem:[#allocation2 + $0xc4] sm:$0xf] %v4553_v7  ;;  %v5923_v23 = vpop.f32.mrf.mxu3  ;;  %v5168_v43 = vsel %vm10707_vm4, %v5163_v14, %v5167_v56  ;;  %v6412_v48 = vshll.u32 %v13060_v31, 16  ;;  %v9810_v38 = vrot.slane %v5632_v1, 9  ;;  %v10411_v56 = vld [vmem:[#allocation2 + $0x84] sm:$0xff]  ;;  %v6410_v7 = vrot.slane %v6409_v12, 4 }
 0x333   : > { %14584 = vst [vmem:[#allocation10_spill] sm:$0xff] %v13043_v52  ;;  %5584 = vmatmul.bf16.gmra.mxu2 %v10370_v35  ;;  %v5217_v30 = vunpack.c.l.b16 %v5168_v43  ;;  %v6399_v43 = vor.u32 %v6398_v0, %v6395_v26  ;;  %v5631_v12 = vld [vmem:[#allocation2 + $0x84] sm:$0xe]  ;;  %v5750_v0 = vrot.slane %v12843_v16, 5  ;;  %v5761_v19 = vrot.slane %v12931_v25, 5 }
 0x334   : > { %4720 = vst [vmem:[#allocation2 + $0xc8] sm:$0x1] %v4719_v42  ;;  %v5747_v42 = vrot.slane %v12836_v2, 5  ;;  %v6414_v24 = vrot.slane %v6412_v48, 5  ;;  %v13298_v52 = vld [vmem:[#allocation2 + $0x40] sm:$0xf] }
 0x335   : > { %v13051_v55 = vpop.f32.mrf.mxu0  ;;  %v5233_v9 = vpack.c.b16 %v5217_v30, %v5216_v6 }
 0x336   : > { %14585 = vst [vmem:[#allocation11_spill] sm:$0xff] %v13051_v55  ;;  %v5545_v44 = vpop.f32.mrf.mxu2  ;;  %v6415_v6 = vsel %vm10707_vm4, %v6410_v7, %v6414_v24  ;;  %v5749_v3 = vrot.slane %v5747_v42, 4  ;;  %v9809_v7 = vrot.slane %v5631_v12, 9  ;;  %v10373_v55 = vld [vmem:[#allocation2 + $0x90] sm:$0xff] }
 0x337   : > { %v5546_v8 = vadd.f32 %v5545_v44, %v12766_v63  ;;  %v5754_v63 = vrot.slane %v12886_v40, 5  ;;  %v6794_v1 = vunpack.c.l.b16 %v6415_v6 }
 0x338   : > { %v13056_v36 = vpop.f32.mrf.mxu1 }
 0x339   : > { %v13058_v15 = vadd.f32 %v5923_v23, %v5546_v8  ;;  %v5756_v35 = vrot.slane %v5754_v63, 4  ;;  %v5755_v40 = vsel %vm10927_vm7, %v9810_v38, %v5754_v63  ;;  %v6426_v8 = vshll.u32 %v13071_v58, 16 }
 0x33a   : > { %v5925_v20 = vpop.f32.mrf.mxu3  ;;  %v6417_v38 = vshrl.u32 %v6347_v33, 16 }
 0x33b   : > { %14586 = vst [vmem:[#allocation12_spill] sm:$0xff] %v13058_v15  ;;  %5381 = vmatmul.bf16.gmra.mxu1 %v5233_v9  ;;  %v5758_v32 = vsel %vm10927_vm7, %v5756_v35, %v5757_v22  ;;  %v10463_v9 = vld [vmem:[%s14513_s3 + $0x1b0] sm:$0xff]  ;;  %v5751_v35 = vsel %vm10927_vm7, %v5749_v3, %v5750_v0  ;;  %v13101_v22 = vrot.slane %v6426_v8, 5  ;;  %v13123_v0 = vld [vmem:[#allocation2 + $0x28] sm:$0xf] }
 0x33c   : > { %v5822_v44 = vunpack.c.l.b16 %v5758_v32  ;;  %7647 = vmatpush.bf16.msra.mxu3 %v10463_v9  ;;  %v5820_v32 = vunpack.c.l.b16 %v5751_v35 }
 0x33d   : > { %v13065_v39 = vpop.f32.mrf.mxu0 }
 0x33e   : > { %14587 = vst [vmem:[#allocation14_spill] sm:$0xff] %v13065_v39  ;;  %v5547_v14 = vpop.f32.mrf.mxu2  ;;  %v13171_v39 = vld [vmem:[#allocation2 + $0x40] sm:$0xf] }
 0x33f   : > { %5967 = vmatmul.bf16.gmra.mxu3 %v12984_v5  ;;  %v5548_v23 = vadd.f32 %v5547_v14, %v12798_v49  ;;  %v5821_v5 = vunpack.c.l.b16 %v5755_v40  ;;  %v6420_v14 = vshll.u32 %v6347_v33, 16  ;;  %v5748_v40 = vsel %vm10927_vm7, %v9809_v7, %v5747_v42 }
 0x340   : > { %6281 = vmatmul.bf16.gmra.mxu0 %v10411_v56  ;;  %v13077_v30 = vpop.f32.mrf.mxu1  ;;  %v6419_v33 = vrot.slane %v6417_v38, 4  ;;  %v5819_v8 = vunpack.c.l.b16 %v5748_v40  ;;  %v10412_v38 = vld [vmem:[#allocation2 + $0x90] sm:$0xff]  ;;  %v5764_v7 = vrot.slane %v12938_v53, 5  ;;  %v6454_v40 = vshrl.u32 %v13123_v0, 16  ;;  %v10372_v53 = vld [vmem:[#allocation2 + $0x84] sm:$0xff] }
 0x341   : > { %v13079_v2 = vadd.f32 %v5925_v20, %v5548_v23  ;;  %v6400_v20 = vrot.slane %v6399_v43, 4  ;;  %v13091_v26 = vpack.c.b16 %v5822_v44, %v5821_v5  ;;  %v6432_v23 = vrot.slane %v6430_v46, 4  ;;  %v5633_v46 = vld [vmem:[#allocation2 + $0x9c] sm:$0xe] }
 0x342   : > { %v5928_v49 = vpop.f32.mrf.mxu3  ;;  %v6422_v5 = vrot.slane %v6420_v14, 5  ;;  %v5840_v9 = vpack.c.b16 %v5820_v32, %v5819_v8 }
 0x343   : > { %14588 = vst [vmem:[#allocation13_spill] sm:$0xff] %v13079_v2  ;;  %5589 = vmatmul.bf16.gmra.mxu2 %v10371_v13  ;;  %v6405_v48 = vsel %vm10707_vm4, %v6400_v20, %v13053_v28  ;;  %v13110_v13 = vld [vmem:[#allocation2 + $0x20] sm:$0x1]  ;;  %v6433_v3 = vor.u32 %v6432_v23, %v13101_v22  ;;  %v6350_v23 = vld [vmem:[#allocation2 + $0x24] sm:$0xf] }
 0x344   : > { %v6793_v43 = vunpack.c.l.b16 %v6405_v48  ;;  %v6436_v42 = vshll.u32 %v13110_v13, 16  ;;  %v6423_v12 = vor.u32 %v6422_v5, %v6419_v33  ;;  %v9811_v48 = vrot.slane %v5633_v46, 9  ;;  %v6354_v46 = vld [vmem:[#allocation2 + $0x34] sm:$0xf] }
 0x345   : > { %v13097_v63 = vpop.f32.mrf.mxu0  ;;  %v6434_v14 = vrot.slane %v6433_v3, 4 }
 0x346   : > { %14589 = vst [vmem:[#allocation16_spill] sm:$0xff] %v13097_v63  ;;  %v5550_v56 = vpop.f32.mrf.mxu2  ;;  %v6825_v6 = vpack.c.b16 %v6794_v1, %v6793_v43  ;;  %v5762_v25 = vsel %vm10927_vm7, %v9811_v48, %v5761_v19  ;;  %v6450_v43 = vshll.u32 %v13123_v0, 16 }
 0x347   : > { %v5551_v16 = vadd.f32 %v5550_v56, %v12816_v10  ;;  %v10471_v10 = vld [vmem:[%s14513_s3 + $0x1f0] sm:$0xff]  ;;  %v5763_v56 = vrot.slane %v5761_v19, 4 }
 0x348   : > { %v13106_v28 = vpop.f32.mrf.mxu1  ;;  %8329 = vmatpush.bf16.msra.mxu0 %v10471_v10  ;;  %v7029_v19 = vld [vmem:[#allocation2 + $0x30] sm:$0xe] }
 0x349   : > { %v13108_v24 = vadd.f32 %v5928_v49, %v5551_v16  ;;  %v10479_v49 = vld [vmem:[%s14513_s3 + $0x230] sm:$0xff]  ;;  %v6438_v16 = vrot.slane %v6436_v42, 5  ;;  %v5765_v32 = vsel %vm10927_vm7, %v5763_v56, %v5764_v7  ;;  %v6441_v42 = vshrl.u32 %v6350_v23, 16 }
 0x34a   : > { %v5930_v44 = vpop.f32.mrf.mxu3  ;;  %8755 = vmatpush.bf16.msra.mxu1 %v10479_v49  ;;  %v5824_v3 = vunpack.c.l.b16 %v5765_v32  ;;  %v6444_v49 = vshll.u32 %v6350_v23, 16  ;;  %v7113_v7 = vrot.slane %v6354_v46, 5 }
 0x34b   : > { %14590 = vst [vmem:[#allocation17_spill] sm:$0xff] %v13108_v24  ;;  %6913 = vmatmul.bf16.vlgmr.msrb.gmra.mxu1 %v6825_v6  ;;  %v6424_v6 = vrot.slane %v6423_v12, 4  ;;  %v6439_v8 = vsel %vm10707_vm4, %v6434_v14, %v6438_v16  ;;  %v6456_v12 = vrot.slane %v6454_v40, 4  ;;  %v10025_v14 = vrot.slane %v7029_v19, 9 }
 0x34c   : > { %v6443_v16 = vrot.slane %v6441_v42, 4  ;;  %v6446_v32 = vrot.slane %v6444_v49, 5  ;;  %v6353_v49 = vld [vmem:[#allocation2 + $0x30] sm:$0xf] }
 0x34d   : > { %v13121_v20 = vpop.f32.mrf.mxu0 }
 0x34e   : > { %14591 = vst [vmem:[#allocation15_spill] sm:$0xff] %v13121_v20  ;;  %v5552_v1 = vpop.f32.mrf.mxu2  ;;  %v6447_v20 = vor.u32 %v6446_v32, %v6443_v16  ;;  %v7030_v32 = vld [vmem:[#allocation2 + $0x3c] sm:$0xe] }
 0x34f   : > { %5972 = vmatmul.bf16.gmra.mxu3 %v5840_v9  ;;  %v5553_v35 = vadd.f32 %v5552_v1, %v12855_v18  ;;  %v5823_v18 = vunpack.c.l.b16 %v5762_v25  ;;  %v6429_v9 = vsel %vm10707_vm4, %v6424_v6, %v13101_v22  ;;  %v13146_v1 = vld [vmem:[#allocation2 + $0x38] sm:$0x1]  ;;  %v13150_v25 = vld [vmem:[#allocation2 + $0x2c] sm:$0x1] }
 0x350   : > { %6286 = vmatmul.bf16.gmra.mxu0 %v10412_v38  ;;  %v13133_v33 = vpop.f32.mrf.mxu1  ;;  %v6796_v38 = vunpack.c.l.b16 %v6439_v8  ;;  %v6795_v23 = vunpack.c.l.b16 %v6429_v9  ;;  %v7116_v40 = vrot.slane %v13146_v1, 5  ;;  %v6460_v42 = vshll.u32 %v13150_v25, 16 }
 0x351   : > { %v13135_v5 = vadd.f32 %v5930_v44, %v5553_v35  ;;  %v13142_v48 = vpack.c.b16 %v5824_v3, %v5823_v18  ;;  %v13144_v44 = vrot.slane %v6450_v43, 5  ;;  %v7114_v43 = vsel %vm10927_vm7, %v10025_v14, %v7113_v7  ;;  %v13157_v18 = vld [vmem:[#allocation2 + $0x1c] sm:$0xf] }
 0x352   : > { %v5933_v10 = vpop.f32.mrf.mxu3  ;;  %v6826_v19 = vpack.c.b16 %v6796_v38, %v6795_v23  ;;  %v6474_v14 = vshll.u32 %v6354_v46, 16  ;;  %v8449_v38 = vld [vmem:[#allocation2 + $0x18] sm:$0xe] }
 0x353   : > { %14592 = vst [vmem:[#allocation19_spill] sm:$0xff] %v13135_v5  ;;  %5594 = vmatmul.bf16.gmra.mxu2 %v10372_v53  ;;  %v7115_v53 = vrot.slane %v7113_v7, 4  ;;  %v6457_v6 = vor.u32 %v6456_v12, %v13144_v44  ;;  %v6478_v7 = vshrl.u32 %v6354_v46, 16  ;;  %v8515_v12 = vrot.slane %v13157_v18, 5 }
 0x354   : > { %v6465_v5 = vshrl.u32 %v6353_v49, 16 }
 0x355   : > { %v13148_v56 = vpop.f32.mrf.mxu0  ;;  %v6458_v63 = vrot.slane %v6457_v6, 4  ;;  %v6480_v16 = vrot.slane %v6478_v7, 4  ;;  %v6448_v6 = vrot.slane %v6447_v20, 4  ;;  %v7120_v20 = vrot.slane %v13171_v39, 5 }
 0x356   : > { %14593 = vst [vmem:[#allocation20_spill] sm:$0xff] %v13148_v56  ;;  %v5555_v35 = vpop.f32.mrf.mxu2 }
 0x357   : > { %v5556_v22 = vadd.f32 %v5555_v35, %v12880_v61  ;;  %v7117_v61 = vsel %vm10927_vm7, %v7115_v53, %v7116_v40  ;;  %v7225_v35 = vunpack.c.l.b16 %v7114_v43  ;;  %v13173_v53 = vld [vmem:[#allocation2 + $0x20] sm:$0x1]  ;;  %v13175_v40 = vrot.slane %v6474_v14, 5 }
 0x358   : > { %v13159_v3 = vpop.f32.mrf.mxu1  ;;  %v7226_v56 = vunpack.c.l.b16 %v7117_v61  ;;  %v10413_v43 = vld [vmem:[#allocation2 + $0x9c] sm:$0xff]  ;;  %v6467_v61 = vrot.slane %v6465_v5, 4  ;;  %v8518_v14 = vrot.slane %v13173_v53, 5 }
 0x359   : > { %v13161_v8 = vadd.f32 %v5933_v10, %v5556_v22  ;;  %v6468_v10 = vshll.u32 %v6353_v49, 16  ;;  %v10246_v49 = vrot.slane %v8449_v38, 9  ;;  %v6481_v5 = vor.u32 %v6480_v16, %v13175_v40 }
 0x35a   : > { %v5935_v9 = vpop.f32.mrf.mxu3  ;;  %v13167_v22 = vpack.c.b16 %v7226_v56, %v7225_v35  ;;  %v7122_v16 = vrot.slane %v7120_v20, 4 }
 0x35b   : > { %14594 = vst [vmem:[#allocation18_spill] sm:$0xff] %v13161_v8  ;;  %6918 = vmatmul.bf16.gmra.mxu1 %v6826_v19  ;;  %v6462_v8 = vrot.slane %v6460_v42, 5  ;;  %v8517_v19 = vrot.slane %v8515_v12, 4  ;;  %v6470_v35 = vrot.slane %v6468_v10, 5  ;;  %v8516_v38 = vsel %vm10927_vm7, %v10246_v49, %v8515_v12 }
 0x35c   : > { %14595 = vst [vmem:[#allocation22_spill] sm:$0xff] %v13167_v22  ;;  %v6453_v12 = vsel %vm10707_vm4, %v6448_v6, %v13144_v44  ;;  %v8642_v2 = vunpack.c.l.b16 %v8516_v38  ;;  %v6482_v60 = vrot.slane %v6481_v5, 4  ;;  %v6356_v38 = vld [vmem:[#allocation2 + $0x3c] sm:$0xf] }
 0x35d   : > { %v13169_v23 = vpop.f32.mrf.mxu0  ;;  %v6463_v42 = vsel %vm10707_vm4, %v6458_v63, %v6462_v8  ;;  %v10438_v8 = vld [vmem:[%s14513_s3 + $0x168] sm:$0xff]  ;;  %v8519_v10 = vsel %vm10927_vm7, %v8517_v19, %v8518_v14  ;;  %v6471_v49 = vor.u32 %v6470_v35, %v6467_v61 }
 0x35e   : > { %14596 = vst [vmem:[#allocation3_spill] sm:$0xff] %v13169_v23  ;;  %v5557_v46 = vpop.f32.mrf.mxu2  ;;  %v13181_v23 = vld [vmem:[#allocation2 + $0x44] sm:$0x1]  ;;  %7333 = vmatpush.bf16.msra.mxu2 %v10438_v8  ;;  %v8643_v19 = vunpack.c.l.b16 %v8519_v10 }
 0x35f   : > { %5977 = vmatmul.bf16.gmra.mxu3 %v13091_v26  ;;  %v5558_v56 = vadd.f32 %v5557_v46, %v12905_v50  ;;  %v13188_v26 = vld [vmem:[#allocation2 + $0x28] sm:$0xf]  ;;  %v10026_v50 = vrot.slane %v7030_v32, 9  ;;  %v8450_v46 = vld [vmem:[#allocation2 + $0x24] sm:$0xe]  ;;  %v7123_v32 = vrot.slane %v13181_v23, 5 }
 0x360   : > { %6291 = vmatmul.bf16.gmra.mxu0 %v10413_v43  ;;  %v13184_v24 = vpop.f32.mrf.mxu1  ;;  %v10247_v6 = vrot.slane %v8450_v46, 9  ;;  %v13216_v35 = vpack.c.b16 %v8643_v19, %v8642_v2 }
 0x361   : > { %v13186_v7 = vadd.f32 %v5935_v9, %v5558_v56  ;;  %v10462_v9 = vld [vmem:[%s14513_s3 + $0x1a8] sm:$0xff]  ;;  %v7121_v43 = vsel %vm10927_vm7, %v10026_v50, %v7120_v20  ;;  %v6798_v56 = vunpack.c.l.b16 %v6463_v42  ;;  %v7124_v44 = vsel %vm10927_vm7, %v7122_v16, %v7123_v32  ;;  %v13222_v16 = vld [vmem:[#allocation2 + $0x34] sm:$0xf] }
 0x362   : > { %v5938_v63 = vpop.f32.mrf.mxu3  ;;  %7648 = vmatpush.bf16.msra.mxu3 %v10462_v9  ;;  %v8522_v50 = vrot.slane %v13188_v26, 5  ;;  %v7227_v42 = vunpack.c.l.b16 %v7121_v43  ;;  %v7228_v61 = vunpack.c.l.b16 %v7124_v44  ;;  %14599 = vst [vmem:[#allocation23_spill] sm:$0xff] %v13216_v35  ;;  %v13230_v43 = vld [vmem:[#allocation2 + $0x38] sm:$0x1] }
 0x363   : > { %14597 = vst [vmem:[#allocation21_spill] sm:$0xff] %v13186_v7  ;;  %5599 = vmatmul.bf16.gmra.mxu2 %v10373_v55  ;;  %v13208_v7 = vld [vmem:[#allocation2 + $0x2c] sm:$0x1]  ;;  %v6484_v55 = vshll.u32 %v13146_v1, 16 }
 0x364   : > { %v8523_v9 = vsel %vm10927_vm7, %v10247_v6, %v8522_v50  ;;  %v8524_v10 = vrot.slane %v8522_v50, 4  ;;  %v8525_v1 = vrot.slane %v13208_v7, 5  ;;  %v13224_v46 = vpack.c.b16 %v7228_v61, %v7227_v42  ;;  %v10470_v6 = vld [vmem:[%s14513_s3 + $0x1e8] sm:$0xff]  ;;  %v8451_v42 = vld [vmem:[#allocation2 + $0x30] sm:$0xe] }
 0x365   : > { %v13210_v14 = vpop.f32.mrf.mxu0  ;;  %v6486_v2 = vrot.slane %v6484_v55, 5  ;;  %v6489_v50 = vshrl.u32 %v6356_v38, 16  ;;  %v13240_v55 = vrot.slane %v6471_v49, 4  ;;  %8330 = vmatpush.bf16.msra.mxu0 %v10470_v6  ;;  %v6360_v49 = vld [vmem:[#allocation2 + $0x4c] sm:$0xf] }
 0x366   : > { %14598 = vst [vmem:[#allocation4_spill] sm:$0xff] %v13210_v14  ;;  %v5560_v20 = vpop.f32.mrf.mxu2  ;;  %v6797_v14 = vunpack.c.l.b16 %v6453_v12  ;;  %v10461_v12 = vld [vmem:[%s14513_s3 + $0x1a0] sm:$0xff]  ;;  %v7031_v6 = vld [vmem:[#allocation2 + $0x48] sm:$0xe] }
 0x367   : > { %v5561_v8 = vadd.f32 %v5560_v20, %v12926_v47  ;;  %14600 = vst [vmem:[#allocation5_spill] sm:$0xff] %v13224_v46  ;;  %v8526_v47 = vsel %vm10927_vm7, %v8524_v10, %v8525_v1  ;;  %v8644_v20 = vunpack.c.l.b16 %v8523_v9  ;;  %v6487_v61 = vsel %vm10707_vm4, %v6482_v60, %v6486_v2  ;;  %7649 = vmatpush.bf16.msra.mxu3 %v10461_v12  ;;  %v10478_v9 = vld [vmem:[%s14513_s3 + $0x228] sm:$0xff] }
 0x368   : > { %v13226_v32 = vpop.f32.mrf.mxu1  ;;  %v6827_v44 = vpack.c.b16 %v6798_v56, %v6797_v14  ;;  %v6492_v56 = vshll.u32 %v6356_v38, 16  ;;  %v6498_v14 = vshll.u32 %v13171_v39, 16  ;;  %v6502_v10 = vshrl.u32 %v13171_v39, 16  ;;  %v10414_v38 = vld [vmem:[#allocation2 + $0xa8] sm:$0xff]  ;;  %8756 = vmatpush.bf16.msra.mxu1 %v10478_v9 }
 0x369   : > { %v13228_v5 = vadd.f32 %v5938_v63, %v5561_v8  ;;  %v8645_v63 = vunpack.c.l.b16 %v8526_v47  ;;  %v8529_v8 = vrot.slane %v13222_v16, 5  ;;  %v10248_v47 = vrot.slane %v8451_v42, 9  ;;  %v10460_v42 = vld [vmem:[%s14513_s3 + $0x198] sm:$0xff] }
 0x36a   : > { %v5940_v19 = vpop.f32.mrf.mxu3  ;;  %v8532_v60 = vrot.slane %v13230_v43, 5  ;;  %v6477_v39 = vsel %vm10707_vm4, %v13240_v55, %v13175_v40  ;;  %v5768_v12 = vrot.slane %v12975_v11, 5  ;;  %v13275_v55 = vrot.slane %v6498_v14, 5  ;;  %v10459_v14 = vld [vmem:[%s14513_s3 + $0x190] sm:$0xff] }
 0x36b   : > { %14601 = vst [vmem:[#allocation6_spill] sm:$0xff] %v13228_v5  ;;  %6923 = vmatmul.bf16.gmra.mxu1 %v6827_v44  ;;  %v13250_v1 = vpack.c.b16 %v8645_v63, %v8644_v20  ;;  %v8531_v35 = vrot.slane %v8529_v8, 4  ;;  %v13260_v5 = vrot.slane %v6489_v50, 4  ;;  %v13264_v63 = vunpack.c.l.b16 %v6487_v61  ;;  %7650 = vmatpush.bf16.msra.mxu3 %v10460_v42 }
 0x36c   : > { %v8530_v40 = vsel %vm10927_vm7, %v10248_v47, %v8529_v8  ;;  %v13273_v50 = vrot.slane %v6492_v56, 5  ;;  %v6522_v61 = vshll.u32 %v6360_v49, 16  ;;  %v6526_v46 = vshrl.u32 %v6360_v49, 16 }
 0x36d   : > { %14602 = vst [vmem:[#allocation7_spill] sm:$0xff] %v13250_v1  ;;  %v13253_v44 = vpop.f32.mrf.mxu0  ;;  %v6359_v1 = vld [vmem:[#allocation2 + $0x48] sm:$0xf]  ;;  %v8533_v11 = vsel %vm10927_vm7, %v8531_v35, %v8532_v60  ;;  %v10027_v8 = vrot.slane %v7031_v6, 9  ;;  %v7127_v47 = vrot.slane %v6360_v49, 5  ;;  %v5770_v35 = vrot.slane %v5768_v12, 4 }
 0x36e   : > { %v5562_v2 = vpop.f32.mrf.mxu2  ;;  %14603 = vst [vmem:[#allocation24_spill] sm:$0xff] %v13253_v44  ;;  %v10374_v44 = vld [vmem:[#allocation2 + $0x9c] sm:$0xff]  ;;  %v6508_v56 = vshll.u32 %v13181_v23, 16  ;;  %v8646_v60 = vunpack.c.l.b16 %v8530_v40  ;;  %v5634_v49 = vld [vmem:[#allocation2 + $0xa8] sm:$0xe]  ;;  %v6513_v6 = vshrl.u32 %v6359_v1, 16 }
 0x36f   : > { %5982 = vmatmul.bf16.gmra.mxu3 %v13142_v48  ;;  %v5563_v20 = vadd.f32 %v5562_v2, %v12947_v59  ;;  %v6504_v48 = vrot.slane %v6502_v10, 4  ;;  %v13277_v59 = vld [vmem:[#allocation2 + $0x50] sm:$0x1]  ;;  %v10437_v10 = vld [vmem:[%s14513_s3 + $0x160] sm:$0xff]  ;;  %v7128_v23 = vsel %vm10927_vm7, %v10027_v8, %v7127_v47  ;;  %v6516_v54 = vshll.u32 %v6359_v1, 16 }
 0x370   : > { %6296 = vmatmul.bf16.gmra.mxu0 %v10414_v38  ;;  %v13279_v9 = vpop.f32.mrf.mxu1  ;;  %v8647_v38 = vunpack.c.l.b16 %v8533_v11  ;;  %v7130_v42 = vrot.slane %v13277_v59, 5  ;;  %7334 = vmatpush.bf16.msra.mxu2 %v10437_v10  ;;  %v10458_v11 = vld [vmem:[%s14513_s3 + $0x188] sm:$0xff]  ;;  %v13307_v8 = vrot.slane %v6522_v61, 5  ;;  %v9812_v1 = vrot.slane %v5634_v49, 9  ;;  %v13319_v49 = vld [vmem:[#allocation2 + $0x44] sm:$0x1] }
 0x371   : > { %14604 = vst [vmem:[#allocation25_spill] sm:$0xff] %v13279_v9  ;;  %v13281_v2 = vadd.f32 %v5940_v19, %v5563_v20  ;;  %v10469_v19 = vld [vmem:[%s14513_s3 + $0x1e0] sm:$0xff]  ;;  %v7129_v20 = vrot.slane %v7127_v47, 4  ;;  %v6505_v22 = vor.u32 %v6504_v48, %v13275_v55  ;;  %7651 = vmatpush.bf16.msra.mxu3 %v10459_v14  ;;  %v6515_v14 = vrot.slane %v6513_v6, 4  ;;  %v7026_v6 = vld [vmem:[#allocation2 + $0xc] sm:$0xe] }
 0x372   : > { %v5943_v15 = vpop.f32.mrf.mxu3  ;;  %8331 = vmatpush.bf16.msra.mxu0 %v10469_v19  ;;  %v13300_v40 = vpack.c.b16 %v8647_v38, %v8646_v60  ;;  %v7229_v19 = vunpack.c.l.b16 %v7128_v23  ;;  %v8452_v38 = vld [vmem:[#allocation2 + $0x3c] sm:$0xe] }
 0x373   : > { %14605 = vst [vmem:[#allocation26_spill] sm:$0xff] %v13281_v2  ;;  %5604 = vmatmul.bf16.gmra.mxu2 %v10374_v44  ;;  %v5771_v2 = vrot.slane %v12979_v17, 5  ;;  %v6495_v44 = vor.u32 %v13273_v50, %v13260_v5  ;;  %v6528_v17 = vrot.slane %v6526_v46, 4  ;;  %v7131_v48 = vsel %vm10927_vm7, %v7129_v20, %v7130_v42 }
 0x374   : > { %14606 = vst [vmem:[#allocation27_spill] sm:$0xff] %v13300_v40  ;;  %v7230_v60 = vunpack.c.l.b16 %v7131_v48  ;;  %v6799_v50 = vunpack.c.l.b16 %v6477_v39  ;;  %v8536_v40 = vrot.slane %v13298_v52, 5  ;;  %v5769_v46 = vsel %vm10927_vm7, %v9812_v1, %v5768_v12 }
 0x375   : > { %v5772_v10 = vsel %vm10927_vm7, %v5770_v35, %v5771_v2  ;;  %v13317_v61 = vpop.f32.mrf.mxu0  ;;  %v6506_v20 = vrot.slane %v6505_v22, 4  ;;  %v6518_v42 = vrot.slane %v6516_v54, 5  ;;  %7652 = vmatpush.bf16.msra.mxu3 %v10458_v11  ;;  %v10249_v23 = vrot.slane %v8452_v38, 9  ;;  %v10436_v54 = vld [vmem:[%s14513_s3 + $0x158] sm:$0xff]  ;;  %v10457_v11 = vld [vmem:[%s14513_s3 + $0x180] sm:$0xff] }
 0x376   : > { %v5565_v47 = vpop.f32.mrf.mxu2  ;;  %14607 = vst [vmem:[#allocation28_spill] sm:$0xff] %v13317_v61  ;;  %v13321_v9 = vpack.c.b16 %v7230_v60, %v7229_v19  ;;  %v5826_v39 = vunpack.c.l.b16 %v5772_v10  ;;  %v6496_v12 = vrot.slane %v6495_v44, 4  ;;  %v10468_v22 = vld [vmem:[%s14513_s3 + $0x1d8] sm:$0xff]  ;;  %v6532_v1 = vshll.u32 %v13277_v59, 16  ;;  %7335 = vmatpush.bf16.msra.mxu2 %v10436_v54  ;;  %v10435_v59 = vld [vmem:[%s14513_s3 + $0x150] sm:$0xff] }
 0x377   : > { %v5566_v5 = vadd.f32 %v5565_v47, %v12973_v62  ;;  %v6828_v62 = vpack.c.b16 %v13264_v63, %v6799_v50  ;;  %v6510_v47 = vrot.slane %v6508_v56, 5  ;;  %v5825_v63 = vunpack.c.l.b16 %v5769_v46  ;;  %8332 = vmatpush.bf16.msra.mxu0 %v10468_v22 }
 0x378   : > { %14608 = vst [vmem:[#allocation29_spill] sm:$0xff] %v13321_v9  ;;  %v13323_v2 = vpop.f32.mrf.mxu1  ;;  %v8537_v56 = vsel %vm10927_vm7, %v10249_v23, %v8536_v40  ;;  %v8538_v44 = vrot.slane %v8536_v40, 4  ;;  %v8539_v10 = vrot.slane %v13319_v49, 5  ;;  %v6519_v60 = vor.u32 %v6518_v42, %v6515_v14  ;;  %v7773_v9 = vld [vmem:[#allocation2 + $0x30] sm:$0xf] }
 0x379   : > { %v13325_v35 = vadd.f32 %v5943_v15, %v5566_v5  ;;  %v6529_v15 = vor.u32 %v6528_v17, %v13307_v8  ;;  %v6511_v19 = vsel %vm10707_vm4, %v6506_v20, %v6510_v47  ;;  %v10022_v17 = vrot.slane %v7026_v6, 9  ;;  %7653 = vmatpush.bf16.msra.mxu3 %v10457_v11  ;;  %v10415_v20 = vld [vmem:[#allocation2 + $0xb4] sm:$0xff] }
 0x37a   : > { %v5945_v48 = vpop.f32.mrf.mxu3  ;;  %v5843_v38 = vpack.c.b16 %v5826_v39, %v5825_v63  ;;  %v6501_v5 = vsel %vm10707_vm4, %v6496_v12, %v13275_v55  ;;  %v7092_v40 = vrot.slane %v13035_v34, 5  ;;  %v8540_v50 = vsel %vm10927_vm7, %v8538_v44, %v8539_v10  ;;  %v10467_v34 = vld [vmem:[%s14513_s3 + $0x1d0] sm:$0xff]  ;;  %v13360_v12 = vld [vmem:[#allocation2 + $0x58] sm:$0xf]  ;;  %7336 = vmatpush.bf16.msra.mxu2 %v10435_v59 }
 0x37b   : > { %14609 = vst [vmem:[#allocation30_spill] sm:$0xff] %v13325_v35  ;;  %6928 = vmatmul.bf16.gmra.mxu1 %v6828_v62  ;;  %v14516_v14 = vrot.slane %v13018_v41, 5  ;;  %v6530_v42 = vrot.slane %v6529_v15, 4  ;;  %v8648_v62 = vunpack.c.l.b16 %v8537_v56  ;;  %v8649_v23 = vunpack.c.l.b16 %v8540_v50  ;;  %v7032_v47 = vld [vmem:[#allocation2 + $0x54] sm:$0xe]  ;;  %v10375_v56 = vld [vmem:[#allocation2 + $0xa8] sm:$0xff]  ;;  %8333 = vmatpush.bf16.msra.mxu0 %v10467_v34 }
 0x37c   : > { %v13355_v6 = vunpack.c.l.b16 %v6511_v19  ;;  %v6534_v55 = vrot.slane %v6532_v1, 5  ;;  %v13362_v54 = vunpack.c.l.b16 %v6501_v5  ;;  %v6520_v22 = vrot.slane %v6519_v60, 4  ;;  %v13365_v63 = vld [vmem:[#allocation2 + $0x18] sm:$0xf]  ;;  %v13377_v19 = vld [vmem:[#allocation2 + $0x5c] sm:$0x1] }
 0x37d   : > { %v7095_v15 = vrot.slane %v13060_v31, 5  ;;  %v13375_v44 = vsel %vm10927_vm7, %v10022_v17, %v7092_v40  ;;  %v7094_v10 = vrot.slane %v7092_v40, 4  ;;  %v7134_v60 = vrot.slane %v13360_v12, 5  ;;  %v13380_v59 = vpop.f32.mrf.mxu0  ;;  %v10434_v17 = vld [vmem:[%s14513_s3 + $0x148] sm:$0xff] }
 0x37e   : > { %v5567_v46 = vpop.f32.mrf.mxu2  ;;  %14612 = vst [vmem:[#allocation33_spill] sm:$0xff] %v13380_v59  ;;  %v6535_v5 = vsel %vm10707_vm4, %v6530_v42, %v6534_v55  ;;  %v10466_v40 = vld [vmem:[%s14513_s3 + $0x1c8] sm:$0xff]  ;;  %v10028_v50 = vrot.slane %v7032_v47, 9  ;;  %v7829_v42 = vshrl.u32 %v13157_v18, 16  ;;  %7337 = vmatpush.bf16.msra.mxu2 %v10434_v17 }
 0x37f   : > { %5987 = vmatmul.bf16.gmra.mxu3 %v5843_v38  ;;  %v5568_v39 = vadd.f32 %v5567_v46, %v12995_v51  ;;  %v13367_v51 = vpack.c.b16 %v8649_v23, %v8648_v62  ;;  %v5777_v38 = vrot.slane %v14516_v14, 4  ;;  %v6829_v46 = vpack.c.b16 %v13355_v6, %v13362_v54  ;;  %8334 = vmatpush.bf16.msra.mxu0 %v10466_v40 }
 0x380   : > { %6301 = vmatmul.bf16.gmra.mxu0 %v10415_v20  ;;  %v13369_v11 = vpop.f32.mrf.mxu1  ;;  %v5635_v20 = vld [vmem:[#allocation2 + $0xb4] sm:$0xe]  ;;  %v7816_v62 = vshrl.u32 %v13365_v63, 16  ;;  %v5778_v23 = vrot.slane %v13020_v45, 5  ;;  %v7135_v55 = vsel %vm10927_vm7, %v10028_v50, %v7134_v60  ;;  %v7136_v34 = vrot.slane %v7134_v60, 4  ;;  %v10465_v45 = vld [vmem:[%s14513_s3 + $0x1c0] sm:$0xff] }
 0x381   : > { %14610 = vst [vmem:[#allocation31_spill] sm:$0xff] %v13367_v51  ;;  %v13371_v1 = vadd.f32 %v5945_v48, %v5568_v39  ;;  %v6525_v48 = vsel %vm10707_vm4, %v6520_v22, %v13307_v8  ;;  %v7825_v8 = vshll.u32 %v13157_v18, 16  ;;  %v10433_v39 = vld [vmem:[%s14513_s3 + $0x140] sm:$0xff]  ;;  %v7137_v6 = vrot.slane %v13377_v19, 5 }
 0x382   : > { %v5948_v31 = vpop.f32.mrf.mxu3  ;;  %v13407_v47 = vunpack.c.l.b16 %v6525_v48  ;;  %v13409_v54 = vunpack.c.l.b16 %v6535_v5  ;;  %v7096_v18 = vsel %vm10927_vm7, %v7094_v10, %v7095_v15  ;;  %v7219_v22 = vunpack.c.l.b16 %v13375_v44  ;;  %v7770_v51 = vld [vmem:[#allocation2 + $0x24] sm:$0xf]  ;;  %7338 = vmatpush.bf16.msra.mxu2 %v10433_v39 }
 0x383   : > { %14611 = vst [vmem:[#allocation32_spill] sm:$0xff] %v13371_v1  ;;  %5609 = vmatmul.bf16.gmra.mxu2 %v10375_v56  ;;  %v13417_v56 = vld [vmem:[#allocation2 + $0x4c] sm:$0xf]  ;;  %v9813_v60 = vrot.slane %v5635_v20, 9  ;;  %v5779_v48 = vsel %vm10927_vm7, %v5777_v38, %v5778_v23  ;;  %v7819_v5 = vshll.u32 %v13365_v63, 16  ;;  %v7138_v40 = vsel %vm10927_vm7, %v7136_v34, %v7137_v6  ;;  %8335 = vmatpush.bf16.msra.mxu0 %v10465_v45  ;;  %v10477_v45 = vld [vmem:[%s14513_s3 + $0x220] sm:$0xff] }
 0x384   : > { %v13425_v14 = vrot.slane %v7825_v8, 5  ;;  %v7231_v15 = vunpack.c.l.b16 %v7135_v55  ;;  %v7232_v10 = vunpack.c.l.b16 %v7138_v40  ;;  %v14613_v44 = vrot.slane %v13018_v41, 5  ;;  %v7027_v38 = vld [vmem:[#allocation2 + $0x18] sm:$0xe]  ;;  %v13438_v6 = vld [vmem:[#allocation2 + $0x50] sm:$0x1]  ;;  %8757 = vmatpush.bf16.msra.mxu1 %v10477_v45 }
 0x385   : > { %v7831_v59 = vrot.slane %v7829_v42, 4  ;;  %v7099_v63 = vrot.slane %v13071_v58, 5  ;;  %v8543_v23 = vrot.slane %v13417_v56, 5  ;;  %v5828_v8 = vunpack.c.l.b16 %v5779_v48  ;;  %v13444_v48 = vpop.f32.mrf.mxu0  ;;  %v13472_v45 = vld [vmem:[#allocation2 + $0x68] sm:$0x1] }
 0x386   : > { %v5570_v17 = vpop.f32.mrf.mxu2  ;;  %v5776_v20 = vsel %vm10927_vm7, %v9813_v60, %v14613_v44  ;;  %v7835_v55 = vshll.u32 %v13173_v53, 16  ;;  %v13440_v41 = vpack.c.b16 %v7232_v10, %v7231_v15  ;;  %v7220_v39 = vunpack.c.l.b16 %v7096_v18  ;;  %14616 = vst [vmem:[#allocation36_spill] sm:$0xff] %v13444_v48  ;;  %v8453_v18 = vld [vmem:[#allocation2 + $0x48] sm:$0xe] }
 0x387   : > { %v5571_v50 = vadd.f32 %v5570_v17, %v13014_v29  ;;  %v7818_v42 = vrot.slane %v7816_v62, 4  ;;  %v7821_v60 = vrot.slane %v7819_v5, 5  ;;  %v7840_v40 = vshrl.u32 %v7770_v51, 16 }
 0x388   : > { %v13433_v34 = vpop.f32.mrf.mxu1  ;;  %14615 = vst [vmem:[#allocation35_spill] sm:$0xff] %v13440_v41  ;;  %v5827_v58 = vunpack.c.l.b16 %v5776_v20  ;;  %v10023_v61 = vrot.slane %v7027_v38, 9  ;;  %v7832_v53 = vor.u32 %v7831_v59, %v13425_v14  ;;  %v8545_v62 = vrot.slane %v8543_v23, 4  ;;  %v10416_v38 = vld [vmem:[#allocation2 + $0xc0] sm:$0xff] }
 0x389   : > { %v13435_v29 = vadd.f32 %v5948_v31, %v5571_v50  ;;  %v7843_v31 = vshll.u32 %v7770_v51, 16  ;;  %v7101_v50 = vrot.slane %v7099_v63, 4  ;;  %v8546_v5 = vrot.slane %v13438_v6, 5 }
 0x38a   : > { %v5950_v17 = vpop.f32.mrf.mxu3  ;;  %v5844_v15 = vpack.c.b16 %v5828_v8, %v5827_v58  ;;  %v7837_v10 = vrot.slane %v7835_v55, 5  ;;  %v7849_v20 = vshll.u32 %v13188_v26, 16  ;;  %v7853_v51 = vshrl.u32 %v13188_v26, 16  ;;  %v13459_v55 = vld [vmem:[#allocation2 + $0x64] sm:$0xf] }
 0x38b   : > { %14614 = vst [vmem:[#allocation34_spill] sm:$0xff] %v13435_v29  ;;  %6933 = vmatmul.bf16.gmra.mxu1 %v6829_v46  ;;  %v7822_v44 = vor.u32 %v7821_v60, %v7818_v42  ;;  %v7102_v59 = vrot.slane %v13110_v13, 5  ;;  %v7842_v48 = vrot.slane %v7840_v40, 4  ;;  %v8547_v29 = vsel %vm10927_vm7, %v8545_v62, %v8546_v5  ;;  %v7033_v58 = vld [vmem:[#allocation2 + $0x60] sm:$0xe] }
 0x38c   : > { %v13457_v35 = vpack.c.b16 %v7220_v39, %v7219_v22  ;;  %v7845_v8 = vrot.slane %v7843_v31, 5  ;;  %v10250_v26 = vrot.slane %v8453_v18, 9  ;;  %v7833_v41 = vrot.slane %v7832_v53, 4  ;;  %v10376_v22 = vld [vmem:[#allocation2 + $0xb4] sm:$0xff] }
 0x38d   : > { %v7100_v42 = vsel %vm10927_vm7, %v10023_v61, %v7099_v63  ;;  %v7103_v13 = vsel %vm10927_vm7, %v7101_v50, %v7102_v59  ;;  %v7141_v60 = vrot.slane %v13459_v55, 5  ;;  %v13470_v39 = vrot.slane %v7849_v20, 5  ;;  %v6362_v63 = vld [vmem:[#allocation2 + $0x54] sm:$0xf] }
 0x38e   : > { %v5572_v46 = vpop.f32.mrf.mxu2  ;;  %v7855_v31 = vrot.slane %v7853_v51, 4  ;;  %v8544_v53 = vsel %vm10927_vm7, %v10250_v26, %v8543_v23  ;;  %v7823_v61 = vrot.slane %v7822_v44, 4  ;;  %v6546_v50 = vshll.u32 %v13360_v12, 16 }
 0x38f   : > { %5992 = vmatmul.bf16.gmra.mxu3 %v5844_v15  ;;  %v5573_v1 = vadd.f32 %v5572_v46, %v13041_v21  ;;  %v10029_v62 = vrot.slane %v7033_v58, 9  ;;  %v8651_v5 = vunpack.c.l.b16 %v8547_v29  ;;  %v7846_v15 = vor.u32 %v7845_v8, %v7842_v48  ;;  %v13488_v48 = vld [vmem:[#allocation2 + $0x58] sm:$0xf]  ;;  %v13490_v8 = vpop.f32.mrf.mxu0 }
 0x390   : > { %6306 = vmatmul.bf16.gmra.mxu0 %v10416_v38  ;;  %v13466_v40 = vpop.f32.mrf.mxu1  ;;  %v7143_v20 = vrot.slane %v7141_v60, 4  ;;  %v7828_v51 = vsel %vm10707_vm4, %v7823_v61, %v13425_v14  ;;  %v7144_v44 = vrot.slane %v13472_v45, 5  ;;  %v8650_v46 = vunpack.c.l.b16 %v8544_v53  ;;  %14618 = vst [vmem:[#allocation38_spill] sm:$0xff] %v13490_v8 }
 0x391   : > { %v13468_v21 = vadd.f32 %v5950_v17, %v5573_v1  ;;  %v6550_v1 = vshrl.u32 %v13360_v12, 16  ;;  %v7222_v17 = vunpack.c.l.b16 %v7103_v13  ;;  %v7142_v23 = vsel %vm10927_vm7, %v10029_v62, %v7141_v60 }
 0x392   : > { %v5953_v18 = vpop.f32.mrf.mxu3  ;;  %v7838_v38 = vsel %vm10707_vm4, %v7833_v41, %v7837_v10  ;;  %v6537_v29 = vshrl.u32 %v6362_v63, 16  ;;  %v7856_v59 = vor.u32 %v7855_v31, %v13470_v39  ;;  %v7859_v12 = vshll.u32 %v13208_v7, 16 }
 0x393   : > { %14617 = vst [vmem:[#allocation37_spill] sm:$0xff] %v13468_v21  ;;  %5614 = vmatmul.bf16.gmra.mxu2 %v10376_v22  ;;  %v6540_v14 = vshll.u32 %v6362_v63, 16  ;;  %v13492_v26 = vrot.slane %v6546_v50, 5  ;;  %v7145_v13 = vsel %vm10927_vm7, %v7143_v20, %v7144_v44  ;;  %v13496_v60 = vpack.c.b16 %v8651_v5, %v8650_v46  ;;  %v13504_v20 = vld [vmem:[#allocation2 + $0x5c] sm:$0x1] }
 0x394   : > { %v6552_v10 = vrot.slane %v6550_v1, 4  ;;  %v7233_v22 = vunpack.c.l.b16 %v7142_v23  ;;  %v7234_v31 = vunpack.c.l.b16 %v7145_v13  ;;  %v8217_v53 = vunpack.c.l.b16 %v7838_v38  ;;  %v13516_v38 = vld [vmem:[#allocation2 + $0x24] sm:$0xe]  ;;  %v8454_v13 = vld [vmem:[#allocation2 + $0x54] sm:$0xe] }
 0x395   : > { %14619 = vst [vmem:[#allocation39_spill] sm:$0xff] %v13496_v60  ;;  %v7221_v7 = vunpack.c.l.b16 %v7100_v42  ;;  %v7847_v61 = vrot.slane %v7846_v15, 4  ;;  %v8550_v62 = vrot.slane %v13488_v48, 5  ;;  %v8216_v50 = vunpack.c.l.b16 %v7828_v51  ;;  %v7776_v60 = vld [vmem:[#allocation2 + $0x3c] sm:$0xf] }
 0x396   : > { %v5575_v58 = vpop.f32.mrf.mxu2  ;;  %v7857_v21 = vrot.slane %v7856_v59, 4  ;;  %v13506_v5 = vpack.c.b16 %v7234_v31, %v7233_v22  ;;  %v7873_v15 = vshll.u32 %v13222_v16, 16  ;;  %v7877_v23 = vshrl.u32 %v13222_v16, 16  ;;  %v10441_v22 = vld [vmem:[#allocation2 + $0x18] sm:$0xff] }
 0x397   : > { %v5576_v41 = vadd.f32 %v5575_v58, %v13056_v36  ;;  %v13508_v1 = vpack.c.b16 %v7222_v17, %v7221_v7  ;;  %v7852_v42 = vsel %vm10707_vm4, %v7847_v61, %v13470_v39  ;;  %v6542_v44 = vrot.slane %v6540_v14, 5 }
 0x398   : > { %v13500_v8 = vpop.f32.mrf.mxu1  ;;  %v6553_v51 = vor.u32 %v6552_v10, %v13492_v26  ;;  %v7861_v46 = vrot.slane %v7859_v12, 5  ;;  %v14621_v59 = vpack.c.b16 %v13409_v54, %v13407_v47  ;;  %v8248_v17 = vpack.c.b16 %v8217_v53, %v8216_v50  ;;  %v13535_v50 = vld [vmem:[#allocation2 + $0x70] sm:$0xf] }
 0x399   : > { %v13502_v63 = vadd.f32 %v5953_v18, %v5576_v41  ;;  %v6539_v18 = vrot.slane %v6537_v29, 4  ;;  %v7864_v58 = vshrl.u32 %v7773_v9, 16  ;;  %v8552_v41 = vrot.slane %v8550_v62, 4 }
 0x39a   : > { %v5955_v36 = vpop.f32.mrf.mxu3  ;;  %v8553_v39 = vrot.slane %v13504_v20, 5  ;;  %v6556_v16 = vshll.u32 %v13377_v19, 16  ;;  %v7862_v29 = vsel %vm10707_vm4, %v7857_v21, %v7861_v46  ;;  %v13525_v14 = vunpack.c.l.b16 %v7852_v42  ;;  %v7034_v21 = vld [vmem:[#allocation2 + $0x6c] sm:$0xe] }
 0x39b   : > { %14620 = vst [vmem:[#allocation40_spill] sm:$0xff] %v13502_v63  ;;  %6938 = vmatmul.bf16.gmra.mxu1 %v14621_v59  ;;  %v7867_v12 = vshll.u32 %v7773_v9, 16  ;;  %v13528_v47 = vrot.slane %v7873_v15, 5  ;;  %v13530_v54 = vrot.slane %v7877_v23, 4  ;;  %v6543_v19 = vor.u32 %v6542_v44, %v6539_v18  ;;  %v13537_v9 = vpop.f32.mrf.mxu0 }
 0x39c   : > { %v8554_v53 = vsel %vm10927_vm7, %v8552_v41, %v8553_v39  ;;  %v6554_v61 = vrot.slane %v6553_v51, 4  ;;  %v10251_v42 = vrot.slane %v8454_v13, 9  ;;  %14622 = vst [vmem:[#allocation41_spill] sm:$0xff] %v13537_v9  ;;  %v13539_v46 = vunpack.c.l.b16 %v7862_v29  ;;  %v13551_v51 = vld [vmem:[#allocation2 + $0x74] sm:$0x1] }
 0x39d   : > { %v13542_v23 = vrot.slane %v7864_v58, 4  ;;  %v7148_v59 = vrot.slane %v13535_v50, 5  ;;  %v6558_v18 = vrot.slane %v6556_v16, 5  ;;  %v13549_v44 = vrot.slane %v7867_v12, 5  ;;  %v6365_v39 = vld [vmem:[#allocation2 + $0x60] sm:$0xf] }
 0x39e   : > { %v5577_v10 = vpop.f32.mrf.mxu2  ;;  %v7880_v58 = vor.u32 %v13530_v54, %v13528_v47  ;;  %v10030_v29 = vrot.slane %v7034_v21, 9  ;;  %v6574_v12 = vshrl.u32 %v13459_v55, 16  ;;  %v7151_v31 = vrot.slane %v13551_v51, 5 }
 0x39f   : > { %7654 = vmatmul.bf16.vlgmr.msra.gmra.mxu3 %v10441_v22  ;;  %v5578_v7 = vadd.f32 %v5577_v10, %v13077_v30  ;;  %v6570_v22 = vshll.u32 %v13459_v55, 16  ;;  %v8653_v10 = vunpack.c.l.b16 %v8554_v53  ;;  %v6559_v16 = vsel %vm10707_vm4, %v6554_v61, %v6558_v18  ;;  %v13570_v61 = vld [vmem:[#allocation2 + $0x64] sm:$0xf] }
 0x3a0   : > { %8336 = vmatmul.bf16.vlgmr.msra.gmra.mxu0 %v8248_v17  ;;  %v13545_v41 = vpop.f32.mrf.mxu1  ;;  %v8551_v17 = vsel %vm10927_vm7, %v10251_v42, %v8550_v62  ;;  %v7897_v62 = vshll.u32 %v13298_v52, 16  ;;  %v7149_v42 = vsel %vm10927_vm7, %v10030_v29, %v7148_v59  ;;  %v6564_v53 = vshll.u32 %v6365_v39, 16 }
 0x3a1   : > { %v13547_v30 = vadd.f32 %v5955_v36, %v5578_v7  ;;  %v6544_v36 = vrot.slane %v6543_v19, 4  ;;  %v7150_v7 = vrot.slane %v7148_v59, 4  ;;  %v8652_v15 = vunpack.c.l.b16 %v8551_v17 }
 0x3a2   : > { %v5958_v13 = vpop.f32.mrf.mxu3  ;;  %v7901_v19 = vshrl.u32 %v13298_v52, 16  ;;  %v6806_v21 = vunpack.c.l.b16 %v6559_v16  ;;  %v13572_v18 = vrot.slane %v6570_v22, 5  ;;  %v6576_v9 = vrot.slane %v6574_v12, 4 }
 0x3a3   : > { %14623 = vst [vmem:[#allocation42_spill] sm:$0xff] %v13547_v30  ;;  %7339 = vmatmul.bf16.vlgmr.msra.gmra.mxu2 %v13457_v35  ;;  %v6549_v54 = vsel %vm10707_vm4, %v6544_v36, %v13492_v26  ;;  %v6561_v35 = vshrl.u32 %v6365_v39, 16  ;;  %v7152_v59 = vsel %vm10927_vm7, %v7150_v7, %v7151_v31  ;;  %v13576_v29 = vpack.c.b16 %v8653_v10, %v8652_v15 }
 0x3a4   : > { %v7235_v26 = vunpack.c.l.b16 %v7149_v42  ;;  %v7236_v36 = vunpack.c.l.b16 %v7152_v59  ;;  %v6805_v39 = vunpack.c.l.b16 %v6549_v54  ;;  %v7870_v52 = vor.u32 %v13549_v44, %v13542_v23  ;;  %v13593_v44 = vld [vmem:[#allocation2 + $0x68] sm:$0x1] }
 0x3a5   : > { %14624 = vst [vmem:[#allocation43_spill] sm:$0xff] %v13576_v29  ;;  %v7883_v30 = vshll.u32 %v13230_v43, 16  ;;  %v14517_v22 = vrot.slane %v13570_v61, 5  ;;  %v7888_v31 = vshrl.u32 %v7776_v60, 16  ;;  %v7891_v15 = vshll.u32 %v7776_v60, 16 }
 0x3a6   : > { %v5580_v55 = vpop.f32.mrf.mxu2  ;;  %v13587_v10 = vpack.c.b16 %v7236_v36, %v7235_v26  ;;  %v6831_v7 = vpack.c.b16 %v6806_v21, %v6805_v39  ;;  %v7881_v42 = vrot.slane %v7880_v58, 4  ;;  %v13591_v54 = vrot.slane %v7897_v62, 5  ;;  %v10476_v58 = vld [vmem:[%s14513_s3 + $0x218] sm:$0xff] }
 0x3a7   : > { %v5581_v17 = vadd.f32 %v5580_v55, %v13106_v28  ;;  %v13589_v28 = vpop.f32.mrf.mxu0  ;;  %v7903_v23 = vrot.slane %v7901_v19, 4  ;;  %v6563_v43 = vrot.slane %v6561_v35, 4  ;;  %v6566_v55 = vrot.slane %v6564_v53, 5  ;;  %v10442_v35 = vld [vmem:[#allocation2 + $0x24] sm:$0xff]  ;;  %8758 = vmatpush.bf16.msra.mxu1 %v10476_v58  ;;  %v6368_v58 = vld [vmem:[#allocation2 + $0x6c] sm:$0xf] }
 0x3a8   : > { %v13583_v16 = vpop.f32.mrf.mxu1  ;;  %14626 = vst [vmem:[#allocation45_spill] sm:$0xff] %v13589_v28  ;;  %v6577_v59 = vor.u32 %v6576_v9, %v13572_v18  ;;  %v8249_v60 = vpack.c.b16 %v13539_v46, %v13525_v14  ;;  %v7885_v21 = vrot.slane %v7883_v30, 5  ;;  %v8559_v62 = vrot.slane %v14517_v22, 4 }
 0x3a9   : > { %v13585_v63 = vadd.f32 %v5958_v13, %v5581_v17  ;;  %v7109_v13 = vrot.slane %v13150_v25, 5  ;;  %v14627_v17 = vrot.slane %v13123_v0, 5  ;;  %v6580_v9 = vshll.u32 %v13472_v45, 16 }
 0x3aa   : > { %v5960_v12 = vpop.f32.mrf.mxu3  ;;  %v7890_v53 = vrot.slane %v7888_v31, 4  ;;  %v7893_v25 = vrot.slane %v7891_v15, 5  ;;  %v8560_v19 = vrot.slane %v13593_v44, 5  ;;  %v13608_v14 = vrot.slane %v7870_v52, 4  ;;  %v13615_v31 = vld [vmem:[#allocation2 + $0x7c] sm:$0xf] }
 0x3ab   : > { %14625 = vst [vmem:[#allocation44_spill] sm:$0xff] %v13585_v63  ;;  %6943 = vmatmul.bf16.gmra.mxu1 %v6831_v7  ;;  %v7108_v26 = vrot.slane %v14627_v17, 4  ;;  %v7886_v46 = vsel %vm10707_vm4, %v7881_v42, %v7885_v21  ;;  %v7904_v30 = vor.u32 %v7903_v23, %v13591_v54  ;;  %v7907_v39 = vshll.u32 %v13319_v49, 16  ;;  %v7035_v15 = vld [vmem:[#allocation2 + $0x78] sm:$0xe] }
 0x3ac   : > { %v6567_v17 = vor.u32 %v6566_v55, %v6563_v43  ;;  %v6578_v45 = vrot.slane %v6577_v59, 4  ;;  %v13619_v52 = vsel %vm10927_vm7, %v8559_v62, %v8560_v19  ;;  %v14628_v42 = vrot.slane %v13123_v0, 5  ;;  %v7779_v43 = vld [vmem:[#allocation2 + $0x48] sm:$0xf] }
 0x3ad   : > { %v14629_v21 = vrot.slane %v13516_v38, 9  ;;  %v7876_v23 = vsel %vm10707_vm4, %v13608_v14, %v13528_v47  ;;  %v7155_v55 = vrot.slane %v13615_v31, 5  ;;  %v6582_v38 = vrot.slane %v6580_v9, 5  ;;  %v8455_v14 = vld [vmem:[#allocation2 + $0x60] sm:$0xe] }
 0x3ae   : > { %v5582_v36 = vpop.f32.mrf.mxu2  ;;  %v7894_v62 = vor.u32 %v7893_v25, %v7890_v53  ;;  %v6598_v19 = vshrl.u32 %v13535_v50, 16  ;;  %v7909_v47 = vrot.slane %v7907_v39, 5  ;;  %v7905_v9 = vrot.slane %v7904_v30, 4 }
 0x3af   : > { %7659 = vmatmul.bf16.gmra.mxu3 %v10442_v35  ;;  %v5583_v7 = vadd.f32 %v5582_v36, %v13133_v33  ;;  %v13627_v49 = vsel %vm10927_vm7, %v14629_v21, %v14628_v42  ;;  %v13631_v33 = vsel %vm10927_vm7, %v7108_v26, %v7109_v13  ;;  %v13644_v35 = vld [vmem:[#allocation2 + $0x80] sm:$0x1]  ;;  %v6594_v26 = vshll.u32 %v13535_v50, 16 }
 0x3b0   : > { %8341 = vmatmul.bf16.gmra.mxu0 %v8249_v60  ;;  %v13638_v59 = vpop.f32.mrf.mxu1  ;;  %v13642_v60 = vunpack.c.l.b16 %v7886_v46  ;;  %v10031_v36 = vrot.slane %v7035_v15, 9  ;;  %v6568_v42 = vrot.slane %v6567_v17, 4  ;;  %v7912_v46 = vshrl.u32 %v7779_v43, 16 }
 0x3b1   : > { %v13640_v0 = vadd.f32 %v5960_v12, %v5583_v7  ;;  %v6583_v12 = vsel %vm10707_vm4, %v6578_v45, %v6582_v38  ;;  %v13651_v7 = vpop.f32.mrf.mxu0  ;;  %v7915_v53 = vshll.u32 %v7779_v43, 16  ;;  %v7157_v21 = vrot.slane %v7155_v55, 4 }
 0x3b2   : > { %v5963_v13 = vpop.f32.mrf.mxu3  ;;  %14631 = vst [vmem:[#allocation47_spill] sm:$0xff] %v13651_v7  ;;  %v7156_v25 = vsel %vm10927_vm7, %v10031_v36, %v7155_v55  ;;  %v7158_v50 = vrot.slane %v13644_v35, 5  ;;  %v6573_v39 = vsel %vm10707_vm4, %v6568_v42, %v13572_v18  ;;  %v6588_v17 = vshll.u32 %v6368_v58, 16 }
 0x3b3   : > { %14630 = vst [vmem:[#allocation46_spill] sm:$0xff] %v13640_v0  ;;  %7344 = vmatmul.bf16.gmra.mxu2 %v13508_v1  ;;  %v6585_v1 = vshrl.u32 %v6368_v58, 16  ;;  %v10252_v15 = vrot.slane %v8455_v14, 9  ;;  %v6808_v45 = vunpack.c.l.b16 %v6583_v12  ;;  %v13659_v30 = vrot.slane %v6594_v26, 5 }
 0x3b4   : > { %v6600_v38 = vrot.slane %v6598_v19, 4  ;;  %v7159_v43 = vsel %vm10927_vm7, %v7157_v21, %v7158_v50  ;;  %v7237_v55 = vunpack.c.l.b16 %v7156_v25  ;;  %v14632_v7 = vrot.slane %v13570_v61, 5 }
 0x3b5   : > { %v7238_v29 = vunpack.c.l.b16 %v7159_v43  ;;  %v6807_v42 = vunpack.c.l.b16 %v6573_v39  ;;  %v7895_v58 = vrot.slane %v7894_v62, 4  ;;  %v7910_v14 = vsel %vm10707_vm4, %v7905_v9, %v7909_v47 }
 0x3b6   : > { %v5585_v22 = vpop.f32.mrf.mxu2  ;;  %v8558_v18 = vsel %vm10927_vm7, %v10252_v15, %v14632_v7  ;;  %v8655_v26 = vunpack.c.l.b16 %v13619_v52  ;;  %v6587_v21 = vrot.slane %v6585_v1, 4  ;;  %v6601_v43 = vor.u32 %v6600_v38, %v13659_v30  ;;  %v13684_v1 = vld [vmem:[#allocation2 + $0x70] sm:$0xf] }
 0x3b7   : > { %v5586_v36 = vadd.f32 %v5585_v22, %v13159_v3  ;;  %v6590_v3 = vrot.slane %v6588_v17, 5  ;;  %v13675_v22 = vpack.c.b16 %v7238_v29, %v7237_v55  ;;  %v6832_v50 = vpack.c.b16 %v6808_v45, %v6807_v42  ;;  %v10443_v15 = vld [vmem:[#allocation2 + $0x30] sm:$0xff] }
 0x3b8   : > { %v13671_v19 = vpop.f32.mrf.mxu1  ;;  %v7921_v7 = vshll.u32 %v13417_v56, 16  ;;  %v8654_v62 = vunpack.c.l.b16 %v8558_v18  ;;  %v7900_v47 = vsel %vm10707_vm4, %v7895_v58, %v13591_v54  ;;  %v7914_v52 = vrot.slane %v7912_v46, 4  ;;  %v13700_v58 = vld [vmem:[#allocation2 + $0x88] sm:$0xf] }
 0x3b9   : > { %v13673_v12 = vadd.f32 %v5963_v13, %v5586_v36  ;;  %v7917_v9 = vrot.slane %v7915_v53, 5  ;;  %v7925_v13 = vshrl.u32 %v13417_v56, 16  ;;  %v8220_v39 = vunpack.c.l.b16 %v7876_v23  ;;  %v13692_v54 = vpop.f32.mrf.mxu0 }
 0x3ba   : > { %v5965_v25 = vpop.f32.mrf.mxu3  ;;  %v6604_v29 = vshll.u32 %v13551_v51, 16  ;;  %v13686_v17 = vpack.c.b16 %v8655_v26, %v8654_v62  ;;  %v7223_v45 = vunpack.c.l.b16 %v13627_v49  ;;  %v7224_v38 = vunpack.c.l.b16 %v13631_v33  ;;  %14635 = vst [vmem:[#allocation50_spill] sm:$0xff] %v13692_v54  ;;  %v7036_v33 = vld [vmem:[#allocation2 + $0x84] sm:$0xe]  ;;  %v13712_v62 = vld [vmem:[#allocation2 + $0x74] sm:$0x1] }
 0x3bb   : > { %14633 = vst [vmem:[#allocation48_spill] sm:$0xff] %v13673_v12  ;;  %6948 = vmatmul.bf16.gmra.mxu1 %v6832_v50  ;;  %v6591_v36 = vor.u32 %v6590_v3, %v6587_v21  ;;  %v13690_v55 = vunpack.c.l.b16 %v7910_v14  ;;  %v8250_v56 = vpack.c.b16 %v13642_v60, %v8220_v39  ;;  %v6602_v23 = vrot.slane %v6601_v43, 4 }
 0x3bc   : > { %14634 = vst [vmem:[#allocation49_spill] sm:$0xff] %v13686_v17  ;;  %v13695_v53 = vunpack.c.l.b16 %v7900_v47  ;;  %v13697_v51 = vrot.slane %v7921_v7, 5  ;;  %v7918_v42 = vor.u32 %v7917_v9, %v7914_v52  ;;  %v7927_v49 = vrot.slane %v7925_v13, 4  ;;  %v13710_v7 = vld [vmem:[#allocation2 + $0x8c] sm:$0x1] }
 0x3bd   : > { %v8564_v14 = vrot.slane %v13684_v1, 5  ;;  %v6606_v26 = vrot.slane %v6604_v29, 5  ;;  %v7162_v21 = vrot.slane %v13700_v58, 5  ;;  %v7253_v50 = vpack.c.b16 %v7224_v38, %v7223_v45  ;;  %v6371_v9 = vld [vmem:[#allocation2 + $0x78] sm:$0xf] }
 0x3be   : > { %v5587_v46 = vpop.f32.mrf.mxu2  ;;  %v6592_v43 = vrot.slane %v6591_v36, 4  ;;  %v6618_v13 = vshll.u32 %v13615_v31, 16  ;;  %v6622_v39 = vshrl.u32 %v13615_v31, 16  ;;  %v13718_v29 = vrot.slane %v7918_v42, 4  ;;  %v8456_v38 = vld [vmem:[#allocation2 + $0x6c] sm:$0xe] }
 0x3bf   : > { %7664 = vmatmul.bf16.gmra.mxu3 %v10443_v15  ;;  %v5588_v18 = vadd.f32 %v5587_v46, %v13184_v24  ;;  %v6607_v52 = vsel %vm10707_vm4, %v6602_v23, %v6606_v26  ;;  %v7928_v15 = vor.u32 %v7927_v49, %v13697_v51  ;;  %v7931_v45 = vshll.u32 %v13438_v6, 16  ;;  %v7782_v26 = vld [vmem:[#allocation2 + $0x54] sm:$0xf] }
 0x3c0   : > { %8346 = vmatmul.bf16.gmra.mxu0 %v8250_v56  ;;  %v13704_v60 = vpop.f32.mrf.mxu1  ;;  %v8566_v36 = vrot.slane %v8564_v14, 4  ;;  %v6597_v46 = vsel %vm10707_vm4, %v6592_v43, %v13659_v30  ;;  %v7164_v23 = vrot.slane %v7162_v21, 4  ;;  %v7165_v31 = vrot.slane %v13710_v7, 5 }
 0x3c1   : > { %v13706_v3 = vadd.f32 %v5965_v25, %v5588_v18  ;;  %v10032_v25 = vrot.slane %v7036_v33, 9  ;;  %v6810_v18 = vunpack.c.l.b16 %v6607_v52  ;;  %v6609_v33 = vshrl.u32 %v6371_v9, 16 }
 0x3c2   : > { %v5968_v47 = vpop.f32.mrf.mxu3  ;;  %v6612_v42 = vshll.u32 %v6371_v9, 16  ;;  %v8567_v49 = vrot.slane %v13712_v62, 5  ;;  %v13729_v6 = vrot.slane %v6618_v13, 5  ;;  %v6624_v24 = vrot.slane %v6622_v39, 4 }
 0x3c3   : > { %14636 = vst [vmem:[#allocation51_spill] sm:$0xff] %v13706_v3  ;;  %7349 = vmatmul.bf16.gmra.mxu2 %v7253_v50  ;;  %v7163_v56 = vsel %vm10927_vm7, %v10032_v25, %v7162_v21  ;;  %v7166_v17 = vsel %vm10927_vm7, %v7164_v23, %v7165_v31  ;;  %v10253_v30 = vrot.slane %v8456_v38, 9  ;;  %v13736_v3 = vpop.f32.mrf.mxu0  ;;  %v6312_v9 = vadd.f32 %v12987_v57, %v13016_v4  ;;  %v13742_v38 = vld [vmem:[#allocation2 + $0x7c] sm:$0xf] }
 0x3c4   : > { %v7239_v25 = vunpack.c.l.b16 %v7163_v56  ;;  %v7240_v21 = vunpack.c.l.b16 %v7166_v17  ;;  %v8568_v52 = vsel %vm10927_vm7, %v8566_v36, %v8567_v49  ;;  %14637 = vst [vmem:[#allocation52_spill] sm:$0xff] %v13736_v3  ;;  %v6809_v54 = vunpack.c.l.b16 %v6597_v46  ;;  %v13753_v49 = vld [vmem:[#allocation2 + $0x80] sm:$0x1] }
 0x3c5   : > { %v7929_v13 = vrot.slane %v7928_v15, 4  ;;  %v7936_v12 = vshrl.u32 %v7782_v26, 16  ;;  %v7939_v23 = vshll.u32 %v7782_v26, 16  ;;  %v8565_v17 = vsel %vm10927_vm7, %v10253_v30, %v8564_v14  ;;  %v10475_v14 = vld [vmem:[%s14513_s3 + $0x210] sm:$0xff] }
 0x3c6   : > { %v5590_v50 = vpop.f32.mrf.mxu2  ;;  %v6833_v31 = vpack.c.b16 %v6810_v18, %v6809_v54  ;;  %v6625_v57 = vor.u32 %v6624_v24, %v13729_v6  ;;  %v7933_v4 = vrot.slane %v7931_v45, 5  ;;  %v6611_v15 = vrot.slane %v6609_v33, 4  ;;  %v8457_v18 = vld [vmem:[#allocation2 + $0x78] sm:$0xe]  ;;  %v10444_v45 = vld [vmem:[#allocation2 + $0x3c] sm:$0xff]  ;;  %8759 = vmatpush.bf16.msra.mxu1 %v10475_v14 }
 0x3c7   : > { %v5591_v43 = vadd.f32 %v5590_v50, %v13226_v32  ;;  %v13744_v32 = vpack.c.b16 %v7240_v21, %v7239_v25  ;;  %v6614_v46 = vrot.slane %v6612_v42, 5  ;;  %v7949_v26 = vshrl.u32 %v13488_v48, 16 }
 0x3c8   : > { %v6914_v39 = vpop.f32.mrf.mxu1  ;;  %v6628_v50 = vshll.u32 %v13644_v35, 16  ;;  %v8656_v30 = vunpack.c.l.b16 %v8565_v17  ;;  %v8657_v54 = vunpack.c.l.b16 %v8568_v52  ;;  %v8571_v24 = vrot.slane %v13742_v38, 5 }
 0x3c9   : > { %v13740_v0 = vadd.f32 %v5968_v47, %v5591_v43  ;;  %v13748_v56 = vadd.f32 %v6914_v39, %v6312_v9  ;;  %v7945_v47 = vshll.u32 %v13488_v48, 16  ;;  %v7924_v48 = vsel %vm10707_vm4, %v13718_v29, %v13697_v51  ;;  %v14640_v39 = vld [vmem:[#allocation25_spill] sm:$0xff] }
 0x3ca   : > { %v5970_v36 = vpop.f32.mrf.mxu3  ;;  %v7934_v33 = vsel %vm10707_vm4, %v7929_v13, %v7933_v4  ;;  %v13766_v42 = vrot.slane %v7936_v12, 4  ;;  %v13768_v35 = vrot.slane %v7939_v23, 5  ;;  %v6626_v25 = vrot.slane %v6625_v57, 4  ;;  %v14641_v13 = vld [vmem:[#allocation10_spill] sm:$0xff]  ;;  %v14642_v12 = vld [vmem:[#allocation8_spill] sm:$0xff] }
 0x3cb   : > { %14638 = vst [vmem:[#allocation53_spill] sm:$0xff] %v13740_v0  ;;  %6953 = vmatmul.bf16.gmra.mxu1 %v6833_v31  ;;  %v13770_v21 = vpack.c.b16 %v8657_v54, %v8656_v30  ;;  %v8573_v52 = vrot.slane %v8571_v24, 4  ;;  %v8574_v9 = vrot.slane %v13753_v49, 5  ;;  %v6615_v31 = vor.u32 %v6614_v46, %v6611_v15  ;;  %v13789_v46 = vpop.f32.mrf.mxu0 }
 0x3cc   : > { %v13774_v51 = vrot.slane %v7945_v47, 5  ;;  %v10254_v29 = vrot.slane %v8457_v18, 9  ;;  %v6313_v4 = vadd.f32 %v14642_v12, %v14641_v13  ;;  %v14643_v23 = vpack.c.b16 %v13690_v55, %v13695_v53  ;;  %14645 = vst [vmem:[#allocation10_spill] sm:$0xff] %v13789_v46  ;;  %v6374_v53 = vld [vmem:[#allocation2 + $0x84] sm:$0xf] }
 0x3cd   : > { %14639 = vst [vmem:[#allocation54_spill] sm:$0xff] %v13770_v21  ;;  %v6630_v57 = vrot.slane %v6628_v50, 5  ;;  %v7951_v14 = vrot.slane %v7949_v26, 4  ;;  %v8575_v30 = vsel %vm10927_vm7, %v8573_v52, %v8574_v9  ;;  %v6642_v26 = vshll.u32 %v13700_v58, 16  ;;  %v13801_v13 = vld [vmem:[#allocation2 + $0x8c] sm:$0x1] }
 0x3ce   : > { %v5592_v43 = vpop.f32.mrf.mxu2  ;;  %v8572_v15 = vsel %vm10927_vm7, %v10254_v29, %v8571_v24  ;;  %v6646_v50 = vshrl.u32 %v13700_v58, 16  ;;  %v6616_v52 = vrot.slane %v6615_v31, 4  ;;  %v8224_v9 = vunpack.c.l.b16 %v7924_v48 }
 0x3cf   : > { %7669 = vmatmul.bf16.gmra.mxu3 %v10444_v45  ;;  %v5593_v17 = vadd.f32 %v5592_v43, %v14640_v39  ;;  %v13785_v43 = vld [vmem:[#allocation2 + $0x88] sm:$0xf]  ;;  %v6631_v55 = vsel %vm10707_vm4, %v6626_v25, %v6630_v57  ;;  %v8225_v39 = vunpack.c.l.b16 %v7934_v33  ;;  %v7942_v24 = vor.u32 %v13768_v35, %v13766_v42 }
 0x3d0   : > { %8351 = vmatmul.bf16.gmra.mxu0 %v14643_v23  ;;  %v6916_v54 = vpop.f32.mrf.mxu1  ;;  %v7952_v29 = vor.u32 %v7951_v14, %v13774_v51  ;;  %v8658_v12 = vunpack.c.l.b16 %v8572_v15  ;;  %v8659_v25 = vunpack.c.l.b16 %v8575_v30  ;;  %v6621_v58 = vsel %vm10707_vm4, %v6616_v52, %v13729_v6  ;;  %v7785_v15 = vld [vmem:[#allocation2 + $0x60] sm:$0xf]  ;;  %v14649_v6 = vld [vmem:[#allocation9_spill] sm:$0xff] }
 0x3d1   : > { %v13783_v45 = vadd.f32 %v5970_v36, %v5593_v17  ;;  %v13791_v18 = vadd.f32 %v6916_v54, %v6313_v4  ;;  %v14646_v36 = vld [vmem:[#allocation22_spill] sm:$0xff]  ;;  %v8458_v17 = vld [vmem:[#allocation2 + $0x84] sm:$0xe]  ;;  %v8578_v4 = vrot.slane %v13785_v43, 5  ;;  %v6812_v23 = vunpack.c.l.b16 %v6631_v55 }
 0x3d2   : > { %v5973_v47 = vpop.f32.mrf.mxu3  ;;  %v6633_v31 = vshrl.u32 %v6374_v53, 16  ;;  %v6636_v48 = vshll.u32 %v6374_v53, 16  ;;  %v13807_v57 = vrot.slane %v6642_v26, 5  ;;  %v6648_v42 = vrot.slane %v6646_v50, 4 }
 0x3d3   : > { %14644 = vst [vmem:[#allocation25_spill] sm:$0xff] %v13783_v45  ;;  %7354 = vmatmul.bf16.gmra.mxu2 %v14646_v36  ;;  %v13809_v35 = vpack.c.b16 %v8659_v25, %v8658_v12  ;;  %v10255_v14 = vrot.slane %v8458_v17, 9  ;;  %v7955_v30 = vshll.u32 %v13504_v20, 16  ;;  %v8580_v36 = vrot.slane %v8578_v4, 4  ;;  %v14648_v45 = vld [vmem:[#allocation12_spill] sm:$0xff] }
 0x3d4   : > { %v8581_v21 = vrot.slane %v13801_v13, 5  ;;  %v6314_v55 = vadd.f32 %v14649_v6, %v14648_v45  ;;  %v6811_v52 = vunpack.c.l.b16 %v6621_v58  ;;  %v7953_v53 = vrot.slane %v7952_v29, 4 }
 0x3d5   : > { %14647 = vst [vmem:[#allocation8_spill] sm:$0xff] %v13809_v35  ;;  %v8579_v26 = vsel %vm10927_vm7, %v10255_v14, %v8578_v4  ;;  %v6635_v17 = vrot.slane %v6633_v31, 4  ;;  %v6638_v25 = vrot.slane %v6636_v48, 5  ;;  %v6649_v46 = vor.u32 %v6648_v42, %v13807_v57  ;;  %v13826_v14 = vpop.f32.mrf.mxu0 }
 0x3d6   : > { %v5595_v33 = vpop.f32.mrf.mxu2  ;;  %v6834_v35 = vpack.c.b16 %v6812_v23, %v6811_v52  ;;  %v7960_v45 = vshrl.u32 %v7785_v15, 16  ;;  %v7963_v58 = vshll.u32 %v7785_v15, 16  ;;  %v7969_v29 = vshll.u32 %v13570_v61, 16  ;;  %14651 = vst [vmem:[#allocation12_spill] sm:$0xff] %v13826_v14  ;;  %v14659_v14 = vld [vmem:[#allocation14_spill] sm:$0xff] }
 0x3d7   : > { %v5596_v54 = vadd.f32 %v5595_v33, %v13323_v2  ;;  %v8582_v2 = vsel %vm10927_vm7, %v8580_v36, %v8581_v21  ;;  %v8660_v6 = vunpack.c.l.b16 %v8579_v26  ;;  %v7943_v31 = vrot.slane %v7942_v24, 4  ;;  %v6378_v24 = vld [vmem:[#allocation2 + $0x94] sm:$0xf] }
 0x3d8   : > { %v6919_v50 = vpop.f32.mrf.mxu1  ;;  %v8661_v4 = vunpack.c.l.b16 %v8582_v2  ;;  %v7957_v48 = vrot.slane %v7955_v30, 5  ;;  %v7973_v21 = vshrl.u32 %v13570_v61, 16  ;;  %v6639_v36 = vor.u32 %v6638_v25, %v6635_v17  ;;  %v13848_v25 = vld [vmem:[#allocation2 + $0x94] sm:$0xf] }
 0x3d9   : > { %v13818_v12 = vadd.f32 %v5973_v47, %v5596_v54  ;;  %v13822_v33 = vadd.f32 %v6919_v50, %v6314_v55  ;;  %v6652_v47 = vshll.u32 %v13710_v7, 16  ;;  %v10445_v54 = vld [vmem:[#allocation2 + $0x48] sm:$0xff]  ;;  %v8252_v55 = vpack.c.b16 %v8225_v39, %v8224_v9  ;;  %v14654_v9 = vld [vmem:[#allocation11_spill] sm:$0xff] }
 0x3da   : > { %v5975_v20 = vpop.f32.mrf.mxu3  ;;  %v13830_v23 = vpack.c.b16 %v8661_v4, %v8660_v6  ;;  %v6650_v15 = vrot.slane %v6649_v46, 4  ;;  %v7948_v52 = vsel %vm10707_vm4, %v7943_v31, %v13774_v51  ;;  %v13838_v30 = vrot.slane %v7960_v45, 4  ;;  %v14653_v50 = vld [vmem:[#allocation13_spill] sm:$0xff]  ;;  %v7037_v6 = vld [vmem:[#allocation2 + $0x90] sm:$0xe] }
 0x3db   : > { %14650 = vst [vmem:[#allocation22_spill] sm:$0xff] %v13818_v12  ;;  %6958 = vmatmul.bf16.gmra.mxu1 %v6834_v35  ;;  %v7958_v35 = vsel %vm10707_vm4, %v7953_v53, %v7957_v48  ;;  %v13840_v61 = vrot.slane %v7963_v58, 5  ;;  %v13842_v26 = vrot.slane %v7969_v29, 5  ;;  %v6315_v46 = vadd.f32 %v14654_v9, %v14653_v50  ;;  %v7788_v51 = vld [vmem:[#allocation2 + $0x6c] sm:$0xf] }
 0x3dc   : > { %14652 = vst [vmem:[#allocation9_spill] sm:$0xff] %v13830_v23  ;;  %v6654_v39 = vrot.slane %v6652_v47, 5  ;;  %v13846_v17 = vrot.slane %v7973_v21, 4  ;;  %v13852_v45 = vunpack.c.l.b16 %v7948_v52  ;;  %v13854_v58 = vunpack.c.l.b16 %v7958_v35  ;;  %v6377_v29 = vld [vmem:[#allocation2 + $0x90] sm:$0xf]  ;;  %v14658_v12 = vld [vmem:[#allocation17_spill] sm:$0xff] }
 0x3dd   : > { %v13860_v48 = vld [vmem:[#allocation2 + $0x98] sm:$0x1]  ;;  %v6666_v21 = vshll.u32 %v6378_v24, 16  ;;  %v8585_v52 = vrot.slane %v13848_v25, 5  ;;  %v10033_v9 = vrot.slane %v7037_v6, 9  ;;  %v6316_v0 = vadd.f32 %v14659_v14, %v14658_v12 }
 0x3de   : > { %v5597_v42 = vpop.f32.mrf.mxu2  ;;  %v6655_v47 = vsel %vm10707_vm4, %v6650_v15, %v6654_v39  ;;  %v7976_v15 = vor.u32 %v13846_v17, %v13842_v26  ;;  %v13871_v50 = vld [vmem:[#allocation2 + $0x98] sm:$0x1]  ;;  %v7987_v3 = vshll.u32 %v7788_v51, 16  ;;  %v7979_v12 = vshll.u32 %v13593_v44, 16 }
 0x3df   : > { %7674 = vmatmul.bf16.gmra.mxu3 %v10445_v54  ;;  %v5598_v7 = vadd.f32 %v5597_v42, %v13369_v11  ;;  %v6640_v11 = vrot.slane %v6639_v36, 4  ;;  %v6670_v54 = vshrl.u32 %v6378_v24, 16  ;;  %v14656_v42 = vld [vmem:[#allocation5_spill] sm:$0xff]  ;;  %v7984_v36 = vshrl.u32 %v7788_v51, 16 }
 0x3e0   : > { %8356 = vmatmul.bf16.gmra.mxu0 %v8252_v55  ;;  %v6921_v53 = vpop.f32.mrf.mxu1  ;;  %v7169_v55 = vrot.slane %v6378_v24, 5  ;;  %v6814_v39 = vunpack.c.l.b16 %v6655_v47  ;;  %v13874_v24 = vpop.f32.mrf.mxu0  ;;  %v13876_v23 = vrot.slane %v6666_v21, 5  ;;  %v7997_v44 = vshrl.u32 %v13684_v1, 16 }
 0x3e1   : > { %v13850_v2 = vadd.f32 %v5975_v20, %v5598_v7  ;;  %v13856_v31 = vadd.f32 %v6921_v53, %v6315_v46  ;;  %v7966_v20 = vor.u32 %v13840_v61, %v13838_v30  ;;  %v6645_v35 = vsel %vm10707_vm4, %v6640_v11, %v13807_v57  ;;  %v8459_v46 = vld [vmem:[#allocation2 + $0x90] sm:$0xe]  ;;  %14657 = vst [vmem:[#allocation11_spill] sm:$0xff] %v13874_v24 }
 0x3e2   : > { %v5978_v4 = vpop.f32.mrf.mxu3  ;;  %v6657_v7 = vshrl.u32 %v6377_v29, 16  ;;  %v6660_v53 = vshll.u32 %v6377_v29, 16  ;;  %v7172_v30 = vrot.slane %v13860_v48, 5  ;;  %v7170_v57 = vsel %vm10927_vm7, %v10033_v9, %v7169_v55 }
 0x3e3   : > { %14655 = vst [vmem:[#allocation13_spill] sm:$0xff] %v13850_v2  ;;  %7359 = vmatmul.bf16.gmra.mxu2 %v14656_v42  ;;  %v7171_v42 = vrot.slane %v7169_v55, 4  ;;  %v6672_v2 = vrot.slane %v6670_v54, 4  ;;  %v8587_v11 = vrot.slane %v8585_v52, 4  ;;  %v10256_v47 = vrot.slane %v8459_v46, 9 }
 0x3e4   : > { %v8588_v29 = vrot.slane %v13871_v50, 5  ;;  %v6813_v24 = vunpack.c.l.b16 %v6645_v35  ;;  %v7241_v63 = vunpack.c.l.b16 %v7170_v57  ;;  %v6659_v14 = vrot.slane %v6657_v7, 4 }
 0x3e5   : > { %v7173_v6 = vsel %vm10927_vm7, %v7171_v42, %v7172_v30  ;;  %v8586_v55 = vsel %vm10927_vm7, %v10256_v47, %v8585_v52  ;;  %v6673_v30 = vor.u32 %v6672_v2, %v13876_v23  ;;  %v6662_v51 = vrot.slane %v6660_v53, 5  ;;  %v10474_v52 = vld [vmem:[%s14513_s3 + $0x208] sm:$0xff]  ;;  %v14663_v47 = vld [vmem:[#allocation19_spill] sm:$0xff] }
 0x3e6   : > { %v5600_v61 = vpop.f32.mrf.mxu2  ;;  %v7242_v21 = vunpack.c.l.b16 %v7173_v6  ;;  %v6835_v42 = vpack.c.b16 %v6814_v39, %v6813_v24  ;;  %v7986_v35 = vrot.slane %v7984_v36, 4  ;;  %v7989_v57 = vrot.slane %v7987_v3, 5  ;;  %v10446_v39 = vld [vmem:[#allocation2 + $0x54] sm:$0xff]  ;;  %8760 = vmatpush.bf16.msra.mxu1 %v10474_v52  ;;  %v6381_v6 = vld [vmem:[#allocation2 + $0xa0] sm:$0xf]  ;;  %v14666_v52 = vld [vmem:[#allocation29_spill] sm:$0xff] }
 0x3e7   : > { %v5601_v17 = vadd.f32 %v5600_v61, %v13433_v34  ;;  %v8589_v34 = vsel %vm10927_vm7, %v8587_v11, %v8588_v29  ;;  %v6676_v61 = vshll.u32 %v13860_v48, 16  ;;  %v7977_v24 = vrot.slane %v7976_v15, 4  ;;  %v14664_v29 = vld [vmem:[#allocation16_spill] sm:$0xff] }
 0x3e8   : > { %v6924_v28 = vpop.f32.mrf.mxu1  ;;  %v7993_v2 = vshll.u32 %v13684_v1, 16  ;;  %v6674_v36 = vrot.slane %v6673_v30, 4  ;;  %v7967_v53 = vrot.slane %v7966_v20, 4  ;;  %v6663_v11 = vor.u32 %v6662_v51, %v6659_v14  ;;  %v13909_v15 = vpop.f32.mrf.mxu0 }
 0x3e9   : > { %v13886_v54 = vadd.f32 %v5978_v4, %v5601_v17  ;;  %v13892_v46 = vadd.f32 %v6924_v28, %v6316_v0  ;;  %v13896_v4 = vpack.c.b16 %v7242_v21, %v7241_v63  ;;  %v8662_v28 = vunpack.c.l.b16 %v8586_v55  ;;  %14662 = vst [vmem:[#allocation14_spill] sm:$0xff] %v13909_v15 }
 0x3ea   : > { %v5980_v9 = vpop.f32.mrf.mxu3  ;;  %v8663_v0 = vunpack.c.l.b16 %v8589_v34  ;;  %v8253_v63 = vpack.c.b16 %v13854_v58, %v13852_v45  ;;  %v7981_v17 = vrot.slane %v7979_v12, 5  ;;  %v6317_v1 = vadd.f32 %v14664_v29, %v14663_v47 }
 0x3eb   : > { %14660 = vst [vmem:[#allocation5_spill] sm:$0xff] %v13886_v54  ;;  %6963 = vmatmul.bf16.gmra.mxu1 %v6835_v42  ;;  %v6678_v21 = vrot.slane %v6676_v61, 5  ;;  %v7972_v45 = vsel %vm10707_vm4, %v7967_v53, %v13842_v26  ;;  %v7990_v58 = vor.u32 %v7989_v57, %v7986_v35  ;;  %v13920_v34 = vrot.slane %v7993_v2, 5  ;;  %v7038_v35 = vld [vmem:[#allocation2 + $0x9c] sm:$0xe] }
 0x3ec   : > { %v13906_v48 = vpack.c.b16 %v8663_v0, %v8662_v28  ;;  %v7999_v42 = vrot.slane %v7997_v44, 4  ;;  %v6690_v51 = vshll.u32 %v6381_v6, 16  ;;  %v6694_v61 = vshrl.u32 %v6381_v6, 16  ;;  %v6380_v0 = vld [vmem:[#allocation2 + $0x9c] sm:$0xf] }
 0x3ed   : > { %v6679_v14 = vsel %vm10707_vm4, %v6674_v36, %v6678_v21  ;;  %v6664_v26 = vrot.slane %v6663_v11, 4  ;;  %v13927_v57 = vunpack.c.l.b16 %v7972_v45  ;;  %v8003_v2 = vshll.u32 %v13712_v62, 16  ;;  %v7791_v36 = vld [vmem:[#allocation2 + $0x78] sm:$0xf] }
 0x3ee   : > { %v5602_v7 = vpop.f32.mrf.mxu2  ;;  %14661 = vst [vmem:[#allocation17_spill] sm:$0xff] %v13906_v48  ;;  %v8017_v53 = vshll.u32 %v13742_v38, 16  ;;  %v13937_v11 = vrot.slane %v6690_v51, 5  ;;  %v10034_v47 = vrot.slane %v7038_v35, 9  ;;  %v6684_v21 = vshll.u32 %v6380_v0, 16 }
 0x3ef   : > { %7679 = vmatmul.bf16.gmra.mxu3 %v10446_v39  ;;  %v5603_v3 = vadd.f32 %v5602_v7, %v13466_v40  ;;  %v7982_v40 = vsel %vm10707_vm4, %v7977_v24, %v7981_v17  ;;  %v6382_v39 = vld [vmem:[#allocation2 + $0xa4] sm:$0x1]  ;;  %v13929_v24 = vrot.slane %v7990_v58, 4  ;;  %v6669_v44 = vsel %vm10707_vm4, %v6664_v26, %v13876_v23  ;;  %v14667_v23 = vld [vmem:[#allocation18_spill] sm:$0xff]  ;;  %v14668_v58 = vld [vmem:[#allocation15_spill] sm:$0xff] }
 0x3f0   : > { %8361 = vmatmul.bf16.gmra.mxu0 %v8253_v63  ;;  %v6926_v20 = vpop.f32.mrf.mxu1  ;;  %v8229_v28 = vunpack.c.l.b16 %v7982_v40  ;;  %v6816_v7 = vunpack.c.l.b16 %v6679_v14  ;;  %v8000_v63 = vor.u32 %v7999_v42, %v13920_v34  ;;  %v6696_v17 = vrot.slane %v6694_v61, 4  ;;  %v13952_v35 = vpop.f32.mrf.mxu0 }
 0x3f1   : > { %v13916_v55 = vadd.f32 %v5980_v9, %v5603_v3  ;;  %v13922_v12 = vadd.f32 %v6926_v20, %v6317_v1  ;;  %v7176_v9 = vrot.slane %v6381_v6, 5  ;;  %v13939_v6 = vld [vmem:[#allocation2 + $0xa0] sm:$0xf]  ;;  %v6681_v1 = vshrl.u32 %v6380_v0, 16  ;;  %14670 = vst [vmem:[#allocation29_spill] sm:$0xff] %v13952_v35 }
 0x3f2   : > { %v5983_v30 = vpop.f32.mrf.mxu3  ;;  %v7179_v45 = vrot.slane %v6382_v39, 5  ;;  %v6318_v20 = vadd.f32 %v14668_v58, %v14667_v23  ;;  %v6815_v40 = vunpack.c.l.b16 %v6669_v44  ;;  %v8021_v42 = vshrl.u32 %v13742_v38, 16 }
 0x3f3   : > { %14665 = vst [vmem:[#allocation19_spill] sm:$0xff] %v13916_v55  ;;  %7364 = vmatmul.bf16.gmra.mxu2 %v14666_v52  ;;  %v7178_v29 = vrot.slane %v7176_v9, 4  ;;  %v7177_v14 = vsel %vm10927_vm7, %v10034_v47, %v7176_v9  ;;  %v8008_v52 = vshrl.u32 %v7791_v36, 16  ;;  %v6697_v38 = vor.u32 %v6696_v17, %v13937_v11 }
 0x3f4   : > { %v6836_v44 = vpack.c.b16 %v6816_v7, %v6815_v40  ;;  %v8011_v23 = vshll.u32 %v7791_v36, 16  ;;  %v6683_v58 = vrot.slane %v6681_v1, 4  ;;  %v6686_v9 = vrot.slane %v6684_v21, 5 }
 0x3f5   : > { %v7180_v26 = vsel %vm10927_vm7, %v7178_v29, %v7179_v45  ;;  %v7243_v47 = vunpack.c.l.b16 %v7177_v14  ;;  %v8001_v48 = vrot.slane %v8000_v63, 4  ;;  %v8023_v29 = vrot.slane %v8021_v42, 4  ;;  %v13959_v45 = vld [vmem:[#allocation2 + $0xa4] sm:$0x1]  ;;  %v14672_v14 = vld [vmem:[#allocation21_spill] sm:$0xff] }
 0x3f6   : > { %v5605_v3 = vpop.f32.mrf.mxu2  ;;  %v14671_v36 = vrot.slane %v13939_v6, 5  ;;  %v6698_v21 = vrot.slane %v6697_v38, 4  ;;  %v13970_v63 = vrot.slane %v8008_v52, 4  ;;  %v8027_v40 = vshll.u32 %v13753_v49, 16 }
 0x3f7   : > { %v5606_v62 = vadd.f32 %v5605_v3, %v13500_v8  ;;  %v10447_v8 = vld [vmem:[#allocation2 + $0x60] sm:$0xff]  ;;  %v8595_v42 = vrot.slane %v13959_v45, 5 }
 0x3f8   : > { %v6929_v51 = vpop.f32.mrf.mxu1  ;;  %v8594_v17 = vrot.slane %v14671_v36, 4  ;;  %v14001_v36 = vrot.slane %v8027_v40, 5  ;;  %v8460_v40 = vld [vmem:[#allocation2 + $0x9c] sm:$0xe] }
 0x3f9   : > { %v13947_v61 = vadd.f32 %v5983_v30, %v5606_v62  ;;  %v13954_v3 = vadd.f32 %v6929_v51, %v6318_v20  ;;  %v7244_v30 = vunpack.c.l.b16 %v7180_v26  ;;  %v6700_v62 = vshll.u32 %v6382_v39, 16  ;;  %v14673_v26 = vld [vmem:[#allocation20_spill] sm:$0xff] }
 0x3fa   : > { %v5985_v0 = vpop.f32.mrf.mxu3  ;;  %v8254_v20 = vpack.c.b16 %v8229_v28, %v13927_v57  ;;  %v8005_v51 = vrot.slane %v8003_v2, 5  ;;  %v7996_v39 = vsel %vm10707_vm4, %v13929_v24, %v13920_v34  ;;  %v6687_v28 = vor.u32 %v6686_v9, %v6683_v58  ;;  %v6384_v2 = vld [vmem:[#allocation2 + $0xac] sm:$0xf] }
 0x3fb   : > { %14669 = vst [vmem:[#allocation16_spill] sm:$0xff] %v13947_v61  ;;  %6968 = vmatmul.bf16.gmra.mxu1 %v6836_v44  ;;  %v13957_v61 = vrot.slane %v8017_v53, 5  ;;  %v13962_v7 = vpack.c.b16 %v7244_v30, %v7243_v47  ;;  %v13972_v53 = vrot.slane %v8011_v23, 5  ;;  %v6319_v44 = vadd.f32 %v14673_v26, %v14672_v14  ;;  %v13986_v23 = vld [vmem:[#allocation2 + $0x84] sm:$0xf] }
 0x3fc   : > { %v6702_v38 = vrot.slane %v6700_v62, 5  ;;  %v8006_v34 = vsel %vm10707_vm4, %v8001_v48, %v8005_v51  ;;  %v13990_v49 = vsel %vm10927_vm7, %v8594_v17, %v8595_v42  ;;  %v6383_v48 = vld [vmem:[#allocation2 + $0xa8] sm:$0xf]  ;;  %v6714_v30 = vshll.u32 %v6384_v2, 16 }
 0x3fd   : > { %v8024_v24 = vor.u32 %v8023_v29, %v13957_v61  ;;  %v6718_v62 = vshrl.u32 %v6384_v2, 16  ;;  %v14675_v29 = vld [vmem:[#allocation35_spill] sm:$0xff]  ;;  %v8014_v51 = vor.u32 %v13972_v53, %v13970_v63  ;;  %v7039_v17 = vld [vmem:[#allocation2 + $0xa8] sm:$0xe]  ;;  %v8035_v42 = vshll.u32 %v13986_v23, 16 }
 0x3fe   : > { %v5607_v1 = vpop.f32.mrf.mxu2  ;;  %v6703_v47 = vsel %vm10707_vm4, %v6698_v21, %v6702_v38  ;;  %v8032_v21 = vshrl.u32 %v13986_v23, 16  ;;  %v7183_v14 = vrot.slane %v6384_v2, 5  ;;  %v6705_v63 = vshrl.u32 %v6383_v48, 16 }
 0x3ff   : > { %7684 = vmatmul.bf16.gmra.mxu3 %v10447_v8  ;;  %v5608_v57 = vadd.f32 %v5607_v1, %v13545_v41  ;;  %v13984_v41 = vunpack.c.l.b16 %v7996_v39  ;;  %v14003_v1 = vpop.f32.mrf.mxu0  ;;  %v14005_v39 = vld [vmem:[#allocation2 + $0xb0] sm:$0x1]  ;;  %v6818_v26 = vunpack.c.l.b16 %v6703_v47  ;;  %v6708_v53 = vshll.u32 %v6383_v48, 16 }
 0x400   : > { %8366 = vmatmul.bf16.gmra.mxu0 %v8254_v20  ;;  %v6931_v52 = vpop.f32.mrf.mxu1  ;;  %v13997_v20 = vunpack.c.l.b16 %v8006_v34  ;;  %14676 = vst [vmem:[#allocation15_spill] sm:$0xff] %v14003_v1  ;;  %v14014_v38 = vrot.slane %v6714_v30, 5  ;;  %v6720_v34 = vrot.slane %v6718_v62, 4  ;;  %v8045_v2 = vshrl.u32 %v13785_v43, 16  ;;  %v14677_v1 = vld [vmem:[#allocation6_spill] sm:$0xff] }
 0x401   : > { %v13982_v8 = vadd.f32 %v5985_v0, %v5608_v57  ;;  %v13992_v9 = vadd.f32 %v6931_v52, %v6319_v44  ;;  %v6688_v0 = vrot.slane %v6687_v28, 4  ;;  %v14007_v57 = vrot.slane %v8024_v24, 4 }
 0x402   : > { %v5988_v58 = vpop.f32.mrf.mxu3  ;;  %v10035_v52 = vrot.slane %v7039_v17, 9  ;;  %v7185_v24 = vrot.slane %v7183_v14, 4  ;;  %v7186_v23 = vrot.slane %v14005_v39, 5  ;;  %v10257_v30 = vrot.slane %v8460_v40, 9 }
 0x403   : > { %14674 = vst [vmem:[#allocation18_spill] sm:$0xff] %v13982_v8  ;;  %7369 = vmatmul.bf16.gmra.mxu2 %v14675_v29  ;;  %v6693_v28 = vsel %vm10707_vm4, %v6688_v0, %v13937_v11  ;;  %v8041_v8 = vshll.u32 %v13785_v43, 16  ;;  %v14678_v11 = vld [vmem:[#allocation3_spill] sm:$0xff]  ;;  %v6707_v17 = vrot.slane %v6705_v63, 4  ;;  %v6710_v35 = vrot.slane %v6708_v53, 5 }
 0x404   : > { %v6320_v47 = vadd.f32 %v14678_v11, %v14677_v1  ;;  %v6817_v0 = vunpack.c.l.b16 %v6693_v28  ;;  %v7184_v48 = vsel %vm10927_vm7, %v10035_v52, %v7183_v14  ;;  %v6721_v15 = vor.u32 %v6720_v34, %v14014_v38  ;;  %v14031_v1 = vld [vmem:[#allocation2 + $0xac] sm:$0xf]  ;;  %v10473_v34 = vld [vmem:[%s14513_s3 + $0x200] sm:$0xff] }
 0x405   : > { %v14681_v28 = vrot.slane %v13939_v6, 5  ;;  %v14039_v63 = vrot.slane %v8014_v51, 4  ;;  %v7245_v53 = vunpack.c.l.b16 %v7184_v48  ;;  %v14049_v52 = vrot.slane %v8041_v8, 5  ;;  %8761 = vmatpush.bf16.msra.mxu1 %v10473_v34 }
 0x406   : > { %v5610_v44 = vpop.f32.mrf.mxu2  ;;  %v6837_v54 = vpack.c.b16 %v6818_v26, %v6817_v0  ;;  %v8030_v26 = vsel %vm10707_vm4, %v14007_v57, %v14001_v36  ;;  %v6711_v57 = vor.u32 %v6710_v35, %v6707_v17  ;;  %v6722_v11 = vrot.slane %v6721_v15, 4  ;;  %v8461_v17 = vld [vmem:[#allocation2 + $0xa8] sm:$0xe] }
 0x407   : > { %v5611_v29 = vadd.f32 %v5610_v44, %v13583_v16  ;;  %v7187_v16 = vsel %vm10927_vm7, %v7185_v24, %v7186_v23  ;;  %v8593_v14 = vsel %vm10927_vm7, %v10257_v30, %v14681_v28  ;;  %v8047_v24 = vrot.slane %v8045_v2, 4  ;;  %v14057_v23 = vpop.f32.mrf.mxu0  ;;  %v14684_v28 = vld [vmem:[#allocation4_spill] sm:$0xff] }
 0x408   : > { %v6934_v55 = vpop.f32.mrf.mxu1  ;;  %v7246_v40 = vunpack.c.l.b16 %v7187_v16  ;;  %v14059_v8 = vrot.slane %v8032_v21, 4  ;;  %v14061_v2 = vrot.slane %v8035_v42, 5  ;;  %v14683_v16 = vld [vmem:[#allocation26_spill] sm:$0xff]  ;;  %v8020_v15 = vsel %vm10707_vm4, %v14039_v63, %v13957_v61 }
 0x409   : > { %v14024_v62 = vadd.f32 %v5988_v58, %v5611_v29  ;;  %v14028_v43 = vadd.f32 %v6934_v55, %v6320_v47  ;;  %v8255_v58 = vpack.c.b16 %v13997_v20, %v13984_v41  ;;  %v6724_v55 = vshll.u32 %v14005_v39, 16  ;;  %v14051_v41 = vld [vmem:[#allocation2 + $0xb0] sm:$0x1]  ;;  %v6387_v47 = vld [vmem:[#allocation2 + $0xb8] sm:$0xf] }
 0x40a   : > { %v5990_v44 = vpop.f32.mrf.mxu3  ;;  %v10448_v20 = vld [vmem:[#allocation2 + $0x6c] sm:$0xff]  ;;  %v14053_v51 = vpack.c.b16 %v7246_v40, %v7245_v53  ;;  %v8665_v39 = vunpack.c.l.b16 %v13990_v49  ;;  %v8599_v29 = vrot.slane %v14031_v1, 5  ;;  %v8602_v49 = vrot.slane %v14051_v41, 5  ;;  %v6386_v42 = vld [vmem:[#allocation2 + $0xb4] sm:$0xf] }
 0x40b   : > { %14679 = vst [vmem:[#allocation21_spill] sm:$0xff] %v14024_v62  ;;  %6973 = vmatmul.bf16.gmra.mxu1 %v6837_v54  ;;  %v8664_v54 = vunpack.c.l.b16 %v8593_v14  ;;  %v6321_v14 = vadd.f32 %v14684_v28, %v14683_v16  ;;  %v6726_v35 = vrot.slane %v6724_v55, 5  ;;  %v14073_v21 = vunpack.c.l.b16 %v8030_v26  ;;  %v14085_v26 = vld [vmem:[#allocation2 + $0xbc] sm:$0x1] }
 0x40c   : > { %14680 = vst [vmem:[#allocation20_spill] sm:$0xff] %v14028_v43  ;;  %v8601_v30 = vrot.slane %v8599_v29, 4  ;;  %v6738_v40 = vshll.u32 %v6387_v47, 16  ;;  %v8048_v34 = vor.u32 %v8047_v24, %v14049_v52  ;;  %v6742_v63 = vshrl.u32 %v6387_v47, 16 }
 0x40d   : > { %v14064_v48 = vpack.c.b16 %v8665_v39, %v8664_v54  ;;  %v6712_v39 = vrot.slane %v6711_v57, 4  ;;  %v6727_v61 = vsel %vm10707_vm4, %v6722_v11, %v6726_v35  ;;  %v8038_v24 = vor.u32 %v14061_v2, %v14059_v8 }
 0x40e   : > { %v5612_v36 = vpop.f32.mrf.mxu2  ;;  %v8051_v57 = vshll.u32 %v13801_v13, 16  ;;  %v7190_v16 = vrot.slane %v6387_v47, 5  ;;  %v6820_v11 = vunpack.c.l.b16 %v6727_v61  ;;  %v14093_v28 = vrot.slane %v6738_v40, 5  ;;  %v14103_v40 = vld [vmem:[#allocation2 + $0xb8] sm:$0xf] }
 0x40f   : > { %7689 = vmatmul.bf16.gmra.mxu3 %v10448_v20  ;;  %v5613_v0 = vadd.f32 %v5612_v36, %v13638_v59  ;;  %14682 = vst [vmem:[#allocation35_spill] sm:$0xff] %v14064_v48  ;;  %v7040_v20 = vld [vmem:[#allocation2 + $0xb4] sm:$0xe]  ;;  %v6732_v36 = vshll.u32 %v6386_v42, 16  ;;  %v14116_v48 = vld [vmem:[#allocation2 + $0xbc] sm:$0x1] }
 0x410   : > { %8371 = vmatmul.bf16.gmra.mxu0 %v8255_v58  ;;  %v6936_v59 = vpop.f32.mrf.mxu1  ;;  %v8603_v58 = vsel %vm10927_vm7, %v8601_v30, %v8602_v49  ;;  %v6717_v30 = vsel %vm10707_vm4, %v6712_v39, %v14014_v38  ;;  %v10036_v49 = vrot.slane %v7040_v20, 9  ;;  %v7192_v2 = vrot.slane %v7190_v16, 4  ;;  %v14687_v20 = vld [vmem:[#allocation30_spill] sm:$0xff]  ;;  %v14688_v39 = vld [vmem:[#allocation24_spill] sm:$0xff] }
 0x411   : > { %v14075_v53 = vadd.f32 %v5990_v44, %v5613_v0  ;;  %v14080_v54 = vadd.f32 %v6936_v59, %v6321_v14  ;;  %v6729_v44 = vshrl.u32 %v6386_v42, 16  ;;  %v10258_v0 = vrot.slane %v8461_v17, 9 }
 0x412   : > { %v5993_v55 = vpop.f32.mrf.mxu3  ;;  %v6744_v42 = vrot.slane %v6742_v63, 4  ;;  %v7191_v8 = vsel %vm10927_vm7, %v10036_v49, %v7190_v16  ;;  %v7193_v38 = vrot.slane %v14085_v26, 5  ;;  %v6819_v17 = vunpack.c.l.b16 %v6717_v30  ;;  %v8462_v49 = vld [vmem:[#allocation2 + $0xb4] sm:$0xe] }
 0x413   : > { %14685 = vst [vmem:[#allocation6_spill] sm:$0xff] %v14075_v53  ;;  %7374 = vmatmul.bf16.gmra.mxu2 %v13506_v5  ;;  %v14095_v5 = vrot.slane %v8048_v34, 4  ;;  %v8600_v14 = vsel %vm10927_vm7, %v10258_v0, %v8599_v29  ;;  %v6731_v47 = vrot.slane %v6729_v44, 4  ;;  %v6734_v59 = vrot.slane %v6732_v36, 5  ;;  %v14105_v34 = vpop.f32.mrf.mxu0 }
 0x414   : > { %14686 = vst [vmem:[#allocation3_spill] sm:$0xff] %v14080_v54  ;;  %v6322_v29 = vadd.f32 %v14688_v39, %v14687_v20  ;;  %v7194_v61 = vsel %vm10927_vm7, %v7192_v2, %v7193_v38  ;;  %v8666_v63 = vunpack.c.l.b16 %v8600_v14  ;;  %v8667_v0 = vunpack.c.l.b16 %v8603_v58  ;;  %v14121_v38 = vld [vmem:[#allocation2 + $0x90] sm:$0xf] }
 0x415   : > { %v7247_v30 = vunpack.c.l.b16 %v7191_v8  ;;  %v7248_v44 = vunpack.c.l.b16 %v7194_v61  ;;  %v6745_v43 = vor.u32 %v6744_v42, %v14093_v28  ;;  %v8606_v2 = vrot.slane %v14103_v40, 5  ;;  %v10449_v42 = vld [vmem:[#allocation2 + $0x78] sm:$0xff] }
 0x416   : > { %v5615_v35 = vpop.f32.mrf.mxu2  ;;  %v14118_v20 = vpack.c.b16 %v8667_v0, %v8666_v63  ;;  %v8232_v14 = vunpack.c.l.b16 %v8020_v15  ;;  %v6735_v58 = vor.u32 %v6734_v59, %v6731_v47  ;;  %v6748_v8 = vshll.u32 %v14085_v26, 16 }
 0x417   : > { %v5616_v13 = vadd.f32 %v5615_v35, %v13671_v19  ;;  %v6838_v19 = vpack.c.b16 %v6820_v11, %v6819_v17  ;;  %v10259_v11 = vrot.slane %v8462_v49, 9  ;;  %v8053_v17 = vrot.slane %v8051_v57, 5  ;;  %v14692_v49 = vld [vmem:[#allocation32_spill] sm:$0xff] }
 0x418   : > { %v6939_v16 = vpop.f32.mrf.mxu1  ;;  %14691 = vst [vmem:[#allocation30_spill] sm:$0xff] %v14118_v20  ;;  %v8256_v39 = vpack.c.b16 %v14073_v21, %v8232_v14  ;;  %v8608_v61 = vrot.slane %v8606_v2, 4  ;;  %v8609_v15 = vrot.slane %v14116_v48, 5  ;;  %v6746_v59 = vrot.slane %v6745_v43, 4 }
 0x419   : > { %v14111_v54 = vadd.f32 %v5993_v55, %v5616_v13  ;;  %v14113_v35 = vadd.f32 %v6939_v16, %v6322_v29  ;;  %v14123_v55 = vpack.c.b16 %v7248_v44, %v7247_v30  ;;  %v14126_v13 = vrot.slane %v8038_v24, 4  ;;  %v14693_v16 = vld [vmem:[#allocation28_spill] sm:$0xff] }
 0x41a   : > { %v5995_v36 = vpop.f32.mrf.mxu3  ;;  %v8607_v29 = vsel %vm10927_vm7, %v10259_v11, %v8606_v2  ;;  %v8054_v26 = vsel %vm10707_vm4, %v14095_v5, %v8053_v17  ;;  %v6736_v57 = vrot.slane %v6735_v58, 4  ;;  %v8065_v0 = vshll.u32 %v13848_v25, 16  ;;  %v6390_v44 = vld [vmem:[#allocation2 + $0xc4] sm:$0xf]  ;;  %v7041_v2 = vld [vmem:[#allocation2 + $0xc0] sm:$0xe] }
 0x41b   : > { %14689 = vst [vmem:[#allocation26_spill] sm:$0xff] %v14111_v54  ;;  %6978 = vmatmul.bf16.gmra.mxu1 %v6838_v19  ;;  %v8610_v43 = vsel %vm10927_vm7, %v8608_v61, %v8609_v15  ;;  %v6323_v19 = vadd.f32 %v14693_v16, %v14692_v49  ;;  %v6750_v30 = vrot.slane %v6748_v8, 5  ;;  %v8668_v14 = vunpack.c.l.b16 %v8607_v29  ;;  %v8463_v61 = vld [vmem:[#allocation2 + $0xc0] sm:$0xe]  ;;  %v14153_v15 = vpop.f32.mrf.mxu0  ;;  %v14166_v49 = vld [vmem:[#allocation2 + $0xc8] sm:$0x1] }
 0x41c   : > { %14690 = vst [vmem:[#allocation4_spill] sm:$0xff] %v14113_v35  ;;  %v8669_v5 = vunpack.c.l.b16 %v8610_v43  ;;  %v14161_v43 = vld [vmem:[#allocation2 + $0xc4] sm:$0xf]  ;;  %v10037_v16 = vrot.slane %v7041_v2, 9  ;;  %v14168_v58 = vrot.slane %v8065_v0, 5  ;;  %v14699_v35 = vld [vmem:[#allocation33_spill] sm:$0xff] }
 0x41d   : > { %14695 = vst [vmem:[#allocation32_spill] sm:$0xff] %v14153_v15  ;;  %v6751_v29 = vsel %vm10707_vm4, %v6746_v59, %v6750_v30  ;;  %v10260_v59 = vrot.slane %v8463_v61, 9 }
 0x41e   : > { %v5617_v47 = vpop.f32.mrf.mxu2  ;;  %v6822_v30 = vunpack.c.l.b16 %v6751_v29  ;;  %v14698_v29 = vld [vmem:[#allocation34_spill] sm:$0xff] }
 0x41f   : > { %7694 = vmatmul.bf16.gmra.mxu3 %v10449_v42  ;;  %v5618_v21 = vadd.f32 %v5617_v47, %v13704_v60  ;;  %v6741_v60 = vsel %vm10707_vm4, %v6736_v57, %v14093_v28  ;;  %v8069_v42 = vshrl.u32 %v13848_v25, 16  ;;  %v8235_v47 = vunpack.c.l.b16 %v8054_v26 }
 0x420   : > { %8376 = vmatmul.bf16.gmra.mxu0 %v8256_v39  ;;  %v6941_v11 = vpop.f32.mrf.mxu1  ;;  %v14163_v28 = vpack.c.b16 %v8669_v5, %v8668_v14  ;;  %v6762_v25 = vshll.u32 %v6390_v44, 16  ;;  %v6766_v57 = vshrl.u32 %v6390_v44, 16  ;;  %v8613_v26 = vrot.slane %v14161_v43, 5 }
 0x421   : > { %v14146_v17 = vadd.f32 %v5995_v36, %v5618_v21  ;;  %v14155_v8 = vadd.f32 %v6941_v11, %v6323_v19  ;;  %v6389_v36 = vld [vmem:[#allocation2 + $0xc0] sm:$0xf]  ;;  %v14159_v21 = vld [vmem:[#allocation2 + $0xc8] sm:$0x1]  ;;  %v7197_v19 = vrot.slane %v6390_v44, 5  ;;  %v6821_v11 = vunpack.c.l.b16 %v6741_v60 }
 0x422   : > { %v7655_v39 = vpop.f32.mrf.mxu3  ;;  %14697 = vst [vmem:[#allocation55_spill] sm:$0xff] %v14163_v28  ;;  %v6753_v24 = vshrl.u32 %v6389_v36, 16  ;;  %v7200_v5 = vrot.slane %v14159_v21, 5  ;;  %v8614_v28 = vsel %vm10927_vm7, %v10260_v59, %v8613_v26  ;;  %v8615_v2 = vrot.slane %v8613_v26, 4 }
 0x423   : > { %14694 = vst [vmem:[#allocation24_spill] sm:$0xff] %v14146_v17  ;;  %7379 = vmatmul.bf16.gmra.mxu2 %v13587_v10  ;;  %v7198_v14 = vsel %vm10927_vm7, %v10037_v16, %v7197_v19  ;;  %v7199_v63 = vrot.slane %v7197_v19, 4  ;;  %v8616_v44 = vrot.slane %v14166_v49, 5  ;;  %v6756_v60 = vshll.u32 %v6389_v36, 16 }
 0x424   : > { %14696 = vst [vmem:[#allocation28_spill] sm:$0xff] %v14155_v8  ;;  %v6764_v61 = vrot.slane %v6762_v25, 5  ;;  %v6768_v8 = vrot.slane %v6766_v57, 4  ;;  %v6324_v20 = vadd.f32 %v14699_v35, %v14698_v29  ;;  %v7249_v17 = vunpack.c.l.b16 %v7198_v14  ;;  %v14192_v14 = vpop.f32.mrf.mxu0 }
 0x425   : > { %v7201_v16 = vsel %vm10927_vm7, %v7199_v63, %v7200_v5  ;;  %v8617_v19 = vsel %vm10927_vm7, %v8615_v2, %v8616_v44  ;;  %v8670_v53 = vunpack.c.l.b16 %v8614_v28  ;;  %v6839_v25 = vpack.c.b16 %v6822_v30, %v6821_v11 }
 0x426   : > { %v7340_v10 = vpop.f32.mrf.mxu2  ;;  %v7250_v26 = vunpack.c.l.b16 %v7201_v16  ;;  %v8671_v15 = vunpack.c.l.b16 %v8617_v19  ;;  %v6755_v57 = vrot.slane %v6753_v24, 4  ;;  %v6758_v35 = vrot.slane %v6756_v60, 5 }
 0x427   : > { %v7420_v0 = vadd.f32 %v7340_v10, %v13748_v56  ;;  %v8071_v10 = vrot.slane %v8069_v42, 4  ;;  %v6769_v29 = vor.u32 %v6768_v8, %v6764_v61  ;;  %v14701_v8 = vshrl.u32 %v14121_v38, 16 }
 0x428   : > { %v6944_v54 = vpop.f32.mrf.mxu1  ;;  %v14188_v62 = vpack.c.b16 %v7250_v26, %v7249_v17  ;;  %v14190_v63 = vpack.c.b16 %v8671_v15, %v8670_v53  ;;  %v6759_v11 = vor.u32 %v6758_v35, %v6755_v57  ;;  %v14702_v5 = vshll.u32 %v14121_v38, 16 }
 0x429   : > { %v14184_v59 = vadd.f32 %v7655_v39, %v7420_v0  ;;  %v14186_v36 = vadd.f32 %v6944_v54, %v6324_v20  ;;  %v14700_v39 = vsel %vm10707_vm4, %v14126_v13, %v14049_v52  ;;  %v10450_v54 = vld [vmem:[#allocation2 + $0x84] sm:$0xff]  ;;  %v6772_v20 = vshll.u32 %v14159_v21, 16 }
 0x42a   : > { %v7657_v56 = vpop.f32.mrf.mxu3  ;;  %v8234_v28 = vunpack.c.l.b16 %v14700_v39  ;;  %v8058_v17 = vrot.slane %v14701_v8, 4  ;;  %v8072_v53 = vor.u32 %v8071_v10, %v14168_v58  ;;  %v6770_v30 = vrot.slane %v6769_v29, 4  ;;  %v14703_v52 = vld [vmem:[#allocation37_spill] sm:$0xff]  ;;  %v14704_v13 = vld [vmem:[#allocation36_spill] sm:$0xff] }
 0x42b   : > { %6983 = vmatmul.bf16.gmra.mxu1 %v6839_v25  ;;  %v8061_v2 = vrot.slane %v14702_v5, 5  ;;  %v6325_v44 = vadd.f32 %v14704_v13, %v14703_v52  ;;  %v8075_v21 = vshll.u32 %v13871_v50, 16  ;;  %v6774_v60 = vrot.slane %v6772_v20, 5 }
 0x42c   : > { %v8257_v42 = vpack.c.b16 %v8235_v47, %v8234_v28  ;;  %v8073_v26 = vrot.slane %v8072_v53, 4  ;;  %v14218_v50 = vpop.f32.mrf.mxu0  ;;  %v8093_v20 = vshrl.u32 %v13939_v6, 16 }
 0x42d   : > { %v6775_v38 = vsel %vm10707_vm4, %v6770_v30, %v6774_v60  ;;  %v8062_v25 = vor.u32 %v8061_v2, %v8058_v17  ;;  %v8077_v57 = vrot.slane %v8075_v21, 5  ;;  %v10451_v21 = vld [vmem:[#allocation2 + $0x90] sm:$0xff] }
 0x42e   : > { %v7342_v24 = vpop.f32.mrf.mxu2  ;;  %v6824_v35 = vunpack.c.l.b16 %v6775_v38 }
 0x42f   : > { %7699 = vmatmul.bf16.gmra.mxu3 %v10450_v54  ;;  %v7421_v15 = vadd.f32 %v7342_v24, %v13791_v18  ;;  %v6760_v18 = vrot.slane %v6759_v11, 4  ;;  %v8078_v29 = vsel %vm10707_vm4, %v8073_v26, %v8077_v57  ;;  %v8063_v28 = vrot.slane %v8062_v25, 4  ;;  %v14705_v24 = vld [vmem:[#allocation40_spill] sm:$0xff]  ;;  %v14707_v25 = vld [vmem:[#allocation42_spill] sm:$0xff]  ;;  %v14708_v57 = vld [vmem:[#allocation41_spill] sm:$0xff] }
 0x430   : > { %8381 = vmatmul.bf16.gmra.mxu0 %v8257_v42  ;;  %v6946_v47 = vpop.f32.mrf.mxu1  ;;  %v8089_v54 = vshll.u32 %v13939_v6, 16  ;;  %v14706_v42 = vld [vmem:[#allocation38_spill] sm:$0xff]  ;;  %v8237_v11 = vunpack.c.l.b16 %v8078_v29  ;;  %v8095_v6 = vrot.slane %v8093_v20, 4  ;;  %v8099_v29 = vshll.u32 %v13959_v45, 16 }
 0x431   : > { %v14209_v0 = vadd.f32 %v7657_v56, %v7421_v15  ;;  %v14211_v19 = vadd.f32 %v6946_v47, %v6325_v44  ;;  %v6765_v10 = vsel %vm10707_vm4, %v6760_v18, %v6764_v61  ;;  %v6326_v8 = vadd.f32 %v14706_v42, %v14705_v24 }
 0x432   : > { %v7660_v16 = vpop.f32.mrf.mxu3  ;;  %v6823_v17 = vunpack.c.l.b16 %v6765_v10  ;;  %v8068_v15 = vsel %vm10707_vm4, %v8063_v28, %v14168_v58  ;;  %v8091_v13 = vrot.slane %v8089_v54, 5  ;;  %v6327_v10 = vadd.f32 %v14708_v57, %v14707_v25 }
 0x433   : > { %7384 = vmatmul.bf16.gmra.mxu2 %v13675_v22  ;;  %v7800_v22 = vld [vmem:[#allocation2 + $0x9c] sm:$0xf]  ;;  %v8236_v44 = vunpack.c.l.b16 %v8068_v15  ;;  %v8117_v45 = vshrl.u32 %v14031_v1, 16  ;;  %v14709_v15 = vld [vmem:[#allocation44_spill] sm:$0xff] }
 0x434   : > { %v6840_v5 = vpack.c.b16 %v6824_v35, %v6823_v17  ;;  %v8080_v2 = vshrl.u32 %v7800_v22, 16  ;;  %v8083_v52 = vshll.u32 %v7800_v22, 16  ;;  %v8096_v58 = vor.u32 %v8095_v6, %v8091_v13  ;;  %v14235_v38 = vpop.f32.mrf.mxu0  ;;  %v7803_v17 = vld [vmem:[#allocation2 + $0xa8] sm:$0xf] }
 0x435   : > { %v8258_v60 = vpack.c.b16 %v8237_v11, %v8236_v44  ;;  %v14710_v11 = vld [vmem:[#allocation45_spill] sm:$0xff]  ;;  %v8104_v44 = vshrl.u32 %v7803_v17, 16 }
 0x436   : > { %v7345_v56 = vpop.f32.mrf.mxu2  ;;  %v8085_v26 = vrot.slane %v8083_v52, 5  ;;  %v8097_v54 = vrot.slane %v8096_v58, 4 }
 0x437   : > { %v7422_v39 = vadd.f32 %v7345_v56, %v13822_v33  ;;  %v8106_v57 = vrot.slane %v8104_v44, 4 }
 0x438   : > { %v6949_v61 = vpop.f32.mrf.mxu1 }
 0x439   : > { %v14227_v53 = vadd.f32 %v7660_v16, %v7422_v39  ;;  %v14232_v33 = vadd.f32 %v6949_v61, %v6326_v8  ;;  %v8082_v16 = vrot.slane %v8080_v2, 4  ;;  %v8113_v61 = vshll.u32 %v14031_v1, 16  ;;  %v14711_v1 = vld [vmem:[#allocation23_spill] sm:$0xff] }
 0x43a   : > { %v7662_v30 = vpop.f32.mrf.mxu3 }
 0x43b   : > { %6988 = vmatmul.bf16.gmra.mxu1 %v6840_v5  ;;  %v8086_v22 = vor.u32 %v8085_v26, %v8082_v16 }
 0x43c   : > { %v14256_v52 = vpop.f32.mrf.mxu0 }
 0x43d   : > { %v8087_v24 = vrot.slane %v8086_v22, 4 }
 0x43e   : > { %v7347_v47 = vpop.f32.mrf.mxu2 }
 0x43f   : > { %7704 = vmatmul.bf16.gmra.mxu3 %v10451_v21  ;;  %v7423_v18 = vadd.f32 %v7347_v47, %v13856_v31  ;;  %v8101_v31 = vrot.slane %v8099_v29, 5  ;;  %v8107_v21 = vshll.u32 %v7803_v17, 16  ;;  %v8115_v47 = vrot.slane %v8113_v61, 5  ;;  %v14712_v29 = vld [vmem:[#allocation46_spill] sm:$0xff] }
 0x440   : > { %8386 = vmatmul.bf16.gmra.mxu0 %v8258_v60  ;;  %v6951_v56 = vpop.f32.mrf.mxu1  ;;  %v8119_v60 = vrot.slane %v8117_v45, 4 }
 0x441   : > { %v14239_v35 = vadd.f32 %v7662_v30, %v7423_v18  ;;  %v14242_v28 = vadd.f32 %v6951_v56, %v6327_v10  ;;  %v8102_v8 = vsel %vm10707_vm4, %v8097_v54, %v8101_v31  ;;  %v6328_v30 = vadd.f32 %v14710_v11, %v14709_v15  ;;  %v10452_v18 = vld [vmem:[#allocation2 + $0x9c] sm:$0xff] }
 0x442   : > { %v7665_v39 = vpop.f32.mrf.mxu3  ;;  %v8239_v6 = vunpack.c.l.b16 %v8102_v8  ;;  %v8109_v10 = vrot.slane %v8107_v21, 5  ;;  %v8120_v56 = vor.u32 %v8119_v60, %v8115_v47 }
 0x443   : > { %7389 = vmatmul.bf16.gmra.mxu2 %v13744_v32  ;;  %v8092_v32 = vsel %vm10707_vm4, %v8087_v24, %v8091_v13 }
 0x444   : > { %v8238_v26 = vunpack.c.l.b16 %v8092_v32  ;;  %v8121_v8 = vrot.slane %v8120_v56, 4  ;;  %v14270_v17 = vpop.f32.mrf.mxu0  ;;  %v14714_v32 = vld [vmem:[#allocation48_spill] sm:$0xff] }
 0x446   : > { %v7350_v20 = vpop.f32.mrf.mxu2  ;;  %v8259_v25 = vpack.c.b16 %v8239_v6, %v8238_v26  ;;  %v14715_v6 = vld [vmem:[#allocation50_spill] sm:$0xff] }
 0x447   : > { %v7424_v42 = vadd.f32 %v7350_v20, %v13892_v46  ;;  %v8123_v20 = vshll.u32 %v14051_v41, 16  ;;  %v8141_v41 = vshrl.u32 %v14103_v40, 16  ;;  %v6330_v44 = vadd.f32 %v14715_v6, %v14714_v32 }
 0x448   : > { %v6954_v5 = vpop.f32.mrf.mxu1  ;;  %v8161_v6 = vshll.u32 %v14161_v43, 16 }
 0x449   : > { %v14252_v2 = vadd.f32 %v7665_v39, %v7424_v42  ;;  %v14258_v46 = vadd.f32 %v6954_v5, %v6328_v30  ;;  %v14713_v39 = vld [vmem:[#allocation47_spill] sm:$0xff]  ;;  %v8110_v42 = vor.u32 %v8109_v10, %v8106_v57  ;;  %v8125_v61 = vrot.slane %v8123_v20, 5  ;;  %v10453_v10 = vld [vmem:[#allocation2 + $0xa8] sm:$0xff] }
 0x44a   : > { %v7667_v16 = vpop.f32.mrf.mxu3  ;;  %v6329_v22 = vadd.f32 %v14713_v39, %v14712_v29  ;;  %v8137_v5 = vshll.u32 %v14103_v40, 16  ;;  %v14716_v57 = vld [vmem:[#allocation7_spill] sm:$0xff] }
 0x44b   : > { %8762 = vmatmul.bf16.vlgmr.msra.gmra.mxu1 %v14711_v1  ;;  %v8111_v15 = vrot.slane %v8110_v42, 4  ;;  %v8126_v30 = vsel %vm10707_vm4, %v8121_v8, %v8125_v61  ;;  %v14717_v42 = vld [vmem:[#allocation51_spill] sm:$0xff]  ;;  %v14718_v8 = vld [vmem:[#allocation52_spill] sm:$0xff] }
 0x44c   : > { %v6331_v61 = vadd.f32 %v14718_v8, %v14717_v42  ;;  %v14722_v42 = vld [vmem:[#allocation25_spill] sm:$0xff]  ;;  %v14723_v8 = vld [vmem:[#allocation12_spill] sm:$0xff] }
 0x44e   : > { %v7352_v58 = vpop.f32.mrf.mxu2 }
 0x44f   : > { %7709 = vmatmul.bf16.gmra.mxu3 %v10452_v18  ;;  %v7425_v13 = vadd.f32 %v7352_v58, %v13922_v12  ;;  %v8139_v58 = vrot.slane %v8137_v5, 5 }
 0x450   : > { %8391 = vmatmul.bf16.gmra.mxu0 %v8259_v25  ;;  %v6956_v54 = vpop.f32.mrf.mxu1  ;;  %v8143_v25 = vrot.slane %v8141_v41, 4 }
 0x451   : > { %v14264_v31 = vadd.f32 %v7667_v16, %v7425_v13  ;;  %v14267_v24 = vadd.f32 %v6956_v54, %v6329_v22  ;;  %v8116_v16 = vsel %vm10707_vm4, %v8111_v15, %v8115_v47  ;;  %v14286_v13 = vpop.f32.mrf.mxu0  ;;  %v8147_v15 = vshll.u32 %v14116_v48, 16 }
 0x452   : > { %v7670_v12 = vpop.f32.mrf.mxu3  ;;  %v8240_v40 = vunpack.c.l.b16 %v8116_v16  ;;  %v8144_v54 = vor.u32 %v8143_v25, %v8139_v58  ;;  %v14720_v16 = vld [vmem:[#allocation10_spill] sm:$0xff] }
 0x453   : > { %7394 = vmatmul.bf16.gmra.mxu2 %v13896_v4  ;;  %v7806_v4 = vld [vmem:[#allocation2 + $0xb4] sm:$0xf] }
 0x454   : > { %v8128_v26 = vshrl.u32 %v7806_v4, 16  ;;  %v8131_v18 = vshll.u32 %v7806_v4, 16  ;;  %v8145_v5 = vrot.slane %v8144_v54, 4 }
 0x456   : > { %v7355_v45 = vpop.f32.mrf.mxu2  ;;  %v8130_v22 = vrot.slane %v8128_v26, 4  ;;  %v8133_v47 = vrot.slane %v8131_v18, 5 }
 0x457   : > { %v7426_v11 = vadd.f32 %v7355_v45, %v13954_v3  ;;  %v8241_v3 = vunpack.c.l.b16 %v8126_v30 }
 0x458   : > { %v6959_v21 = vpop.f32.mrf.mxu1  ;;  %v8134_v30 = vor.u32 %v8133_v47, %v8130_v22 }
 0x459   : > { %v14279_v60 = vadd.f32 %v7670_v12, %v7426_v11  ;;  %v14283_v1 = vadd.f32 %v6959_v21, %v6330_v44  ;;  %v8260_v29 = vpack.c.b16 %v8241_v3, %v8240_v40  ;;  %v8165_v44 = vshrl.u32 %v14161_v43, 16  ;;  %v14301_v4 = vpop.f32.mrf.mxu0  ;;  %v14719_v21 = vld [vmem:[#allocation53_spill] sm:$0xff]  ;;  %v7809_v3 = vld [vmem:[#allocation2 + $0xc0] sm:$0xf] }
 0x45a   : > { %v7672_v20 = vpop.f32.mrf.mxu3  ;;  %v8135_v41 = vrot.slane %v8134_v30, 4  ;;  %v6332_v48 = vadd.f32 %v14720_v16, %v14719_v21  ;;  %v8155_v40 = vshll.u32 %v7809_v3, 16  ;;  %v14725_v21 = vld [vmem:[#allocation11_spill] sm:$0xff] }
 0x45b   : > { %8767 = vmatmul.bf16.gmra.mxu1 %v14716_v57  ;;  %v8152_v57 = vshrl.u32 %v7809_v3, 16 }
 0x45c   : > { %v8157_v54 = vrot.slane %v8155_v40, 5 }
 0x45d   : > { %v8154_v47 = vrot.slane %v8152_v57, 4  ;;  %v10455_v57 = vld [vmem:[#allocation2 + $0xc0] sm:$0xff] }
 0x45e   : > { %v7357_v56 = vpop.f32.mrf.mxu2 }
 0x45f   : > { %7714 = vmatmul.bf16.gmra.mxu3 %v10453_v10  ;;  %v7427_v39 = vadd.f32 %v7357_v56, %v13992_v9  ;;  %v8149_v9 = vrot.slane %v8147_v15, 5  ;;  %v8163_v10 = vrot.slane %v8161_v6, 5  ;;  %v8167_v56 = vrot.slane %v8165_v44, 4  ;;  %v14724_v44 = vld [vmem:[#allocation22_spill] sm:$0xff] }
 0x460   : > { %8396 = vmatmul.bf16.gmra.mxu0 %v8260_v29  ;;  %v6961_v12 = vpop.f32.mrf.mxu1  ;;  %v14721_v29 = vld [vmem:[#allocation27_spill] sm:$0xff]  ;;  %v6334_v16 = vadd.f32 %v14725_v21, %v14724_v44 }
 0x461   : > { %v14291_v45 = vadd.f32 %v7672_v20, %v7427_v39  ;;  %v14294_v11 = vadd.f32 %v6961_v12, %v6331_v61  ;;  %v8150_v32 = vsel %vm10707_vm4, %v8145_v5, %v8149_v9  ;;  %v10454_v39 = vld [vmem:[#allocation2 + $0xb4] sm:$0xff]  ;;  %v8168_v20 = vor.u32 %v8167_v56, %v8163_v10  ;;  %v14313_v15 = vpop.f32.mrf.mxu0  ;;  %v14727_v56 = vld [vmem:[#allocation13_spill] sm:$0xff] }
 0x462   : > { %v8243_v25 = vunpack.c.l.b16 %v8150_v32  ;;  %v6333_v61 = vadd.f32 %v14723_v8, %v14722_v42  ;;  %v8171_v12 = vshll.u32 %v14166_v49, 16  ;;  %v8158_v5 = vor.u32 %v8157_v54, %v8154_v47  ;;  %v7812_v47 = vld [vmem:[#allocation2 + $0xcc] sm:$0xf]  ;;  %v14335_v54 = vld [vmem:[#allocation2 + $0xd4] sm:$0x1] }
 0x463   : > { %7399 = vmatmul.bf16.gmra.mxu2 %v13962_v7  ;;  %v8140_v7 = vsel %vm10707_vm4, %v8135_v41, %v8139_v58  ;;  %v8169_v9 = vrot.slane %v8168_v20, 4  ;;  %v8176_v20 = vshrl.u32 %v7812_v47, 16  ;;  %v8179_v42 = vshll.u32 %v7812_v47, 16 }
 0x464   : > { %v8242_v43 = vunpack.c.l.b16 %v8140_v7  ;;  %v8173_v41 = vrot.slane %v8171_v12, 5  ;;  %v8159_v32 = vrot.slane %v8158_v5, 4 }
 0x465   : > { %v8178_v12 = vrot.slane %v8176_v20, 4  ;;  %v8181_v5 = vrot.slane %v8179_v42, 5  ;;  %v14732_v42 = vld [vmem:[#allocation19_spill] sm:$0xff] }
 0x466   : > { %v8261_v22 = vpack.c.b16 %v8243_v25, %v8242_v43  ;;  %v8174_v6 = vsel %vm10707_vm4, %v8169_v9, %v8173_v41  ;;  %v8164_v49 = vsel %vm10707_vm4, %v8159_v32, %v8163_v10  ;;  %v14333_v10 = vld [vmem:[#allocation2 + $0xd0] sm:$0xf] }
 0x467   : > { %v8244_v25 = vunpack.c.l.b16 %v8164_v49  ;;  %v8185_v8 = vshll.u32 %v14333_v10, 16 }
 0x468   : > { %v6964_v26 = vpop.f32.mrf.mxu1 }
 0x469   : > { %v14307_v18 = vadd.f32 %v6964_v26, %v6332_v48  ;;  %v8245_v26 = vunpack.c.l.b16 %v8174_v6  ;;  %v14326_v7 = vpop.f32.mrf.mxu0  ;;  %v8187_v9 = vrot.slane %v8185_v8, 5  ;;  %v8182_v6 = vor.u32 %v8181_v5, %v8178_v12  ;;  %v14733_v8 = vld [vmem:[#allocation15_spill] sm:$0xff]  ;;  %v14734_v5 = vld [vmem:[#allocation16_spill] sm:$0xff] }
 0x46a   : > { %v6338_v37 = vadd.f32 %v14057_v23, %v14734_v5  ;;  %v14740_v23 = vld [vmem:[#allocation6_spill] sm:$0xff] }
 0x46b   : > { %8772 = vmatmul.bf16.gmra.mxu1 %v14721_v29  ;;  %v8262_v40 = vpack.c.b16 %v8245_v26, %v8244_v25  ;;  %v14728_v29 = vld [vmem:[#allocation14_spill] sm:$0xff]  ;;  %v8183_v26 = vrot.slane %v8182_v6, 4  ;;  %v14735_v6 = vld [vmem:[#allocation43_spill] sm:$0xff] }
 0x46c   : > { %v6335_v43 = vadd.f32 %v14728_v29, %v14727_v56  ;;  %v14731_v29 = vld [vmem:[#allocation39_spill] sm:$0xff] }
 0x46f   : > { %7719 = vmatmul.bf16.gmra.mxu3 %v10454_v39 }
 0x470   : > { %8401 = vmatmul.bf16.gmra.mxu0 %v8261_v22  ;;  %v6966_v58 = vpop.f32.mrf.mxu1 }
 0x471   : > { %v14315_v30 = vadd.f32 %v6966_v58, %v6333_v61  ;;  %v8189_v61 = vshrl.u32 %v14333_v10, 16  ;;  %v8195_v58 = vshll.u32 %v14335_v54, 16  ;;  %v14341_v32 = vpop.f32.mrf.mxu0 }
 0x473   : > { %7404 = vmatmul.bf16.gmra.mxu2 %v14053_v51  ;;  %v14726_v51 = vld [vmem:[#allocation31_spill] sm:$0xff]  ;;  %v8191_v41 = vrot.slane %v8189_v61, 4  ;;  %v8197_v21 = vrot.slane %v8195_v58, 5  ;;  %v6337_v61 = vadd.f32 %v14733_v8, %v14732_v42  ;;  %v14742_v42 = vld [vmem:[#allocation54_spill] sm:$0xff]  ;;  %v14743_v8 = vld [vmem:[#allocation24_spill] sm:$0xff] }
 0x475   : > { %v8192_v44 = vor.u32 %v8191_v41, %v8187_v9 }
 0x478   : > { %v6969_v48 = vpop.f32.mrf.mxu1 }
 0x479   : > { %v14324_v3 = vadd.f32 %v6969_v48, %v6334_v16  ;;  %v14729_v16 = vld [vmem:[#allocation5_spill] sm:$0xff]  ;;  %v14352_v20 = vpop.f32.mrf.mxu0 }
 0x47a   : > { %v14730_v48 = vld [vmem:[#allocation29_spill] sm:$0xff] }
 0x47b   : > { %8777 = vmatmul.bf16.gmra.mxu1 %v14726_v51  ;;  %v8193_v51 = vrot.slane %v8192_v44, 4  ;;  %v14736_v44 = vld [vmem:[#allocation18_spill] sm:$0xff] }
 0x47d   : > { %v8198_v56 = vsel %vm10707_vm4, %v8193_v51, %v8197_v21  ;;  %v6339_v21 = vadd.f32 %v14105_v34, %v14736_v44  ;;  %v7360_v44 = vpop.f32.mrf.mxu2 }
 0x47f   : > { %7724 = vmatmul.bf16.gmra.mxu3 %v10455_v57  ;;  %v10456_v57 = vld [vmem:[#allocation2 + $0xcc] sm:$0xff] }
 0x480   : > { %8406 = vmatmul.bf16.gmra.mxu0 %v8262_v40  ;;  %v6971_v39 = vpop.f32.mrf.mxu1  ;;  %v8188_v40 = vsel %vm10707_vm4, %v8183_v26, %v8187_v9 }
 0x481   : > { %v14331_v22 = vadd.f32 %v6971_v39, %v6335_v43  ;;  %v8246_v43 = vunpack.c.l.b16 %v8188_v40  ;;  %v8247_v39 = vunpack.c.l.b16 %v8198_v56  ;;  %v6341_v40 = vadd.f32 %v14192_v14, %v14740_v23 }
 0x482   : > { %v8417_v14 = vadd.f32 %v14256_v52, %v14184_v59  ;;  %v7675_v59 = vpop.f32.mrf.mxu3  ;;  %v8419_v23 = vadd.f32 %v14286_v13, %v14227_v53 }
 0x483   : > { %7409 = vmatmul.bf16.gmra.mxu2 %v14123_v55  ;;  %v6336_v55 = vadd.f32 %v14730_v48, %v14729_v16  ;;  %v8263_v47 = vpack.c.b16 %v8247_v39, %v8246_v43  ;;  %v14741_v43 = vld [vmem:[#allocation26_spill] sm:$0xff] }
 0x484   : > { %v6342_v34 = vadd.f32 %v14218_v50, %v14741_v43  ;;  %v14392_v50 = vld [vmem:[%s14514_s4] ss:$0 sm:$0xff] }
 0x488   : > { %v6974_v49 = vpop.f32.mrf.mxu1 }
 0x489   : > { %v14345_v25 = vadd.f32 %v6974_v49, %v6336_v55  ;;  %v14737_v55 = vld [vmem:[#allocation21_spill] sm:$0xff]  ;;  %v14738_v49 = vld [vmem:[#allocation32_spill] sm:$0xff] }
 0x48a   : > { %v6340_v26 = vadd.f32 %v14738_v49, %v14737_v55  ;;  %v7677_v43 = vpop.f32.mrf.mxu3 }
 0x48b   : > { %8782 = vmatmul.bf16.gmra.mxu1 %v14731_v29 }
 0x48f   : > { %7729 = vmatmul.bf16.gmra.mxu3 %v10456_v57 }
 0x490   : > { %8411 = vmatmul.bf16.gmra.mxu0 %v8263_v47  ;;  %v6976_v58 = vpop.f32.mrf.mxu1 }
 0x491   : > { %v14356_v12 = vadd.f32 %v6976_v58, %v6337_v61  ;;  %v6343_v61 = vadd.f32 %v14235_v38, %v14743_v8 }
 0x492   : > { %v7680_v53 = vpop.f32.mrf.mxu3 }
 0x493   : > { %7414 = vmatmul.bf16.gmra.mxu2 %v14188_v62  ;;  %v14739_v62 = vld [vmem:[#allocation49_spill] sm:$0xff] }
 0x498   : > { %v6979_v9 = vpop.f32.mrf.mxu1 }
 0x499   : > { %v14361_v41 = vadd.f32 %v6979_v9, %v6338_v37  ;;  %v14744_v9 = vld [vmem:[#allocation8_spill] sm:$0xff] }
 0x49b   : > { %8787 = vmatmul.bf16.gmra.mxu1 %v14735_v6 }
 0x4a0   : > { %v6981_v16 = vpop.f32.mrf.mxu1 }
 0x4a1   : > { %v14366_v48 = vadd.f32 %v6981_v16, %v6339_v21  ;;  %v8418_v21 = vadd.f32 %v14270_v17, %v14209_v0  ;;  %v7362_v0 = vpop.f32.mrf.mxu2 }
 0x4a8   : > { %v6984_v51 = vpop.f32.mrf.mxu1 }
 0x4a9   : > { %v14370_v57 = vadd.f32 %v6984_v51, %v6340_v26  ;;  %v14404_v51 = vpop.f32.mrf.mxu0 }
 0x4ab   : > { %8792 = vmatmul.bf16.gmra.mxu1 %v14739_v62 }
 0x4b0   : > { %v6986_v56 = vpop.f32.mrf.mxu1 }
 0x4b1   : > { %v14375_v29 = vadd.f32 %v6986_v56, %v6341_v40  ;;  %v14745_v40 = vld [vmem:[#allocation9_spill] sm:$0xff] }
 0x4b8   : > { %v6989_v39 = vpop.f32.mrf.mxu1 }
 0x4b9   : > { %v14379_v47 = vadd.f32 %v6989_v39, %v6342_v34  ;;  %v8420_v34 = vadd.f32 %v14301_v4, %v14239_v35 }
 0x4bb   : > { %8797 = vmatmul.bf16.gmra.mxu1 %v14742_v42  ;;  %v8359_v42 = vpop.f32.mrf.mxu0 }
 0x4c0   : > { %v6991_v58 = vpop.f32.mrf.mxu1 }
 0x4c1   : > { %v14384_v5 = vadd.f32 %v6991_v58, %v6343_v61  ;;  %v7365_v58 = vpop.f32.mrf.mxu2 }
 0x4c8   : > { %v8763_v37 = vpop.f32.mrf.mxu1 }
 0x4c9   : > { %v8843_v6 = vadd.f32 %v8763_v37, %v8417_v14  ;;  %v7367_v35 = vpop.f32.mrf.mxu2 }
 0x4cb   : > { %8802 = vmatmul.bf16.gmra.mxu1 %v14744_v9  ;;  %v8879_v16 = vadd.f32 %v14392_v50, %v8843_v6 }
 0x4cd   : > { %v8911_v52 = vmax.f32 %v8879_v16, 0.0  ;;  %v14746_v16 = vld [vmem:[#allocation17_spill] sm:$0xff] }
 0x4d0   : > { %v8765_v38 = vpop.f32.mrf.mxu1 }
 0x4d1   : > { %v8844_v55 = vadd.f32 %v8765_v38, %v8418_v21  ;;  %v8362_v21 = vpop.f32.mrf.mxu0  ;;  %v8421_v38 = vadd.f32 %v14313_v15, %v14252_v2 }
 0x4d3   : > { %v8880_v49 = vadd.f32 %v14392_v50, %v8844_v55  ;;  %v8422_v55 = vadd.f32 %v14326_v7, %v14264_v31 }
 0x4d5   : > { %v8912_v26 = vmax.f32 %v8880_v49, 0.0 }
 0x4d7   : > { %v10484_v62 = vpack.c.bf16 %v8912_v26, %v8911_v52 }
 0x4d8   : > { %v8768_v17 = vpop.f32.mrf.mxu1 }
 0x4d9   : > { %10485 = vst [vmem:[%s14402_s14] sm:$0xff] %v10484_v62   ;;  %v8845_v56 = vadd.f32 %v8768_v17, %v8419_v23  ;;  %v7682_v62 = vpop.f32.mrf.mxu3  ;;  %v8364_v23 = vpop.f32.mrf.mxu0 }
 0x4db   : > { %8807 = vmatmul.bf16.gmra.mxu1 %v14745_v40  ;;  %v8881_v8 = vadd.f32 %v14392_v50, %v8845_v56 }
 0x4dd   : > { %v8913_v14 = vmax.f32 %v8881_v8, 0.0  ;;  %v14747_v8 = vld [vmem:[#allocation35_spill] sm:$0xff] }
 0x4e0   : > { %v8770_v39 = vpop.f32.mrf.mxu1 }
 0x4e1   : > { %v8846_v61 = vadd.f32 %v8770_v39, %v8420_v34  ;;  %v7370_v34 = vpop.f32.mrf.mxu2  ;;  %v8423_v39 = vadd.f32 %v14341_v32, %v14279_v60  ;;  %v7685_v31 = vpop.f32.mrf.mxu3 }
 0x4e3   : > { %v8882_v37 = vadd.f32 %v14392_v50, %v8846_v61  ;;  %v14426_v61 = vpop.f32.mrf.mxu0 }
 0x4e5   : > { %v8914_v9 = vmax.f32 %v8882_v37, 0.0  ;;  %v8424_v37 = vadd.f32 %v14352_v20, %v14291_v45 }
 0x4e7   : > { %v10489_v6 = vpack.c.bf16 %v8914_v9, %v8913_v14 }
 0x4e8   : > { %v8773_v13 = vpop.f32.mrf.mxu1 }
 0x4e9   : > { %10561 = vst [vmem:[%s14402_s14 + $0x8] sm:$0xff] %v10489_v6   ;;  %v8847_v4 = vadd.f32 %v8773_v13, %v8421_v38  ;;  %v7372_v14 = vpop.f32.mrf.mxu2  ;;  %v14748_v38 = vld [vmem:[#allocation20_spill] sm:$0xff] }
 0x4eb   : > { %8812 = vmatmul.bf16.gmra.mxu1 %v14746_v16  ;;  %v8883_v52 = vadd.f32 %v14392_v50, %v8847_v4  ;;  %v7428_v16 = vadd.f32 %v7360_v44, %v14748_v38 }
 0x4ed   : > { %v8915_v40 = vmax.f32 %v8883_v52, 0.0  ;;  %v14749_v52 = vld [vmem:[#allocation3_spill] sm:$0xff] }
 0x4f0   : > { %v8775_v49 = vpop.f32.mrf.mxu1 }
 0x4f1   : > { %v8848_v26 = vadd.f32 %v8775_v49, %v8422_v55  ;;  %v7687_v55 = vpop.f32.mrf.mxu3  ;;  %v7743_v49 = vadd.f32 %v7675_v59, %v7428_v16  ;;  %v7375_v45 = vpop.f32.mrf.mxu2 }
 0x4f3   : > { %v8884_v17 = vadd.f32 %v14392_v50, %v8848_v26  ;;  %v7429_v26 = vadd.f32 %v7362_v0, %v14749_v52 }
 0x4f5   : > { %v8916_v56 = vmax.f32 %v8884_v17, 0.0  ;;  %v7744_v20 = vadd.f32 %v7677_v43, %v7429_v26 }
 0x4f7   : > { %v10494_v2 = vpack.c.bf16 %v8916_v56, %v8915_v40  ;;  %v8369_v56 = vpop.f32.mrf.mxu0  ;;  %v8426_v44 = vadd.f32 %v8359_v42, %v7744_v20 }
 0x4f8   : > { %v8778_v15 = vpop.f32.mrf.mxu1 }
 0x4f9   : > { %10562 = vst [vmem:[%s14402_s14 + $0x10] sm:$0xff] %v10494_v2   ;;  %v8849_v7 = vadd.f32 %v8778_v15, %v8423_v39  ;;  %v8425_v2 = vadd.f32 %v14404_v51, %v7743_v49  ;;  %v14750_v15 = vld [vmem:[#allocation30_spill] sm:$0xff]  ;;  %v7377_v38 = vpop.f32.mrf.mxu2 }
 0x4fb   : > { %8817 = vmatmul.bf16.gmra.mxu1 %v14747_v8  ;;  %v8885_v6 = vadd.f32 %v14392_v50, %v8849_v7  ;;  %v7690_v8 = vpop.f32.mrf.mxu3 }
 0x4fd   : > { %v8917_v60 = vmax.f32 %v8885_v6, 0.0 }
 0x4ff   : > { %v14439_v6 = vpop.f32.mrf.mxu0 }
 0x500   : > { %v8780_v9 = vpop.f32.mrf.mxu1 }
 0x501   : > { %v8850_v13 = vadd.f32 %v8780_v9, %v8424_v37  ;;  %v14751_v9 = vld [vmem:[#allocation4_spill] sm:$0xff]  ;;  %v7380_v20 = vpop.f32.mrf.mxu2 }
 0x502   : > { %v7430_v0 = vadd.f32 %v7365_v58, %v14751_v9 }
 0x503   : > { %v8886_v4 = vadd.f32 %v14392_v50, %v8850_v13  ;;  %v7692_v42 = vpop.f32.mrf.mxu3 }
 0x504   : > { %v7745_v51 = vadd.f32 %v7680_v53, %v7430_v0  ;;  %v7432_v53 = vadd.f32 %v7370_v34, %v14186_v36 }
 0x505   : > { %v8918_v32 = vmax.f32 %v8886_v4, 0.0  ;;  %v14752_v4 = vld [vmem:[#allocation28_spill] sm:$0xff] }
 0x506   : > { %v8427_v26 = vadd.f32 %v8362_v21, %v7745_v51  ;;  %v7433_v21 = vadd.f32 %v7372_v14, %v14211_v19 }
 0x507   : > { %v10499_v17 = vpack.c.bf16 %v8918_v32, %v8917_v60  ;;  %v7431_v60 = vadd.f32 %v7367_v35, %v14752_v4 }
 0x508   : > { %v8783_v40 = vpop.f32.mrf.mxu1  ;;  %v7748_v51 = vadd.f32 %v7687_v55, %v7433_v21 }
 0x509   : > { %10563 = vst [vmem:[%s14402_s14 + $0x18] sm:$0xff] %v10499_v17   ;;  %v8851_v39 = vadd.f32 %v8783_v40, %v8425_v2  ;;  %v7746_v52 = vadd.f32 %v7682_v62, %v7431_v60  ;;  %v14753_v17 = vld [vmem:[#allocation55_spill] sm:$0xff]  ;;  %v8374_v40 = vpop.f32.mrf.mxu0  ;;  %v7747_v62 = vadd.f32 %v7685_v31, %v7432_v53  ;;  %v8623_v60 = vrot.slane %v14335_v54, 5 }
 0x50a   : > { %v8430_v19 = vadd.f32 %v8369_v56, %v7748_v51 }
 0x50b   : > { %8822 = vmatmul.bf16.gmra.mxu1 %v14750_v15  ;;  %v8887_v37 = vadd.f32 %v14392_v50, %v8851_v39  ;;  %v8428_v2 = vadd.f32 %v8364_v23, %v7746_v52  ;;  %v8620_v23 = vrot.slane %v14333_v10, 5  ;;  %v8429_v4 = vadd.f32 %v14426_v61, %v7747_v62 }
 0x50d   : > { %v8919_v43 = vmax.f32 %v8887_v37, 0.0  ;;  %v8622_v34 = vrot.slane %v8620_v23, 4 }
 0x50f   : > { %v8624_v10 = vsel %vm10927_vm7, %v8622_v34, %v8623_v60 }
 0x510   : > { %v8785_v7 = vpop.f32.mrf.mxu1 }
 0x511   : > { %v8852_v59 = vadd.f32 %v8785_v7, %v8426_v44  ;;  %v7695_v7 = vpop.f32.mrf.mxu3  ;;  %v8377_v9 = vpop.f32.mrf.mxu0 }
 0x513   : > { %v8888_v13 = vadd.f32 %v14392_v50, %v8852_v59 }
 0x515   : > { %v8920_v16 = vmax.f32 %v8888_v13, 0.0  ;;  %v7382_v13 = vpop.f32.mrf.mxu2 }
 0x517   : > { %v10504_v32 = vpack.c.bf16 %v8920_v16, %v8919_v43  ;;  %v8464_v16 = vld [vmem:[#allocation2 + $0xcc] sm:$0xe] }
 0x518   : > { %v8788_v49 = vpop.f32.mrf.mxu1  ;;  %v10261_v36 = vrot.slane %v8464_v16, 9 }
 0x519   : > { %10564 = vst [vmem:[%s14402_s14 + $0x20] sm:$0xff] %v10504_v32   ;;  %v8853_v58 = vadd.f32 %v8788_v49, %v8427_v26  ;;  %v7697_v32 = vpop.f32.mrf.mxu3  ;;  %v8379_v52 = vpop.f32.mrf.mxu0  ;;  %v7434_v26 = vadd.f32 %v7375_v45, %v14232_v33 }
 0x51a   : > { %v8621_v49 = vsel %vm10927_vm7, %v10261_v36, %v8620_v23 }
 0x51b   : > { %8827 = vmatmul.bf16.gmra.mxu1 %v14753_v17  ;;  %v8889_v39 = vadd.f32 %v14392_v50, %v8853_v58  ;;  %v8672_v17 = vunpack.c.l.b16 %v8621_v49  ;;  %v8673_v58 = vunpack.c.l.b16 %v8624_v10 }
 0x51d   : > { %v8921_v37 = vmax.f32 %v8889_v39, 0.0  ;;  %v7435_v39 = vadd.f32 %v7377_v38, %v14242_v28  ;;  %v8689_v27 = vpack.c.b16 %v8673_v58, %v8672_v17  ;;  %v7436_v28 = vadd.f32 %v7380_v20, %v14258_v46 }
 0x51f   : > { %v7751_v36 = vadd.f32 %v7695_v7, %v7436_v28 }
 0x520   : > { %v8790_v15 = vpop.f32.mrf.mxu1 }
 0x521   : > { %v8854_v44 = vadd.f32 %v8790_v15, %v8428_v2  ;;  %v7749_v15 = vadd.f32 %v7690_v8, %v7434_v26  ;;  %v7700_v53 = vpop.f32.mrf.mxu3 }
 0x523   : > { %v8890_v35 = vadd.f32 %v14392_v50, %v8854_v44  ;;  %v8431_v62 = vadd.f32 %v14439_v6, %v7749_v15  ;;  %v7437_v6 = vadd.f32 %v7382_v13, %v14267_v24 }
 0x525   : > { %v8922_v59 = vmax.f32 %v8890_v35, 0.0 }
 0x527   : > { %v10509_v0 = vpack.c.bf16 %v8922_v59, %v8921_v37  ;;  %v7750_v37 = vadd.f32 %v7692_v42, %v7435_v39  ;;  %v8382_v59 = vpop.f32.mrf.mxu0 }
 0x528   : > { %v8793_v43 = vpop.f32.mrf.mxu1 }
 0x529   : > { %10565 = vst [vmem:[%s14402_s14 + $0x28] sm:$0xff] %v10509_v0   ;;  %v8855_v31 = vadd.f32 %v8793_v43, %v8429_v4  ;;  %v8432_v21 = vadd.f32 %v8374_v40, %v7750_v37  ;;  %v7702_v23 = vpop.f32.mrf.mxu3  ;;  %v7752_v40 = vadd.f32 %v7697_v32, %v7437_v6 }
 0x52b   : > { %8832 = vmatmul.bf16.gmra.mxu1 %v14190_v63  ;;  %v8891_v61 = vadd.f32 %v14392_v50, %v8855_v31  ;;  %v7385_v63 = vpop.f32.mrf.mxu2  ;;  %v8433_v31 = vadd.f32 %v8377_v9, %v7751_v36  ;;  %v8434_v10 = vadd.f32 %v8379_v52, %v7752_v40 }
 0x52c   : > { %v7438_v26 = vadd.f32 %v7385_v63, %v14283_v1 }
 0x52d   : > { %v8923_v56 = vmax.f32 %v8891_v61, 0.0 }
 0x52e   : > { %v7753_v17 = vadd.f32 %v7700_v53, %v7438_v26 }
 0x52f   : > { %v8384_v16 = vpop.f32.mrf.mxu0 }
 0x530   : > { %v8795_v14 = vpop.f32.mrf.mxu1  ;;  %v8435_v15 = vadd.f32 %v8382_v59, %v7753_v17 }
 0x531   : > { %v8856_v55 = vadd.f32 %v8795_v14, %v8430_v19  ;;  %v7705_v19 = vpop.f32.mrf.mxu3 }
 0x533   : > { %v8892_v54 = vadd.f32 %v14392_v50, %v8856_v55  ;;  %v7387_v33 = vpop.f32.mrf.mxu2 }
 0x534   : > { %v7439_v9 = vadd.f32 %v7387_v33, %v14294_v11 }
 0x535   : > { %v8924_v2 = vmax.f32 %v8892_v54, 0.0 }
 0x537   : > { %v10514_v44 = vpack.c.bf16 %v8924_v2, %v8923_v56  ;;  %v8387_v49 = vpop.f32.mrf.mxu0  ;;  %v7754_v2 = vadd.f32 %v7702_v23, %v7439_v9 }
 0x538   : > { %v8798_v35 = vpop.f32.mrf.mxu1 }
 0x539   : > { %10566 = vst [vmem:[%s14402_s14 + $0x30] sm:$0xff] %v10514_v44   ;;  %v8857_v45 = vadd.f32 %v8798_v35, %v8431_v62  ;;  %v7707_v54 = vpop.f32.mrf.mxu3  ;;  %v8436_v44 = vadd.f32 %v8384_v16, %v7754_v2 }
 0x53b   : > { %8837 = vmatmul.bf16.gmra.mxu1 %v8689_v27  ;;  %v8893_v43 = vadd.f32 %v14392_v50, %v8857_v45  ;;  %v7390_v4 = vpop.f32.mrf.mxu2 }
 0x53c   : > { %v7440_v37 = vadd.f32 %v7390_v4, %v14307_v18 }
 0x53d   : > { %v8925_v51 = vmax.f32 %v8893_v43, 0.0 }
 0x53f   : > { %v8389_v56 = vpop.f32.mrf.mxu0 }
 0x540   : > { %v8800_v0 = vpop.f32.mrf.mxu1 }
 0x541   : > { %v8858_v8 = vadd.f32 %v8800_v0, %v8432_v21  ;;  %v7710_v27 = vpop.f32.mrf.mxu3  ;;  %v7755_v21 = vadd.f32 %v7705_v19, %v7440_v37 }
 0x543   : > { %v8894_v38 = vadd.f32 %v14392_v50, %v8858_v8  ;;  %v7392_v46 = vpop.f32.mrf.mxu2  ;;  %v8437_v28 = vadd.f32 %v8387_v49, %v7755_v21 }
 0x544   : > { %v7441_v0 = vadd.f32 %v7392_v46, %v14315_v30 }
 0x545   : > { %v8926_v42 = vmax.f32 %v8894_v38, 0.0 }
 0x546   : > { %v7756_v23 = vadd.f32 %v7707_v54, %v7441_v0 }
 0x547   : > { %v10519_v34 = vpack.c.bf16 %v8926_v42, %v8925_v51  ;;  %v8392_v53 = vpop.f32.mrf.mxu0 }
 0x548   : > { %v8803_v60 = vpop.f32.mrf.mxu1  ;;  %v8438_v18 = vadd.f32 %v8389_v56, %v7756_v23 }
 0x549   : > { %10567 = vst [vmem:[%s14402_s14 + $0x38] sm:$0xff] %v10519_v34   ;;  %v8859_v14 = vadd.f32 %v8803_v60, %v8433_v31  ;;  %v7712_v8 = vpop.f32.mrf.mxu3 }
 0x54b   : > { %v8895_v61 = vadd.f32 %v14392_v50, %v8859_v14  ;;  %v7395_v52 = vpop.f32.mrf.mxu2 }
 0x54c   : > { %v7442_v6 = vadd.f32 %v7395_v52, %v14324_v3 }
 0x54d   : > { %v8927_v24 = vmax.f32 %v8895_v61, 0.0 }
 0x54e   : > { %v7757_v31 = vadd.f32 %v7710_v27, %v7442_v6 }
 0x54f   : > { %v8394_v38 = vpop.f32.mrf.mxu0 }
 0x550   : > { %v8805_v20 = vpop.f32.mrf.mxu1  ;;  %v8439_v61 = vadd.f32 %v8392_v53, %v7757_v31 }
 0x551   : > { %v8860_v55 = vadd.f32 %v8805_v20, %v8434_v10  ;;  %v7715_v30 = vpop.f32.mrf.mxu3 }
 0x553   : > { %v8896_v7 = vadd.f32 %v14392_v50, %v8860_v55  ;;  %v7397_v62 = vpop.f32.mrf.mxu2 }
 0x554   : > { %v7443_v19 = vadd.f32 %v7397_v62, %v14331_v22 }
 0x555   : > { %v8928_v13 = vmax.f32 %v8896_v7, 0.0 }
 0x556   : > { %v7758_v20 = vadd.f32 %v7712_v8, %v7443_v19 }
 0x557   : > { %v10524_v32 = vpack.c.bf16 %v8928_v13, %v8927_v24  ;;  %v8397_v14 = vpop.f32.mrf.mxu0 }
 0x558   : > { %v8808_v58 = vpop.f32.mrf.mxu1  ;;  %v8440_v7 = vadd.f32 %v8394_v38, %v7758_v20 }
 0x559   : > { %10568 = vst [vmem:[%s14402_s14 + $0x40] sm:$0xff] %v10524_v32   ;;  %v8861_v39 = vadd.f32 %v8808_v58, %v8435_v15  ;;  %v7717_v26 = vpop.f32.mrf.mxu3 }
 0x55b   : > { %v8897_v63 = vadd.f32 %v14392_v50, %v8861_v39  ;;  %v7400_v51 = vpop.f32.mrf.mxu2 }
 0x55c   : > { %v7444_v9 = vadd.f32 %v7400_v51, %v14345_v25 }
 0x55d   : > { %v8929_v33 = vmax.f32 %v8897_v63, 0.0 }
 0x55e   : > { %v7759_v56 = vadd.f32 %v7715_v30, %v7444_v9 }
 0x55f   : > { %v8399_v24 = vpop.f32.mrf.mxu0 }
 0x560   : > { %v8810_v1 = vpop.f32.mrf.mxu1 }
 0x561   : > { %v8862_v35 = vadd.f32 %v8810_v1, %v8436_v44  ;;  %v7720_v15 = vpop.f32.mrf.mxu3  ;;  %v8441_v1 = vadd.f32 %v8397_v14, %v7759_v56 }
 0x563   : > { %v8898_v11 = vadd.f32 %v14392_v50, %v8862_v35  ;;  %v7402_v10 = vpop.f32.mrf.mxu2 }
 0x564   : > { %v7445_v52 = vadd.f32 %v7402_v10, %v14356_v12 }
 0x565   : > { %v8930_v45 = vmax.f32 %v8898_v11, 0.0 }
 0x566   : > { %v7760_v44 = vadd.f32 %v7717_v26, %v7445_v52 }
 0x567   : > { %v10529_v59 = vpack.c.bf16 %v8930_v45, %v8929_v33  ;;  %v8402_v27 = vpop.f32.mrf.mxu0 }
 0x568   : > { %v8813_v43 = vpop.f32.mrf.mxu1  ;;  %v8442_v37 = vadd.f32 %v8399_v24, %v7760_v44 }
 0x569   : > { %10569 = vst [vmem:[%s14402_s14 + $0x48] sm:$0xff] %v10529_v59   ;;  %v8863_v16 = vadd.f32 %v8813_v43, %v8437_v28  ;;  %v7722_v62 = vpop.f32.mrf.mxu3 }
 0x56b   : > { %v8899_v4 = vadd.f32 %v14392_v50, %v8863_v16  ;;  %v7405_v17 = vpop.f32.mrf.mxu2 }
 0x56c   : > { %v7446_v33 = vadd.f32 %v7405_v17, %v14361_v41 }
 0x56d   : > { %v8931_v60 = vmax.f32 %v8899_v4, 0.0 }
 0x56e   : > { %v7761_v43 = vadd.f32 %v7720_v15, %v7446_v33 }
 0x56f   : > { %v8404_v45 = vpop.f32.mrf.mxu0 }
 0x570   : > { %v8815_v42 = vpop.f32.mrf.mxu1  ;;  %v8443_v16 = vadd.f32 %v8402_v27, %v7761_v43 }
 0x571   : > { %v8864_v36 = vadd.f32 %v8815_v42, %v8438_v18  ;;  %v7725_v51 = vpop.f32.mrf.mxu3 }
 0x573   : > { %v8900_v34 = vadd.f32 %v14392_v50, %v8864_v36  ;;  %v7407_v63 = vpop.f32.mrf.mxu2 }
 0x574   : > { %v7447_v8 = vadd.f32 %v7407_v63, %v14366_v48 }
 0x575   : > { %v8932_v40 = vmax.f32 %v8900_v34, 0.0 }
 0x576   : > { %v7762_v38 = vadd.f32 %v7722_v62, %v7447_v8 }
 0x577   : > { %v10534_v49 = vpack.c.bf16 %v8932_v40, %v8931_v60  ;;  %v8407_v42 = vpop.f32.mrf.mxu0 }
 0x578   : > { %v8818_v46 = vpop.f32.mrf.mxu1  ;;  %v8444_v4 = vadd.f32 %v8404_v45, %v7762_v38 }
 0x579   : > { %10570 = vst [vmem:[%s14402_s14 + $0x50] sm:$0xff] %v10534_v49   ;;  %v8865_v55 = vadd.f32 %v8818_v46, %v8439_v61  ;;  %v7727_v31 = vpop.f32.mrf.mxu3 }
 0x57b   : > { %v8901_v13 = vadd.f32 %v14392_v50, %v8865_v55  ;;  %v7410_v59 = vpop.f32.mrf.mxu2 }
 0x57c   : > { %v7448_v30 = vadd.f32 %v7410_v59, %v14370_v57 }
 0x57d   : > { %v8933_v32 = vmax.f32 %v8901_v13, 0.0 }
 0x57e   : > { %v7763_v19 = vadd.f32 %v7725_v51, %v7448_v30 }
 0x57f   : > { %v8409_v46 = vpop.f32.mrf.mxu0 }
 0x580   : > { %v8820_v3 = vpop.f32.mrf.mxu1  ;;  %v8445_v55 = vadd.f32 %v8407_v42, %v7763_v19 }
 0x581   : > { %v8866_v54 = vadd.f32 %v8820_v3, %v8440_v7  ;;  %v7730_v7 = vpop.f32.mrf.mxu3 }
 0x583   : > { %v8902_v22 = vadd.f32 %v14392_v50, %v8866_v54  ;;  %v7412_v41 = vpop.f32.mrf.mxu2 }
 0x584   : > { %v7449_v14 = vadd.f32 %v7412_v41, %v14375_v29 }
 0x585   : > { %v8934_v58 = vmax.f32 %v8902_v22, 0.0 }
 0x586   : > { %v7764_v61 = vadd.f32 %v7727_v31, %v7449_v14 }
 0x587   : > { %v10539_v2 = vpack.c.bf16 %v8934_v58, %v8933_v32  ;;  %v8412_v54 = vpop.f32.mrf.mxu0 }
 0x588   : > { %v8823_v39 = vpop.f32.mrf.mxu1  ;;  %v8446_v3 = vadd.f32 %v8409_v46, %v7764_v61 }
 0x589   : > { %10571 = vst [vmem:[%s14402_s14 + $0x58] sm:$0xff] %v10539_v2   ;;  %v8867_v35 = vadd.f32 %v8823_v39, %v8441_v1  ;;  %v7732_v2 = vpop.f32.mrf.mxu3 }
 0x58b   : > { %v8903_v25 = vadd.f32 %v14392_v50, %v8867_v35  ;;  %v7415_v20 = vpop.f32.mrf.mxu2 }
 0x58c   : > { %v7450_v17 = vadd.f32 %v7415_v20, %v14379_v47 }
 0x58d   : > { %v8935_v21 = vmax.f32 %v8903_v25, 0.0 }
 0x58e   : > { %v7765_v58 = vadd.f32 %v7730_v7, %v7450_v17 }
 0x58f   : > { %v8414_v27 = vpop.f32.mrf.mxu0 }
 0x590   : > { %v8825_v53 = vpop.f32.mrf.mxu1  ;;  %v8447_v39 = vadd.f32 %v8412_v54, %v7765_v58 }
 0x591   : > { %v8868_v11 = vadd.f32 %v8825_v53, %v8442_v37 }
 0x593   : > { %v8904_v12 = vadd.f32 %v14392_v50, %v8868_v11  ;;  %v7417_v9 = vpop.f32.mrf.mxu2 }
 0x594   : > { %v7451_v56 = vadd.f32 %v7417_v9, %v14384_v5 }
 0x595   : > { %v8936_v0 = vmax.f32 %v8904_v12, 0.0 }
 0x596   : > { %v7766_v44 = vadd.f32 %v7732_v2, %v7451_v56 }
 0x597   : > { %v10544_v23 = vpack.c.bf16 %v8936_v0, %v8935_v21 }
 0x598   : > { %v8828_v28 = vpop.f32.mrf.mxu1  ;;  %v8448_v63 = vadd.f32 %v8414_v27, %v7766_v44 }
 0x599   : > { %10572 = vst [vmem:[%s14402_s14 + $0x60] sm:$0xff] %v10544_v23   ;;  %v8869_v18 = vadd.f32 %v8828_v28, %v8443_v16 }
 0x59b   : > { %v8905_v6 = vadd.f32 %v14392_v50, %v8869_v18 }
 0x59d   : > { %v8937_v48 = vmax.f32 %v8905_v6, 0.0 }
 0x5a0   : > { %v8830_v36 = vpop.f32.mrf.mxu1 }
 0x5a1   : > { %v8870_v34 = vadd.f32 %v8830_v36, %v8444_v4 }
 0x5a3   : > { %v8906_v60 = vadd.f32 %v14392_v50, %v8870_v34 }
 0x5a5   : > { %v8938_v40 = vmax.f32 %v8906_v60, 0.0 }
 0x5a7   : > { %v10549_v49 = vpack.c.bf16 %v8938_v40, %v8937_v48 }
 0x5a8   : > { %v8833_v10 = vpop.f32.mrf.mxu1 }
 0x5a9   : > { %10573 = vst [vmem:[%s14402_s14 + $0x68] sm:$0xff] %v10549_v49   ;;  %v8871_v26 = vadd.f32 %v8833_v10, %v8445_v55 }
 0x5ab   : > { %v8907_v24 = vadd.f32 %v14392_v50, %v8871_v26 }
 0x5ad   : > { %v8939_v22 = vmax.f32 %v8907_v24, 0.0 }
 0x5b0   : > { %v8835_v57 = vpop.f32.mrf.mxu1 }
 0x5b1   : > { %v8872_v13 = vadd.f32 %v8835_v57, %v8446_v3 }
 0x5b3   : > { %v8908_v29 = vadd.f32 %v14392_v50, %v8872_v13 }
 0x5b5   : > { %v8940_v32 = vmax.f32 %v8908_v29, 0.0 }
 0x5b7   : > { %v10554_v52 = vpack.c.bf16 %v8940_v32, %v8939_v22 }
 0x5b8   : > { %v8838_v15 = vpop.f32.mrf.mxu1 }
 0x5b9   : > { %10574 = vst [vmem:[%s14402_s14 + $0x70] sm:$0xff] %v10554_v52   ;;  %v8873_v1 = vadd.f32 %v8838_v15, %v8447_v39 }
 0x5bb   : > { %v8909_v47 = vadd.f32 %v14392_v50, %v8873_v1 }
 0x5bd   : > { %v8941_v25 = vmax.f32 %v8909_v47, 0.0 }
 0x5c0   : > { %v8840_v35 = vpop.f32.mrf.mxu1 }
 0x5c1   : > { %v8874_v37 = vadd.f32 %v8840_v35, %v8448_v63 }
 0x5c3   : > { %v8910_v53 = vadd.f32 %v14392_v50, %v8874_v37 }
 0x5c5   : > { %v8942_v11 = vmax.f32 %v8910_v53, 0.0 }
 0x5c7   : > { %v10559_v62 = vpack.c.bf16 %v8942_v11, %v8941_v25 }
 0x5c9   : > { %10575 = vst [vmem:[%s14402_s14 + $0x78] sm:$0xff] %v10559_v62  }
 0x5ca PF: > { %s15_s18 = sadd.s32 1, %s10616_s18  }
 0x5cb   : > { %p12_p4 = scmp.ge.s32.totalorder %s15_s18, 4  }
 0x5cd   :  { %14 = sbr.rel (!%p12_p4) target bundleno = 1 (0x1), region = 91 }

</bundles_post_ra>
